<compile_context>
chip_gen: v7x
topology: tpu7x:2x2x1
jax: 0.10.0
libtpu: 0.0.40
codegen_flags: <defaults>
</compile_context>

<pallas_src>
import math
from functools import partial

import jax
import jax.numpy as jnp
from jax.experimental import pallas as pl
from jax.experimental.pallas import tpu as pltpu


# ---------------------------------------------------------------------------
# Kernel 1: channel mean / max pool.  Block: x (1, C, TS) -> out (1, 2, TS).
# ---------------------------------------------------------------------------
def _pool_kernel(x_ref, o_ref):
    xv = x_ref[...]                                            # (1, C, TS) f32
    o_ref[:, 0:1, :] = jnp.mean(xv, axis=1, keepdims=True)
    o_ref[:, 1:2, :] = jnp.max(xv, axis=1, keepdims=True)


# ---------------------------------------------------------------------------
# Kernel 2: 3x3x3 conv (2 -> 1 channel, padding already applied) + bias + sigmoid.
#   a_ref : (1, 2, D+2, H+2, W+2) VMEM
#   w_ref : (55,) SMEM  (54 taps in [c, kd, kh, kw] order, then bias)
#   o_ref : (1, D, H, W)
# ---------------------------------------------------------------------------
def _conv_sigmoid_kernel(a_ref, w_ref, o_ref, *, D, H, W):
    a = a_ref[0]                                               # (2, D+2, H+2, W+2)
    acc = jnp.zeros((D, H, W), jnp.float32)
    k = 0
    for c in range(2):
        for kd in range(3):
            for kh in range(3):
                for kw in range(3):
                    tap = a[c, kd:kd + D, kh:kh + H, kw:kw + W]   # static slice
                    acc = acc + tap * w_ref[k]                    # scalar from SMEM
                    k += 1
    acc = acc + w_ref[54]                                      # bias
    o_ref[0] = 1.0 / (1.0 + jnp.exp(-acc))                     # sigmoid (EUP)


# ---------------------------------------------------------------------------
# Kernel 3: apply attention.  y = x * a, a broadcast over the channel axis.
# ---------------------------------------------------------------------------
def _apply_kernel(x_ref, a_ref, o_ref):
    o_ref[...] = x_ref[...] * a_ref[...]                       # (1,C,TS)*(1,1,TS)


# ---------------------------------------------------------------------------
# Tiling helper: lane-axis tile over S = D*H*W (multiple of 128 when possible).
# ---------------------------------------------------------------------------
def _choose_ts(S, target=8192):
    if S <= target:
        return S
    t = (target // 128) * 128
    while t >= 128:
        if S % t == 0:
            return t
        t -= 128
    return S


# ---------------------------------------------------------------------------
# Forward pass
# ---------------------------------------------------------------------------
def spatial_attention_forward(x, weight, bias):
    """x: (N, C, D, H, W) f32; weight: (1, 2, 3, 3, 3); bias: (1,). Returns x * attn."""
    x = x.astype(jnp.float32)
    N, C, D, H, W = x.shape
    S = D * H * W
    TS = _choose_ts(S)
    x3 = x.reshape(N, C, S)                                    # free, contiguous

    # ---- K1: channel mean / max --------------------------------------------
    pooled = pl.pallas_call(
        _pool_kernel,
        out_shape=jax.ShapeDtypeStruct((N, 2, S), jnp.float32),
        grid=(N, S // TS),
        in_specs=[pl.BlockSpec((1, C, TS), lambda n, s: (n, 0, s))],
        out_specs=pl.BlockSpec((1, 2, TS), lambda n, s: (n, 0, s)),
        compiler_params=pltpu.CompilerParams(
            dimension_semantics=("parallel", "parallel")),
    )(x3)

    # ---- K2: conv(2->1, k3, pad1) + sigmoid on the tiny pooled map ----------
    # Host-side pad only touches the 2-channel pooled map (2/C of x) — cheap.
    ap = jnp.pad(pooled.reshape(N, 2, D, H, W),
                 ((0, 0), (0, 0), (1, 1), (1, 1), (1, 1)))
    wvec = jnp.concatenate(
        [weight.reshape(-1), bias.reshape(-1)]).astype(jnp.float32)   # (55,)

    att = pl.pallas_call(
        partial(_conv_sigmoid_kernel, D=D, H=H, W=W),
        out_shape=jax.ShapeDtypeStruct((N, D, H, W), jnp.float32),
        grid=(N,),
        in_specs=[
            pl.BlockSpec((1, 2, D + 2, H + 2, W + 2), lambda n: (n, 0, 0, 0, 0)),
            pl.BlockSpec(memory_space=pltpu.MemorySpace.SMEM),   # conv weights
        ],
        out_specs=pl.BlockSpec((1, D, H, W), lambda n: (n, 0, 0, 0)),
        compiler_params=pltpu.CompilerParams(dimension_semantics=("parallel",)),
    )(ap, wvec)

    # ---- K3: y = x * att (broadcast over C), lane-dense over S --------------
    att3 = att.reshape(N, 1, S)                                # free, contiguous
    y3 = pl.pallas_call(
        _apply_kernel,
        out_shape=jax.ShapeDtypeStruct((N, C, S), jnp.float32),
        grid=(N, S // TS),
        in_specs=[pl.BlockSpec((1, C, TS), lambda n, s: (n, 0, s)),
                  pl.BlockSpec((1, 1, TS), lambda n, s: (n, 0, s))],
        out_specs=pl.BlockSpec((1, C, TS), lambda n, s: (n, 0, s)),
        compiler_params=pltpu.CompilerParams(
            dimension_semantics=("parallel", "parallel")),
    )(x3, att3)

    return y3.reshape(N, C, D, H, W)


# ---------------------------------------------------------------------------
# Pure-JAX reference (same math as the PyTorch module)
# ---------------------------------------------------------------------------
def spatial_attention_reference(x, weight, bias):
    avg = jnp.mean(x, axis=1, keepdims=True)
    mx = jnp.max(x, axis=1, keepdims=True)
    a = jnp.concatenate([avg, mx], axis=1)                     # (N, 2, D, H, W)
    a = jax.lax.conv_general_dilated(
        a, weight, window_strides=(1, 1, 1), padding="SAME",
        dimension_numbers=("NCDHW", "OIDHW", "NCDHW"),
        precision=jax.lax.Precision.HIGHEST)
    a = jax.nn.sigmoid(a + bias.reshape(1, -1, 1, 1, 1))
    return x * a


if __name__ == "__main__":
    key = jax.random.PRNGKey(0)
    kx, kw, kb = jax.random.split(key, 3)

    # Small shapes consistent with the module: NCDHW, C=4, 8 frames of 16x16.
    N, C, D, H, W = 2, 4, 8, 16, 16
    x = jax.random.normal(kx, (N, C, D, H, W), jnp.float32)

    # Conv3d(2, 1, k=3) parameters (PyTorch-style uniform init, deterministic).
    fan_in = 2 * 3 * 3 * 3
    bound = 1.0 / math.sqrt(fan_in)
    weight = jax.random.uniform(kw, (1, 2, 3, 3, 3), jnp.float32, -bound, bound)
    bias = jax.random.uniform(kb, (1,), jnp.float32, -bound, bound)

    fwd = jax.jit(spatial_attention_forward)
    y = fwd(x, weight, bias)
    jax.block_until_ready(y)

    y_ref = spatial_attention_reference(x, weight, bias)
    jax.block_until_ready(y_ref)

    assert y.shape == (N, C, D, H, W) and y.dtype == jnp.float32
    assert jnp.allclose(y, y_ref, rtol=1e-4, atol=1e-4), "mismatch vs reference"
    print("KERNEL_OK")
</pallas_src>

<mosaic_0001>
module attributes {stable_mosaic.version = 11 : i64} {
  func.func @_pool_kernel(%arg0: i32, %arg1: i32, %arg2: memref<1x4x2048xf32, #tpu.memory_space<vmem>>, %arg3: memref<1x2x2048xf32, #tpu.memory_space<vmem>>) attributes {dimension_semantics = [#tpu.dimension_semantics<parallel>, #tpu.dimension_semantics<parallel>], iteration_bounds = array<i64: 2, 1>, scalar_prefetch = 0 : i64, scratch_operands = 0 : i64, tpu.core_type = #tpu.core_type<tc>, window_params = [{transform_indices = @transform_0, window_bounds = array<i64: 1, 4, 2048>}, {transform_indices = @transform_1, window_bounds = array<i64: 1, 2, 2048>}]} {
    %c0 = arith.constant 0 : index
    %c0_0 = arith.constant 0 : index
    %c0_1 = arith.constant 0 : index
    %0 = vector.load %arg2[%c0, %c0_0, %c0_1] : memref<1x4x2048xf32, #tpu.memory_space<vmem>>, vector<1x4x2048xf32>
    %cst = arith.constant dense<0.000000e+00> : vector<1x2048xf32>
    %1 = vector.multi_reduction <add>, %0, %cst [1] : vector<1x4x2048xf32> to vector<1x2048xf32>
    %2 = vector.shape_cast %1 : vector<1x2048xf32> to vector<1x1x2048xf32>
    %cst_2 = arith.constant 4.000000e+00 : f32
    %3 = vector.broadcast %cst_2 : f32 to vector<1x1x2048xf32>
    %4 = arith.divf %2, %3 : vector<1x1x2048xf32>
    %c0_3 = arith.constant 0 : index
    %c0_4 = arith.constant 0 : index
    %c0_5 = arith.constant 0 : index
    %5 = vector.load %arg3[%c0_3, %c0_4, %c0_5] : memref<1x2x2048xf32, #tpu.memory_space<vmem>>, vector<1x1x2048xf32>
    tpu.vector_store %arg3[%c0_3, %c0_4, %c0_5], %4 {strides = array<i32>} : memref<1x2x2048xf32, #tpu.memory_space<vmem>>, vector<1x1x2048xf32>,
    %cst_6 = arith.constant dense<0xFF800000> : vector<1x2048xf32>
    %6 = vector.multi_reduction <maximumf>, %0, %cst_6 [1] : vector<1x4x2048xf32> to vector<1x2048xf32>
    %7 = vector.shape_cast %6 : vector<1x2048xf32> to vector<1x1x2048xf32>
    %c0_7 = arith.constant 0 : index
    %c1 = arith.constant 1 : index
    %c0_8 = arith.constant 0 : index
    %8 = vector.load %arg3[%c0_7, %c1, %c0_8] : memref<1x2x2048xf32, #tpu.memory_space<vmem>>, vector<1x1x2048xf32>
    tpu.vector_store %arg3[%c0_7, %c1, %c0_8], %7 {strides = array<i32>} : memref<1x2x2048xf32, #tpu.memory_space<vmem>>, vector<1x1x2048xf32>,
    return
  }
  func.func @transform_0(%arg0: i32, %arg1: i32) -> (i32, i32, i32) {
    %c0_i32 = arith.constant 0 : i32
    %c0_i32_0 = arith.constant 0 : i32
    return %arg0, %c0_i32, %arg1 : i32, i32, i32
  }
  func.func @transform_1(%arg0: i32, %arg1: i32) -> (i32, i32, i32) {
    %c0_i32 = arith.constant 0 : i32
    %c0_i32_0 = arith.constant 0 : i32
    return %arg0, %c0_i32, %arg1 : i32, i32, i32
  }
}

module attributes {stable_mosaic.version = 11 : i64} {
  func.func @_conv_sigmoid_kernel(%arg0: i32, %arg1: memref<1x2x10x18x18xf32, #tpu.memory_space<vmem>>, %arg2: memref<55xf32, #tpu.memory_space<smem>>, %arg3: memref<1x8x16x16xf32, #tpu.memory_space<vmem>>) attributes {dimension_semantics = [#tpu.dimension_semantics<parallel>], iteration_bounds = array<i64: 2>, scalar_prefetch = 0 : i64, scratch_operands = 0 : i64, tpu.core_type = #tpu.core_type<tc>, window_params = [{transform_indices = @transform_0, window_bounds = array<i64: 1, 2, 10, 18, 18>}, {transform_indices = @transform_1, window_bounds = array<i64: 55>}, {transform_indices = @transform_2, window_bounds = array<i64: 1, 8, 16, 16>}]} {
    %c0 = arith.constant 0 : index
    %c0_0 = arith.constant 0 : index
    %c0_1 = arith.constant 0 : index
    %c0_2 = arith.constant 0 : index
    %c0_3 = arith.constant 0 : index
    %0 = vector.load %arg1[%c0, %c0_0, %c0_1, %c0_2, %c0_3] : memref<1x2x10x18x18xf32, #tpu.memory_space<vmem>>, vector<1x2x10x18x18xf32>
    %1 = vector.shape_cast %0 : vector<1x2x10x18x18xf32> to vector<2x10x18x18xf32>
    %cst = arith.constant 0.000000e+00 : f32
    %2 = vector.broadcast %cst : f32 to vector<8x16x16xf32>
    %3 = vector.extract_strided_slice %1 {offsets = [0, 0, 0, 0], sizes = [1, 8, 16, 16], strides = [1, 1, 1, 1]} : vector<2x10x18x18xf32> to vector<1x8x16x16xf32>
    %4 = vector.shape_cast %3 : vector<1x8x16x16xf32> to vector<8x16x16xf32>
    %c0_4 = arith.constant 0 : index
    %5 = memref.load %arg2[%c0_4] : memref<55xf32, #tpu.memory_space<smem>>
    %6 = vector.broadcast %5 : f32 to vector<8x16x16xf32>
    %7 = arith.mulf %4, %6 : vector<8x16x16xf32>
    %8 = arith.addf %2, %7 : vector<8x16x16xf32>
    %9 = vector.extract_strided_slice %1 {offsets = [0, 0, 0, 1], sizes = [1, 8, 16, 16], strides = [1, 1, 1, 1]} : vector<2x10x18x18xf32> to vector<1x8x16x16xf32>
    %10 = vector.shape_cast %9 : vector<1x8x16x16xf32> to vector<8x16x16xf32>
    %c1 = arith.constant 1 : index
    %11 = memref.load %arg2[%c1] : memref<55xf32, #tpu.memory_space<smem>>
    %12 = vector.broadcast %11 : f32 to vector<8x16x16xf32>
    %13 = arith.mulf %10, %12 : vector<8x16x16xf32>
    %14 = arith.addf %8, %13 : vector<8x16x16xf32>
    %15 = vector.extract_strided_slice %1 {offsets = [0, 0, 0, 2], sizes = [1, 8, 16, 16], strides = [1, 1, 1, 1]} : vector<2x10x18x18xf32> to vector<1x8x16x16xf32>
    %16 = vector.shape_cast %15 : vector<1x8x16x16xf32> to vector<8x16x16xf32>
    %c2 = arith.constant 2 : index
    %17 = memref.load %arg2[%c2] : memref<55xf32, #tpu.memory_space<smem>>
    %18 = vector.broadcast %17 : f32 to vector<8x16x16xf32>
    %19 = arith.mulf %16, %18 : vector<8x16x16xf32>
    %20 = arith.addf %14, %19 : vector<8x16x16xf32>
    %21 = vector.extract_strided_slice %1 {offsets = [0, 0, 1, 0], sizes = [1, 8, 16, 16], strides = [1, 1, 1, 1]} : vector<2x10x18x18xf32> to vector<1x8x16x16xf32>
    %22 = vector.shape_cast %21 : vector<1x8x16x16xf32> to vector<8x16x16xf32>
    %c3 = arith.constant 3 : index
    %23 = memref.load %arg2[%c3] : memref<55xf32, #tpu.memory_space<smem>>
    %24 = vector.broadcast %23 : f32 to vector<8x16x16xf32>
    %25 = arith.mulf %22, %24 : vector<8x16x16xf32>
    %26 = arith.addf %20, %25 : vector<8x16x16xf32>
    %27 = vector.extract_strided_slice %1 {offsets = [0, 0, 1, 1], sizes = [1, 8, 16, 16], strides = [1, 1, 1, 1]} : vector<2x10x18x18xf32> to vector<1x8x16x16xf32>
    %28 = vector.shape_cast %27 : vector<1x8x16x16xf32> to vector<8x16x16xf32>
    %c4 = arith.constant 4 : index
    %29 = memref.load %arg2[%c4] : memref<55xf32, #tpu.memory_space<smem>>
    %30 = vector.broadcast %29 : f32 to vector<8x16x16xf32>
    %31 = arith.mulf %28, %30 : vector<8x16x16xf32>
    %32 = arith.addf %26, %31 : vector<8x16x16xf32>
    %33 = vector.extract_strided_slice %1 {offsets = [0, 0, 1, 2], sizes = [1, 8, 16, 16], strides = [1, 1, 1, 1]} : vector<2x10x18x18xf32> to vector<1x8x16x16xf32>
    %34 = vector.shape_cast %33 : vector<1x8x16x16xf32> to vector<8x16x16xf32>
    %c5 = arith.constant 5 : index
    %35 = memref.load %arg2[%c5] : memref<55xf32, #tpu.memory_space<smem>>
    %36 = vector.broadcast %35 : f32 to vector<8x16x16xf32>
    %37 = arith.mulf %34, %36 : vector<8x16x16xf32>
    %38 = arith.addf %32, %37 : vector<8x16x16xf32>
    %39 = vector.extract_strided_slice %1 {offsets = [0, 0, 2, 0], sizes = [1, 8, 16, 16], strides = [1, 1, 1, 1]} : vector<2x10x18x18xf32> to vector<1x8x16x16xf32>
    %40 = vector.shape_cast %39 : vector<1x8x16x16xf32> to vector<8x16x16xf32>
    %c6 = arith.constant 6 : index
    %41 = memref.load %arg2[%c6] : memref<55xf32, #tpu.memory_space<smem>>
    %42 = vector.broadcast %41 : f32 to vector<8x16x16xf32>
    %43 = arith.mulf %40, %42 : vector<8x16x16xf32>
    %44 = arith.addf %38, %43 : vector<8x16x16xf32>
    %45 = vector.extract_strided_slice %1 {offsets = [0, 0, 2, 1], sizes = [1, 8, 16, 16], strides = [1, 1, 1, 1]} : vector<2x10x18x18xf32> to vector<1x8x16x16xf32>
    %46 = vector.shape_cast %45 : vector<1x8x16x16xf32> to vector<8x16x16xf32>
    %c7 = arith.constant 7 : index
    %47 = memref.load %arg2[%c7] : memref<55xf32, #tpu.memory_space<smem>>
    %48 = vector.broadcast %47 : f32 to vector<8x16x16xf32>
    %49 = arith.mulf %46, %48 : vector<8x16x16xf32>
    %50 = arith.addf %44, %49 : vector<8x16x16xf32>
    %51 = vector.extract_strided_slice %1 {offsets = [0, 0, 2, 2], sizes = [1, 8, 16, 16], strides = [1, 1, 1, 1]} : vector<2x10x18x18xf32> to vector<1x8x16x16xf32>
    %52 = vector.shape_cast %51 : vector<1x8x16x16xf32> to vector<8x16x16xf32>
    %c8 = arith.constant 8 : index
    %53 = memref.load %arg2[%c8] : memref<55xf32, #tpu.memory_space<smem>>
    %54 = vector.broadcast %53 : f32 to vector<8x16x16xf32>
    %55 = arith.mulf %52, %54 : vector<8x16x16xf32>
    %56 = arith.addf %50, %55 : vector<8x16x16xf32>
    %57 = vector.extract_strided_slice %1 {offsets = [0, 1, 0, 0], sizes = [1, 8, 16, 16], strides = [1, 1, 1, 1]} : vector<2x10x18x18xf32> to vector<1x8x16x16xf32>
    %58 = vector.shape_cast %57 : vector<1x8x16x16xf32> to vector<8x16x16xf32>
    %c9 = arith.constant 9 : index
    %59 = memref.load %arg2[%c9] : memref<55xf32, #tpu.memory_space<smem>>
    %60 = vector.broadcast %59 : f32 to vector<8x16x16xf32>
    %61 = arith.mulf %58, %60 : vector<8x16x16xf32>
    %62 = arith.addf %56, %61 : vector<8x16x16xf32>
    %63 = vector.extract_strided_slice %1 {offsets = [0, 1, 0, 1], sizes = [1, 8, 16, 16], strides = [1, 1, 1, 1]} : vector<2x10x18x18xf32> to vector<1x8x16x16xf32>
    %64 = vector.shape_cast %63 : vector<1x8x16x16xf32> to vector<8x16x16xf32>
    %c10 = arith.constant 10 : index
    %65 = memref.load %arg2[%c10] : memref<55xf32, #tpu.memory_space<smem>>
    %66 = vector.broadcast %65 : f32 to vector<8x16x16xf32>
    %67 = arith.mulf %64, %66 : vector<8x16x16xf32>
    %68 = arith.addf %62, %67 : vector<8x16x16xf32>
    %69 = vector.extract_strided_slice %1 {offsets = [0, 1, 0, 2], sizes = [1, 8, 16, 16], strides = [1, 1, 1, 1]} : vector<2x10x18x18xf32> to vector<1x8x16x16xf32>
    %70 = vector.shape_cast %69 : vector<1x8x16x16xf32> to vector<8x16x16xf32>
    %c11 = arith.constant 11 : index
    %71 = memref.load %arg2[%c11] : memref<55xf32, #tpu.memory_space<smem>>
    %72 = vector.broadcast %71 : f32 to vector<8x16x16xf32>
    %73 = arith.mulf %70, %72 : vector<8x16x16xf32>
    %74 = arith.addf %68, %73 : vector<8x16x16xf32>
    %75 = vector.extract_strided_slice %1 {offsets = [0, 1, 1, 0], sizes = [1, 8, 16, 16], strides = [1, 1, 1, 1]} : vector<2x10x18x18xf32> to vector<1x8x16x16xf32>
    %76 = vector.shape_cast %75 : vector<1x8x16x16xf32> to vector<8x16x16xf32>
    %c12 = arith.constant 12 : index
    %77 = memref.load %arg2[%c12] : memref<55xf32, #tpu.memory_space<smem>>
    %78 = vector.broadcast %77 : f32 to vector<8x16x16xf32>
    %79 = arith.mulf %76, %78 : vector<8x16x16xf32>
    %80 = arith.addf %74, %79 : vector<8x16x16xf32>
    %81 = vector.extract_strided_slice %1 {offsets = [0, 1, 1, 1], sizes = [1, 8, 16, 16], strides = [1, 1, 1, 1]} : vector<2x10x18x18xf32> to vector<1x8x16x16xf32>
    %82 = vector.shape_cast %81 : vector<1x8x16x16xf32> to vector<8x16x16xf32>
    %c13 = arith.constant 13 : index
    %83 = memref.load %arg2[%c13] : memref<55xf32, #tpu.memory_space<smem>>
    %84 = vector.broadcast %83 : f32 to vector<8x16x16xf32>
    %85 = arith.mulf %82, %84 : vector<8x16x16xf32>
    %86 = arith.addf %80, %85 : vector<8x16x16xf32>
    %87 = vector.extract_strided_slice %1 {offsets = [0, 1, 1, 2], sizes = [1, 8, 16, 16], strides = [1, 1, 1, 1]} : vector<2x10x18x18xf32> to vector<1x8x16x16xf32>
    %88 = vector.shape_cast %87 : vector<1x8x16x16xf32> to vector<8x16x16xf32>
    %c14 = arith.constant 14 : index
    %89 = memref.load %arg2[%c14] : memref<55xf32, #tpu.memory_space<smem>>
    %90 = vector.broadcast %89 : f32 to vector<8x16x16xf32>
    %91 = arith.mulf %88, %90 : vector<8x16x16xf32>
    %92 = arith.addf %86, %91 : vector<8x16x16xf32>
    %93 = vector.extract_strided_slice %1 {offsets = [0, 1, 2, 0], sizes = [1, 8, 16, 16], strides = [1, 1, 1, 1]} : vector<2x10x18x18xf32> to vector<1x8x16x16xf32>
    %94 = vector.shape_cast %93 : vector<1x8x16x16xf32> to vector<8x16x16xf32>
    %c15 = arith.constant 15 : index
    %95 = memref.load %arg2[%c15] : memref<55xf32, #tpu.memory_space<smem>>
    %96 = vector.broadcast %95 : f32 to vector<8x16x16xf32>
    %97 = arith.mulf %94, %96 : vector<8x16x16xf32>
    %98 = arith.addf %92, %97 : vector<8x16x16xf32>
    %99 = vector.extract_strided_slice %1 {offsets = [0, 1, 2, 1], sizes = [1, 8, 16, 16], strides = [1, 1, 1, 1]} : vector<2x10x18x18xf32> to vector<1x8x16x16xf32>
    %100 = vector.shape_cast %99 : vector<1x8x16x16xf32> to vector<8x16x16xf32>
    %c16 = arith.constant 16 : index
    %101 = memref.load %arg2[%c16] : memref<55xf32, #tpu.memory_space<smem>>
    %102 = vector.broadcast %101 : f32 to vector<8x16x16xf32>
    %103 = arith.mulf %100, %102 : vector<8x16x16xf32>
    %104 = arith.addf %98, %103 : vector<8x16x16xf32>
    %105 = vector.extract_strided_slice %1 {offsets = [0, 1, 2, 2], sizes = [1, 8, 16, 16], strides = [1, 1, 1, 1]} : vector<2x10x18x18xf32> to vector<1x8x16x16xf32>
    %106 = vector.shape_cast %105 : vector<1x8x16x16xf32> to vector<8x16x16xf32>
    %c17 = arith.constant 17 : index
    %107 = memref.load %arg2[%c17] : memref<55xf32, #tpu.memory_space<smem>>
    %108 = vector.broadcast %107 : f32 to vector<8x16x16xf32>
    %109 = arith.mulf %106, %108 : vector<8x16x16xf32>
    %110 = arith.addf %104, %109 : vector<8x16x16xf32>
    %111 = vector.extract_strided_slice %1 {offsets = [0, 2, 0, 0], sizes = [1, 8, 16, 16], strides = [1, 1, 1, 1]} : vector<2x10x18x18xf32> to vector<1x8x16x16xf32>
    %112 = vector.shape_cast %111 : vector<1x8x16x16xf32> to vector<8x16x16xf32>
    %c18 = arith.constant 18 : index
    %113 = memref.load %arg2[%c18] : memref<55xf32, #tpu.memory_space<smem>>
    %114 = vector.broadcast %113 : f32 to vector<8x16x16xf32>
    %115 = arith.mulf %112, %114 : vector<8x16x16xf32>
    %116 = arith.addf %110, %115 : vector<8x16x16xf32>
    %117 = vector.extract_strided_slice %1 {offsets = [0, 2, 0, 1], sizes = [1, 8, 16, 16], strides = [1, 1, 1, 1]} : vector<2x10x18x18xf32> to vector<1x8x16x16xf32>
    %118 = vector.shape_cast %117 : vector<1x8x16x16xf32> to vector<8x16x16xf32>
    %c19 = arith.constant 19 : index
    %119 = memref.load %arg2[%c19] : memref<55xf32, #tpu.memory_space<smem>>
    %120 = vector.broadcast %119 : f32 to vector<8x16x16xf32>
    %121 = arith.mulf %118, %120 : vector<8x16x16xf32>
    %122 = arith.addf %116, %121 : vector<8x16x16xf32>
    %123 = vector.extract_strided_slice %1 {offsets = [0, 2, 0, 2], sizes = [1, 8, 16, 16], strides = [1, 1, 1, 1]} : vector<2x10x18x18xf32> to vector<1x8x16x16xf32>
    %124 = vector.shape_cast %123 : vector<1x8x16x16xf32> to vector<8x16x16xf32>
    %c20 = arith.constant 20 : index
    %125 = memref.load %arg2[%c20] : memref<55xf32, #tpu.memory_space<smem>>
    %126 = vector.broadcast %125 : f32 to vector<8x16x16xf32>
    %127 = arith.mulf %124, %126 : vector<8x16x16xf32>
    %128 = arith.addf %122, %127 : vector<8x16x16xf32>
    %129 = vector.extract_strided_slice %1 {offsets = [0, 2, 1, 0], sizes = [1, 8, 16, 16], strides = [1, 1, 1, 1]} : vector<2x10x18x18xf32> to vector<1x8x16x16xf32>
    %130 = vector.shape_cast %129 : vector<1x8x16x16xf32> to vector<8x16x16xf32>
    %c21 = arith.constant 21 : index
    %131 = memref.load %arg2[%c21] : memref<55xf32, #tpu.memory_space<smem>>
    %132 = vector.broadcast %131 : f32 to vector<8x16x16xf32>
    %133 = arith.mulf %130, %132 : vector<8x16x16xf32>
    %134 = arith.addf %128, %133 : vector<8x16x16xf32>
    %135 = vector.extract_strided_slice %1 {offsets = [0, 2, 1, 1], sizes = [1, 8, 16, 16], strides = [1, 1, 1, 1]} : vector<2x10x18x18xf32> to vector<1x8x16x16xf32>
    %136 = vector.shape_cast %135 : vector<1x8x16x16xf32> to vector<8x16x16xf32>
    %c22 = arith.constant 22 : index
    %137 = memref.load %arg2[%c22] : memref<55xf32, #tpu.memory_space<smem>>
    %138 = vector.broadcast %137 : f32 to vector<8x16x16xf32>
    %139 = arith.mulf %136, %138 : vector<8x16x16xf32>
    %140 = arith.addf %134, %139 : vector<8x16x16xf32>
    %141 = vector.extract_strided_slice %1 {offsets = [0, 2, 1, 2], sizes = [1, 8, 16, 16], strides = [1, 1, 1, 1]} : vector<2x10x18x18xf32> to vector<1x8x16x16xf32>
    %142 = vector.shape_cast %141 : vector<1x8x16x16xf32> to vector<8x16x16xf32>
    %c23 = arith.constant 23 : index
    %143 = memref.load %arg2[%c23] : memref<55xf32, #tpu.memory_space<smem>>
    %144 = vector.broadcast %143 : f32 to vector<8x16x16xf32>
    %145 = arith.mulf %142, %144 : vector<8x16x16xf32>
    %146 = arith.addf %140, %145 : vector<8x16x16xf32>
    %147 = vector.extract_strided_slice %1 {offsets = [0, 2, 2, 0], sizes = [1, 8, 16, 16], strides = [1, 1, 1, 1]} : vector<2x10x18x18xf32> to vector<1x8x16x16xf32>
    %148 = vector.shape_cast %147 : vector<1x8x16x16xf32> to vector<8x16x16xf32>
    %c24 = arith.constant 24 : index
    %149 = memref.load %arg2[%c24] : memref<55xf32, #tpu.memory_space<smem>>
    %150 = vector.broadcast %149 : f32 to vector<8x16x16xf32>
    %151 = arith.mulf %148, %150 : vector<8x16x16xf32>
    %152 = arith.addf %146, %151 : vector<8x16x16xf32>
    %153 = vector.extract_strided_slice %1 {offsets = [0, 2, 2, 1], sizes = [1, 8, 16, 16], strides = [1, 1, 1, 1]} : vector<2x10x18x18xf32> to vector<1x8x16x16xf32>
    %154 = vector.shape_cast %153 : vector<1x8x16x16xf32> to vector<8x16x16xf32>
    %c25 = arith.constant 25 : index
    %155 = memref.load %arg2[%c25] : memref<55xf32, #tpu.memory_space<smem>>
    %156 = vector.broadcast %155 : f32 to vector<8x16x16xf32>
    %157 = arith.mulf %154, %156 : vector<8x16x16xf32>
    %158 = arith.addf %152, %157 : vector<8x16x16xf32>
    %159 = vector.extract_strided_slice %1 {offsets = [0, 2, 2, 2], sizes = [1, 8, 16, 16], strides = [1, 1, 1, 1]} : vector<2x10x18x18xf32> to vector<1x8x16x16xf32>
    %160 = vector.shape_cast %159 : vector<1x8x16x16xf32> to vector<8x16x16xf32>
    %c26 = arith.constant 26 : index
    %161 = memref.load %arg2[%c26] : memref<55xf32, #tpu.memory_space<smem>>
    %162 = vector.broadcast %161 : f32 to vector<8x16x16xf32>
    %163 = arith.mulf %160, %162 : vector<8x16x16xf32>
    %164 = arith.addf %158, %163 : vector<8x16x16xf32>
    %165 = vector.extract_strided_slice %1 {offsets = [1, 0, 0, 0], sizes = [1, 8, 16, 16], strides = [1, 1, 1, 1]} : vector<2x10x18x18xf32> to vector<1x8x16x16xf32>
    %166 = vector.shape_cast %165 : vector<1x8x16x16xf32> to vector<8x16x16xf32>
    %c27 = arith.constant 27 : index
    %167 = memref.load %arg2[%c27] : memref<55xf32, #tpu.memory_space<smem>>
    %168 = vector.broadcast %167 : f32 to vector<8x16x16xf32>
    %169 = arith.mulf %166, %168 : vector<8x16x16xf32>
    %170 = arith.addf %164, %169 : vector<8x16x16xf32>
    %171 = vector.extract_strided_slice %1 {offsets = [1, 0, 0, 1], sizes = [1, 8, 16, 16], strides = [1, 1, 1, 1]} : vector<2x10x18x18xf32> to vector<1x8x16x16xf32>
    %172 = vector.shape_cast %171 : vector<1x8x16x16xf32> to vector<8x16x16xf32>
    %c28 = arith.constant 28 : index
    %173 = memref.load %arg2[%c28] : memref<55xf32, #tpu.memory_space<smem>>
    %174 = vector.broadcast %173 : f32 to vector<8x16x16xf32>
    %175 = arith.mulf %172, %174 : vector<8x16x16xf32>
    %176 = arith.addf %170, %175 : vector<8x16x16xf32>
    %177 = vector.extract_strided_slice %1 {offsets = [1, 0, 0, 2], sizes = [1, 8, 16, 16], strides = [1, 1, 1, 1]} : vector<2x10x18x18xf32> to vector<1x8x16x16xf32>
    %178 = vector.shape_cast %177 : vector<1x8x16x16xf32> to vector<8x16x16xf32>
    %c29 = arith.constant 29 : index
    %179 = memref.load %arg2[%c29] : memref<55xf32, #tpu.memory_space<smem>>
    %180 = vector.broadcast %179 : f32 to vector<8x16x16xf32>
    %181 = arith.mulf %178, %180 : vector<8x16x16xf32>
    %182 = arith.addf %176, %181 : vector<8x16x16xf32>
    %183 = vector.extract_strided_slice %1 {offsets = [1, 0, 1, 0], sizes = [1, 8, 16, 16], strides = [1, 1, 1, 1]} : vector<2x10x18x18xf32> to vector<1x8x16x16xf32>
    %184 = vector.shape_cast %183 : vector<1x8x16x16xf32> to vector<8x16x16xf32>
    %c30 = arith.constant 30 : index
    %185 = memref.load %arg2[%c30] : memref<55xf32, #tpu.memory_space<smem>>
    %186 = vector.broadcast %185 : f32 to vector<8x16x16xf32>
    %187 = arith.mulf %184, %186 : vector<8x16x16xf32>
    %188 = arith.addf %182, %187 : vector<8x16x16xf32>
    %189 = vector.extract_strided_slice %1 {offsets = [1, 0, 1, 1], sizes = [1, 8, 16, 16], strides = [1, 1, 1, 1]} : vector<2x10x18x18xf32> to vector<1x8x16x16xf32>
    %190 = vector.shape_cast %189 : vector<1x8x16x16xf32> to vector<8x16x16xf32>
    %c31 = arith.constant 31 : index
    %191 = memref.load %arg2[%c31] : memref<55xf32, #tpu.memory_space<smem>>
    %192 = vector.broadcast %191 : f32 to vector<8x16x16xf32>
    %193 = arith.mulf %190, %192 : vector<8x16x16xf32>
    %194 = arith.addf %188, %193 : vector<8x16x16xf32>
    %195 = vector.extract_strided_slice %1 {offsets = [1, 0, 1, 2], sizes = [1, 8, 16, 16], strides = [1, 1, 1, 1]} : vector<2x10x18x18xf32> to vector<1x8x16x16xf32>
    %196 = vector.shape_cast %195 : vector<1x8x16x16xf32> to vector<8x16x16xf32>
    %c32 = arith.constant 32 : index
    %197 = memref.load %arg2[%c32] : memref<55xf32, #tpu.memory_space<smem>>
    %198 = vector.broadcast %197 : f32 to vector<8x16x16xf32>
    %199 = arith.mulf %196, %198 : vector<8x16x16xf32>
    %200 = arith.addf %194, %199 : vector<8x16x16xf32>
    %201 = vector.extract_strided_slice %1 {offsets = [1, 0, 2, 0], sizes = [1, 8, 16, 16], strides = [1, 1, 1, 1]} : vector<2x10x18x18xf32> to vector<1x8x16x16xf32>
    %202 = vector.shape_cast %201 : vector<1x8x16x16xf32> to vector<8x16x16xf32>
    %c33 = arith.constant 33 : index
    %203 = memref.load %arg2[%c33] : memref<55xf32, #tpu.memory_space<smem>>
    %204 = vector.broadcast %203 : f32 to vector<8x16x16xf32>
    %205 = arith.mulf %202, %204 : vector<8x16x16xf32>
    %206 = arith.addf %200, %205 : vector<8x16x16xf32>
    %207 = vector.extract_strided_slice %1 {offsets = [1, 0, 2, 1], sizes = [1, 8, 16, 16], strides = [1, 1, 1, 1]} : vector<2x10x18x18xf32> to vector<1x8x16x16xf32>
    %208 = vector.shape_cast %207 : vector<1x8x16x16xf32> to vector<8x16x16xf32>
    %c34 = arith.constant 34 : index
    %209 = memref.load %arg2[%c34] : memref<55xf32, #tpu.memory_space<smem>>
    %210 = vector.broadcast %209 : f32 to vector<8x16x16xf32>
    %211 = arith.mulf %208, %210 : vector<8x16x16xf32>
    %212 = arith.addf %206, %211 : vector<8x16x16xf32>
    %213 = vector.extract_strided_slice %1 {offsets = [1, 0, 2, 2], sizes = [1, 8, 16, 16], strides = [1, 1, 1, 1]} : vector<2x10x18x18xf32> to vector<1x8x16x16xf32>
    %214 = vector.shape_cast %213 : vector<1x8x16x16xf32> to vector<8x16x16xf32>
    %c35 = arith.constant 35 : index
    %215 = memref.load %arg2[%c35] : memref<55xf32, #tpu.memory_space<smem>>
    %216 = vector.broadcast %215 : f32 to vector<8x16x16xf32>
    %217 = arith.mulf %214, %216 : vector<8x16x16xf32>
    %218 = arith.addf %212, %217 : vector<8x16x16xf32>
    %219 = vector.extract_strided_slice %1 {offsets = [1, 1, 0, 0], sizes = [1, 8, 16, 16], strides = [1, 1, 1, 1]} : vector<2x10x18x18xf32> to vector<1x8x16x16xf32>
    %220 = vector.shape_cast %219 : vector<1x8x16x16xf32> to vector<8x16x16xf32>
    %c36 = arith.constant 36 : index
    %221 = memref.load %arg2[%c36] : memref<55xf32, #tpu.memory_space<smem>>
    %222 = vector.broadcast %221 : f32 to vector<8x16x16xf32>
    %223 = arith.mulf %220, %222 : vector<8x16x16xf32>
    %224 = arith.addf %218, %223 : vector<8x16x16xf32>
    %225 = vector.extract_strided_slice %1 {offsets = [1, 1, 0, 1], sizes = [1, 8, 16, 16], strides = [1, 1, 1, 1]} : vector<2x10x18x18xf32> to vector<1x8x16x16xf32>
    %226 = vector.shape_cast %225 : vector<1x8x16x16xf32> to vector<8x16x16xf32>
    %c37 = arith.constant 37 : index
    %227 = memref.load %arg2[%c37] : memref<55xf32, #tpu.memory_space<smem>>
    %228 = vector.broadcast %227 : f32 to vector<8x16x16xf32>
    %229 = arith.mulf %226, %228 : vector<8x16x16xf32>
    %230 = arith.addf %224, %229 : vector<8x16x16xf32>
    %231 = vector.extract_strided_slice %1 {offsets = [1, 1, 0, 2], sizes = [1, 8, 16, 16], strides = [1, 1, 1, 1]} : vector<2x10x18x18xf32> to vector<1x8x16x16xf32>
    %232 = vector.shape_cast %231 : vector<1x8x16x16xf32> to vector<8x16x16xf32>
    %c38 = arith.constant 38 : index
    %233 = memref.load %arg2[%c38] : memref<55xf32, #tpu.memory_space<smem>>
    %234 = vector.broadcast %233 : f32 to vector<8x16x16xf32>
    %235 = arith.mulf %232, %234 : vector<8x16x16xf32>
    %236 = arith.addf %230, %235 : vector<8x16x16xf32>
    %237 = vector.extract_strided_slice %1 {offsets = [1, 1, 1, 0], sizes = [1, 8, 16, 16], strides = [1, 1, 1, 1]} : vector<2x10x18x18xf32> to vector<1x8x16x16xf32>
    %238 = vector.shape_cast %237 : vector<1x8x16x16xf32> to vector<8x16x16xf32>
    %c39 = arith.constant 39 : index
    %239 = memref.load %arg2[%c39] : memref<55xf32, #tpu.memory_space<smem>>
    %240 = vector.broadcast %239 : f32 to vector<8x16x16xf32>
    %241 = arith.mulf %238, %240 : vector<8x16x16xf32>
    %242 = arith.addf %236, %241 : vector<8x16x16xf32>
    %243 = vector.extract_strided_slice %1 {offsets = [1, 1, 1, 1], sizes = [1, 8, 16, 16], strides = [1, 1, 1, 1]} : vector<2x10x18x18xf32> to vector<1x8x16x16xf32>
    %244 = vector.shape_cast %243 : vector<1x8x16x16xf32> to vector<8x16x16xf32>
    %c40 = arith.constant 40 : index
    %245 = memref.load %arg2[%c40] : memref<55xf32, #tpu.memory_space<smem>>
    %246 = vector.broadcast %245 : f32 to vector<8x16x16xf32>
    %247 = arith.mulf %244, %246 : vector<8x16x16xf32>
    %248 = arith.addf %242, %247 : vector<8x16x16xf32>
    %249 = vector.extract_strided_slice %1 {offsets = [1, 1, 1, 2], sizes = [1, 8, 16, 16], strides = [1, 1, 1, 1]} : vector<2x10x18x18xf32> to vector<1x8x16x16xf32>
    %250 = vector.shape_cast %249 : vector<1x8x16x16xf32> to vector<8x16x16xf32>
    %c41 = arith.constant 41 : index
    %251 = memref.load %arg2[%c41] : memref<55xf32, #tpu.memory_space<smem>>
    %252 = vector.broadcast %251 : f32 to vector<8x16x16xf32>
    %253 = arith.mulf %250, %252 : vector<8x16x16xf32>
    %254 = arith.addf %248, %253 : vector<8x16x16xf32>
    %255 = vector.extract_strided_slice %1 {offsets = [1, 1, 2, 0], sizes = [1, 8, 16, 16], strides = [1, 1, 1, 1]} : vector<2x10x18x18xf32> to vector<1x8x16x16xf32>
    %256 = vector.shape_cast %255 : vector<1x8x16x16xf32> to vector<8x16x16xf32>
    %c42 = arith.constant 42 : index
    %257 = memref.load %arg2[%c42] : memref<55xf32, #tpu.memory_space<smem>>
    %258 = vector.broadcast %257 : f32 to vector<8x16x16xf32>
    %259 = arith.mulf %256, %258 : vector<8x16x16xf32>
    %260 = arith.addf %254, %259 : vector<8x16x16xf32>
    %261 = vector.extract_strided_slice %1 {offsets = [1, 1, 2, 1], sizes = [1, 8, 16, 16], strides = [1, 1, 1, 1]} : vector<2x10x18x18xf32> to vector<1x8x16x16xf32>
    %262 = vector.shape_cast %261 : vector<1x8x16x16xf32> to vector<8x16x16xf32>
    %c43 = arith.constant 43 : index
    %263 = memref.load %arg2[%c43] : memref<55xf32, #tpu.memory_space<smem>>
    %264 = vector.broadcast %263 : f32 to vector<8x16x16xf32>
    %265 = arith.mulf %262, %264 : vector<8x16x16xf32>
    %266 = arith.addf %260, %265 : vector<8x16x16xf32>
    %267 = vector.extract_strided_slice %1 {offsets = [1, 1, 2, 2], sizes = [1, 8, 16, 16], strides = [1, 1, 1, 1]} : vector<2x10x18x18xf32> to vector<1x8x16x16xf32>
    %268 = vector.shape_cast %267 : vector<1x8x16x16xf32> to vector<8x16x16xf32>
    %c44 = arith.constant 44 : index
    %269 = memref.load %arg2[%c44] : memref<55xf32, #tpu.memory_space<smem>>
    %270 = vector.broadcast %269 : f32 to vector<8x16x16xf32>
    %271 = arith.mulf %268, %270 : vector<8x16x16xf32>
    %272 = arith.addf %266, %271 : vector<8x16x16xf32>
    %273 = vector.extract_strided_slice %1 {offsets = [1, 2, 0, 0], sizes = [1, 8, 16, 16], strides = [1, 1, 1, 1]} : vector<2x10x18x18xf32> to vector<1x8x16x16xf32>
    %274 = vector.shape_cast %273 : vector<1x8x16x16xf32> to vector<8x16x16xf32>
    %c45 = arith.constant 45 : index
    %275 = memref.load %arg2[%c45] : memref<55xf32, #tpu.memory_space<smem>>
    %276 = vector.broadcast %275 : f32 to vector<8x16x16xf32>
    %277 = arith.mulf %274, %276 : vector<8x16x16xf32>
    %278 = arith.addf %272, %277 : vector<8x16x16xf32>
    %279 = vector.extract_strided_slice %1 {offsets = [1, 2, 0, 1], sizes = [1, 8, 16, 16], strides = [1, 1, 1, 1]} : vector<2x10x18x18xf32> to vector<1x8x16x16xf32>
    %280 = vector.shape_cast %279 : vector<1x8x16x16xf32> to vector<8x16x16xf32>
    %c46 = arith.constant 46 : index
    %281 = memref.load %arg2[%c46] : memref<55xf32, #tpu.memory_space<smem>>
    %282 = vector.broadcast %281 : f32 to vector<8x16x16xf32>
    %283 = arith.mulf %280, %282 : vector<8x16x16xf32>
    %284 = arith.addf %278, %283 : vector<8x16x16xf32>
    %285 = vector.extract_strided_slice %1 {offsets = [1, 2, 0, 2], sizes = [1, 8, 16, 16], strides = [1, 1, 1, 1]} : vector<2x10x18x18xf32> to vector<1x8x16x16xf32>
    %286 = vector.shape_cast %285 : vector<1x8x16x16xf32> to vector<8x16x16xf32>
    %c47 = arith.constant 47 : index
    %287 = memref.load %arg2[%c47] : memref<55xf32, #tpu.memory_space<smem>>
    %288 = vector.broadcast %287 : f32 to vector<8x16x16xf32>
    %289 = arith.mulf %286, %288 : vector<8x16x16xf32>
    %290 = arith.addf %284, %289 : vector<8x16x16xf32>
    %291 = vector.extract_strided_slice %1 {offsets = [1, 2, 1, 0], sizes = [1, 8, 16, 16], strides = [1, 1, 1, 1]} : vector<2x10x18x18xf32> to vector<1x8x16x16xf32>
    %292 = vector.shape_cast %291 : vector<1x8x16x16xf32> to vector<8x16x16xf32>
    %c48 = arith.constant 48 : index
    %293 = memref.load %arg2[%c48] : memref<55xf32, #tpu.memory_space<smem>>
    %294 = vector.broadcast %293 : f32 to vector<8x16x16xf32>
    %295 = arith.mulf %292, %294 : vector<8x16x16xf32>
    %296 = arith.addf %290, %295 : vector<8x16x16xf32>
    %297 = vector.extract_strided_slice %1 {offsets = [1, 2, 1, 1], sizes = [1, 8, 16, 16], strides = [1, 1, 1, 1]} : vector<2x10x18x18xf32> to vector<1x8x16x16xf32>
    %298 = vector.shape_cast %297 : vector<1x8x16x16xf32> to vector<8x16x16xf32>
    %c49 = arith.constant 49 : index
    %299 = memref.load %arg2[%c49] : memref<55xf32, #tpu.memory_space<smem>>
    %300 = vector.broadcast %299 : f32 to vector<8x16x16xf32>
    %301 = arith.mulf %298, %300 : vector<8x16x16xf32>
    %302 = arith.addf %296, %301 : vector<8x16x16xf32>
    %303 = vector.extract_strided_slice %1 {offsets = [1, 2, 1, 2], sizes = [1, 8, 16, 16], strides = [1, 1, 1, 1]} : vector<2x10x18x18xf32> to vector<1x8x16x16xf32>
    %304 = vector.shape_cast %303 : vector<1x8x16x16xf32> to vector<8x16x16xf32>
    %c50 = arith.constant 50 : index
    %305 = memref.load %arg2[%c50] : memref<55xf32, #tpu.memory_space<smem>>
    %306 = vector.broadcast %305 : f32 to vector<8x16x16xf32>
    %307 = arith.mulf %304, %306 : vector<8x16x16xf32>
    %308 = arith.addf %302, %307 : vector<8x16x16xf32>
    %309 = vector.extract_strided_slice %1 {offsets = [1, 2, 2, 0], sizes = [1, 8, 16, 16], strides = [1, 1, 1, 1]} : vector<2x10x18x18xf32> to vector<1x8x16x16xf32>
    %310 = vector.shape_cast %309 : vector<1x8x16x16xf32> to vector<8x16x16xf32>
    %c51 = arith.constant 51 : index
    %311 = memref.load %arg2[%c51] : memref<55xf32, #tpu.memory_space<smem>>
    %312 = vector.broadcast %311 : f32 to vector<8x16x16xf32>
    %313 = arith.mulf %310, %312 : vector<8x16x16xf32>
    %314 = arith.addf %308, %313 : vector<8x16x16xf32>
    %315 = vector.extract_strided_slice %1 {offsets = [1, 2, 2, 1], sizes = [1, 8, 16, 16], strides = [1, 1, 1, 1]} : vector<2x10x18x18xf32> to vector<1x8x16x16xf32>
    %316 = vector.shape_cast %315 : vector<1x8x16x16xf32> to vector<8x16x16xf32>
    %c52 = arith.constant 52 : index
    %317 = memref.load %arg2[%c52] : memref<55xf32, #tpu.memory_space<smem>>
    %318 = vector.broadcast %317 : f32 to vector<8x16x16xf32>
    %319 = arith.mulf %316, %318 : vector<8x16x16xf32>
    %320 = arith.addf %314, %319 : vector<8x16x16xf32>
    %321 = vector.extract_strided_slice %1 {offsets = [1, 2, 2, 2], sizes = [1, 8, 16, 16], strides = [1, 1, 1, 1]} : vector<2x10x18x18xf32> to vector<1x8x16x16xf32>
    %322 = vector.shape_cast %321 : vector<1x8x16x16xf32> to vector<8x16x16xf32>
    %c53 = arith.constant 53 : index
    %323 = memref.load %arg2[%c53] : memref<55xf32, #tpu.memory_space<smem>>
    %324 = vector.broadcast %323 : f32 to vector<8x16x16xf32>
    %325 = arith.mulf %322, %324 : vector<8x16x16xf32>
    %326 = arith.addf %320, %325 : vector<8x16x16xf32>
    %c54 = arith.constant 54 : index
    %327 = memref.load %arg2[%c54] : memref<55xf32, #tpu.memory_space<smem>>
    %328 = vector.broadcast %327 : f32 to vector<8x16x16xf32>
    %329 = arith.addf %326, %328 : vector<8x16x16xf32>
    %cst_5 = arith.constant 0.000000e+00 : f32
    %330 = vector.broadcast %cst_5 : f32 to vector<8x16x16xf32>
    %331 = arith.subf %330, %329 : vector<8x16x16xf32>
    %332 = math.exp %331 : vector<8x16x16xf32>
    %cst_6 = arith.constant 1.000000e+00 : f32
    %333 = vector.broadcast %cst_6 : f32 to vector<8x16x16xf32>
    %334 = arith.addf %333, %332 : vector<8x16x16xf32>
    %cst_7 = arith.constant 1.000000e+00 : f32
    %335 = vector.broadcast %cst_7 : f32 to vector<8x16x16xf32>
    %336 = arith.divf %335, %334 : vector<8x16x16xf32>
    %c0_8 = arith.constant 0 : index
    %c0_9 = arith.constant 0 : index
    %c0_10 = arith.constant 0 : index
    %c0_11 = arith.constant 0 : index
    %337 = vector.load %arg3[%c0_8, %c0_9, %c0_10, %c0_11] : memref<1x8x16x16xf32, #tpu.memory_space<vmem>>, vector<1x8x16x16xf32>
    %338 = vector.shape_cast %337 : vector<1x8x16x16xf32> to vector<8x16x16xf32>
    %339 = vector.shape_cast %336 : vector<8x16x16xf32> to vector<1x8x16x16xf32>
    tpu.vector_store %arg3[%c0_8, %c0_9, %c0_10, %c0_11], %339 {strides = array<i32>} : memref<1x8x16x16xf32, #tpu.memory_space<vmem>>, vector<1x8x16x16xf32>,
    return
  }
  func.func @transform_0(%arg0: i32) -> (i32, i32, i32, i32, i32) {
    %c0_i32 = arith.constant 0 : i32
    %c0_i32_0 = arith.constant 0 : i32
    %c0_i32_1 = arith.constant 0 : i32
    %c0_i32_2 = arith.constant 0 : i32
    %c0_i32_3 = arith.constant 0 : i32
    return %arg0, %c0_i32, %c0_i32_0, %c0_i32_1, %c0_i32_2 : i32, i32, i32, i32, i32
  }
  func.func @transform_1(%arg0: i32) -> i32 {
    %c0_i32 = arith.constant 0 : i32
    %c0_i32_0 = arith.constant 0 : i32
    return %c0_i32 : i32
  }
  func.func @transform_2(%arg0: i32) -> (i32, i32, i32, i32) {
    %c0_i32 = arith.constant 0 : i32
    %c0_i32_0 = arith.constant 0 : i32
    %c0_i32_1 = arith.constant 0 : i32
    %c0_i32_2 = arith.constant 0 : i32
    return %arg0, %c0_i32, %c0_i32_0, %c0_i32_1 : i32, i32, i32, i32
  }
}

module attributes {stable_mosaic.version = 11 : i64} {
  func.func @_apply_kernel(%arg0: i32, %arg1: i32, %arg2: memref<1x4x2048xf32, #tpu.memory_space<vmem>>, %arg3: memref<1x1x2048xf32, #tpu.memory_space<vmem>>, %arg4: memref<1x4x2048xf32, #tpu.memory_space<vmem>>) attributes {dimension_semantics = [#tpu.dimension_semantics<parallel>, #tpu.dimension_semantics<parallel>], iteration_bounds = array<i64: 2, 1>, scalar_prefetch = 0 : i64, scratch_operands = 0 : i64, tpu.core_type = #tpu.core_type<tc>, window_params = [{transform_indices = @transform_0, window_bounds = array<i64: 1, 4, 2048>}, {transform_indices = @transform_1, window_bounds = array<i64: 1, 1, 2048>}, {transform_indices = @transform_2, window_bounds = array<i64: 1, 4, 2048>}]} {
    %c0 = arith.constant 0 : index
    %c0_0 = arith.constant 0 : index
    %c0_1 = arith.constant 0 : index
    %0 = vector.load %arg2[%c0, %c0_0, %c0_1] : memref<1x4x2048xf32, #tpu.memory_space<vmem>>, vector<1x4x2048xf32>
    %c0_2 = arith.constant 0 : index
    %c0_3 = arith.constant 0 : index
    %c0_4 = arith.constant 0 : index
    %1 = vector.load %arg3[%c0_2, %c0_3, %c0_4] : memref<1x1x2048xf32, #tpu.memory_space<vmem>>, vector<1x1x2048xf32>
    %2 = vector.broadcast %1 : vector<1x1x2048xf32> to vector<1x4x2048xf32>
    %3 = arith.mulf %0, %2 : vector<1x4x2048xf32>
    %c0_5 = arith.constant 0 : index
    %c0_6 = arith.constant 0 : index
    %c0_7 = arith.constant 0 : index
    %4 = vector.load %arg4[%c0_5, %c0_6, %c0_7] : memref<1x4x2048xf32, #tpu.memory_space<vmem>>, vector<1x4x2048xf32>
    tpu.vector_store %arg4[%c0_5, %c0_6, %c0_7], %3 {strides = array<i32>} : memref<1x4x2048xf32, #tpu.memory_space<vmem>>, vector<1x4x2048xf32>,
    return
  }
  func.func @transform_0(%arg0: i32, %arg1: i32) -> (i32, i32, i32) {
    %c0_i32 = arith.constant 0 : i32
    %c0_i32_0 = arith.constant 0 : i32
    return %arg0, %c0_i32, %arg1 : i32, i32, i32
  }
  func.func @transform_1(%arg0: i32, %arg1: i32) -> (i32, i32, i32) {
    %c0_i32 = arith.constant 0 : i32
    %c0_i32_0 = arith.constant 0 : i32
    return %arg0, %c0_i32, %arg1 : i32, i32, i32
  }
  func.func @transform_2(%arg0: i32, %arg1: i32) -> (i32, i32, i32) {
    %c0_i32 = arith.constant 0 : i32
    %c0_i32_0 = arith.constant 0 : i32
    return %arg0, %c0_i32, %arg1 : i32, i32, i32
  }
}

</mosaic_0001>

<bundles_post_ra>
// kernel: spatial_attention_forward.3
= control target key start
LH: loop header
LB: loop body
LE: loop exit
PB: predicated region body
PF: predicated region fallthrough
CT: control target
= control target key end

     0   :  { %s840_s6 = smov 0   ;;  %s842_s7 = smov 0   ;;  %s1039_s0 = inlined_call_operand.vmem [shape: f32[2,4,2048], index: 0, kind: input, shape index: {}]   ;;  %s1040_s1 = inlined_call_operand.vmem [shape: f32[2,2,2048], index: 1, kind: output, shape index: {}]  }
   0x1   :  { %s844_s8 = smov 0  }
   0x2 LB: > { %s23_s9 = sadd.s32 1, %s823_s7  ;;  %p760_p0 = scmp.ge.s32.totalorder %s827_s8, 1  ;;  %s827_s8 = sphi %s844_s8, %s11_s8   ;;  %s823_s7 = sphi %s842_s7, %s1042_s7   ;;  %s819_s6 = sphi %s840_s6, %s1041_s6  }
   0x3   : > { %p25_p1 = scmp.ge.s32.totalorder %s23_s9, 2  ;;  %p108_p2 = scmp.lt.s32.totalorder %s827_s8, 3 }
   0x5   : > { %s1044_s9 = smov (%p25_p1, %s23_s9), 0  ;;  %p109_p3 = pnand %p760_p0, %p108_p2 }
   0x6   : > { %p137_p4 = scmp.lt.s32.totalorder (!%p109_p3), %s819_s6, 1  ;;  %v341_v0 = vlaneseq (!%p109_p3)  ;;  %v829_v1 = vmov (!%p109_p3), 1966171168   ;;  %vm188_vm0 = vcmask (!%p109_p3), 1043456  }
   0x7   : > { %112 = sbr.rel (%p109_p3) target bundleno = 104 (0x68), region = 24  ;;  %v339_v2 = vunpack.c.l.s4 (!%p109_p3), %v829_v1 }
   0x8   : > { %v342_v3 = vshrl.u32 (!%p109_p3), %v341_v0, 7 }
   0x9   : > { %v340_v4 = vunpack.c.0.s8 (!%p109_p3), %v339_v2 }
   0xb   : > { %v870_v8 = vsub.s32 (!%p109_p3), %v340_v4, %v342_v3 }
   0xe   : > { %s1046_s6 = smov (!%p137_p4, %s819_s6), 1 }
   0xf   : > { %s770_s10 = sshll.u32 %s1046_s6, 6  ;;  %s771_s14 = sshll.u32 %s1046_s6, 5 }
  0x10   : > { %s144_s13 = scalar_lea.vmem %s1039_s0, %s770_s10  ;;  %s972_s17 = scalar_lea.vmem %s1040_s1, %s771_s14 }
  0x11   : > { %v864_v5 = vld [vmem:[%s144_s13] sm:$0xff]  ;;  %v866_v6 = vld [vmem:[%s144_s13 + $0x8] sm:$0xff]  ;;  %v868_v7 = vld [vmem:[%s144_s13 + $0x10] sm:$0xff] }
  0x12   : > { %v872_v9 = vld [vmem:[%s144_s13 + $0x18] sm:$0xff]  ;;  %v874_v10 = vld [vmem:[%s144_s13 + $0x20] sm:$0xff]  ;;  %v876_v11 = vld [vmem:[%s144_s13 + $0x28] sm:$0xff]  ;;  %v880_v12 = vcombine.high %v864_v5, %v864_v5  ;;  %v884_v13 = vcombine.high %v866_v6, %v866_v6  ;;  %v888_v14 = vcombine.high %v868_v7, %v868_v7  ;;  %v189_v15 = vsel %vm188_vm0, %v864_v5, 0.0 }
  0x13   : > { %v892_v16 = vld [vmem:[%s144_s13 + $0x30] sm:$0xff]  ;;  %v894_v17 = vld [vmem:[%s144_s13 + $0x38] sm:$0xff]  ;;  %v898_v18 = vcombine.high %v872_v9, %v872_v9  ;;  %v902_v19 = vcombine.high %v874_v10, %v874_v10  ;;  %v906_v20 = vcombine.high %v876_v11, %v876_v11  ;;  %v190_v21 = vrot.slane %v189_v15, 4 }
  0x14   : > { %v910_v22 = vcombine.high %v892_v16, %v892_v16  ;;  %v914_v23 = vcombine.high %v894_v17, %v894_v17  ;;  %v196_v24 = vsel %vm188_vm0, %v880_v12, 0.0  ;;  %v203_v25 = vsel %vm188_vm0, %v866_v6, 0.0 }
  0x15   : > { %v191_v26 = vadd.f32 %v190_v21, %v189_v15  ;;  %v197_v27 = vrot.slane %v196_v24, 4  ;;  %v204_v28 = vrot.slane %v203_v25, 4  ;;  %v210_v29 = vsel %vm188_vm0, %v884_v13, 0.0 }
  0x16   : > { %v211_v30 = vrot.slane %v210_v29, 4  ;;  %v217_v31 = vsel %vm188_vm0, %v868_v7, 0.0  ;;  %v224_v32 = vsel %vm188_vm0, %v888_v14, 0.0  ;;  %v231_v33 = vsel %vm188_vm0, %v872_v9, 0.0 }
  0x17   : > { %v192_v34 = vrot.slane %v191_v26, 2  ;;  %v198_v35 = vadd.f32 %v197_v27, %v196_v24  ;;  %v205_v36 = vadd.f32 %v204_v28, %v203_v25  ;;  %v218_v37 = vrot.slane %v217_v31, 4 }
  0x18   : > { %v212_v38 = vadd.f32 %v211_v30, %v210_v29  ;;  %v225_v39 = vrot.slane %v224_v32, 4  ;;  %v232_v40 = vrot.slane %v231_v33, 4  ;;  %v238_v41 = vsel %vm188_vm0, %v898_v18, 0.0 }
  0x19   : > { %v193_v42 = vadd.f32 %v192_v34, %v191_v26  ;;  %v199_v43 = vrot.slane %v198_v35, 2  ;;  %v206_v44 = vrot.slane %v205_v36, 2  ;;  %v219_v45 = vadd.f32 %v218_v37, %v217_v31 }
  0x1a   : > { %v213_v46 = vrot.slane %v212_v38, 2  ;;  %v226_v47 = vadd.f32 %v225_v39, %v224_v32  ;;  %v233_v48 = vadd.f32 %v232_v40, %v231_v33  ;;  %v239_v49 = vrot.slane %v238_v41, 4 }
  0x1b   : > { %v194_v50 = vrot.slane %v193_v42, 1  ;;  %v200_v51 = vadd.f32 %v199_v43, %v198_v35  ;;  %v207_v52 = vadd.f32 %v206_v44, %v205_v36  ;;  %v220_v53 = vrot.slane %v219_v45, 2 }
  0x1c   : > { %v214_v54 = vadd.f32 %v213_v46, %v212_v38  ;;  %v227_v55 = vrot.slane %v226_v47, 2  ;;  %v234_v56 = vrot.slane %v233_v48, 2  ;;  %v240_v57 = vadd.f32 %v239_v49, %v238_v41 }
  0x1d   : > { %v930_v58 = vadd.f32 %v194_v50, %v193_v42  ;;  %v201_v59 = vrot.slane %v200_v51, 1  ;;  %v208_v60 = vrot.slane %v207_v52, 1  ;;  %v221_v61 = vadd.f32 %v220_v53, %v219_v45 }
  0x1e   : > { %v215_v62 = vrot.slane %v214_v54, 1  ;;  %v228_v63 = vadd.f32 %v227_v55, %v226_v47  ;;  %v235_v0 = vadd.f32 %v234_v56, %v233_v48  ;;  %v241_v1 = vrot.slane %v240_v57, 2 }
  0x1f   : > { %v202_v2 = vadd.f32 %v201_v59, %v200_v51  ;;  %v932_v3 = vadd.f32 %v208_v60, %v207_v52  ;;  %v222_v4 = vrot.slane %v221_v61, 1  ;;  %v245_v15 = vsel %vm188_vm0, %v874_v10, 0.0 }
  0x20   : > { %v216_v21 = vadd.f32 %v215_v62, %v214_v54  ;;  %v229_v24 = vrot.slane %v228_v63, 1  ;;  %v236_v25 = vrot.slane %v235_v0, 1  ;;  %v242_v26 = vadd.f32 %v241_v1, %v240_v57 }
  0x21   : > { %v223_v27 = vadd.f32 %v222_v4, %v221_v61  ;;  %v246_v28 = vrot.slane %v245_v15, 4  ;;  %v252_v29 = vsel %vm188_vm0, %v902_v19, 0.0  ;;  %v259_v30 = vsel %vm188_vm0, %v876_v11, 0.0 }
  0x22   : > { %v230_v31 = vadd.f32 %v229_v24, %v228_v63  ;;  %v237_v32 = vadd.f32 %v236_v25, %v235_v0  ;;  %v243_v33 = vrot.slane %v242_v26, 1  ;;  %v253_v34 = vrot.slane %v252_v29, 4 }
  0x23   : > { %v247_v35 = vadd.f32 %v246_v28, %v245_v15  ;;  %v260_v36 = vrot.slane %v259_v30, 4  ;;  %v266_v37 = vsel %vm188_vm0, %v906_v20, 0.0  ;;  %v273_v38 = vsel %vm188_vm0, %v892_v16, 0.0 }
  0x24   : > { %v244_v39 = vadd.f32 %v243_v33, %v242_v26  ;;  %v254_v40 = vadd.f32 %v253_v34, %v252_v29  ;;  %v267_v41 = vrot.slane %v266_v37, 4  ;;  %v274_v42 = vrot.slane %v273_v38, 4 }
  0x25   : > { %v248_v43 = vrot.slane %v247_v35, 2  ;;  %v261_v44 = vadd.f32 %v260_v36, %v259_v30  ;;  %v280_v45 = vsel %vm188_vm0, %v910_v22, 0.0  ;;  %v287_v46 = vsel %vm188_vm0, %v894_v17, 0.0 }
  0x26   : > { %v255_v47 = vrot.slane %v254_v40, 2  ;;  %v268_v48 = vadd.f32 %v267_v41, %v266_v37  ;;  %v275_v49 = vadd.f32 %v274_v42, %v273_v38  ;;  %v281_v50 = vrot.slane %v280_v45, 4 }
  0x27   : > { %v249_v51 = vadd.f32 %v248_v43, %v247_v35  ;;  %v262_v52 = vrot.slane %v261_v44, 2  ;;  %v288_v53 = vrot.slane %v287_v46, 4  ;;  %v294_v54 = vsel %vm188_vm0, %v914_v23, 0.0 }
  0x28   : > { %v256_v55 = vadd.f32 %v255_v47, %v254_v40  ;;  %v269_v56 = vrot.slane %v268_v48, 2  ;;  %v276_v57 = vrot.slane %v275_v49, 2  ;;  %v282_v59 = vadd.f32 %v281_v50, %v280_v45 }
  0x29   : > { %v250_v60 = vrot.slane %v249_v51, 1  ;;  %v263_v61 = vadd.f32 %v262_v52, %v261_v44  ;;  %v289_v62 = vadd.f32 %v288_v53, %v287_v46  ;;  %v295_v63 = vrot.slane %v294_v54, 4 }
  0x2a   : > { %v257_v0 = vrot.slane %v256_v55, 1  ;;  %v270_v1 = vadd.f32 %v269_v56, %v268_v48  ;;  %v277_v4 = vadd.f32 %v276_v57, %v275_v49  ;;  %v283_v15 = vrot.slane %v282_v59, 2 }
  0x2b   : > { %v251_v24 = vadd.f32 %v250_v60, %v249_v51  ;;  %v264_v25 = vrot.slane %v263_v61, 1  ;;  %v290_v26 = vrot.slane %v289_v62, 2  ;;  %v296_v28 = vadd.f32 %v295_v63, %v294_v54 }
  0x2c   : > { %v258_v29 = vadd.f32 %v257_v0, %v256_v55  ;;  %v271_v30 = vrot.slane %v270_v1, 1  ;;  %v278_v33 = vrot.slane %v277_v4, 1  ;;  %v284_v34 = vadd.f32 %v283_v15, %v282_v59 }
  0x2d   : > { %v265_v35 = vadd.f32 %v264_v25, %v263_v61  ;;  %v291_v36 = vadd.f32 %v290_v26, %v289_v62  ;;  %v297_v37 = vrot.slane %v296_v28, 2  ;;  %v302_v38 = vmul.f32 0.25, %v930_v58 }
  0x2e   : > { %v272_v40 = vadd.f32 %v271_v30, %v270_v1  ;;  %v279_v41 = vadd.f32 %v278_v33, %v277_v4  ;;  %v285_v42 = vrot.slane %v284_v34, 1  ;;  %v303_v43 = vmul.f32 0.25, %v202_v2 }
  0x2f   : > { %v292_v44 = vrot.slane %v291_v36, 1  ;;  %v298_v45 = vadd.f32 %v297_v37, %v296_v28  ;;  %v304_v46 = vmul.f32 0.25, %v932_v3  ;;  %v305_v47 = vmul.f32 0.25, %v216_v21 }
  0x30   : > { %v286_v48 = vadd.f32 %v285_v42, %v284_v34  ;;  %v306_v49 = vmul.f32 0.25, %v223_v27  ;;  %v307_v50 = vmul.f32 0.25, %v230_v31  ;;  %v308_v51 = vmul.f32 0.25, %v237_v32 }
  0x31   : > { %v293_v52 = vadd.f32 %v292_v44, %v291_v36  ;;  %v299_v53 = vrot.slane %v298_v45, 1  ;;  %v309_v54 = vmul.f32 0.25, %v244_v39  ;;  %v310_v55 = vmul.f32 0.25, %v251_v24 }
  0x32   : > { %v311_v56 = vmul.f32 0.25, %v258_v29  ;;  %v312_v57 = vmul.f32 0.25, %v265_v35  ;;  %v313_v58 = vmul.f32 0.25, %v272_v40  ;;  %v314_v59 = vmul.f32 0.25, %v279_v41 }
  0x33   : > { %v300_v60 = vadd.f32 %v299_v53, %v298_v45  ;;  %v315_v61 = vmul.f32 0.25, %v286_v48  ;;  %v316_v2 = vmul.f32 0.25, %v293_v52  ;;  %v334_v62 = vcombine.low %v302_v38, %v303_v43 }
  0x34   : > { %v335_v63 = vcombine.low %v304_v46, %v305_v47  ;;  %v336_v3 = vcombine.low %v306_v49, %v307_v50  ;;  %v337_v21 = vcombine.low %v308_v51, %v309_v54  ;;  %v383_v0 = vcombine.low %v310_v55, %v311_v56 }
  0x35   : > { %v317_v27 = vmul.f32 0.25, %v300_v60  ;;  %v344_v31 = vrot.slane %v334_v62, %v870_v8  ;;  %v384_v32 = vcombine.low %v312_v57, %v313_v58  ;;  %v385_v1 = vcombine.low %v314_v59, %v315_v61 }
  0x36   : > { %v351_v39 = vrot.slane %v335_v63, %v870_v8  ;;  %v358_v4 = vrot.slane %v336_v3, %v870_v8  ;;  %v365_v15 = vrot.slane %v337_v21, %v870_v8  ;;  %v393_v24 = vrot.slane %v383_v0, %v870_v8 }
  0x37   : > { %v386_v25 = vcombine.low %v316_v2, %v317_v27  ;;  %v400_v26 = vrot.slane %v384_v32, %v870_v8  ;;  %v407_v28 = vrot.slane %v385_v1, %v870_v8  ;;  %v437_v29 = vsel %vm188_vm0, %v864_v5, -inf }
  0x38   : > { %v366_v30 = vcombine.low %v344_v31, %v351_v39  ;;  %v367_v33 = vcombine.low %v358_v4, %v365_v15  ;;  %v438_v34 = vrot.slane %v437_v29, 4  ;;  %v444_v35 = vsel %vm188_vm0, %v880_v12, -inf }
  0x39   : > { %v414_v36 = vrot.slane %v386_v25, %v870_v8  ;;  %v415_v37 = vcombine.low %v393_v24, %v400_v26  ;;  %v445_v38 = vrot.slane %v444_v35, 4  ;;  %v451_v40 = vsel %vm188_vm0, %v866_v6, -inf }
  0x3a   : > { %v374_v41 = vrot.slane %v366_v30, %v870_v8  ;;  %v381_v42 = vrot.slane %v367_v33, %v870_v8  ;;  %v439_v43 = vmax.f32 %v437_v29, %v438_v34  ;;  %v452_v5 = vrot.slane %v451_v40, 4 }
  0x3b   : > { %v416_v12 = vcombine.low %v407_v28, %v414_v36  ;;  %v423_v44 = vrot.slane %v415_v37, %v870_v8  ;;  %v446_v45 = vmax.f32 %v444_v35, %v445_v38  ;;  %v458_v46 = vsel %vm188_vm0, %v884_v13, -inf }
  0x3c   : > { %v382_v6 = vcombine.low %v374_v41, %v381_v42  ;;  %v440_v47 = vrot.slane %v439_v43, 2  ;;  %v453_v48 = vmax.f32 %v451_v40, %v452_v5  ;;  %v459_v49 = vrot.slane %v458_v46, 4 }
  0x3d   : > { %v430_v50 = vrot.slane %v416_v12, %v870_v8  ;;  %v447_v51 = vrot.slane %v446_v45, 2  ;;  %v465_v52 = vsel %vm188_vm0, %v868_v7, -inf  ;;  %v472_v53 = vsel %vm188_vm0, %v888_v14, -inf }
  0x3e   : > { %434 = vst [vmem:[%s972_s17] ss:$2 sm:$0xff] %v382_v6  ;;  %v441_v54 = vmax.f32 %v439_v43, %v440_v47  ;;  %v454_v55 = vrot.slane %v453_v48, 2  ;;  %v460_v56 = vmax.f32 %v458_v46, %v459_v49  ;;  %v466_v57 = vrot.slane %v465_v52, 4 }
  0x3f   : > { %v431_v13 = vcombine.low %v423_v44, %v430_v50  ;;  %v448_v58 = vmax.f32 %v446_v45, %v447_v51  ;;  %v473_v59 = vrot.slane %v472_v53, 4  ;;  %v479_v60 = vsel %vm188_vm0, %v872_v9, -inf }
  0x40   : > { %v442_v61 = vrot.slane %v441_v54, 1  ;;  %v455_v2 = vmax.f32 %v453_v48, %v454_v55  ;;  %v461_v62 = vrot.slane %v460_v56, 2  ;;  %v467_v63 = vmax.f32 %v465_v52, %v466_v57 }
  0x41   : > { %765 = vst [vmem:[%s972_s17 + $0x10] ss:$2 sm:$0xff] %v431_v13  ;;  %v449_v7 = vrot.slane %v448_v58, 1  ;;  %v474_v3 = vmax.f32 %v472_v53, %v473_v59  ;;  %v480_v21 = vrot.slane %v479_v60, 4  ;;  %v486_v14 = vsel %vm188_vm0, %v898_v18, -inf }
  0x42   : > { %v988_v0 = vmax.f32 %v441_v54, %v442_v61  ;;  %v456_v27 = vrot.slane %v455_v2, 1  ;;  %v462_v31 = vmax.f32 %v460_v56, %v461_v62  ;;  %v468_v32 = vrot.slane %v467_v63, 2 }
  0x43   : > { %v990_v1 = vmax.f32 %v448_v58, %v449_v7  ;;  %v475_v39 = vrot.slane %v474_v3, 2  ;;  %v481_v9 = vmax.f32 %v479_v60, %v480_v21  ;;  %v487_v4 = vrot.slane %v486_v14, 4 }
  0x44   : > { %v992_v15 = vmax.f32 %v455_v2, %v456_v27  ;;  %v463_v24 = vrot.slane %v462_v31, 1  ;;  %v469_v25 = vmax.f32 %v467_v63, %v468_v32  ;;  %v493_v26 = vsel %vm188_vm0, %v874_v10, -inf }
  0x45   : > { %v476_v28 = vmax.f32 %v474_v3, %v475_v39  ;;  %v482_v29 = vrot.slane %v481_v9, 2  ;;  %v488_v18 = vmax.f32 %v486_v14, %v487_v4  ;;  %v494_v30 = vrot.slane %v493_v26, 4 }
  0x46   : > { %v996_v33 = vmax.f32 %v462_v31, %v463_v24  ;;  %v470_v34 = vrot.slane %v469_v25, 1  ;;  %v500_v35 = vsel %vm188_vm0, %v902_v19, -inf  ;;  %v507_v36 = vsel %vm188_vm0, %v876_v11, -inf }
  0x47   : > { %v477_v37 = vrot.slane %v476_v28, 1  ;;  %v483_v38 = vmax.f32 %v481_v9, %v482_v29  ;;  %v489_v40 = vrot.slane %v488_v18, 2  ;;  %v495_v41 = vmax.f32 %v493_v26, %v494_v30 }
  0x48   : > { %v471_v42 = vmax.f32 %v469_v25, %v470_v34  ;;  %v501_v43 = vrot.slane %v500_v35, 4  ;;  %v508_v10 = vrot.slane %v507_v36, 4  ;;  %v514_v5 = vsel %vm188_vm0, %v906_v20, -inf }
  0x49   : > { %v478_v12 = vmax.f32 %v476_v28, %v477_v37  ;;  %v484_v44 = vrot.slane %v483_v38, 1  ;;  %v490_v45 = vmax.f32 %v488_v18, %v489_v40  ;;  %v496_v46 = vrot.slane %v495_v41, 2 }
  0x4a   : > { %v502_v6 = vmax.f32 %v500_v35, %v501_v43  ;;  %v509_v47 = vmax.f32 %v507_v36, %v508_v10  ;;  %v515_v19 = vrot.slane %v514_v5, 4  ;;  %v521_v11 = vsel %vm188_vm0, %v892_v16, -inf }
  0x4b   : > { %v485_v48 = vmax.f32 %v483_v38, %v484_v44  ;;  %v491_v49 = vrot.slane %v490_v45, 1  ;;  %v497_v50 = vmax.f32 %v495_v41, %v496_v46  ;;  %v522_v51 = vrot.slane %v521_v11, 4 }
  0x4c   : > { %v503_v52 = vrot.slane %v502_v6, 2  ;;  %v510_v53 = vrot.slane %v509_v47, 2  ;;  %v516_v54 = vmax.f32 %v514_v5, %v515_v19  ;;  %v528_v20 = vsel %vm188_vm0, %v910_v22, -inf }
  0x4d   : > { %v492_v55 = vmax.f32 %v490_v45, %v491_v49  ;;  %v498_v56 = vrot.slane %v497_v50, 1  ;;  %v523_v57 = vmax.f32 %v521_v11, %v522_v51  ;;  %v529_v13 = vrot.slane %v528_v20, 4 }
  0x4e   : > { %v504_v58 = vmax.f32 %v502_v6, %v503_v52  ;;  %v511_v59 = vmax.f32 %v509_v47, %v510_v53  ;;  %v517_v60 = vrot.slane %v516_v54, 2  ;;  %v535_v16 = vsel %vm188_vm0, %v894_v17, -inf }
  0x4f   : > { %v499_v61 = vmax.f32 %v497_v50, %v498_v56  ;;  %v524_v2 = vrot.slane %v523_v57, 2  ;;  %v530_v62 = vmax.f32 %v528_v20, %v529_v13  ;;  %v536_v63 = vrot.slane %v535_v16, 4 }
  0x50   : > { %v505_v7 = vrot.slane %v504_v58, 1  ;;  %v512_v3 = vrot.slane %v511_v59, 1  ;;  %v518_v21 = vmax.f32 %v516_v54, %v517_v60  ;;  %v542_v22 = vsel %vm188_vm0, %v914_v23, -inf }
  0x51   : > { %v525_v14 = vmax.f32 %v523_v57, %v524_v2  ;;  %v531_v27 = vrot.slane %v530_v62, 2  ;;  %v537_v31 = vmax.f32 %v535_v16, %v536_v63  ;;  %v543_v32 = vrot.slane %v542_v22, 4 }
  0x52   : > { %v506_v39 = vmax.f32 %v504_v58, %v505_v7  ;;  %v513_v9 = vmax.f32 %v511_v59, %v512_v3  ;;  %v519_v4 = vrot.slane %v518_v21, 1  ;;  %v565_v17 = vcombine.low %v988_v0, %v990_v1 }
  0x53   : > { %v526_v24 = vrot.slane %v525_v14, 1  ;;  %v532_v25 = vmax.f32 %v530_v62, %v531_v27  ;;  %v538_v26 = vrot.slane %v537_v31, 2  ;;  %v544_v28 = vmax.f32 %v542_v22, %v543_v32 }
  0x54   : > { %v520_v29 = vmax.f32 %v518_v21, %v519_v4  ;;  %v566_v18 = vcombine.low %v992_v15, %v996_v33  ;;  %v567_v30 = vcombine.low %v471_v42, %v478_v12  ;;  %v568_v23 = vcombine.low %v485_v48, %v492_v55 }
  0x55   : > { %v527_v34 = vmax.f32 %v525_v14, %v526_v24  ;;  %v533_v35 = vrot.slane %v532_v25, 1  ;;  %v539_v36 = vmax.f32 %v537_v31, %v538_v26  ;;  %v545_v37 = vrot.slane %v544_v28, 2 }
  0x56   : > { %v575_v38 = vrot.slane %v565_v17, %v870_v8  ;;  %v582_v40 = vrot.slane %v566_v18, %v870_v8  ;;  %v589_v0 = vrot.slane %v567_v30, %v870_v8  ;;  %v596_v1 = vrot.slane %v568_v23, %v870_v8 }
  0x57   : > { %v534_v41 = vmax.f32 %v532_v25, %v533_v35  ;;  %v540_v43 = vrot.slane %v539_v36, 1  ;;  %v546_v10 = vmax.f32 %v544_v28, %v545_v37  ;;  %v614_v5 = vcombine.low %v499_v61, %v506_v39 }
  0x58   : > { %v597_v15 = vcombine.low %v575_v38, %v582_v40  ;;  %v598_v33 = vcombine.low %v589_v0, %v596_v1  ;;  %v615_v42 = vcombine.low %v513_v9, %v520_v29 }
  0x59   : > { %v541_v12 = vmax.f32 %v539_v36, %v540_v43  ;;  %v547_v44 = vrot.slane %v546_v10, 1  ;;  %v616_v45 = vcombine.low %v527_v34, %v534_v41  ;;  %v624_v46 = vrot.slane %v614_v5, %v870_v8 }
  0x5a   : > { %v605_v6 = vrot.slane %v597_v15, %v870_v8  ;;  %v612_v47 = vrot.slane %v598_v33, %v870_v8  ;;  %v631_v19 = vrot.slane %v615_v42, %v870_v8 }
  0x5b   : > { %v548_v11 = vmax.f32 %v546_v10, %v547_v44  ;;  %v638_v50 = vrot.slane %v616_v45, %v870_v8 }
  0x5c   : > { %v613_v48 = vcombine.low %v605_v6, %v612_v47  ;;  %v646_v51 = vcombine.low %v624_v46, %v631_v19 }
  0x5d   : > { %v617_v49 = vcombine.low %v541_v12, %v548_v11 }
  0x5e   : > { %766 = vst [vmem:[%s972_s17 + $0x1] ss:$2 sm:$0xff] %v613_v48  ;;  %v654_v54 = vrot.slane %v646_v51, %v870_v8 }
  0x5f   : > { %v645_v52 = vrot.slane %v617_v49, %v870_v8 }
  0x61   : > { %v647_v53 = vcombine.low %v638_v50, %v645_v52 }
  0x63   : > { %v661_v20 = vrot.slane %v647_v53, %v870_v8 }
  0x65   : > { %v662_v55 = vcombine.low %v654_v54, %v661_v20 }
  0x67   : > { %767 = vst [vmem:[%s972_s17 + $0x11] ss:$2 sm:$0xff] %v662_v55 }
  0x68 PF: > { %s11_s8 = sadd.s32 1, %s827_s8   ;;  %s1041_s6 = smov %s823_s7 }
  0x69   : > { %p8_p5 = scmp.ge.s32.totalorder %s11_s8, 4   ;;  %s1042_s7 = smov %s1044_s9 }
  0x6b   :  { %10 = sbr.rel (!%p8_p5) target bundleno = 2 (0x2), region = 57 }

// kernel: spatial_attention_forward.5
= control target key start
LH: loop header
LB: loop body
LE: loop exit
PB: predicated region body
PF: predicated region fallthrough
CT: control target
= control target key end

     0   :  { %s503_s9 = smov 0   ;;  %s505_s10 = smov 0   ;;  %s567_s0 = inlined_call_operand.vmem [shape: f32[2,4,2048], index: 0, kind: input, shape index: {}]   ;;  %s568_s1 = inlined_call_operand.vmem [shape: f32[2,1,2048], index: 1, kind: input, shape index: {}]   ;;  %s569_s2 = inlined_call_operand.vmem [shape: f32[2,4,2048], index: 2, kind: output, shape index: {}]  }
   0x1   :  { %s507_s11 = smov 0  }
   0x2 LB: > { %s24_s12 = sadd.s32 1, %s482_s10  ;;  %p430_p0 = scmp.ge.s32.totalorder %s486_s11, 1  ;;  %s486_s11 = sphi %s507_s11, %s12_s11   ;;  %s482_s10 = sphi %s505_s10, %s571_s10   ;;  %s478_s9 = sphi %s503_s9, %s570_s9  }
   0x3   : > { %p26_p1 = scmp.ge.s32.totalorder %s24_s12, 2  ;;  %p149_p2 = scmp.lt.s32.totalorder %s486_s11, 3 }
   0x5   : > { %s573_s12 = smov (%p26_p1, %s24_s12), 0  ;;  %p150_p3 = pnand %p430_p0, %p149_p2 }
   0x6   : > { %p188_p4 = scmp.lt.s32.totalorder (!%p150_p3), %s478_s9, 1  ;;  %v228_v0 = vlaneseq (!%p150_p3) }
   0x7   : > { %153 = sbr.rel (%p150_p3) target bundleno = 31 (0x1f), region = 28 }
   0x8   : > { %v229_v1 = vshrl.u32 (!%p150_p3), %v228_v0, 7 }
   0xa   : > { %v230_v2 = vsub.s32 (!%p150_p3), 0, %v229_v1  ;;  %v234_v3 = vsub.s32 (!%p150_p3), 1, %v229_v1  ;;  %v238_v4 = vsub.s32 (!%p150_p3), 2, %v229_v1  ;;  %v242_v5 = vsub.s32 (!%p150_p3), 3, %v229_v1 }
   0xb   : > { %v246_v6 = vsub.s32 (!%p150_p3), 4, %v229_v1  ;;  %v250_v7 = vsub.s32 (!%p150_p3), 5, %v229_v1  ;;  %v254_v8 = vsub.s32 (!%p150_p3), 6, %v229_v1  ;;  %v258_v9 = vsub.s32 (!%p150_p3), 7, %v229_v1 }
   0xe   : > { %s575_s9 = smov (!%p188_p4, %s478_s9), 1 }
   0xf   : > { %s438_s13 = sshll.u32 %s575_s9, 6  ;;  %s433_s14 = sshll.u32 %s575_s9, 4 }
  0x10   : > { %s530_s17 = scalar_lea.vmem %s567_s0, %s438_s13  ;;  %s204_s20 = scalar_lea.vmem %s568_s1, %s433_s14 }
  0x11   : > { %v224_v10 = vld [vmem:[%s204_s20] sm:$0xff]  ;;  %v217_v16 = vld [vmem:[%s530_s17 + $0x8] sm:$0xff]  ;;  %v218_v24 = vld [vmem:[%s530_s17 + $0x10] sm:$0xff]  ;;  %s544_s23 = scalar_lea.vmem %s569_s2, %s438_s13 }
  0x12   : > { %v231_v11 = vrot.slane %v224_v10, %v230_v2  ;;  %v235_v12 = vrot.slane %v224_v10, %v234_v3  ;;  %v239_v13 = vrot.slane %v224_v10, %v238_v4  ;;  %v243_v14 = vrot.slane %v224_v10, %v242_v5  ;;  %v216_v15 = vld [vmem:[%s530_s17] sm:$0xff]  ;;  %v225_v21 = vld [vmem:[%s204_s20 + $0x8] sm:$0xff]  ;;  %v219_v25 = vld [vmem:[%s530_s17 + $0x18] sm:$0xff] }
  0x13   : > { %v247_v17 = vrot.slane %v224_v10, %v246_v6  ;;  %v251_v18 = vrot.slane %v224_v10, %v250_v7  ;;  %v255_v19 = vrot.slane %v224_v10, %v254_v8  ;;  %v259_v20 = vrot.slane %v224_v10, %v258_v9  ;;  %v220_v30 = vld [vmem:[%s530_s17 + $0x20] sm:$0xff]  ;;  %v221_v36 = vld [vmem:[%s530_s17 + $0x28] sm:$0xff]  ;;  %v222_v43 = vld [vmem:[%s530_s17 + $0x30] sm:$0xff] }
  0x14   : > { %v292_v22 = vcombine.low %v231_v11, %v235_v12  ;;  %v293_v23 = vcombine.low %v239_v13, %v243_v14  ;;  %v263_v26 = vrot.slane %v225_v21, %v230_v2  ;;  %v267_v27 = vrot.slane %v225_v21, %v234_v3  ;;  %v223_v48 = vld [vmem:[%s530_s17 + $0x38] sm:$0xff] }
  0x15   : > { %v294_v28 = vcombine.low %v247_v17, %v251_v18  ;;  %v295_v29 = vcombine.low %v255_v19, %v259_v20  ;;  %v271_v31 = vrot.slane %v225_v21, %v238_v4  ;;  %v275_v32 = vrot.slane %v225_v21, %v242_v5 }
  0x16   : > { %v308_v33 = vmul.f32 %v292_v22, %v216_v15  ;;  %v309_v34 = vmul.f32 %v293_v23, %v217_v16  ;;  %v296_v35 = vcombine.low %v263_v26, %v267_v27  ;;  %v279_v37 = vrot.slane %v225_v21, %v246_v6 }
  0x17   : > { %v310_v38 = vmul.f32 %v294_v28, %v218_v24  ;;  %v311_v39 = vmul.f32 %v295_v29, %v219_v25  ;;  %v297_v40 = vcombine.low %v271_v31, %v275_v32  ;;  %v283_v41 = vrot.slane %v225_v21, %v250_v7 }
  0x18   : > { %316 = vst [vmem:[%s544_s23] sm:$0xff] %v308_v33  ;;  %317 = vst [vmem:[%s544_s23 + $0x8] sm:$0xff] %v309_v34  ;;  %v312_v42 = vmul.f32 %v296_v35, %v220_v30  ;;  %v287_v44 = vrot.slane %v225_v21, %v254_v8  ;;  %v291_v45 = vrot.slane %v225_v21, %v258_v9 }
  0x19   : > { %318 = vst [vmem:[%s544_s23 + $0x10] sm:$0xff] %v310_v38  ;;  %319 = vst [vmem:[%s544_s23 + $0x18] sm:$0xff] %v311_v39  ;;  %v313_v46 = vmul.f32 %v297_v40, %v221_v36  ;;  %v298_v47 = vcombine.low %v279_v37, %v283_v41 }
  0x1a   : > { %320 = vst [vmem:[%s544_s23 + $0x20] sm:$0xff] %v312_v42  ;;  %v299_v49 = vcombine.low %v287_v44, %v291_v45 }
  0x1b   : > { %321 = vst [vmem:[%s544_s23 + $0x28] sm:$0xff] %v313_v46  ;;  %v314_v50 = vmul.f32 %v298_v47, %v222_v43 }
  0x1c   : > { %v315_v51 = vmul.f32 %v299_v49, %v223_v48 }
  0x1d   : > { %322 = vst [vmem:[%s544_s23 + $0x30] sm:$0xff] %v314_v50 }
  0x1e   : > { %323 = vst [vmem:[%s544_s23 + $0x38] sm:$0xff] %v315_v51 }
  0x1f PF: > { %s12_s11 = sadd.s32 1, %s486_s11   ;;  %s570_s9 = smov %s482_s10 }
  0x20   : > { %p9_p5 = scmp.ge.s32.totalorder %s12_s11, 4   ;;  %s571_s10 = smov %s573_s12 }
  0x22   :  { %11 = sbr.rel (!%p9_p5) target bundleno = 2 (0x2), region = 61 }

// kernel: spatial_attention_forward.4
= control target key start
LH: loop header
LB: loop body
LE: loop exit
PB: predicated region body
PF: predicated region fallthrough
CT: control target
= control target key end

     0   :  { %7 = vsyncpa [#allocation3], 0  ;;  %s7356_s9 = smov 0   ;;  %s15358_s0 = inlined_call_operand.vmem [shape: f32[2,2,10,18,18], index: 0, kind: input, shape index: {}]   ;;  %s15359_s1 = inlined_call_operand.vmem [shape: f32[55], index: 1, kind: input, shape index: {}]   ;;  %s15360_s2 = inlined_call_operand.vmem [shape: f32[2,8,16,16], index: 2, kind: output, shape index: {}]  }
   0x1 LB: > { %s6958_s10 = sadd.s32 4294967295, %s7336_s9   ;;  %p6960_p0 = scmp.ge.s32.totalorder %s7336_s9, 1  ;;  %s7336_s9 = sphi %s7356_s9, %s13_s9  }
   0x2   : > { %p91_p1 = scmp.lt.s32.totalorder %s7336_s9, 3  ;;  %s104_s13 = sshll.u32 %s15359_s1, 4  ;;  %s105_s13 = int_to_ptr.vmem [resolvable:$true] %s104_s13 }
   0x3   : > { %p7034_p3 = scmp.eq.s32.totalorder %s6958_s10, 0  ;;  %s7311_s15 = scalar_lea.vmem %s105_s13, 16 }
   0x4   : > { %p7367_p2 = pnand %p6960_p0, %p91_p1  ;;  %p7312_p6 = scmp.ne.s32.totalorder %s105_s13, %s7311_s15 }
   0x5   : > { %p7319_p10 = scmp.lt.s32.totalorder %s105_s13, %s105_s13  ;;  %p7320_p11 = scmp.lt.s32.totalorder %s7311_s15, %s7311_s15 }
   0x6   : > { %p7030_p4 = pneg %p7367_p2 }
   0x7   : > { %p7321_p12 = por %p7320_p11, %p7319_p10 }
   0x8   : > { %p7031_p5 = pnand %p7034_p3, %p7030_p4 }
   0xa   : > { %p7313_p7 = pneg %p7031_p5 }
   0xc   : > { %p7314_p8 = pnand %p7313_p7, %p7312_p6 }
   0xe   : > { %p7315_p9 = pneg %p7314_p8 }
  0x10   : > { %p7322_p13 = pnand %p7321_p12, %p7315_p9 }
  0x12   : > { %7325 = shalt.err (!%p7322_p13)
}
  0x13   : > { %s7338_s16 = smov [#allocation2]   ;;  %125 = sbr.rel (%p7367_p2) target bundleno = 1345 (0x541), region = 28 }
  0x14   : > { %7033 = dma.vmem_to_smem (!%p7031_p5), %s105_s13, 16, %s7338_s16, [#allocation3]  }
  0x1a   : > { %7331 = dma.done.wait (%p7034_p3), [#allocation3], 16  }
  0x1b   : > { %7333 = vsyncadd (%p7034_p3), [#allocation3], 4294967280 }
  0x1c   : > { %131 = sfence }
  0x1d   : > { %p148_p0 = scmp.lt.s32.totalorder %s6958_s10, 1  ;;  %s6968_s17 = sld [smem:[#allocation2 + $0x1]]  ;;  %vm498_vm0 = vcmask 1046528   ;;  %vm929_vm1 = vcmask 1045504   ;;  %vm6874_vm2 = vcmask 130048  }
  0x1e   : > { %s7339_s22 = smov 127   ;;  %s6969_s23 = sld [smem:[#allocation2 + $0x2]] }
  0x1f   : > { %s17136_s10 = smov (!%p148_p0, %s6958_s10), 1  ;;  %s7340_s24 = smov 126  }
  0x20   : > { %s7025_s18 = smul.u32 480, %s17136_s10  ;;  %s6971_s25 = sld [smem:[#allocation2 + $0x4]] }
  0x21   : > { %s6972_s26 = sld [smem:[#allocation2 + $0x5]]  ;;  %s6974_s27 = sld [smem:[#allocation2 + $0x7]] }
  0x22   : > { %s7384_s21 = scalar_lea.vmem %s15358_s0, %s7025_s18  ;;  %s6975_s28 = sld [smem:[#allocation2 + $0x8]] }
  0x23   : > { %v253_v0 = vstv %s6968_s17  ;;  %v7387_v1 = vld [vmem:[%s7384_s21 + $0x18] sm:$0xff]  ;;  %v7390_v2 = vld [vmem:[%s7384_s21] sm:$0xff]  ;;  %v7398_v6 = vld [vmem:[%s7384_s21 + $0x8] sm:$0xff]  ;;  %s6977_s29 = sld [smem:[#allocation2 + $0xa]]  ;;  %s6978_s30 = sld [smem:[#allocation2 + $0xb]] }
  0x24   : > { %v7393_v3 = vld [vmem:[%s7384_s21 + $0x20] sm:$0xff]  ;;  %v256_v4 = vmul.f32 %v253_v0, %v7387_v1  ;;  %v254_v5 = vmul.f32 %v253_v0, %v7390_v2  ;;  %v255_v8 = vmul.f32 %v253_v0, %v7398_v6  ;;  %v7405_v9 = vld [vmem:[%s7384_s21 + $0x38] sm:$0xff]  ;;  %v7408_v10 = vld [vmem:[%s7384_s21 + $0x30] sm:$0xff]  ;;  %v351_v33 = vstv %s6969_s23  ;;  %s6980_s3 = sld [smem:[#allocation2 + $0xd]]  ;;  %s6981_s4 = sld [smem:[#allocation2 + $0xe]] }
  0x25   : > { %v257_v7 = vmul.f32 %v253_v0, %v7393_v3  ;;  %v259_v11 = vmul.f32 %v253_v0, %v7405_v9  ;;  %v258_v12 = vmul.f32 %v253_v0, %v7408_v10  ;;  %v7415_v13 = vld [vmem:[%s7384_s21 + $0x50] sm:$0xff]  ;;  %v7418_v14 = vld [vmem:[%s7384_s21 + $0x48] sm:$0xff]  ;;  %v7428_v18 = vld [vmem:[%s7384_s21 + $0x60] sm:$0xff]  ;;  %v353_v34 = vmul.f32 %v351_v33, %v7398_v6  ;;  %s6983_s5 = sld [smem:[#allocation2 + $0x10]]  ;;  %s6984_s6 = sld [smem:[#allocation2 + $0x11]] }
  0x26   : > { %290 = vrot.lane.b32.xlu1 %v256_v4, %s7339_s22  ;;  %286 = vrot.lane.b32.xlu0 %v254_v5, %s7339_s22  ;;  %v261_v15 = vmul.f32 %v253_v0, %v7415_v13  ;;  %v260_v16 = vmul.f32 %v253_v0, %v7418_v14  ;;  %v7425_v17 = vld [vmem:[%s7384_s21 + $0x68] sm:$0xff]  ;;  %v262_v20 = vmul.f32 %v253_v0, %v7428_v18  ;;  %v7435_v21 = vld [vmem:[%s7384_s21 + $0x80] sm:$0xff]  ;;  %s6986_s7 = sld [smem:[#allocation2 + $0x13]]  ;;  %s6987_s8 = sld [smem:[#allocation2 + $0x14]] }
  0x27   : > { %v263_v19 = vmul.f32 %v253_v0, %v7425_v17  ;;  %v7438_v22 = vld [vmem:[%s7384_s21 + $0x78] sm:$0xff]  ;;  %v265_v23 = vmul.f32 %v253_v0, %v7435_v21  ;;  %v7448_v26 = vld [vmem:[%s7384_s21 + $0x90] sm:$0xff]  ;;  %v7458_v30 = vld [vmem:[%s7384_s21 + $0xa8] sm:$0xff]  ;;  %v352_v35 = vmul.f32 %v351_v33, %v7390_v2  ;;  %v355_v36 = vmul.f32 %v351_v33, %v7393_v3  ;;  %s6989_s11 = sld [smem:[#allocation2 + $0x16]]  ;;  %s6990_s12 = sld [smem:[#allocation2 + $0x17]] }
  0x28   : > { %v264_v24 = vmul.f32 %v253_v0, %v7438_v22  ;;  %v7445_v25 = vld [vmem:[%s7384_s21 + $0x98] sm:$0xff]  ;;  %v266_v28 = vmul.f32 %v253_v0, %v7448_v26  ;;  %v7455_v29 = vld [vmem:[%s7384_s21 + $0xb0] sm:$0xff]  ;;  %v268_v32 = vmul.f32 %v253_v0, %v7458_v30  ;;  %v354_v37 = vmul.f32 %v351_v33, %v7387_v1  ;;  %v7504_v53 = vld [vmem:[%s7384_s21 + $0x28] sm:$0x3]  ;;  %s8817_s13 = sld [smem:[#allocation2]]  ;;  %s8851_s14 = sld [smem:[#allocation2 + $0x3]] }
  0x29   : > { %v267_v27 = vmul.f32 %v253_v0, %v7445_v25  ;;  %v269_v31 = vmul.f32 %v253_v0, %v7455_v29  ;;  %v357_v38 = vmul.f32 %v351_v33, %v7405_v9  ;;  %v356_v39 = vmul.f32 %v351_v33, %v7408_v10  ;;  %v7489_v46 = vld [vmem:[%s7384_s21 + $0x10] sm:$0x3]  ;;  %v7517_v62 = vld [vmem:[%s7384_s21 + $0x40] sm:$0x3]  ;;  %s9061_s15 = sld [smem:[#allocation2 + $0x19]]  ;;  %s9191_s16 = sld [smem:[#allocation2 + $0x6]] }
  0x2a   : > { %292 = vrot.lane.b32.xlu1 %v257_v7, %s7339_s22  ;;  %288 = vrot.lane.b32.xlu0 %v255_v8, %s7339_s22  ;;  %v359_v40 = vmul.f32 %v351_v33, %v7415_v13  ;;  %v358_v41 = vmul.f32 %v351_v33, %v7418_v14  ;;  %v361_v42 = vmul.f32 %v351_v33, %v7425_v17  ;;  %v7491_v47 = vstv %s6971_s25  ;;  %s9292_s17 = sld [smem:[#allocation2 + $0x1a]]  ;;  %s9504_s18 = sld [smem:[#allocation2 + $0x9]] }
  0x2b   : > { %v360_v43 = vmul.f32 %v351_v33, %v7428_v18  ;;  %v363_v44 = vmul.f32 %v351_v33, %v7435_v21  ;;  %v362_v45 = vmul.f32 %v351_v33, %v7438_v22  ;;  %v365_v48 = vmul.f32 %v351_v33, %v7445_v25  ;;  %s9593_s19 = sld [smem:[#allocation2 + $0x1c]]  ;;  %s9965_s23 = sld [smem:[#allocation2 + $0x1d]] }
  0x2c   : > { %v364_v49 = vmul.f32 %v351_v33, %v7448_v26  ;;  %v574_v50 = vmul.f32 %v7491_v47, %v7398_v6  ;;  %v575_v51 = vmul.f32 %v7491_v47, %v7489_v46  ;;  %v573_v52 = vmul.f32 %v7491_v47, %v7390_v2  ;;  %s9686_s20 = sld [smem:[#allocation2 + $0xc]]  ;;  %s10069_s25 = sld [smem:[#allocation2 + $0xf]] }
  0x2d   : > { %v367_v54 = vmul.f32 %v351_v33, %v7455_v29  ;;  %v366_v55 = vmul.f32 %v351_v33, %v7458_v30  ;;  %v577_v56 = vmul.f32 %v7491_v47, %v7393_v3  ;;  %v578_v57 = vmul.f32 %v7491_v47, %v7504_v53 }
  0x2e   : > { %296 = vrot.lane.b32.xlu1 %v259_v11, %s7339_s22  ;;  %294 = vrot.lane.b32.xlu0 %v258_v12, %s7339_s22  ;;  %v622_v58 = vrot.slane %v574_v50, 1  ;;  %v624_v59 = vrot.slane %v575_v51, 1  ;;  %v621_v60 = vrot.slane %v573_v52, 1  ;;  %v576_v61 = vmul.f32 %v7491_v47, %v7387_v1  ;;  %v7569_v52 = vld [vmem:[%s7384_s21 + $0xa0] sm:$0x3] }
  0x2f   : > { %v627_v63 = vrot.slane %v577_v56, 1  ;;  %v629_v0 = vrot.slane %v578_v57, 1  ;;  %v580_v4 = vmul.f32 %v7491_v47, %v7405_v9  ;;  %v581_v5 = vmul.f32 %v7491_v47, %v7517_v62 }
  0x30   : > { %v625_v7 = vsel %vm498_vm0, %v622_v58, %v624_v59  ;;  %v623_v8 = vsel %vm498_vm0, %v621_v60, %v622_v58  ;;  %v626_v11 = vrot.slane %v576_v61, 1  ;;  %v579_v12 = vmul.f32 %v7491_v47, %v7408_v10 }
  0x31   : > { %v588_v51 = vmul.f32 %v7491_v47, %v7438_v22  ;;  %v592_v57 = vmul.f32 %v7491_v47, %v7445_v25  ;;  %v593_v60 = vmul.f32 %v7491_v47, %v7569_v52  ;;  %v591_v61 = vmul.f32 %v7491_v47, %v7448_v26 }
  0x32   : > { %300 = vrot.lane.b32.xlu1 %v261_v15, %s7339_s22  ;;  %298 = vrot.lane.b32.xlu0 %v260_v16, %s7339_s22  ;;  %v7530_v15 = vld [vmem:[%s7384_s21 + $0x58] sm:$0x3]  ;;  %v630_v16 = vsel %vm498_vm0, %v627_v63, %v629_v0  ;;  %v595_v0 = vmul.f32 %v7491_v47, %v7455_v29 }
  0x33   : > { %v646_v59 = vrot.slane %v588_v51, 1 }
  0x36   : > { %304 = vrot.lane.b32.xlu1 %v263_v19, %s7339_s22  ;;  %302 = vrot.lane.b32.xlu0 %v262_v20, %s7339_s22  ;;  %v632_v19 = vrot.slane %v580_v4, 1  ;;  %v634_v20 = vrot.slane %v581_v5, 1  ;;  %v652_v5 = vrot.slane %v592_v57, 1 }
  0x38   : > { %v635_v33 = vsel %vm498_vm0, %v632_v19, %v634_v20  ;;  %v657_v20 = vrot.slane %v595_v0, 1 }
  0x3a   : > { %308 = vrot.lane.b32.xlu1 %v265_v23, %s7339_s22  ;;  %306 = vrot.lane.b32.xlu0 %v264_v24, %s7339_s22  ;;  %v583_v23 = vmul.f32 %v7491_v47, %v7415_v13  ;;  %v628_v24 = vsel %vm498_vm0, %v626_v11, %v627_v63  ;;  %v7582_v63 = vld [vmem:[%s7384_s21 + $0xb8] sm:$0x3] }
  0x3e   : > { %312 = vrot.lane.b32.xlu1 %v267_v27, %s7339_s22  ;;  %310 = vrot.lane.b32.xlu0 %v266_v28, %s7339_s22  ;;  %v631_v27 = vrot.slane %v579_v12, 1  ;;  %v584_v28 = vmul.f32 %v7491_v47, %v7530_v15  ;;  %v654_v12 = vrot.slane %v593_v60, 1 }
  0x42   : > { %316 = vrot.lane.b32.xlu1 %v269_v31, %s7339_s22  ;;  %314 = vrot.lane.b32.xlu0 %v268_v32, %s7339_s22  ;;  %v582_v31 = vmul.f32 %v7491_v47, %v7418_v14  ;;  %v7543_v32 = vld [vmem:[%s7384_s21 + $0x70] sm:$0x3] }
  0x46   : > { %386 = vrot.lane.b32.xlu1 %v353_v34, %s7340_s24  ;;  %384 = vrot.lane.b32.xlu0 %v352_v35, %s7340_s24  ;;  %v637_v34 = vrot.slane %v583_v23, 1  ;;  %v586_v35 = vmul.f32 %v7491_v47, %v7425_v17 }
  0x4a   : > { %390 = vrot.lane.b32.xlu1 %v355_v36, %s7340_s24  ;;  %388 = vrot.lane.b32.xlu0 %v354_v37, %s7340_s24  ;;  %v587_v36 = vmul.f32 %v7491_v47, %v7543_v32  ;;  %v633_v37 = vsel %vm498_vm0, %v631_v27, %v632_v19  ;;  %v7594_v19 = vstv %s6972_s26  ;;  %s10222_s26 = sld [smem:[#allocation2 + $0x1f]] }
  0x4b   : > { %v729_v27 = vmul.f32 %v7594_v19, %v7489_v46  ;;  %v737_v57 = vmul.f32 %v7594_v19, %v7415_v13  ;;  %v736_v0 = vmul.f32 %v7594_v19, %v7418_v14 }
  0x4e   : > { %394 = vrot.lane.b32.xlu1 %v357_v38, %s7340_s24  ;;  %392 = vrot.lane.b32.xlu0 %v356_v39, %s7340_s24  ;;  %v639_v38 = vrot.slane %v584_v28, 1  ;;  %v636_v39 = vrot.slane %v582_v31, 1 }
  0x52   : > { %398 = vrot.lane.b32.xlu1 %v359_v40, %s7340_s24  ;;  %396 = vrot.lane.b32.xlu0 %v358_v41, %s7340_s24  ;;  %v585_v40 = vmul.f32 %v7491_v47, %v7428_v18  ;;  %v7556_v41 = vld [vmem:[%s7384_s21 + $0x88] sm:$0x3] }
  0x54   : > { %v641_v50 = vrot.slane %v585_v40, 1  ;;  %v732_v40 = vmul.f32 %v7594_v19, %v7504_v53 }
  0x56   : > { %402 = vrot.lane.b32.xlu1 %v361_v42, %s7340_s24  ;;  %400 = vrot.lane.b32.xlu0 %v360_v43, %s7340_s24  ;;  %v642_v42 = vrot.slane %v586_v35, 1  ;;  %v644_v43 = vrot.slane %v587_v36, 1  ;;  %v778_v36 = vrot.slane %v729_v27, 1 }
  0x58   : > { %v643_v58 = vsel %vm498_vm0, %v641_v50, %v642_v42  ;;  %v783_v50 = vrot.slane %v732_v40, 1 }
  0x5a   : > { %406 = vrot.lane.b32.xlu1 %v363_v44, %s7340_s24  ;;  %404 = vrot.lane.b32.xlu0 %v362_v45, %s7340_s24  ;;  %v589_v44 = vmul.f32 %v7491_v47, %v7435_v21  ;;  %v590_v45 = vmul.f32 %v7491_v47, %v7556_v41 }
  0x5c   : > { %v649_v56 = vrot.slane %v590_v45, 1  ;;  %v734_v45 = vmul.f32 %v7594_v19, %v7405_v9 }
  0x5e   : > { %410 = vrot.lane.b32.xlu1 %v365_v48, %s7340_s24  ;;  %408 = vrot.lane.b32.xlu0 %v364_v49, %s7340_s24  ;;  %v640_v48 = vsel %vm498_vm0, %v637_v34, %v639_v38  ;;  %v638_v49 = vsel %vm498_vm0, %v636_v39, %v637_v34 }
  0x62   : > { %414 = vrot.lane.b32.xlu1 %v367_v54, %s7340_s24  ;;  %412 = vrot.lane.b32.xlu0 %v366_v55, %s7340_s24  ;;  %v645_v54 = vsel %vm498_vm0, %v642_v42, %v644_v43  ;;  %v647_v55 = vrot.slane %v589_v44, 1  ;;  %v730_v42 = vmul.f32 %v7594_v19, %v7387_v1 }
  0x64   : > { %v650_v4 = vsel %vm498_vm0, %v647_v55, %v649_v56  ;;  %v648_v11 = vsel %vm498_vm0, %v646_v59, %v647_v55  ;;  %v780_v51 = vrot.slane %v730_v42, 1  ;;  %v786_v55 = vrot.slane %v734_v45, 1 }
  0x66   : > { %663 = vrot.lane.b32.xlu1 %v625_v7, %s7339_s22  ;;  %661 = vrot.lane.b32.xlu0 %v623_v8, %s7339_s22  ;;  %v596_v7 = vmul.f32 %v7491_v47, %v7582_v63  ;;  %v594_v8 = vmul.f32 %v7491_v47, %v7458_v30  ;;  %v655_v47 = vsel %vm498_vm0, %v652_v5, %v654_v12 }
  0x68   : > { %v659_v23 = vrot.slane %v596_v7, 1  ;;  %v656_v31 = vrot.slane %v594_v8, 1  ;;  %v791_v7 = vrot.slane %v737_v57, 1 }
  0x6a   : > { %667 = vrot.lane.b32.xlu1 %v630_v16, %s7339_s22  ;;  %665 = vrot.lane.b32.xlu0 %v628_v24, %s7339_s22  ;;  %v651_v16 = vrot.slane %v591_v61, 1  ;;  %v728_v24 = vmul.f32 %v7594_v19, %v7398_v6  ;;  %v660_v34 = vsel %vm498_vm0, %v657_v20, %v659_v23  ;;  %v658_v38 = vsel %vm498_vm0, %v656_v31, %v657_v20 }
  0x6b   : > { %v790_v20 = vrot.slane %v736_v0, 1  ;;  %v743_v31 = vmul.f32 %v7594_v19, %v7435_v21 }
  0x6c   : > { %v653_v28 = vsel %vm498_vm0, %v651_v16, %v652_v5  ;;  %v776_v35 = vrot.slane %v728_v24, 1  ;;  %v741_v5 = vmul.f32 %v7594_v19, %v7543_v32 }
  0x6d   : > { %v801_v40 = vrot.slane %v743_v31, 1 }
  0x6e   : > { %671 = vrot.lane.b32.xlu1 %v635_v33, %s7339_s22  ;;  %669 = vrot.lane.b32.xlu0 %v633_v37, %s7339_s22  ;;  %v727_v33 = vmul.f32 %v7594_v19, %v7390_v2  ;;  %v731_v37 = vmul.f32 %v7594_v19, %v7393_v3  ;;  %v779_v43 = vsel %vm498_vm0, %v776_v35, %v778_v36  ;;  %v798_v24 = vrot.slane %v741_v5, 1 }
  0x6f   : > { %v746_v36 = vmul.f32 %v7594_v19, %v7445_v25 }
  0x70   : > { %v775_v39 = vrot.slane %v727_v33, 1  ;;  %v781_v44 = vrot.slane %v731_v37, 1  ;;  %v744_v33 = vmul.f32 %v7594_v19, %v7556_v41  ;;  %v747_v37 = vmul.f32 %v7594_v19, %v7569_v52 }
  0x71   : > { %v806_v45 = vrot.slane %v746_v36, 1 }
  0x72   : > { %675 = vrot.lane.b32.xlu1 %v640_v48, %s7339_s22  ;;  %673 = vrot.lane.b32.xlu0 %v638_v49, %s7339_s22  ;;  %v735_v48 = vmul.f32 %v7594_v19, %v7517_v62  ;;  %v777_v49 = vsel %vm498_vm0, %v775_v39, %v776_v35  ;;  %v784_v59 = vsel %vm498_vm0, %v781_v44, %v783_v50  ;;  %v803_v42 = vrot.slane %v744_v33, 1 }
  0x73   : > { %v782_v60 = vsel %vm498_vm0, %v780_v51, %v781_v44  ;;  %v7666_v44 = vstv %s6974_s27  ;;  %v749_v50 = vmul.f32 %v7594_v19, %v7455_v29  ;;  %s10536_s27 = sld [smem:[#allocation2 + $0x20]] }
  0x74   : > { %v788_v56 = vrot.slane %v735_v48, 1  ;;  %v808_v48 = vrot.slane %v747_v37, 1  ;;  %v804_v51 = vsel %vm498_vm0, %v801_v40, %v803_v42  ;;  %v1005_v0 = vmul.f32 %v7666_v44, %v7398_v6 }
  0x75   : > { %v1011_v37 = vmul.f32 %v7666_v44, %v7405_v9  ;;  %v1010_v42 = vmul.f32 %v7666_v44, %v7408_v10 }
  0x76   : > { %679 = vrot.lane.b32.xlu1 %v645_v54, %s7339_s22  ;;  %677 = vrot.lane.b32.xlu0 %v643_v58, %s7339_s22  ;;  %v733_v54 = vmul.f32 %v7594_v19, %v7408_v10  ;;  %v738_v58 = vmul.f32 %v7594_v19, %v7530_v15  ;;  %v789_v12 = vsel %vm498_vm0, %v786_v55, %v788_v56 }
  0x77   : > { %v748_v56 = vmul.f32 %v7594_v19, %v7458_v30 }
  0x78   : > { %v785_v61 = vrot.slane %v733_v54, 1  ;;  %v793_v8 = vrot.slane %v738_v58, 1 }
  0x79   : > { %v810_v5 = vrot.slane %v748_v56, 1  ;;  %v1015_v56 = vmul.f32 %v7666_v44, %v7530_v15 }
  0x7a   : > { %683 = vrot.lane.b32.xlu1 %v650_v4, %s7339_s22  ;;  %681 = vrot.lane.b32.xlu0 %v648_v11, %s7339_s22  ;;  %v740_v4 = vmul.f32 %v7594_v19, %v7425_v17  ;;  %v739_v11 = vmul.f32 %v7594_v19, %v7428_v18  ;;  %v787_v16 = vsel %vm498_vm0, %v785_v61, %v786_v55  ;;  %v811_v61 = vrot.slane %v749_v50, 1 }
  0x7b   : > { %v794_v27 = vsel %vm498_vm0, %v791_v7, %v793_v8  ;;  %v750_v55 = vmul.f32 %v7594_v19, %v7582_v63  ;;  %v1063_v50 = vrot.slane %v1011_v37, 2 }
  0x7c   : > { %v796_v23 = vrot.slane %v740_v4, 1 }
  0x7d   : > { %v813_v4 = vrot.slane %v750_v55, 1  ;;  %v1062_v55 = vrot.slane %v1010_v42, 2 }
  0x7e   : > { %687 = vrot.lane.b32.xlu1 %v655_v47, %s7339_s22  ;;  %685 = vrot.lane.b32.xlu0 %v653_v28, %s7339_s22  ;;  %v795_v47 = vrot.slane %v739_v11, 1  ;;  %v792_v28 = vsel %vm498_vm0, %v790_v20, %v791_v7  ;;  %v799_v35 = vsel %vm498_vm0, %v796_v23, %v798_v24  ;;  %v1004_v7 = vmul.f32 %v7666_v44, %v7390_v2 }
  0x7f   : > { %v1009_v20 = vmul.f32 %v7666_v44, %v7504_v53  ;;  %v814_v24 = vsel %vm498_vm0, %v811_v61, %v813_v4  ;;  %v1017_v4 = vmul.f32 %v7666_v44, %v7425_v17 }
  0x80   : > { %v797_v39 = vsel %vm498_vm0, %v795_v47, %v796_v23  ;;  %v1007_v23 = vmul.f32 %v7666_v44, %v7387_v1 }
  0x82   : > { %691 = vrot.lane.b32.xlu1 %v660_v34, %s7339_s22  ;;  %689 = vrot.lane.b32.xlu0 %v658_v38, %s7339_s22  ;;  %v742_v34 = vmul.f32 %v7594_v19, %v7438_v22  ;;  %v745_v38 = vmul.f32 %v7594_v19, %v7448_v26  ;;  %v1006_v19 = vmul.f32 %v7666_v44, %v7489_v46  ;;  %v1057_v36 = vrot.slane %v1007_v23, 2 }
  0x84   : > { %v1055_v47 = vrot.slane %v1006_v19, 2  ;;  %v1016_v19 = vmul.f32 %v7666_v44, %v7428_v18 }
  0x86   : > { %817 = vrot.lane.b32.xlu1 %v779_v43, %s7340_s24  ;;  %815 = vrot.lane.b32.xlu0 %v777_v49, %s7340_s24  ;;  %v800_v43 = vrot.slane %v742_v34, 1  ;;  %v805_v49 = vrot.slane %v745_v38, 1 }
  0x88   : > { %v802_v54 = vsel %vm498_vm0, %v800_v43, %v801_v40  ;;  %v1012_v40 = vmul.f32 %v7666_v44, %v7517_v62 }
  0x8a   : > { %821 = vrot.lane.b32.xlu1 %v784_v59, %s7340_s24  ;;  %819 = vrot.lane.b32.xlu0 %v782_v60, %s7340_s24  ;;  %v809_v59 = vsel %vm498_vm0, %v806_v45, %v808_v48  ;;  %v807_v60 = vsel %vm498_vm0, %v805_v49, %v806_v45 }
  0x8e   : > { %825 = vrot.lane.b32.xlu1 %v789_v12, %s7340_s24  ;;  %823 = vrot.lane.b32.xlu0 %v787_v16, %s7340_s24  ;;  %v1053_v12 = vrot.slane %v1005_v0, 2  ;;  %v1008_v16 = vmul.f32 %v7666_v44, %v7393_v3 }
  0x90   : > { %v1058_v34 = vrot.slane %v1008_v16, 2  ;;  %v1056_v38 = vsel %vm929_vm1, %v1053_v12, %v1055_v47  ;;  %v1070_v16 = vrot.slane %v1015_v56, 2  ;;  %v1021_v47 = vmul.f32 %v7666_v44, %v7556_v41 }
  0x91   : > { %v1022_v56 = vmul.f32 %v7666_v44, %v7448_v26 }
  0x92   : > { %829 = vrot.lane.b32.xlu1 %v794_v27, %s7340_s24  ;;  %827 = vrot.lane.b32.xlu0 %v792_v28, %s7340_s24  ;;  %v812_v27 = vsel %vm498_vm0, %v810_v5, %v811_v61  ;;  %v1052_v28 = vrot.slane %v1004_v7, 2  ;;  %v1059_v49 = vsel %vm929_vm1, %v1057_v36, %v1058_v34  ;;  %v1018_v5 = vmul.f32 %v7666_v44, %v7543_v32 }
  0x96   : > { %833 = vrot.lane.b32.xlu1 %v799_v35, %s7340_s24  ;;  %831 = vrot.lane.b32.xlu0 %v797_v39, %s7340_s24  ;;  %v1060_v35 = vrot.slane %v1009_v20, 2  ;;  %v1054_v39 = vsel %vm929_vm1, %v1052_v28, %v1053_v12  ;;  %v1064_v12 = vsel %vm929_vm1, %v1062_v55, %v1063_v50  ;;  %v1073_v28 = vrot.slane %v1017_v4, 2 }
  0x97   : > { %v1024_v55 = vmul.f32 %v7666_v44, %v7569_v52 }
  0x98   : > { %v7678_v57 = vpop.permute.xlu1 %290  ;;  %v7680_v58 = vpop.permute.xlu0 %286  ;;  %v1061_v48 = vsel %vm929_vm1, %v1058_v34, %v1060_v35  ;;  %v1075_v34 = vrot.slane %v1018_v5, 2  ;;  %v1072_v35 = vrot.slane %v1016_v19, 2  ;;  %v1026_v5 = vmul.f32 %v7666_v44, %v7455_v29 }
  0x99   : > { %15487 = vst [vmem:[#allocation5_spill] sm:$0xff] %v7680_v58  ;;  %v1027_v19 = vmul.f32 %v7666_v44, %v7582_v63 }
  0x9a   : > { %837 = vrot.lane.b32.xlu1 %v804_v51, %s7340_s24  ;;  %835 = vrot.lane.b32.xlu0 %v802_v54, %s7340_s24  ;;  %v1014_v51 = vmul.f32 %v7666_v44, %v7415_v13  ;;  %v1065_v54 = vrot.slane %v1012_v40, 2 }
  0x9c   : > { %v7692_v8 = vpop.permute.xlu1 %292  ;;  %v7694_v11 = vpop.permute.xlu0 %288  ;;  %v1068_v0 = vrot.slane %v1014_v51, 2  ;;  %v1066_v7 = vsel %vm929_vm1, %v1063_v50, %v1065_v54  ;;  %v1074_v50 = vsel %vm929_vm1, %v1072_v35, %v1073_v28  ;;  %v1023_v54 = vmul.f32 %v7666_v44, %v7445_v25 }
  0x9d   : > { %15488 = vst [vmem:[#allocation6_spill] sm:$0xff] %v7692_v8  ;;  %15489 = vst [vmem:[#allocation7_spill] sm:$0xff] %v7694_v11 }
  0x9e   : > { %841 = vrot.lane.b32.xlu1 %v809_v59, %s7340_s24  ;;  %839 = vrot.lane.b32.xlu0 %v807_v60, %s7340_s24  ;;  %v1013_v59 = vmul.f32 %v7666_v44, %v7418_v14  ;;  %v1071_v36 = vsel %vm929_vm1, %v1068_v0, %v1070_v16 }
  0xa0   : > { %v7706_v31 = vpop.permute.xlu1 %296  ;;  %v7708_v33 = vpop.permute.xlu0 %294  ;;  %v1067_v20 = vrot.slane %v1013_v59, 2 }
  0xa1   : > { %15490 = vst [vmem:[#allocation8_spill] sm:$0xff] %v7706_v31  ;;  %15491 = vst [vmem:[#allocation9_spill] sm:$0xff] %v7708_v33 }
  0xa2   : > { %845 = vrot.lane.b32.xlu1 %v814_v24, %s7340_s24  ;;  %843 = vrot.lane.b32.xlu0 %v812_v27, %s7340_s24  ;;  %v1020_v27 = vmul.f32 %v7666_v44, %v7435_v21  ;;  %v1069_v37 = vsel %vm929_vm1, %v1067_v20, %v1068_v0  ;;  %v1083_v20 = vrot.slane %v1023_v54, 2 }
  0xa4   : > { %v7720_v43 = vpop.permute.xlu1 %300  ;;  %v7722_v45 = vpop.permute.xlu0 %298  ;;  %v1078_v42 = vrot.slane %v1020_v27, 2  ;;  %v1085_v27 = vrot.slane %v1024_v55, 2 }
  0xa5   : > { %15492 = vst [vmem:[#allocation10_spill] sm:$0xff] %v7720_v43  ;;  %15493 = vst [vmem:[#allocation11_spill] sm:$0xff] %v7722_v45 }
  0xa6   : > { %1094 = vrot.lane.b32.xlu1 %v1056_v38, %s7339_s22  ;;  %1092 = vrot.lane.b32.xlu0 %v1054_v39, %s7339_s22  ;;  %v1019_v38 = vmul.f32 %v7666_v44, %v7438_v22 }
  0xa8   : > { %v7734_v60 = vpop.permute.xlu1 %304  ;;  %v7736_v61 = vpop.permute.xlu0 %302  ;;  %v1077_v51 = vrot.slane %v1019_v38, 2 }
  0xa9   : > { %15494 = vst [vmem:[#allocation12_spill] sm:$0xff] %v7734_v60  ;;  %15495 = vst [vmem:[#allocation13_spill] sm:$0xff] %v7736_v61 }
  0xaa   : > { %1098 = vrot.lane.b32.xlu1 %v1061_v48, %s7339_s22  ;;  %1096 = vrot.lane.b32.xlu0 %v1059_v49, %s7339_s22  ;;  %v1080_v48 = vrot.slane %v1021_v47, 2  ;;  %v1076_v49 = vsel %vm929_vm1, %v1073_v28, %v1075_v34  ;;  %v1079_v16 = vsel %vm929_vm1, %v1077_v51, %v1078_v42  ;;  %v1082_v47 = vrot.slane %v1022_v56, 2 }
  0xac   : > { %v7748_v23 = vpop.permute.xlu1 %308  ;;  %v7750_v24 = vpop.permute.xlu0 %306  ;;  %v1081_v4 = vsel %vm929_vm1, %v1078_v42, %v1080_v48  ;;  %v1086_v42 = vsel %vm929_vm1, %v1083_v20, %v1085_v27  ;;  %v1084_v48 = vsel %vm929_vm1, %v1082_v47, %v1083_v20 }
  0xad   : > { %15496 = vst [vmem:[#allocation14_spill] sm:$0xff] %v7748_v23  ;;  %15497 = vst [vmem:[#allocation15_spill] sm:$0xff] %v7750_v24 }
  0xae   : > { %1102 = vrot.lane.b32.xlu1 %v1066_v7, %s7339_s22  ;;  %1100 = vrot.lane.b32.xlu0 %v1064_v12, %s7339_s22  ;;  %v1025_v7 = vmul.f32 %v7666_v44, %v7458_v30  ;;  %v7789_v12 = vstv %s6975_s28  ;;  %v1088_v44 = vrot.slane %v1026_v5, 2  ;;  %s10613_s28 = sld [smem:[#allocation2 + $0x12]] }
  0xaf   : > { %v1159_v35 = vmul.f32 %v7789_v12, %v7398_v6  ;;  %v1161_v5 = vmul.f32 %v7789_v12, %v7387_v1  ;;  %v1165_v20 = vmul.f32 %v7789_v12, %v7405_v9  ;;  %v1166_v27 = vmul.f32 %v7789_v12, %v7517_v62 }
  0xb0   : > { %v7762_v39 = vpop.permute.xlu1 %312  ;;  %v7764_v40 = vpop.permute.xlu0 %310  ;;  %v1087_v38 = vrot.slane %v1025_v7, 2  ;;  %v1164_v47 = vmul.f32 %v7789_v12, %v7408_v10 }
  0xb1   : > { %15498 = vst [vmem:[#allocation16_spill] sm:$0xff] %v7762_v39  ;;  %15499 = vst [vmem:[#allocation17_spill] sm:$0xff] %v7764_v40  ;;  %v1207_v51 = vrot.slane %v1159_v35, 2  ;;  %v8998_v39 = vld [vmem:[%s7384_s21 + $0x90] sm:$0xff] }
  0xb2   : > { %1106 = vrot.lane.b32.xlu1 %v1071_v36, %s7339_s22  ;;  %1104 = vrot.lane.b32.xlu0 %v1069_v37, %s7339_s22  ;;  %v1160_v36 = vmul.f32 %v7789_v12, %v7489_v46  ;;  %v1090_v37 = vrot.slane %v1027_v19, 2  ;;  %v1089_v55 = vsel %vm929_vm1, %v1087_v38, %v1088_v44 }
  0xb4   : > { %v7776_v59 = vpop.permute.xlu1 %316  ;;  %v7778_v0 = vpop.permute.xlu0 %314  ;;  %v1209_v46 = vrot.slane %v1160_v36, 2  ;;  %v1091_v54 = vsel %vm929_vm1, %v1088_v44, %v1090_v37  ;;  %v1211_v37 = vrot.slane %v1161_v5, 2 }
  0xb5   : > { %15500 = vst [vmem:[#allocation18_spill] sm:$0xff] %v7776_v59  ;;  %15501 = vst [vmem:[#allocation19_spill] sm:$0xff] %v7778_v0 }
  0xb6   : > { %1110 = vrot.lane.b32.xlu1 %v1076_v49, %s7339_s22  ;;  %1108 = vrot.lane.b32.xlu0 %v1074_v50, %s7339_s22  ;;  %v1158_v49 = vmul.f32 %v7789_v12, %v7390_v2  ;;  %v1163_v2 = vmul.f32 %v7789_v12, %v7504_v53 }
  0xb8   : > { %v7792_v28 = vpop.permute.xlu1 %386  ;;  %v7794_v34 = vpop.permute.xlu0 %384  ;;  %v1206_v56 = vrot.slane %v1158_v49, 2  ;;  %v1214_v44 = vrot.slane %v1163_v2, 2  ;;  %v1169_v49 = vmul.f32 %v7789_v12, %v7530_v15 }
  0xb9   : > { %15502 = vst [vmem:[#allocation20_spill] sm:$0xff] %v7792_v28  ;;  %15503 = vst [vmem:[#allocation21_spill] sm:$0xff] %v7794_v34  ;;  %v8985_v34 = vld [vmem:[%s7384_s21 + $0x98] sm:$0xff] }
  0xba   : > { %1114 = vrot.lane.b32.xlu1 %v1081_v4, %s7339_s22  ;;  %1112 = vrot.lane.b32.xlu0 %v1079_v16, %s7339_s22  ;;  %v1162_v4 = vmul.f32 %v7789_v12, %v7393_v3  ;;  %v1210_v16 = vsel %vm929_vm1, %v1207_v51, %v1209_v46  ;;  %v1208_v35 = vsel %vm929_vm1, %v1206_v56, %v1207_v51  ;;  %v1217_v46 = vrot.slane %v1165_v20, 2 }
  0xbb   : > { %v1216_v51 = vrot.slane %v1164_v47, 2  ;;  %v1171_v47 = vmul.f32 %v7789_v12, %v7425_v17 }
  0xbc   : > { %v7806_v50 = vpop.permute.xlu1 %390  ;;  %v7808_v6 = vpop.permute.xlu0 %388  ;;  %v1212_v36 = vrot.slane %v1162_v4, 2  ;;  %v1167_v4 = vmul.f32 %v7789_v12, %v7418_v14 }
  0xbd   : > { %15504 = vst [vmem:[#allocation22_spill] sm:$0xff] %v7806_v50  ;;  %15505 = vst [vmem:[#allocation23_spill] sm:$0xff] %v7808_v6  ;;  %v1218_v20 = vsel %vm929_vm1, %v1216_v51, %v1217_v46  ;;  %v8951_v50 = vld [vmem:[%s7384_s21 + $0x78] sm:$0xff] }
  0xbe   : > { %1118 = vrot.lane.b32.xlu1 %v1086_v42, %s7339_s22  ;;  %1116 = vrot.lane.b32.xlu0 %v1084_v48, %s7339_s22  ;;  %v1168_v48 = vmul.f32 %v7789_v12, %v7415_v13  ;;  %v1213_v56 = vsel %vm929_vm1, %v1211_v37, %v1212_v36 }
  0xc0   : > { %v7820_v19 = vpop.permute.xlu1 %394  ;;  %v7822_v7 = vpop.permute.xlu0 %392 }
  0xc1   : > { %15506 = vst [vmem:[#allocation24_spill] sm:$0xff] %v7820_v19  ;;  %15507 = vst [vmem:[#allocation25_spill] sm:$0xff] %v7822_v7  ;;  %v8336_v19 = vstv %s6983_s5  ;;  %s11529_s5 = sld [smem:[#allocation2 + $0x25]] }
  0xc2   : > { %1122 = vrot.lane.b32.xlu1 %v1091_v54, %s7339_s22  ;;  %1120 = vrot.lane.b32.xlu0 %v1089_v55, %s7339_s22  ;;  %v1219_v54 = vrot.slane %v1166_v27, 2  ;;  %v1215_v55 = vsel %vm929_vm1, %v1212_v36, %v1214_v44  ;;  %v1221_v27 = vrot.slane %v1167_v4, 2  ;;  %v1170_v36 = vmul.f32 %v7789_v12, %v7428_v18 }
  0xc4   : > { %v7834_v38 = vpop.permute.xlu1 %398  ;;  %v7836_v42 = vpop.permute.xlu0 %396  ;;  %v1226_v4 = vrot.slane %v1170_v36, 2 }
  0xc5   : > { %15508 = vst [vmem:[#allocation26_spill] sm:$0xff] %v7834_v38  ;;  %15509 = vst [vmem:[#allocation27_spill] sm:$0xff] %v7836_v42  ;;  %v1222_v42 = vrot.slane %v1168_v48, 2  ;;  %v1224_v38 = vrot.slane %v1169_v49, 2  ;;  %v1174_v49 = vmul.f32 %v7789_v12, %v7435_v21 }
  0xc6   : > { %1248 = vrot.lane.b32.xlu1 %v1210_v16, %s7340_s24  ;;  %1246 = vrot.lane.b32.xlu0 %v1208_v35, %s7340_s24  ;;  %v1220_v16 = vsel %vm929_vm1, %v1217_v46, %v1219_v54  ;;  %v1172_v35 = vmul.f32 %v7789_v12, %v7543_v32  ;;  %v1175_v46 = vmul.f32 %v7789_v12, %v7556_v41 }
  0xc7   : > { %v1225_v48 = vsel %vm929_vm1, %v1222_v42, %v1224_v38  ;;  %v1173_v54 = vmul.f32 %v7789_v12, %v7438_v22  ;;  %v1223_v51 = vsel %vm929_vm1, %v1221_v27, %v1222_v42  ;;  %v1178_v27 = vmul.f32 %v7789_v12, %v7569_v52 }
  0xc8   : > { %v7848_v2 = vpop.permute.xlu1 %402  ;;  %v7850_v5 = vpop.permute.xlu0 %400 }
  0xc9   : > { %15510 = vst [vmem:[#allocation28_spill] sm:$0xff] %v7848_v2  ;;  %15511 = vst [vmem:[#allocation29_spill] sm:$0xff] %v7850_v5  ;;  %v1177_v5 = vmul.f32 %v7789_v12, %v7445_v25 }
  0xca   : > { %1252 = vrot.lane.b32.xlu1 %v1215_v55, %s7340_s24  ;;  %1250 = vrot.lane.b32.xlu0 %v1213_v56, %s7340_s24  ;;  %v1227_v55 = vrot.slane %v1171_v47, 2  ;;  %v1229_v56 = vrot.slane %v1172_v35, 2  ;;  %v1176_v47 = vmul.f32 %v7789_v12, %v7448_v26 }
  0xcc   : > { %v7862_v44 = vpop.permute.xlu1 %406  ;;  %v7864_v37 = vpop.permute.xlu0 %404  ;;  %v1230_v2 = vsel %vm929_vm1, %v1227_v55, %v1229_v56  ;;  %v1228_v42 = vsel %vm929_vm1, %v1226_v4, %v1227_v55  ;;  %v1236_v55 = vrot.slane %v1176_v47, 2  ;;  %v1181_v56 = vmul.f32 %v7789_v12, %v7582_v63 }
  0xcd   : > { %15512 = vst [vmem:[#allocation30_spill] sm:$0xff] %v7862_v44  ;;  %15513 = vst [vmem:[#allocation31_spill] sm:$0xff] %v7864_v37  ;;  %v1231_v44 = vrot.slane %v1173_v54, 2  ;;  %v1180_v54 = vmul.f32 %v7789_v12, %v7455_v29  ;;  %v1179_v4 = vmul.f32 %v7789_v12, %v7458_v30 }
  0xce   : > { %1256 = vrot.lane.b32.xlu1 %v1220_v16, %s7340_s24  ;;  %1254 = vrot.lane.b32.xlu0 %v1218_v20, %s7340_s24  ;;  %v1232_v16 = vrot.slane %v1174_v49, 2  ;;  %v1234_v20 = vrot.slane %v1175_v46, 2  ;;  %v1237_v46 = vrot.slane %v1177_v5, 2 }
  0xcf   : > { %v1242_v5 = vrot.slane %v1180_v54, 2 }
  0xd0   : > { %v7876_v37 = vpop.permute.xlu1 %410  ;;  %v7878_v38 = vpop.permute.xlu0 %408  ;;  %v1233_v49 = vsel %vm929_vm1, %v1231_v44, %v1232_v16 }
  0xd1   : > { %15514 = vst [vmem:[#allocation32_spill] sm:$0xff] %v7876_v37  ;;  %15515 = vst [vmem:[#allocation33_spill] sm:$0xff] %v7878_v38 }
  0xd2   : > { %1260 = vrot.lane.b32.xlu1 %v1225_v48, %s7340_s24  ;;  %1258 = vrot.lane.b32.xlu0 %v1223_v51, %s7340_s24  ;;  %v1235_v48 = vsel %vm929_vm1, %v1232_v16, %v1234_v20  ;;  %v1239_v51 = vrot.slane %v1178_v27, 2  ;;  %v1238_v16 = vsel %vm929_vm1, %v1236_v55, %v1237_v46  ;;  %v1244_v20 = vrot.slane %v1181_v56, 2 }
  0xd3   : > { %v1241_v27 = vrot.slane %v1179_v4, 2 }
  0xd4   : > { %v7890_v35 = vpop.permute.xlu1 %414  ;;  %v7892_v36 = vpop.permute.xlu0 %412  ;;  %v1240_v44 = vsel %vm929_vm1, %v1237_v46, %v1239_v51  ;;  %v1245_v12 = vsel %vm929_vm1, %v1242_v5, %v1244_v20 }
  0xd5   : > { %15516 = vst [vmem:[#allocation34_spill] sm:$0xff] %v7890_v35  ;;  %15517 = vst [vmem:[#allocation35_spill] sm:$0xff] %v7892_v36 }
  0xd6   : > { %1264 = vrot.lane.b32.xlu1 %v1230_v2, %s7340_s24  ;;  %1262 = vrot.lane.b32.xlu0 %v1228_v42, %s7340_s24 }
  0xd8   : > { %v7904_v2 = vpop.permute.xlu1 %663  ;;  %v7906_v42 = vpop.permute.xlu0 %661 }
  0xd9   : > { %15518 = vst [vmem:[#allocation36_spill] sm:$0xff] %v7904_v2  ;;  %15519 = vst [vmem:[#allocation37_spill] sm:$0xff] %v7906_v42 }
  0xda   : > { %1268 = vrot.lane.b32.xlu1 %v1235_v48, %s7340_s24  ;;  %1266 = vrot.lane.b32.xlu0 %v1233_v49, %s7340_s24  ;;  %v1243_v48 = vsel %vm929_vm1, %v1241_v27, %v1242_v5  ;;  %v1345_v49 = vstv %s6977_s29  ;;  %s10822_s29 = sld [smem:[#allocation2 + $0x22]] }
  0xdb   : > { %v1347_v46 = vmul.f32 %v1345_v49, %v7393_v3  ;;  %v1346_v55 = vmul.f32 %v1345_v49, %v7387_v1  ;;  %v1349_v5 = vmul.f32 %v1345_v49, %v7405_v9  ;;  %v1351_v1 = vmul.f32 %v1345_v49, %v7415_v13 }
  0xdc   : > { %v7912_v47 = vpop.permute.xlu1 %667  ;;  %v7914_v36 = vpop.permute.xlu0 %665  ;;  %v1350_v27 = vmul.f32 %v1345_v49, %v7418_v14 }
  0xdd   : > { %15520 = vst [vmem:[#allocation38_spill] sm:$0xff] %v7912_v47  ;;  %15521 = vst [vmem:[#allocation39_spill] sm:$0xff] %v7914_v36  ;;  %v8185_v47 = vld [vmem:[%s7384_s21 + $0xd0] sm:$0x3] }
  0xde   : > { %1272 = vrot.lane.b32.xlu1 %v1240_v44, %s7340_s24  ;;  %1270 = vrot.lane.b32.xlu0 %v1238_v16, %s7340_s24  ;;  %v1348_v44 = vmul.f32 %v1345_v49, %v7408_v10 }
  0xe0   : > { %v7920_v54 = vpop.permute.xlu1 %671  ;;  %v7922_v51 = vpop.permute.xlu0 %669 }
  0xe1   : > { %15522 = vst [vmem:[#allocation40_spill] sm:$0xff] %v7920_v54  ;;  %15523 = vst [vmem:[#allocation41_spill] sm:$0xff] %v7922_v51 }
  0xe2   : > { %1276 = vrot.lane.b32.xlu1 %v1245_v12, %s7340_s24  ;;  %1274 = vrot.lane.b32.xlu0 %v1243_v48, %s7340_s24 }
  0xe4   : > { %v7928_v56 = vpop.permute.xlu1 %675  ;;  %v7930_v4 = vpop.permute.xlu0 %673 }
  0xe5   : > { %15524 = vst [vmem:[#allocation42_spill] sm:$0xff] %v7928_v56  ;;  %15525 = vst [vmem:[#allocation43_spill] sm:$0xff] %v7930_v4  ;;  %v8111_v4 = vld [vmem:[%s7384_s21 + $0x68] sm:$0xff] }
  0xe6   : > { %1380 = vrot.lane.b32.xlu1 %v1347_v46, %s7339_s22  ;;  %1378 = vrot.lane.b32.xlu0 %v1346_v55, %s7339_s22  ;;  %v1353_v46 = vmul.f32 %v1345_v49, %v7425_v17  ;;  %v1352_v55 = vmul.f32 %v1345_v49, %v7428_v18 }
  0xe8   : > { %v7936_v16 = vpop.permute.xlu1 %679  ;;  %v7938_v20 = vpop.permute.xlu0 %677 }
  0xe9   : > { %15526 = vst [vmem:[#allocation44_spill] sm:$0xff] %v7936_v16  ;;  %15527 = vst [vmem:[#allocation45_spill] sm:$0xff] %v7938_v20 }
  0xea   : > { %1384 = vrot.lane.b32.xlu1 %v1349_v5, %s7339_s22  ;;  %1382 = vrot.lane.b32.xlu0 %v1348_v44, %s7339_s22  ;;  %v1355_v44 = vmul.f32 %v1345_v49, %v7435_v21 }
  0xec   : > { %v7944_v12 = vpop.permute.xlu1 %683  ;;  %v7946_v48 = vpop.permute.xlu0 %681 }
  0xed   : > { %15528 = vst [vmem:[#allocation46_spill] sm:$0xff] %v7944_v12  ;;  %15529 = vst [vmem:[#allocation47_spill] sm:$0xff] %v7946_v48 }
  0xee   : > { %1388 = vrot.lane.b32.xlu1 %v1351_v1, %s7339_s22  ;;  %1386 = vrot.lane.b32.xlu0 %v1350_v27, %s7339_s22  ;;  %v1354_v1 = vmul.f32 %v1345_v49, %v7438_v22 }
  0xf0   : > { %v7952_v20 = vpop.permute.xlu1 %687  ;;  %v7954_v5 = vpop.permute.xlu0 %685 }
  0xf1   : > { %15530 = vst [vmem:[#allocation48_spill] sm:$0xff] %v7952_v20  ;;  %15531 = vst [vmem:[#allocation49_spill] sm:$0xff] %v7954_v5  ;;  %v1357_v5 = vmul.f32 %v1345_v49, %v7445_v25 }
  0xf2   : > { %1392 = vrot.lane.b32.xlu1 %v1353_v46, %s7339_s22  ;;  %1390 = vrot.lane.b32.xlu0 %v1352_v55, %s7339_s22  ;;  %v1356_v46 = vmul.f32 %v1345_v49, %v7448_v26 }
  0xf4   : > { %v7960_v48 = vpop.permute.xlu1 %691  ;;  %v7962_v27 = vpop.permute.xlu0 %689 }
  0xf5   : > { %15532 = vst [vmem:[#allocation50_spill] sm:$0xff] %v7960_v48  ;;  %15533 = vst [vmem:[#allocation51_spill] sm:$0xff] %v7962_v27  ;;  %v1359_v48 = vmul.f32 %v1345_v49, %v7455_v29  ;;  %v7977_v27 = vld [vmem:[%s7384_s21 + $0xc8] sm:$0xff]  ;;  %v1443_v29 = vstv %s6978_s30  ;;  %s10915_s30 = sld [smem:[#allocation2 + $0x15]] }
  0xf6   : > { %1396 = vrot.lane.b32.xlu1 %v1355_v44, %s7339_s22  ;;  %1394 = vrot.lane.b32.xlu0 %v1354_v1, %s7339_s22  ;;  %v1358_v44 = vmul.f32 %v1345_v49, %v7458_v30  ;;  %v7980_v1 = vld [vmem:[%s7384_s21 + $0xc0] sm:$0xff] }
  0xf8   : > { %v7968_v55 = vpop.permute.xlu1 %817  ;;  %v7970_v20 = vpop.permute.xlu0 %815 }
  0xf9   : > { %15534 = vst [vmem:[#allocation52_spill] sm:$0xff] %v7968_v55  ;;  %15535 = vst [vmem:[#allocation53_spill] sm:$0xff] %v7970_v20 }
  0xfa   : > { %1400 = vrot.lane.b32.xlu1 %v1357_v5, %s7339_s22  ;;  %1398 = vrot.lane.b32.xlu0 %v1356_v46, %s7339_s22  ;;  %v1361_v5 = vmul.f32 %v1345_v49, %v7977_v27  ;;  %v1360_v46 = vmul.f32 %v1345_v49, %v7980_v1  ;;  %v1447_v49 = vmul.f32 %v1443_v29, %v7405_v9 }
  0xfb   : > { %v1451_v9 = vmul.f32 %v1443_v29, %v7425_v17 }
  0xfc   : > { %v7982_v12 = vpop.permute.xlu1 %821  ;;  %v7984_v16 = vpop.permute.xlu0 %819 }
  0xfd   : > { %15536 = vst [vmem:[#allocation54_spill] sm:$0xff] %v7982_v12  ;;  %15537 = vst [vmem:[#allocation55_spill] sm:$0xff] %v7984_v16  ;;  %v1445_v12 = vmul.f32 %v1443_v29, %v7393_v3  ;;  %v7998_v16 = vld [vmem:[%s7384_s21 + $0x18] sm:$0xff]  ;;  %v1449_v3 = vmul.f32 %v1443_v29, %v7415_v13  ;;  %v1453_v13 = vmul.f32 %v1443_v29, %v7435_v21 }
  0xfe   : > { %1404 = vrot.lane.b32.xlu1 %v1359_v48, %s7339_s22  ;;  %1402 = vrot.lane.b32.xlu0 %v1358_v44, %s7339_s22  ;;  %v1444_v48 = vmul.f32 %v7998_v16, %v1443_v29 }
 0x100   : > { %v7990_v20 = vpop.permute.xlu1 %825  ;;  %v7992_v30 = vpop.permute.xlu0 %823 }
 0x101   : > { %15538 = vst [vmem:[#allocation56_spill] sm:$0xff] %v7990_v20  ;;  %15539 = vst [vmem:[#allocation57_spill] sm:$0xff] %v7992_v30 }
 0x102   : > { %1408 = vrot.lane.b32.xlu1 %v1361_v5, %s7339_s22  ;;  %1406 = vrot.lane.b32.xlu0 %v1360_v46, %s7339_s22  ;;  %v1446_v5 = vmul.f32 %v1443_v29, %v7408_v10  ;;  %v1450_v10 = vmul.f32 %v1443_v29, %v7428_v18  ;;  %v1455_v18 = vmul.f32 %v1443_v29, %v7445_v25  ;;  %v8057_v25 = vld [vmem:[%s7384_s21 + $0xb0] sm:$0xff] }
 0x104   : > { %v8001_v44 = vpop.permute.xlu1 %829  ;;  %v8003_v55 = vpop.permute.xlu0 %827 }
 0x105   : > { %15540 = vst [vmem:[#allocation58_spill] sm:$0xff] %v8001_v44  ;;  %15541 = vst [vmem:[#allocation59_spill] sm:$0xff] %v8003_v55  ;;  %v1448_v55 = vmul.f32 %v1443_v29, %v7418_v14  ;;  %v1452_v14 = vmul.f32 %v1443_v29, %v7438_v22  ;;  %v8048_v22 = vld [vmem:[%s7384_s21 + $0x20] sm:$0xff] }
 0x106   : > { %1478 = vrot.lane.b32.xlu1 %v1445_v12, %s7340_s24  ;;  %1476 = vrot.lane.b32.xlu0 %v1444_v48, %s7340_s24 }
 0x108   : > { %v8009_v30 = vpop.permute.xlu1 %833  ;;  %v8011_v46 = vpop.permute.xlu0 %831 }
 0x109   : > { %15542 = vst [vmem:[#allocation60_spill] sm:$0xff] %v8009_v30  ;;  %15543 = vst [vmem:[#allocation61_spill] sm:$0xff] %v8011_v46  ;;  %v8101_v46 = vld [vmem:[%s7384_s21 + $0x48] sm:$0xff] }
 0x10a   : > { %1482 = vrot.lane.b32.xlu1 %v1447_v49, %s7340_s24  ;;  %1480 = vrot.lane.b32.xlu0 %v1446_v5, %s7340_s24  ;;  %v1454_v5 = vmul.f32 %v1443_v29, %v7448_v26  ;;  %v1457_v26 = vmul.f32 %v8057_v25, %v1443_v29 }
 0x10c   : > { %v8017_v44 = vpop.permute.xlu1 %837  ;;  %v8019_v12 = vpop.permute.xlu0 %835 }
 0x10d   : > { %15544 = vst [vmem:[#allocation62_spill] sm:$0xff] %v8017_v44  ;;  %15545 = vst [vmem:[#allocation63_spill] sm:$0xff] %v8019_v12  ;;  %v8075_v12 = vld [vmem:[%s7384_s21 + $0x38] sm:$0xff] }
 0x10e   : > { %1486 = vrot.lane.b32.xlu1 %v1449_v3, %s7340_s24  ;;  %1484 = vrot.lane.b32.xlu0 %v1448_v55, %s7340_s24  ;;  %v8041_v3 = vstv %s6980_s3  ;;  %s11169_s3 = sld [smem:[#allocation2 + $0x23]] }
 0x10f   : > { %v1672_v44 = vmul.f32 %v8041_v3, %v7530_v15  ;;  %v1674_v15 = vmul.f32 %v8111_v4, %v8041_v3  ;;  %v1675_v56 = vmul.f32 %v8041_v3, %v7543_v32  ;;  %v1683_v54 = vmul.f32 %v8057_v25, %v8041_v3 }
 0x110   : > { %v8025_v48 = vpop.permute.xlu1 %841  ;;  %v8027_v49 = vpop.permute.xlu0 %839 }
 0x111   : > { %15546 = vst [vmem:[#allocation64_spill] sm:$0xff] %v8025_v48  ;;  %15547 = vst [vmem:[#allocation65_spill] sm:$0xff] %v8027_v49  ;;  %v1458_v49 = vmul.f32 %v1443_v29, %v7980_v1 }
 0x112   : > { %1490 = vrot.lane.b32.xlu1 %v1451_v9, %s7340_s24  ;;  %1488 = vrot.lane.b32.xlu0 %v1450_v10, %s7340_s24  ;;  %v1665_v10 = vmul.f32 %v8048_v22, %v8041_v3 }
 0x114   : > { %v8033_v55 = vpop.permute.xlu1 %845  ;;  %v8035_v17 = vpop.permute.xlu0 %843 }
 0x115   : > { %15548 = vst [vmem:[#allocation66_spill] sm:$0xff] %v8033_v55  ;;  %15549 = vst [vmem:[#allocation67_spill] sm:$0xff] %v8035_v17 }
 0x116   : > { %1494 = vrot.lane.b32.xlu1 %v1453_v13, %s7340_s24  ;;  %1492 = vrot.lane.b32.xlu0 %v1452_v14, %s7340_s24  ;;  %v1666_v13 = vmul.f32 %v8041_v3, %v7504_v53  ;;  %v8061_v14 = vld [vmem:[%s7384_s21 + $0xa8] sm:$0xff] }
 0x118   : > { %v8043_v9 = vpop.permute.xlu1 %1094  ;;  %v8045_v21 = vpop.permute.xlu0 %1092  ;;  %v1715_v55 = vrot.slane %v1666_v13, 1  ;;  %v8082_v13 = vld [vmem:[%s7384_s21 + $0x30] sm:$0xff] }
 0x119   : > { %15550 = vst [vmem:[#allocation68_spill] sm:$0xff] %v8043_v9  ;;  %15551 = vst [vmem:[#allocation69_spill] sm:$0xff] %v8045_v21  ;;  %v1456_v21 = vmul.f32 %v8061_v14, %v1443_v29  ;;  %v1664_v9 = vmul.f32 %v7998_v16, %v8041_v3 }
 0x11a   : > { %1498 = vrot.lane.b32.xlu1 %v1455_v18, %s7340_s24  ;;  %1496 = vrot.lane.b32.xlu0 %v1454_v5, %s7340_s24  ;;  %v1713_v18 = vrot.slane %v1665_v10, 1  ;;  %v1459_v5 = vmul.f32 %v1443_v29, %v7977_v27  ;;  %v1669_v10 = vmul.f32 %v8041_v3, %v7517_v62 }
 0x11b   : > { %v1712_v48 = vrot.slane %v1664_v9, 1  ;;  %v8094_v9 = vld [vmem:[%s7384_s21 + $0x50] sm:$0xff] }
 0x11c   : > { %v8066_v17 = vpop.permute.xlu1 %1098  ;;  %v8068_v53 = vpop.permute.xlu0 %1096  ;;  %v1716_v29 = vsel %vm498_vm0, %v1713_v18, %v1715_v55  ;;  %v1671_v62 = vmul.f32 %v8094_v9, %v8041_v3 }
 0x11d   : > { %15552 = vst [vmem:[#allocation70_spill] sm:$0xff] %v8066_v17  ;;  %15553 = vst [vmem:[#allocation71_spill] sm:$0xff] %v8068_v53  ;;  %v1668_v17 = vmul.f32 %v8075_v12, %v8041_v3 }
 0x11e   : > { %1502 = vrot.lane.b32.xlu1 %v1457_v26, %s7340_s24  ;;  %1500 = vrot.lane.b32.xlu0 %v1456_v21, %s7340_s24  ;;  %v1667_v26 = vmul.f32 %v8082_v13, %v8041_v3 }
 0x11f   : > { %v1718_v55 = vrot.slane %v1668_v17, 1  ;;  %v1725_v17 = vrot.slane %v1672_v44, 1 }
 0x120   : > { %v8086_v21 = vpop.permute.xlu1 %1102  ;;  %v8088_v53 = vpop.permute.xlu0 %1100  ;;  %v1717_v30 = vrot.slane %v1667_v26, 1 }
 0x121   : > { %15554 = vst [vmem:[#allocation72_spill] sm:$0xff] %v8086_v21  ;;  %15555 = vst [vmem:[#allocation73_spill] sm:$0xff] %v8088_v53  ;;  %v1670_v21 = vmul.f32 %v8101_v46, %v8041_v3  ;;  %v1714_v53 = vsel %vm498_vm0, %v1712_v48, %v1713_v18  ;;  %v1723_v48 = vrot.slane %v1671_v62, 1  ;;  %v8135_v62 = vld [vmem:[%s7384_s21 + $0x80] sm:$0xff] }
 0x122   : > { %1506 = vrot.lane.b32.xlu1 %v1459_v5, %s7340_s24  ;;  %1504 = vrot.lane.b32.xlu0 %v1458_v49, %s7340_s24  ;;  %v1720_v5 = vrot.slane %v1669_v10, 1  ;;  %v1719_v26 = vsel %vm498_vm0, %v1717_v30, %v1718_v55 }
 0x123   : > { %v1722_v18 = vrot.slane %v1670_v21, 1  ;;  %v1726_v44 = vsel %vm498_vm0, %v1723_v48, %v1725_v17 }
 0x124   : > { %v8106_v49 = vpop.permute.xlu1 %1106  ;;  %v8108_v20 = vpop.permute.xlu0 %1104  ;;  %v1721_v10 = vsel %vm498_vm0, %v1718_v55, %v1720_v5  ;;  %v1677_v55 = vmul.f32 %v8135_v62, %v8041_v3  ;;  %v1678_v5 = vmul.f32 %v8041_v3, %v7556_v41 }
 0x125   : > { %15556 = vst [vmem:[#allocation74_spill] sm:$0xff] %v8106_v49  ;;  %15557 = vst [vmem:[#allocation75_spill] sm:$0xff] %v8108_v20  ;;  %v8122_v20 = vld [vmem:[%s7384_s21 + $0x60] sm:$0xff]  ;;  %v1724_v30 = vsel %vm498_vm0, %v1722_v18, %v1723_v48  ;;  %v1681_v18 = vmul.f32 %v8041_v3, %v7569_v52  ;;  %v1684_v52 = vmul.f32 %v8041_v3, %v7582_v63  ;;  %v1743_v63 = vrot.slane %v1683_v54, 1 }
 0x126   : > { %1754 = vrot.lane.b32.xlu1 %v1716_v29, %s7339_s22  ;;  %1752 = vrot.lane.b32.xlu0 %v1714_v53, %s7339_s22  ;;  %v1673_v49 = vmul.f32 %v8122_v20, %v8041_v3  ;;  %v1728_v29 = vrot.slane %v1674_v15, 1  ;;  %v1730_v53 = vrot.slane %v1675_v56, 1  ;;  %v8142_v56 = vld [vmem:[%s7384_s21 + $0x78] sm:$0xff]  ;;  %v1685_v54 = vmul.f32 %v8041_v3, %v7980_v1 }
 0x127   : > { %v1676_v15 = vmul.f32 %v8142_v56, %v8041_v3 }
 0x128   : > { %v8126_v51 = vpop.permute.xlu1 %1110  ;;  %v8128_v32 = vpop.permute.xlu0 %1108  ;;  %v1727_v21 = vrot.slane %v1673_v49, 1  ;;  %v1731_v48 = vsel %vm498_vm0, %v1728_v29, %v1730_v53  ;;  %v8154_v49 = vld [vmem:[%s7384_s21 + $0x98] sm:$0xff]  ;;  %v1733_v53 = vrot.slane %v1677_v55, 1 }
 0x129   : > { %15558 = vst [vmem:[#allocation76_spill] sm:$0xff] %v8126_v51  ;;  %15559 = vst [vmem:[#allocation77_spill] sm:$0xff] %v8128_v32  ;;  %v1680_v41 = vmul.f32 %v8154_v49, %v8041_v3  ;;  %v1735_v32 = vrot.slane %v1678_v5, 1  ;;  %v1682_v5 = vmul.f32 %v8061_v14, %v8041_v3 }
 0x12a   : > { %1758 = vrot.lane.b32.xlu1 %v1721_v10, %s7339_s22  ;;  %1756 = vrot.lane.b32.xlu0 %v1719_v26, %s7339_s22  ;;  %v8161_v26 = vld [vmem:[%s7384_s21 + $0x90] sm:$0xff] }
 0x12c   : > { %v8146_v10 = vpop.permute.xlu1 %1114  ;;  %v8148_v17 = vpop.permute.xlu0 %1112 }
 0x12d   : > { %15560 = vst [vmem:[#allocation78_spill] sm:$0xff] %v8146_v10  ;;  %15561 = vst [vmem:[#allocation79_spill] sm:$0xff] %v8148_v17  ;;  %v1679_v10 = vmul.f32 %v8161_v26, %v8041_v3  ;;  %v1729_v17 = vsel %vm498_vm0, %v1727_v21, %v1728_v29  ;;  %v1738_v29 = vrot.slane %v1680_v41, 1  ;;  %v1740_v21 = vrot.slane %v1681_v18, 1 }
 0x12e   : > { %1762 = vrot.lane.b32.xlu1 %v1726_v44, %s7339_s22  ;;  %1760 = vrot.lane.b32.xlu0 %v1724_v30, %s7339_s22  ;;  %v1732_v44 = vrot.slane %v1676_v15, 1  ;;  %v1736_v15 = vsel %vm498_vm0, %v1733_v53, %v1735_v32  ;;  %v1742_v32 = vrot.slane %v1682_v5, 1  ;;  %v1686_v41 = vmul.f32 %v8041_v3, %v7977_v27 }
 0x12f   : > { %v1737_v55 = vrot.slane %v1679_v10, 1  ;;  %v1741_v10 = vsel %vm498_vm0, %v1738_v29, %v1740_v21  ;;  %v1687_v18 = vmul.f32 %v8041_v3, %v8185_v47 }
 0x130   : > { %v8166_v30 = vpop.permute.xlu1 %1118  ;;  %v8168_v51 = vpop.permute.xlu0 %1116  ;;  %v1748_v5 = vrot.slane %v1686_v41, 1 }
 0x131   : > { %15562 = vst [vmem:[#allocation80_spill] sm:$0xff] %v8166_v30  ;;  %15563 = vst [vmem:[#allocation81_spill] sm:$0xff] %v8168_v51  ;;  %v1734_v51 = vsel %vm498_vm0, %v1732_v44, %v1733_v53  ;;  %v8197_v53 = vstv %s6981_s4  ;;  %s11456_s4 = sld [smem:[#allocation2 + $0x18]] }
 0x132   : > { %1766 = vrot.lane.b32.xlu1 %v1731_v48, %s7339_s22  ;;  %1764 = vrot.lane.b32.xlu0 %v1729_v17, %s7339_s22  ;;  %v1745_v48 = vrot.slane %v1684_v52, 1  ;;  %v1739_v17 = vsel %vm498_vm0, %v1737_v55, %v1738_v29  ;;  %v1744_v29 = vsel %vm498_vm0, %v1742_v32, %v1743_v63  ;;  %v1819_v21 = vmul.f32 %v8048_v22, %v8197_v53  ;;  %v8210_v55 = vld [vmem:[%s7384_s21 + $0x28] sm:$0x3] }
 0x133   : > { %v1820_v3 = vmul.f32 %v8210_v55, %v8197_v53 }
 0x134   : > { %v8180_v30 = vpop.permute.xlu1 %1122  ;;  %v8182_v36 = vpop.permute.xlu0 %1120  ;;  %v1746_v52 = vsel %vm498_vm0, %v1743_v63, %v1745_v48  ;;  %v1818_v48 = vmul.f32 %v7998_v16, %v8197_v53  ;;  %v1822_v63 = vmul.f32 %v8075_v12, %v8197_v53  ;;  %v1867_v41 = vrot.slane %v1819_v21, 1 }
 0x135   : > { %15564 = vst [vmem:[#allocation82_spill] sm:$0xff] %v8180_v30  ;;  %15565 = vst [vmem:[#allocation83_spill] sm:$0xff] %v8182_v36  ;;  %v1747_v36 = vrot.slane %v1685_v54, 1  ;;  %v1821_v54 = vmul.f32 %v8082_v13, %v8197_v53 }
 0x136   : > { %1770 = vrot.lane.b32.xlu1 %v1736_v15, %s7339_s22  ;;  %1768 = vrot.lane.b32.xlu0 %v1734_v51, %s7339_s22  ;;  %v1750_v15 = vrot.slane %v1687_v18, 1  ;;  %v1869_v18 = vrot.slane %v1820_v3, 1  ;;  %v1866_v30 = vrot.slane %v1818_v48, 1  ;;  %v1872_v2 = vrot.slane %v1822_v63, 1  ;;  %v8244_v3 = vld [vmem:[%s7384_s21 + $0x58] sm:$0x3] }
 0x137   : > { %v1828_v63 = vmul.f32 %v8111_v4, %v8197_v53 }
 0x138   : > { %v8199_v44 = vpop.permute.xlu1 %1248  ;;  %v8201_v51 = vpop.permute.xlu0 %1246  ;;  %v1868_v21 = vsel %vm498_vm0, %v1866_v30, %v1867_v41 }
 0x139   : > { %15566 = vst [vmem:[#allocation84_spill] sm:$0xff] %v8199_v44  ;;  %15567 = vst [vmem:[#allocation85_spill] sm:$0xff] %v8201_v51 }
 0x13a   : > { %1774 = vrot.lane.b32.xlu1 %v1741_v10, %s7339_s22  ;;  %1772 = vrot.lane.b32.xlu0 %v1739_v17, %s7339_s22  ;;  %v8223_v17 = vld [vmem:[%s7384_s21 + $0x40] sm:$0x3] }
 0x13b   : > { %v1823_v32 = vmul.f32 %v8223_v17, %v8197_v53 }
 0x13c   : > { %v8216_v51 = vpop.permute.xlu1 %1252  ;;  %v8218_v10 = vpop.permute.xlu0 %1250 }
 0x13d   : > { %15568 = vst [vmem:[#allocation86_spill] sm:$0xff] %v8216_v51  ;;  %15569 = vst [vmem:[#allocation87_spill] sm:$0xff] %v8218_v10  ;;  %v1751_v10 = vsel %vm498_vm0, %v1748_v5, %v1750_v15  ;;  %v1749_v51 = vsel %vm498_vm0, %v1747_v36, %v1748_v5  ;;  %v1874_v35 = vrot.slane %v1823_v32, 1  ;;  %v1825_v36 = vmul.f32 %v8094_v9, %v8197_v53  ;;  %v8261_v32 = vld [vmem:[%s7384_s21 + $0x70] sm:$0x3] }
 0x13e   : > { %1778 = vrot.lane.b32.xlu1 %v1746_v52, %s7339_s22  ;;  %1776 = vrot.lane.b32.xlu0 %v1744_v29, %s7339_s22  ;;  %v1870_v52 = vsel %vm498_vm0, %v1867_v41, %v1869_v18  ;;  %v1871_v29 = vrot.slane %v1821_v54, 1  ;;  %v1826_v5 = vmul.f32 %v8244_v3, %v8197_v53  ;;  %v1824_v15 = vmul.f32 %v8101_v46, %v8197_v53 }
 0x13f   : > { %v1829_v41 = vmul.f32 %v8261_v32, %v8197_v53  ;;  %v1877_v18 = vrot.slane %v1825_v36, 1  ;;  %v1882_v36 = vrot.slane %v1828_v63, 1 }
 0x140   : > { %v8233_v44 = vpop.permute.xlu1 %1256  ;;  %v8235_v42 = vpop.permute.xlu0 %1254  ;;  %v1873_v30 = vsel %vm498_vm0, %v1871_v29, %v1872_v2  ;;  %v1879_v54 = vrot.slane %v1826_v5, 1  ;;  %v8274_v29 = vld [vmem:[%s7384_s21 + $0x88] sm:$0x3] }
 0x141   : > { %15570 = vst [vmem:[#allocation88_spill] sm:$0xff] %v8233_v44  ;;  %15571 = vst [vmem:[#allocation89_spill] sm:$0xff] %v8235_v42  ;;  %v1884_v5 = vrot.slane %v1829_v41, 1  ;;  %v8295_v41 = vld [vmem:[%s7384_s21 + $0xa0] sm:$0x3] }
 0x142   : > { %1782 = vrot.lane.b32.xlu1 %v1751_v10, %s7339_s22  ;;  %1780 = vrot.lane.b32.xlu0 %v1749_v51, %s7339_s22  ;;  %v1875_v10 = vsel %vm498_vm0, %v1872_v2, %v1874_v35  ;;  %v1827_v35 = vmul.f32 %v8122_v20, %v8197_v53  ;;  %v1831_v2 = vmul.f32 %v8135_v62, %v8197_v53 }
 0x144   : > { %v8250_v48 = vpop.permute.xlu1 %1260  ;;  %v8252_v51 = vpop.permute.xlu0 %1258  ;;  %v1881_v42 = vrot.slane %v1827_v35, 1  ;;  %v1887_v37 = vrot.slane %v1831_v2, 1  ;;  %v1837_v2 = vmul.f32 %v8057_v25, %v8197_v53 }
 0x145   : > { %15572 = vst [vmem:[#allocation90_spill] sm:$0xff] %v8250_v48  ;;  %15573 = vst [vmem:[#allocation91_spill] sm:$0xff] %v8252_v51  ;;  %v1876_v48 = vrot.slane %v1824_v15, 1  ;;  %v1830_v15 = vmul.f32 %v8142_v56, %v8197_v53 }
 0x146   : > { %1908 = vrot.lane.b32.xlu1 %v1870_v52, %s7340_s24  ;;  %1906 = vrot.lane.b32.xlu0 %v1868_v21, %s7340_s24  ;;  %v1832_v21 = vmul.f32 %v8274_v29, %v8197_v53  ;;  %v1883_v63 = vsel %vm498_vm0, %v1881_v42, %v1882_v36 }
 0x148   : > { %v8267_v51 = vpop.permute.xlu1 %1264  ;;  %v8269_v52 = vpop.permute.xlu0 %1262  ;;  %v1889_v7 = vrot.slane %v1832_v21, 1  ;;  %v8312_v21 = vld [vmem:[%s7384_s21 + $0xb8] sm:$0x3] }
 0x149   : > { %15574 = vst [vmem:[#allocation92_spill] sm:$0xff] %v8267_v51  ;;  %15575 = vst [vmem:[#allocation93_spill] sm:$0xff] %v8269_v52  ;;  %v1880_v52 = vsel %vm498_vm0, %v1877_v18, %v1879_v54  ;;  %v1878_v51 = vsel %vm498_vm0, %v1876_v48, %v1877_v18  ;;  %v1834_v48 = vmul.f32 %v8154_v49, %v8197_v53 }
 0x14a   : > { %1912 = vrot.lane.b32.xlu1 %v1875_v10, %s7340_s24  ;;  %1910 = vrot.lane.b32.xlu0 %v1873_v30, %s7340_s24  ;;  %v1885_v10 = vsel %vm498_vm0, %v1882_v36, %v1884_v5  ;;  %v1886_v30 = vrot.slane %v1830_v15, 1  ;;  %v1835_v18 = vmul.f32 %v8295_v41, %v8197_v53  ;;  %v1833_v54 = vmul.f32 %v8161_v26, %v8197_v53 }
 0x14b   : > { %v1838_v36 = vmul.f32 %v8312_v21, %v8197_v53  ;;  %v1892_v5 = vrot.slane %v1834_v48, 1 }
 0x14c   : > { %v8284_v44 = vpop.permute.xlu1 %1268  ;;  %v8286_v38 = vpop.permute.xlu0 %1266  ;;  %v1888_v42 = vsel %vm498_vm0, %v1886_v30, %v1887_v37  ;;  %v1894_v15 = vrot.slane %v1835_v18, 1  ;;  %v1841_v30 = vmul.f32 %v8197_v53, %v8185_v47  ;;  %v1839_v18 = vmul.f32 %v8197_v53, %v7980_v1 }
 0x14d   : > { %15576 = vst [vmem:[#allocation94_spill] sm:$0xff] %v8284_v44  ;;  %15577 = vst [vmem:[#allocation95_spill] sm:$0xff] %v8286_v38  ;;  %v1899_v48 = vrot.slane %v1838_v36, 1  ;;  %v2096_v36 = vmul.f32 %v8210_v55, %v8336_v19 }
 0x14e   : > { %1916 = vrot.lane.b32.xlu1 %v1880_v52, %s7340_s24  ;;  %1914 = vrot.lane.b32.xlu0 %v1878_v51, %s7340_s24  ;;  %v1890_v52 = vsel %vm498_vm0, %v1887_v37, %v1889_v7  ;;  %v1836_v7 = vmul.f32 %v8061_v14, %v8197_v53  ;;  %v1840_v37 = vmul.f32 %v8197_v53, %v7977_v27  ;;  %v1901_v53 = vrot.slane %v1839_v18, 1 }
 0x150   : > { %v8301_v35 = vpop.permute.xlu1 %1272  ;;  %v8303_v51 = vpop.permute.xlu0 %1270  ;;  %v1902_v6 = vrot.slane %v1840_v37, 1  ;;  %v2098_v37 = vmul.f32 %v8075_v12, %v8336_v19 }
 0x151   : > { %15578 = vst [vmem:[#allocation96_spill] sm:$0xff] %v8301_v35  ;;  %15579 = vst [vmem:[#allocation97_spill] sm:$0xff] %v8303_v51  ;;  %v1891_v51 = vrot.slane %v1833_v54, 1  ;;  %v1895_v54 = vsel %vm498_vm0, %v1892_v5, %v1894_v15 }
 0x152   : > { %1920 = vrot.lane.b32.xlu1 %v1885_v10, %s7340_s24  ;;  %1918 = vrot.lane.b32.xlu0 %v1883_v63, %s7340_s24  ;;  %v1897_v63 = vrot.slane %v1837_v2, 1 }
 0x154   : > { %v8318_v35 = vpop.permute.xlu1 %1276  ;;  %v8320_v10 = vpop.permute.xlu0 %1274 }
 0x155   : > { %15580 = vst [vmem:[#allocation98_spill] sm:$0xff] %v8318_v35  ;;  %15581 = vst [vmem:[#allocation99_spill] sm:$0xff] %v8320_v10  ;;  %v1893_v35 = vsel %vm498_vm0, %v1891_v51, %v1892_v5  ;;  %v1896_v10 = vrot.slane %v1836_v7, 1  ;;  %v2095_v51 = vmul.f32 %v8048_v22, %v8336_v19  ;;  %v2094_v5 = vmul.f32 %v7998_v16, %v8336_v19 }
 0x156   : > { %1924 = vrot.lane.b32.xlu1 %v1890_v52, %s7340_s24  ;;  %1922 = vrot.lane.b32.xlu0 %v1888_v42, %s7340_s24  ;;  %v1904_v52 = vrot.slane %v1841_v30, 1  ;;  %v1900_v42 = vsel %vm498_vm0, %v1897_v63, %v1899_v48  ;;  %v2099_v30 = vmul.f32 %v8223_v17, %v8336_v19  ;;  %v2145_v48 = vrot.slane %v2096_v36, 2 }
 0x157   : > { %v1898_v2 = vsel %vm498_vm0, %v1896_v10, %v1897_v63  ;;  %v1903_v10 = vsel %vm498_vm0, %v1901_v53, %v1902_v6  ;;  %v2143_v63 = vrot.slane %v2095_v51, 2  ;;  %v2142_v18 = vrot.slane %v2094_v5, 2 }
 0x158   : > { %v8332_v38 = vpop.permute.xlu1 %1380  ;;  %v8334_v44 = vpop.permute.xlu0 %1378  ;;  %v2148_v53 = vrot.slane %v2098_v37, 2  ;;  %v2100_v51 = vmul.f32 %v8101_v46, %v8336_v19 }
 0x159   : > { %15582 = vst [vmem:[#allocation100_spill] sm:$0xff] %v8332_v38  ;;  %15583 = vst [vmem:[#allocation101_spill] sm:$0xff] %v8334_v44  ;;  %v2146_v36 = vsel %vm929_vm1, %v2143_v63, %v2145_v48  ;;  %v2144_v5 = vsel %vm929_vm1, %v2142_v18, %v2143_v63  ;;  %v2105_v63 = vmul.f32 %v8261_v32, %v8336_v19 }
 0x15a   : > { %1928 = vrot.lane.b32.xlu1 %v1895_v54, %s7340_s24  ;;  %1926 = vrot.lane.b32.xlu0 %v1893_v35, %s7340_s24  ;;  %v1905_v35 = vsel %vm498_vm0, %v1902_v6, %v1904_v52  ;;  %v2097_v54 = vmul.f32 %v8082_v13, %v8336_v19  ;;  %v2102_v6 = vmul.f32 %v8244_v3, %v8336_v19 }
 0x15b   : > { %v2103_v48 = vmul.f32 %v8122_v20, %v8336_v19 }
 0x15c   : > { %v8348_v15 = vpop.permute.xlu1 %1384  ;;  %v8350_v7 = vpop.permute.xlu0 %1382  ;;  %v2155_v38 = vrot.slane %v2102_v6, 2  ;;  %v2107_v6 = vmul.f32 %v8135_v62, %v8336_v19 }
 0x15d   : > { %15584 = vst [vmem:[#allocation102_spill] sm:$0xff] %v8348_v15  ;;  %15585 = vst [vmem:[#allocation103_spill] sm:$0xff] %v8350_v7 }
 0x15e   : > { %1932 = vrot.lane.b32.xlu1 %v1900_v42, %s7340_s24  ;;  %1930 = vrot.lane.b32.xlu0 %v1898_v2, %s7340_s24  ;;  %v2101_v42 = vmul.f32 %v8094_v9, %v8336_v19  ;;  %v2150_v2 = vrot.slane %v2099_v30, 2  ;;  %v2104_v30 = vmul.f32 %v8111_v4, %v8336_v19 }
 0x160   : > { %v8362_v7 = vpop.permute.xlu1 %1388  ;;  %v8364_v52 = vpop.permute.xlu0 %1386  ;;  %v2153_v44 = vrot.slane %v2101_v42, 2 }
 0x161   : > { %15586 = vst [vmem:[#allocation104_spill] sm:$0xff] %v8362_v7  ;;  %15587 = vst [vmem:[#allocation105_spill] sm:$0xff] %v8364_v52  ;;  %v2147_v52 = vrot.slane %v2097_v54, 2 }
 0x162   : > { %1936 = vrot.lane.b32.xlu1 %v1905_v35, %s7340_s24  ;;  %1934 = vrot.lane.b32.xlu0 %v1903_v10, %s7340_s24  ;;  %v2151_v35 = vsel %vm929_vm1, %v2148_v53, %v2150_v2  ;;  %v2152_v10 = vrot.slane %v2100_v51, 2  ;;  %v2156_v42 = vsel %vm929_vm1, %v2153_v44, %v2155_v38  ;;  %v2158_v2 = vrot.slane %v2104_v30, 2 }
 0x163   : > { %v2149_v37 = vsel %vm929_vm1, %v2147_v52, %v2148_v53  ;;  %v2108_v53 = vmul.f32 %v8274_v29, %v8336_v19  ;;  %v2160_v51 = vrot.slane %v2105_v63, 2  ;;  %v2109_v30 = vmul.f32 %v8161_v26, %v8336_v19 }
 0x164   : > { %v8376_v7 = vpop.permute.xlu1 %1392  ;;  %v8378_v15 = vpop.permute.xlu0 %1390  ;;  %v2154_v52 = vsel %vm929_vm1, %v2152_v10, %v2153_v44  ;;  %v2111_v44 = vmul.f32 %v8295_v41, %v8336_v19  ;;  %v2163_v10 = vrot.slane %v2107_v6, 2 }
 0x165   : > { %15588 = vst [vmem:[#allocation106_spill] sm:$0xff] %v8376_v7  ;;  %15589 = vst [vmem:[#allocation107_spill] sm:$0xff] %v8378_v15  ;;  %v2161_v63 = vsel %vm929_vm1, %v2158_v2, %v2160_v51  ;;  %v2112_v51 = vmul.f32 %v8061_v14, %v8336_v19 }
 0x166   : > { %2184 = vrot.lane.b32.xlu1 %v2146_v36, %s7339_s22  ;;  %2182 = vrot.lane.b32.xlu0 %v2144_v5, %s7339_s22  ;;  %v2157_v36 = vrot.slane %v2103_v48, 2  ;;  %v2106_v5 = vmul.f32 %v8142_v56, %v8336_v19  ;;  %v2170_v7 = vrot.slane %v2111_v44, 2  ;;  %v2116_v44 = vmul.f32 %v8336_v19, %v7977_v27 }
 0x168   : > { %v8390_v18 = vpop.permute.xlu1 %1396  ;;  %v8392_v54 = vpop.permute.xlu0 %1394  ;;  %v2159_v48 = vsel %vm929_vm1, %v2157_v36, %v2158_v2  ;;  %v2114_v2 = vmul.f32 %v8312_v21, %v8336_v19 }
 0x169   : > { %15590 = vst [vmem:[#allocation108_spill] sm:$0xff] %v8390_v18  ;;  %15591 = vst [vmem:[#allocation109_spill] sm:$0xff] %v8392_v54 }
 0x16a   : > { %2188 = vrot.lane.b32.xlu1 %v2151_v35, %s7339_s22  ;;  %2186 = vrot.lane.b32.xlu0 %v2149_v37, %s7339_s22  ;;  %v2110_v35 = vmul.f32 %v8154_v49, %v8336_v19  ;;  %v2165_v37 = vrot.slane %v2108_v53, 2  ;;  %v2113_v53 = vmul.f32 %v8057_v25, %v8336_v19 }
 0x16c   : > { %v8404_v54 = vpop.permute.xlu1 %1400  ;;  %v8406_v38 = vpop.permute.xlu0 %1398  ;;  %v2168_v15 = vrot.slane %v2110_v35, 2 }
 0x16d   : > { %15592 = vst [vmem:[#allocation110_spill] sm:$0xff] %v8404_v54  ;;  %15593 = vst [vmem:[#allocation111_spill] sm:$0xff] %v8406_v38  ;;  %v2162_v38 = vrot.slane %v2106_v5, 2 }
 0x16e   : > { %2192 = vrot.lane.b32.xlu1 %v2156_v42, %s7339_s22  ;;  %2190 = vrot.lane.b32.xlu0 %v2154_v52, %s7339_s22  ;;  %v2166_v42 = vsel %vm929_vm1, %v2163_v10, %v2165_v37  ;;  %v2167_v52 = vrot.slane %v2109_v30, 2  ;;  %v2171_v35 = vsel %vm929_vm1, %v2168_v15, %v2170_v7  ;;  %v2115_v37 = vmul.f32 %v8336_v19, %v7980_v1 }
 0x16f   : > { %v2164_v6 = vsel %vm929_vm1, %v2162_v38, %v2163_v10  ;;  %v2117_v10 = vmul.f32 %v8336_v19, %v8185_v47  ;;  %v2173_v30 = vrot.slane %v2113_v53, 2 }
 0x170   : > { %v8418_v54 = vpop.permute.xlu1 %1404  ;;  %v8420_v18 = vpop.permute.xlu0 %1402  ;;  %v2169_v38 = vsel %vm929_vm1, %v2167_v52, %v2168_v15  ;;  %v2177_v52 = vrot.slane %v2115_v37, 2 }
 0x171   : > { %15594 = vst [vmem:[#allocation112_spill] sm:$0xff] %v8418_v54  ;;  %15595 = vst [vmem:[#allocation113_spill] sm:$0xff] %v8420_v18  ;;  %v2180_v15 = vrot.slane %v2117_v10, 2 }
 0x172   : > { %2196 = vrot.lane.b32.xlu1 %v2161_v63, %s7339_s22  ;;  %2194 = vrot.lane.b32.xlu0 %v2159_v48, %s7339_s22  ;;  %v2175_v63 = vrot.slane %v2114_v2, 2  ;;  %v2172_v48 = vrot.slane %v2112_v51, 2 }
 0x174   : > { %v8432_v36 = vpop.permute.xlu1 %1408  ;;  %v8434_v5 = vpop.permute.xlu0 %1406  ;;  %v2176_v53 = vsel %vm929_vm1, %v2173_v30, %v2175_v63  ;;  %v2174_v2 = vsel %vm929_vm1, %v2172_v48, %v2173_v30 }
 0x175   : > { %15596 = vst [vmem:[#allocation114_spill] sm:$0xff] %v8432_v36  ;;  %15597 = vst [vmem:[#allocation115_spill] sm:$0xff] %v8434_v5  ;;  %v8446_v5 = vstv %s6984_s6  ;;  %s11799_s6 = sld [smem:[#allocation2 + $0x1b]] }
 0x176   : > { %2200 = vrot.lane.b32.xlu1 %v2166_v42, %s7339_s22  ;;  %2198 = vrot.lane.b32.xlu0 %v2164_v6, %s7339_s22  ;;  %v2178_v42 = vrot.slane %v2116_v44, 2  ;;  %v2249_v6 = vmul.f32 %v8048_v22, %v8446_v5  ;;  %v2250_v19 = vmul.f32 %v8210_v55, %v8446_v5  ;;  %v2248_v51 = vmul.f32 %v7998_v16, %v8446_v5 }
 0x177   : > { %v2252_v30 = vmul.f32 %v8075_v12, %v8446_v5  ;;  %v2253_v16 = vmul.f32 %v8223_v17, %v8446_v5  ;;  %v2251_v63 = vmul.f32 %v8082_v13, %v8446_v5 }
 0x178   : > { %v8448_v7 = vpop.permute.xlu1 %1478  ;;  %v8450_v36 = vpop.permute.xlu0 %1476  ;;  %v2181_v22 = vsel %vm929_vm1, %v2178_v42, %v2180_v15  ;;  %v2297_v55 = vrot.slane %v2249_v6, 2  ;;  %v2299_v10 = vrot.slane %v2250_v19, 2  ;;  %v2296_v37 = vrot.slane %v2248_v51, 2 }
 0x179   : > { %15598 = vst [vmem:[#allocation116_spill] sm:$0xff] %v8448_v7  ;;  %15599 = vst [vmem:[#allocation117_spill] sm:$0xff] %v8450_v36  ;;  %v2255_v15 = vmul.f32 %v8094_v9, %v8446_v5  ;;  %v2254_v6 = vmul.f32 %v8101_v46, %v8446_v5  ;;  %v2304_v51 = vrot.slane %v2253_v16, 2  ;;  %v2257_v16 = vmul.f32 %v8122_v20, %v8446_v5 }
 0x17a   : > { %2204 = vrot.lane.b32.xlu1 %v2171_v35, %s7339_s22  ;;  %2202 = vrot.lane.b32.xlu0 %v2169_v38, %s7339_s22  ;;  %v2179_v38 = vsel %vm929_vm1, %v2177_v52, %v2178_v42  ;;  %v2300_v42 = vsel %vm929_vm1, %v2297_v55, %v2299_v10  ;;  %v2256_v52 = vmul.f32 %v8244_v3, %v8446_v5 }
 0x17b   : > { %v2298_v19 = vsel %vm929_vm1, %v2296_v37, %v2297_v55  ;;  %v2306_v10 = vrot.slane %v2254_v6, 2  ;;  %v2259_v55 = vmul.f32 %v8261_v32, %v8446_v5 }
 0x17c   : > { %v8462_v44 = vpop.permute.xlu1 %1482  ;;  %v8464_v35 = vpop.permute.xlu0 %1480 }
 0x17d   : > { %15600 = vst [vmem:[#allocation118_spill] sm:$0xff] %v8462_v44  ;;  %15601 = vst [vmem:[#allocation119_spill] sm:$0xff] %v8464_v35  ;;  %v2258_v44 = vmul.f32 %v8111_v4, %v8446_v5 }
 0x17e   : > { %2208 = vrot.lane.b32.xlu1 %v2176_v53, %s7339_s22  ;;  %2206 = vrot.lane.b32.xlu0 %v2174_v2, %s7339_s22  ;;  %v2302_v2 = vrot.slane %v2252_v30, 2 }
 0x17f   : > { %v2312_v6 = vrot.slane %v2258_v44, 2 }
 0x180   : > { %v8476_v48 = vpop.permute.xlu1 %1486  ;;  %v8478_v53 = vpop.permute.xlu0 %1484  ;;  %v2305_v37 = vsel %vm929_vm1, %v2302_v2, %v2304_v51  ;;  %v2311_v51 = vrot.slane %v2257_v16, 2 }
 0x181   : > { %15602 = vst [vmem:[#allocation120_spill] sm:$0xff] %v8476_v48  ;;  %15603 = vst [vmem:[#allocation121_spill] sm:$0xff] %v8478_v53  ;;  %v2301_v53 = vrot.slane %v2251_v63, 2 }
 0x182   : > { %2212 = vrot.lane.b32.xlu1 %v2181_v22, %s7339_s22  ;;  %2210 = vrot.lane.b32.xlu0 %v2179_v38, %s7339_s22  ;;  %v2307_v22 = vrot.slane %v2255_v15, 2  ;;  %v2309_v38 = vrot.slane %v2256_v52, 2 }
 0x183   : > { %v2303_v30 = vsel %vm929_vm1, %v2301_v53, %v2302_v2  ;;  %v2261_v53 = vmul.f32 %v8135_v62, %v8446_v5  ;;  %v2262_v2 = vmul.f32 %v8274_v29, %v8446_v5 }
 0x184   : > { %v8490_v48 = vpop.permute.xlu1 %1490  ;;  %v8492_v35 = vpop.permute.xlu0 %1488  ;;  %v2308_v52 = vsel %vm929_vm1, %v2306_v10, %v2307_v22  ;;  %v2263_v10 = vmul.f32 %v8161_v26, %v8446_v5 }
 0x185   : > { %15604 = vst [vmem:[#allocation122_spill] sm:$0xff] %v8490_v48  ;;  %15605 = vst [vmem:[#allocation123_spill] sm:$0xff] %v8492_v35  ;;  %v2319_v16 = vrot.slane %v2262_v2, 2  ;;  %v2267_v48 = vmul.f32 %v8057_v25, %v8446_v5 }
 0x186   : > { %2338 = vrot.lane.b32.xlu1 %v2300_v42, %s7340_s24  ;;  %2336 = vrot.lane.b32.xlu0 %v2298_v19, %s7340_s24  ;;  %v2310_v42 = vsel %vm929_vm1, %v2307_v22, %v2309_v38  ;;  %v2314_v19 = vrot.slane %v2259_v55, 2  ;;  %v2264_v38 = vmul.f32 %v8154_v49, %v8446_v5  ;;  %v2265_v22 = vmul.f32 %v8295_v41, %v8446_v5 }
 0x187   : > { %v2313_v55 = vsel %vm929_vm1, %v2311_v51, %v2312_v6 }
 0x188   : > { %v8504_v63 = vpop.permute.xlu1 %1494  ;;  %v8506_v15 = vpop.permute.xlu0 %1492  ;;  %v2315_v44 = vsel %vm929_vm1, %v2312_v6, %v2314_v19  ;;  %v2321_v19 = vrot.slane %v2263_v10, 2  ;;  %v2268_v6 = vmul.f32 %v8312_v21, %v8446_v5  ;;  %v2327_v10 = vrot.slane %v2267_v48, 2 }
 0x189   : > { %15606 = vst [vmem:[#allocation124_spill] sm:$0xff] %v8504_v63  ;;  %15607 = vst [vmem:[#allocation125_spill] sm:$0xff] %v8506_v15  ;;  %v2260_v15 = vmul.f32 %v8142_v56, %v8446_v5 }
 0x18a   : > { %2342 = vrot.lane.b32.xlu1 %v2305_v37, %s7340_s24  ;;  %2340 = vrot.lane.b32.xlu0 %v2303_v30, %s7340_s24  ;;  %v2317_v30 = vrot.slane %v2261_v53, 2  ;;  %v2266_v53 = vmul.f32 %v8061_v14, %v8446_v5 }
 0x18c   : > { %v8518_v63 = vpop.permute.xlu1 %1498  ;;  %v8520_v37 = vpop.permute.xlu0 %1496  ;;  %v2320_v51 = vsel %vm929_vm1, %v2317_v30, %v2319_v16  ;;  %v2326_v16 = vrot.slane %v2266_v53, 2 }
 0x18d   : > { %15608 = vst [vmem:[#allocation126_spill] sm:$0xff] %v8518_v63  ;;  %15609 = vst [vmem:[#allocation127_spill] sm:$0xff] %v8520_v37  ;;  %v2316_v37 = vrot.slane %v2260_v15, 2 }
 0x18e   : > { %2346 = vrot.lane.b32.xlu1 %v2310_v42, %s7340_s24  ;;  %2344 = vrot.lane.b32.xlu0 %v2308_v52, %s7340_s24  ;;  %v2322_v42 = vrot.slane %v2264_v38, 2  ;;  %v2324_v52 = vrot.slane %v2265_v22, 2 }
 0x18f   : > { %v2318_v15 = vsel %vm929_vm1, %v2316_v37, %v2317_v30  ;;  %v2270_v37 = vmul.f32 %v8446_v5, %v7977_v27  ;;  %v2271_v30 = vmul.f32 %v8446_v5, %v8185_v47 }
 0x190   : > { %v8532_v63 = vpop.permute.xlu1 %1502  ;;  %v8534_v35 = vpop.permute.xlu0 %1500  ;;  %v2323_v22 = vsel %vm929_vm1, %v2321_v19, %v2322_v42 }
 0x191   : > { %15610 = vst [vmem:[#allocation128_spill] sm:$0xff] %v8532_v63  ;;  %15611 = vst [vmem:[#allocation129_spill] sm:$0xff] %v8534_v35  ;;  %v2334_v19 = vrot.slane %v2271_v30, 2 }
 0x192   : > { %2350 = vrot.lane.b32.xlu1 %v2315_v44, %s7340_s24  ;;  %2348 = vrot.lane.b32.xlu0 %v2313_v55, %s7340_s24  ;;  %v2325_v44 = vsel %vm929_vm1, %v2322_v42, %v2324_v52  ;;  %v2329_v55 = vrot.slane %v2268_v6, 2  ;;  %v2328_v42 = vsel %vm929_vm1, %v2326_v16, %v2327_v10  ;;  %v2332_v52 = vrot.slane %v2270_v37, 2 }
 0x194   : > { %v8546_v2 = vpop.permute.xlu1 %1506  ;;  %v8548_v38 = vpop.permute.xlu0 %1504  ;;  %v2330_v48 = vsel %vm929_vm1, %v2327_v10, %v2329_v55 }
 0x195   : > { %15612 = vst [vmem:[#allocation130_spill] sm:$0xff] %v8546_v2  ;;  %15613 = vst [vmem:[#allocation131_spill] sm:$0xff] %v8548_v38  ;;  %v2269_v38 = vmul.f32 %v8446_v5, %v7980_v1  ;;  %v2335_v5 = vsel %vm929_vm1, %v2332_v52, %v2334_v19 }
 0x196   : > { %2354 = vrot.lane.b32.xlu1 %v2320_v51, %s7340_s24  ;;  %2352 = vrot.lane.b32.xlu0 %v2318_v15, %s7340_s24 }
 0x197   : > { %v2331_v6 = vrot.slane %v2269_v38, 2 }
 0x198   : > { %v8560_v51 = vpop.permute.xlu1 %1754  ;;  %v8562_v15 = vpop.permute.xlu0 %1752 }
 0x199   : > { %15614 = vst [vmem:[#allocation132_spill] sm:$0xff] %v8560_v51  ;;  %15615 = vst [vmem:[#allocation133_spill] sm:$0xff] %v8562_v15  ;;  %v8937_v51 = vstv %s8851_s14  ;;  %s12662_s14 = sld [smem:[#allocation2 + $0x2b]] }
 0x19a   : > { %2358 = vrot.lane.b32.xlu1 %v2325_v44, %s7340_s24  ;;  %2356 = vrot.lane.b32.xlu0 %v2323_v22, %s7340_s24  ;;  %v2333_v44 = vsel %vm929_vm1, %v2331_v6, %v2332_v52  ;;  %v2435_v22 = vstv %s6986_s7  ;;  %s11815_s7 = sld [smem:[#allocation2 + $0x26]] }
 0x19b   : > { %v2437_v38 = vmul.f32 %v8075_v12, %v2435_v22  ;;  %v2436_v10 = vmul.f32 %v8082_v13, %v2435_v22  ;;  %v2439_v30 = vmul.f32 %v8094_v9, %v2435_v22  ;;  %v2441_v19 = vmul.f32 %v8111_v4, %v2435_v22 }
 0x19c   : > { %v8568_v53 = vpop.permute.xlu1 %1758  ;;  %v8570_v2 = vpop.permute.xlu0 %1756  ;;  %v2440_v6 = vmul.f32 %v8122_v20, %v2435_v22 }
 0x19d   : > { %15616 = vst [vmem:[#allocation134_spill] sm:$0xff] %v8568_v53  ;;  %15617 = vst [vmem:[#allocation135_spill] sm:$0xff] %v8570_v2 }
 0x19e   : > { %2362 = vrot.lane.b32.xlu1 %v2330_v48, %s7340_s24  ;;  %2360 = vrot.lane.b32.xlu0 %v2328_v42, %s7340_s24  ;;  %v2438_v48 = vmul.f32 %v8101_v46, %v2435_v22 }
 0x1a0   : > { %v8576_v15 = vpop.permute.xlu1 %1762  ;;  %v8578_v55 = vpop.permute.xlu0 %1760 }
 0x1a1   : > { %15618 = vst [vmem:[#allocation136_spill] sm:$0xff] %v8576_v15  ;;  %15619 = vst [vmem:[#allocation137_spill] sm:$0xff] %v8578_v55 }
 0x1a2   : > { %2366 = vrot.lane.b32.xlu1 %v2335_v5, %s7340_s24  ;;  %2364 = vrot.lane.b32.xlu0 %v2333_v44, %s7340_s24 }
 0x1a4   : > { %v8584_v16 = vpop.permute.xlu1 %1766  ;;  %v8586_v37 = vpop.permute.xlu0 %1764 }
 0x1a5   : > { %15620 = vst [vmem:[#allocation138_spill] sm:$0xff] %v8584_v16  ;;  %15621 = vst [vmem:[#allocation139_spill] sm:$0xff] %v8586_v37 }
 0x1a6   : > { %2470 = vrot.lane.b32.xlu1 %v2437_v38, %s7339_s22  ;;  %2468 = vrot.lane.b32.xlu0 %v2436_v10, %s7339_s22  ;;  %v2443_v38 = vmul.f32 %v8135_v62, %v2435_v22  ;;  %v2442_v10 = vmul.f32 %v8142_v56, %v2435_v22 }
 0x1a8   : > { %v8592_v42 = vpop.permute.xlu1 %1770  ;;  %v8594_v52 = vpop.permute.xlu0 %1768 }
 0x1a9   : > { %15622 = vst [vmem:[#allocation140_spill] sm:$0xff] %v8592_v42  ;;  %15623 = vst [vmem:[#allocation141_spill] sm:$0xff] %v8594_v52 }
 0x1aa   : > { %2474 = vrot.lane.b32.xlu1 %v2439_v30, %s7339_s22  ;;  %2472 = vrot.lane.b32.xlu0 %v2438_v48, %s7339_s22  ;;  %v2445_v48 = vmul.f32 %v8154_v49, %v2435_v22 }
 0x1ac   : > { %v8600_v5 = vpop.permute.xlu1 %1774  ;;  %v8602_v44 = vpop.permute.xlu0 %1772 }
 0x1ad   : > { %15624 = vst [vmem:[#allocation142_spill] sm:$0xff] %v8600_v5  ;;  %15625 = vst [vmem:[#allocation143_spill] sm:$0xff] %v8602_v44 }
 0x1ae   : > { %2478 = vrot.lane.b32.xlu1 %v2441_v19, %s7339_s22  ;;  %2476 = vrot.lane.b32.xlu0 %v2440_v6, %s7339_s22  ;;  %v2444_v19 = vmul.f32 %v8161_v26, %v2435_v22 }
 0x1b0   : > { %v8608_v52 = vpop.permute.xlu1 %1778  ;;  %v8610_v30 = vpop.permute.xlu0 %1776 }
 0x1b1   : > { %15626 = vst [vmem:[#allocation144_spill] sm:$0xff] %v8608_v52  ;;  %15627 = vst [vmem:[#allocation145_spill] sm:$0xff] %v8610_v30  ;;  %v2447_v30 = vmul.f32 %v8057_v25, %v2435_v22 }
 0x1b2   : > { %2482 = vrot.lane.b32.xlu1 %v2443_v38, %s7339_s22  ;;  %2480 = vrot.lane.b32.xlu0 %v2442_v10, %s7339_s22  ;;  %v2446_v38 = vmul.f32 %v8061_v14, %v2435_v22 }
 0x1b4   : > { %v8616_v44 = vpop.permute.xlu1 %1782  ;;  %v8618_v6 = vpop.permute.xlu0 %1780 }
 0x1b5   : > { %15628 = vst [vmem:[#allocation146_spill] sm:$0xff] %v8616_v44  ;;  %15629 = vst [vmem:[#allocation147_spill] sm:$0xff] %v8618_v6  ;;  %v2449_v44 = vmul.f32 %v2435_v22, %v7977_v27  ;;  %v2448_v6 = vmul.f32 %v2435_v22, %v7980_v1 }
 0x1b6   : > { %2486 = vrot.lane.b32.xlu1 %v2445_v48, %s7339_s22  ;;  %2484 = vrot.lane.b32.xlu0 %v2444_v19, %s7339_s22  ;;  %v8633_v48 = vld [vmem:[%s7384_s21 + $0xe0] sm:$0xff]  ;;  %v8636_v19 = vld [vmem:[%s7384_s21 + $0xd8] sm:$0xff] }
 0x1b8   : > { %v8624_v10 = vpop.permute.xlu1 %1908  ;;  %v8626_v52 = vpop.permute.xlu0 %1906 }
 0x1b9   : > { %15630 = vst [vmem:[#allocation148_spill] sm:$0xff] %v8624_v10  ;;  %15631 = vst [vmem:[#allocation149_spill] sm:$0xff] %v8626_v52  ;;  %v2533_v52 = vstv %s6987_s8  ;;  %s11943_s8 = sld [smem:[#allocation2 + $0x1e]] }
 0x1ba   : > { %2490 = vrot.lane.b32.xlu1 %v2447_v30, %s7339_s22  ;;  %2488 = vrot.lane.b32.xlu0 %v2446_v38, %s7339_s22  ;;  %v2451_v30 = vmul.f32 %v2435_v22, %v8633_v48  ;;  %v2450_v38 = vmul.f32 %v2435_v22, %v8636_v19  ;;  %v2537_v22 = vmul.f32 %v8094_v9, %v2533_v52 }
 0x1bc   : > { %v8638_v5 = vpop.permute.xlu1 %1912  ;;  %v8640_v42 = vpop.permute.xlu0 %1910 }
 0x1bd   : > { %15632 = vst [vmem:[#allocation150_spill] sm:$0xff] %v8638_v5  ;;  %15633 = vst [vmem:[#allocation151_spill] sm:$0xff] %v8640_v42  ;;  %v2535_v5 = vmul.f32 %v8075_v12, %v2533_v52  ;;  %v2534_v42 = vmul.f32 %v8082_v13, %v2533_v52 }
 0x1be   : > { %2494 = vrot.lane.b32.xlu1 %v2449_v44, %s7339_s22  ;;  %2492 = vrot.lane.b32.xlu0 %v2448_v6, %s7339_s22 }
 0x1c0   : > { %v8646_v27 = vpop.permute.xlu1 %1916  ;;  %v8648_v1 = vpop.permute.xlu0 %1914 }
 0x1c1   : > { %15634 = vst [vmem:[#allocation152_spill] sm:$0xff] %v8646_v27  ;;  %15635 = vst [vmem:[#allocation153_spill] sm:$0xff] %v8648_v1  ;;  %v2536_v1 = vmul.f32 %v8101_v46, %v2533_v52 }
 0x1c2   : > { %2498 = vrot.lane.b32.xlu1 %v2451_v30, %s7339_s22  ;;  %2496 = vrot.lane.b32.xlu0 %v2450_v38, %s7339_s22  ;;  %v2539_v38 = vmul.f32 %v8111_v4, %v2533_v52 }
 0x1c4   : > { %v8654_v44 = vpop.permute.xlu1 %1920  ;;  %v8656_v6 = vpop.permute.xlu0 %1918 }
 0x1c5   : > { %15636 = vst [vmem:[#allocation154_spill] sm:$0xff] %v8654_v44  ;;  %15637 = vst [vmem:[#allocation155_spill] sm:$0xff] %v8656_v6  ;;  %v2538_v6 = vmul.f32 %v8122_v20, %v2533_v52 }
 0x1c6   : > { %2568 = vrot.lane.b32.xlu1 %v2535_v5, %s7340_s24  ;;  %2566 = vrot.lane.b32.xlu0 %v2534_v42, %s7340_s24  ;;  %v2541_v42 = vmul.f32 %v8135_v62, %v2533_v52 }
 0x1c8   : > { %v8662_v27 = vpop.permute.xlu1 %1924  ;;  %v8664_v30 = vpop.permute.xlu0 %1922 }
 0x1c9   : > { %15638 = vst [vmem:[#allocation156_spill] sm:$0xff] %v8662_v27  ;;  %15639 = vst [vmem:[#allocation157_spill] sm:$0xff] %v8664_v30  ;;  %v2540_v30 = vmul.f32 %v8142_v56, %v2533_v52 }
 0x1ca   : > { %2572 = vrot.lane.b32.xlu1 %v2537_v22, %s7340_s24  ;;  %2570 = vrot.lane.b32.xlu0 %v2536_v1, %s7340_s24 }
 0x1cc   : > { %v8670_v44 = vpop.permute.xlu1 %1928  ;;  %v8672_v5 = vpop.permute.xlu0 %1926 }
 0x1cd   : > { %15640 = vst [vmem:[#allocation158_spill] sm:$0xff] %v8670_v44  ;;  %15641 = vst [vmem:[#allocation159_spill] sm:$0xff] %v8672_v5  ;;  %v2543_v5 = vmul.f32 %v8154_v49, %v2533_v52 }
 0x1ce   : > { %2576 = vrot.lane.b32.xlu1 %v2539_v38, %s7340_s24  ;;  %2574 = vrot.lane.b32.xlu0 %v2538_v6, %s7340_s24  ;;  %v2542_v38 = vmul.f32 %v8161_v26, %v2533_v52 }
 0x1d0   : > { %v8678_v22 = vpop.permute.xlu1 %1932  ;;  %v8680_v1 = vpop.permute.xlu0 %1930 }
 0x1d1   : > { %15642 = vst [vmem:[#allocation160_spill] sm:$0xff] %v8678_v22  ;;  %15643 = vst [vmem:[#allocation161_spill] sm:$0xff] %v8680_v1  ;;  %v2545_v1 = vmul.f32 %v8057_v25, %v2533_v52  ;;  %v8694_v22 = vstv %s6989_s11  ;;  %s12030_s11 = sld [smem:[#allocation2 + $0x28]] }
 0x1d2   : > { %2580 = vrot.lane.b32.xlu1 %v2541_v42, %s7340_s24  ;;  %2578 = vrot.lane.b32.xlu0 %v2540_v30, %s7340_s24  ;;  %v2544_v42 = vmul.f32 %v8061_v14, %v2533_v52  ;;  %v2755_v10 = vmul.f32 %v8075_v12, %v8694_v22  ;;  %v8711_v14 = vld [vmem:[%s7384_s21 + $0xc0] sm:$0xff]  ;;  %v2758_v55 = vmul.f32 %v8094_v9, %v8694_v22 }
 0x1d3   : > { %v2762_v9 = vmul.f32 %v8261_v32, %v8694_v22 }
 0x1d4   : > { %v8686_v6 = vpop.permute.xlu1 %1936  ;;  %v8688_v44 = vpop.permute.xlu0 %1934 }
 0x1d5   : > { %15644 = vst [vmem:[#allocation162_spill] sm:$0xff] %v8686_v6  ;;  %15645 = vst [vmem:[#allocation163_spill] sm:$0xff] %v8688_v44  ;;  %v2756_v44 = vmul.f32 %v8223_v17, %v8694_v22  ;;  %v2803_v6 = vrot.slane %v2755_v10, 1 }
 0x1d6   : > { %2584 = vrot.lane.b32.xlu1 %v2543_v5, %s7340_s24  ;;  %2582 = vrot.lane.b32.xlu0 %v2542_v38, %s7340_s24  ;;  %v8707_v5 = vld [vmem:[%s7384_s21 + $0xc8] sm:$0xff]  ;;  %v2546_v38 = vmul.f32 %v8711_v14, %v2533_v52 }
 0x1d7   : > { %v2547_v25 = vmul.f32 %v8707_v5, %v2533_v52  ;;  %v2805_v37 = vrot.slane %v2756_v44, 1 }
 0x1d8   : > { %v8696_v30 = vpop.permute.xlu1 %2184  ;;  %v8698_v27 = vpop.permute.xlu0 %2182 }
 0x1d9   : > { %15646 = vst [vmem:[#allocation164_spill] sm:$0xff] %v8696_v30  ;;  %15647 = vst [vmem:[#allocation165_spill] sm:$0xff] %v8698_v27  ;;  %v2754_v27 = vmul.f32 %v8082_v13, %v8694_v22  ;;  %v2759_v13 = vmul.f32 %v8244_v3, %v8694_v22 }
 0x1da   : > { %2588 = vrot.lane.b32.xlu1 %v2545_v1, %s7340_s24  ;;  %2586 = vrot.lane.b32.xlu0 %v2544_v42, %s7340_s24  ;;  %v2549_v1 = vmul.f32 %v2533_v52, %v8633_v48  ;;  %v2548_v42 = vmul.f32 %v2533_v52, %v8636_v19  ;;  %v2761_v52 = vmul.f32 %v8111_v4, %v8694_v22 }
 0x1db   : > { %v2802_v16 = vrot.slane %v2754_v27, 1  ;;  %v2760_v27 = vmul.f32 %v8122_v20, %v8694_v22  ;;  %v2765_v4 = vmul.f32 %v8274_v29, %v8694_v22 }
 0x1dc   : > { %v8716_v30 = vpop.permute.xlu1 %2188  ;;  %v8718_v12 = vpop.permute.xlu0 %2186  ;;  %v2813_v20 = vrot.slane %v2761_v52, 1  ;;  %v2768_v52 = vmul.f32 %v8295_v41, %v8694_v22 }
 0x1dd   : > { %15648 = vst [vmem:[#allocation166_spill] sm:$0xff] %v8716_v30  ;;  %15649 = vst [vmem:[#allocation167_spill] sm:$0xff] %v8718_v12  ;;  %v2757_v12 = vmul.f32 %v8101_v46, %v8694_v22  ;;  %v2804_v46 = vsel %vm498_vm0, %v2802_v16, %v2803_v6  ;;  %v2812_v16 = vrot.slane %v2760_v27, 1 }
 0x1de   : > { %2592 = vrot.lane.b32.xlu1 %v2547_v25, %s7340_s24  ;;  %2590 = vrot.lane.b32.xlu0 %v2546_v38, %s7340_s24  ;;  %v2806_v25 = vsel %vm498_vm0, %v2803_v6, %v2805_v37  ;;  %v2808_v38 = vrot.slane %v2758_v55, 1 }
 0x1e0   : > { %v8730_v10 = vpop.permute.xlu1 %2192  ;;  %v8732_v44 = vpop.permute.xlu0 %2190 }
 0x1e1   : > { %15650 = vst [vmem:[#allocation168_spill] sm:$0xff] %v8730_v10  ;;  %15651 = vst [vmem:[#allocation169_spill] sm:$0xff] %v8732_v44  ;;  %v2810_v10 = vrot.slane %v2759_v13, 1  ;;  %v2807_v44 = vrot.slane %v2757_v12, 1  ;;  %v2763_v12 = vmul.f32 %v8142_v56, %v8694_v22  ;;  %v2767_v56 = vmul.f32 %v8154_v49, %v8694_v22 }
 0x1e2   : > { %2596 = vrot.lane.b32.xlu1 %v2549_v1, %s7340_s24  ;;  %2594 = vrot.lane.b32.xlu0 %v2548_v42, %s7340_s24  ;;  %v2764_v1 = vmul.f32 %v8135_v62, %v8694_v22  ;;  %v2815_v42 = vrot.slane %v2762_v9, 1  ;;  %v2766_v9 = vmul.f32 %v8161_v26, %v8694_v22 }
 0x1e3   : > { %v2811_v55 = vsel %vm498_vm0, %v2808_v38, %v2810_v10  ;;  %v2809_v6 = vsel %vm498_vm0, %v2807_v44, %v2808_v38  ;;  %v2814_v10 = vsel %vm498_vm0, %v2812_v16, %v2813_v20  ;;  %v2817_v44 = vrot.slane %v2763_v12, 1 }
 0x1e4   : > { %v8744_v30 = vpop.permute.xlu1 %2196  ;;  %v8746_v37 = vpop.permute.xlu0 %2194  ;;  %v2825_v16 = vrot.slane %v2768_v52, 1 }
 0x1e5   : > { %15652 = vst [vmem:[#allocation170_spill] sm:$0xff] %v8744_v30  ;;  %15653 = vst [vmem:[#allocation171_spill] sm:$0xff] %v8746_v37  ;;  %v2818_v37 = vrot.slane %v2764_v1, 1  ;;  %v2820_v30 = vrot.slane %v2765_v4, 1  ;;  %v8780_v1 = vld [vmem:[%s7384_s21 + $0xb0] sm:$0xff]  ;;  %v2771_v4 = vmul.f32 %v8312_v21, %v8694_v22  ;;  %v2774_v21 = vmul.f32 %v8694_v22, %v8185_v47 }
 0x1e6   : > { %2844 = vrot.lane.b32.xlu1 %v2806_v25, %s7339_s22  ;;  %2842 = vrot.lane.b32.xlu0 %v2804_v46, %s7339_s22  ;;  %v2816_v25 = vsel %vm498_vm0, %v2813_v20, %v2815_v42  ;;  %v2770_v49 = vmul.f32 %v8780_v1, %v8694_v22  ;;  %v8787_v20 = vld [vmem:[%s7384_s21 + $0xa8] sm:$0xff] }
 0x1e7   : > { %v2821_v38 = vsel %vm498_vm0, %v2818_v37, %v2820_v30  ;;  %v2769_v26 = vmul.f32 %v8787_v20, %v8694_v22  ;;  %v2819_v42 = vsel %vm498_vm0, %v2817_v44, %v2818_v37  ;;  %v2823_v30 = vrot.slane %v2767_v56, 1 }
 0x1e8   : > { %v8758_v13 = vpop.permute.xlu1 %2200  ;;  %v8760_v62 = vpop.permute.xlu0 %2198  ;;  %v2828_v37 = vrot.slane %v2770_v49, 1  ;;  %v2772_v56 = vmul.f32 %v8711_v14, %v8694_v22 }
 0x1e9   : > { %15654 = vst [vmem:[#allocation172_spill] sm:$0xff] %v8758_v13  ;;  %15655 = vst [vmem:[#allocation173_spill] sm:$0xff] %v8760_v62  ;;  %v2827_v44 = vrot.slane %v2769_v26, 1  ;;  %v2826_v52 = vsel %vm498_vm0, %v2823_v30, %v2825_v16  ;;  %v2775_v16 = vmul.f32 %v8694_v22, %v8636_v19 }
 0x1ea   : > { %2848 = vrot.lane.b32.xlu1 %v2811_v55, %s7339_s22  ;;  %2846 = vrot.lane.b32.xlu0 %v2809_v6, %s7339_s22  ;;  %v2822_v55 = vrot.slane %v2766_v9, 1  ;;  %v2832_v26 = vrot.slane %v2772_v56, 1 }
 0x1ec   : > { %v8772_v27 = vpop.permute.xlu1 %2204  ;;  %v8774_v46 = vpop.permute.xlu0 %2202  ;;  %v2824_v9 = vsel %vm498_vm0, %v2822_v55, %v2823_v30  ;;  %v8825_v55 = vstv %s6990_s12  ;;  %s12374_s12 = sld [smem:[#allocation2 + $0x29]] }
 0x1ed   : > { %15656 = vst [vmem:[#allocation174_spill] sm:$0xff] %v8772_v27  ;;  %15657 = vst [vmem:[#allocation175_spill] sm:$0xff] %v8774_v46  ;;  %v8811_v46 = vld [vmem:[%s7384_s21 + $0xe8] sm:$0x3]  ;;  %v2910_v56 = vmul.f32 %v8223_v17, %v8825_v55  ;;  %v2919_v36 = vmul.f32 %v8274_v29, %v8825_v55  ;;  %v2921_v59 = vmul.f32 %v8985_v34, %v8825_v55 }
 0x1ee   : > { %2852 = vrot.lane.b32.xlu1 %v2816_v25, %s7339_s22  ;;  %2850 = vrot.lane.b32.xlu0 %v2814_v10, %s7339_s22  ;;  %v2773_v25 = vmul.f32 %v8707_v5, %v8694_v22  ;;  %v2830_v10 = vrot.slane %v2771_v4, 1  ;;  %v2829_v4 = vsel %vm498_vm0, %v2827_v44, %v2828_v37  ;;  %v2777_v30 = vmul.f32 %v8694_v22, %v8811_v46  ;;  %v8836_v44 = vld [vmem:[%s7384_s21 + $0x38] sm:$0xff] }
 0x1ef   : > { %v2922_v40 = vmul.f32 %v8295_v41, %v8825_v55  ;;  %v2974_v28 = vrot.slane %v2919_v36, 1  ;;  %v2920_v24 = vmul.f32 %v8998_v39, %v8825_v55  ;;  %v457_v60 = vmul.f32 %v8836_v44, %v8937_v51 }
 0x1f0   : > { %v8792_v6 = vpop.permute.xlu1 %2208  ;;  %v8794_v12 = vpop.permute.xlu0 %2206  ;;  %v2833_v47 = vrot.slane %v2773_v25, 1  ;;  %v2831_v49 = vsel %vm498_vm0, %v2828_v37, %v2830_v10 }
 0x1f1   : > { %15658 = vst [vmem:[#allocation176_spill] sm:$0xff] %v8792_v6  ;;  %15659 = vst [vmem:[#allocation177_spill] sm:$0xff] %v8794_v12 }
 0x1f2   : > { %2856 = vrot.lane.b32.xlu1 %v2821_v38, %s7339_s22  ;;  %2854 = vrot.lane.b32.xlu0 %v2819_v42, %s7339_s22  ;;  %v2835_v38 = vrot.slane %v2774_v21, 1  ;;  %v2776_v42 = vmul.f32 %v8694_v22, %v8633_v48  ;;  %v2834_v10 = vsel %vm498_vm0, %v2832_v26, %v2833_v47  ;;  %v2909_v22 = vmul.f32 %v8836_v44, %v8825_v55  ;;  %v8854_v26 = vld [vmem:[%s7384_s21 + $0x50] sm:$0xff] }
 0x1f3   : > { %v2912_v17 = vmul.f32 %v8854_v26, %v8825_v55 }
 0x1f4   : > { %v8806_v12 = vpop.permute.xlu1 %2212  ;;  %v8808_v6 = vpop.permute.xlu0 %2210  ;;  %v2836_v37 = vsel %vm498_vm0, %v2833_v47, %v2835_v38  ;;  %v8843_v38 = vld [vmem:[%s7384_s21 + $0x30] sm:$0xff] }
 0x1f5   : > { %15660 = vst [vmem:[#allocation178_spill] sm:$0xff] %v8806_v12  ;;  %15661 = vst [vmem:[#allocation179_spill] sm:$0xff] %v8808_v6  ;;  %v2837_v6 = vrot.slane %v2775_v16, 1  ;;  %v2959_v16 = vrot.slane %v2910_v56, 1  ;;  %v8868_v12 = vstv %s8817_s13  ;;  %v8877_v56 = vld [vmem:[%s7384_s21 + $0x18] sm:$0xff]  ;;  %s12475_s13 = sld [smem:[#allocation2 + $0x21]] }
 0x1f6   : > { %2860 = vrot.lane.b32.xlu1 %v2826_v52, %s7339_s22  ;;  %2858 = vrot.lane.b32.xlu0 %v2824_v9, %s7339_s22  ;;  %v2838_v52 = vrot.slane %v2776_v42, 1  ;;  %v2840_v9 = vrot.slane %v2777_v30, 1  ;;  %v2913_v42 = vmul.f32 %v8244_v3, %v8825_v55  ;;  %v2957_v30 = vrot.slane %v2909_v22, 1 }
 0x1f7   : > { %v8881_v62 = vmul.f32 %v8877_v56, %v8868_v12  ;;  %v8930_v2 = vmul.f32 %v8843_v38, %v8868_v12  ;;  %v8934_v53 = vmul.f32 %v8854_v26, %v8868_v12  ;;  %v9004_v23 = vmul.f32 %v8985_v34, %v8868_v12 }
 0x1f8   : > { %v8827_v25 = vpop.permute.xlu1 %2338  ;;  %v8829_v21 = vpop.permute.xlu0 %2336  ;;  %v2964_v22 = vrot.slane %v2913_v42, 1  ;;  %v2916_v42 = vmul.f32 %v8261_v32, %v8825_v55 }
 0x1f9   : > { %15662 = vst [vmem:[#allocation180_spill] sm:$0xff] %v8827_v25  ;;  %15663 = vst [vmem:[#allocation181_spill] sm:$0xff] %v8829_v21  ;;  %v2841_v21 = vsel %vm498_vm0, %v2838_v52, %v2840_v9  ;;  %v2839_v25 = vsel %vm498_vm0, %v2837_v6, %v2838_v52  ;;  %v2960_v6 = vsel %vm498_vm0, %v2957_v30, %v2959_v16 }
 0x1fa   : > { %2864 = vrot.lane.b32.xlu1 %v2831_v49, %s7339_s22  ;;  %2862 = vrot.lane.b32.xlu0 %v2829_v4, %s7339_s22  ;;  %v2908_v49 = vmul.f32 %v8843_v38, %v8825_v55  ;;  %15673 = vst [vmem:[#allocation191_spill] sm:$0xff] %v8930_v2  ;;  %15674 = vst [vmem:[#allocation192_spill] sm:$0xff] %v8934_v53  ;;  %v2969_v54 = vrot.slane %v2916_v42, 1  ;;  %v2931_v2 = vmul.f32 %v8825_v55, %v8811_v46 }
 0x1fb   : > { %15682 = vst [vmem:[#allocation200_spill] sm:$0xff] %v9004_v23 }
 0x1fc   : > { %v8847_v4 = vpop.permute.xlu1 %2342  ;;  %v8849_v47 = vpop.permute.xlu0 %2340  ;;  %v2956_v3 = vrot.slane %v2908_v49, 1  ;;  %v8888_v49 = vld [vmem:[%s7384_s21 + $0x68] sm:$0xff] }
 0x1fd   : > { %15664 = vst [vmem:[#allocation182_spill] sm:$0xff] %v8847_v4  ;;  %15665 = vst [vmem:[#allocation183_spill] sm:$0xff] %v8849_v47  ;;  %v8863_v4 = vld [vmem:[%s7384_s21 + $0x48] sm:$0xff] }
 0x1fe   : > { %2868 = vrot.lane.b32.xlu1 %v2836_v37, %s7339_s22  ;;  %2866 = vrot.lane.b32.xlu0 %v2834_v10, %s7339_s22  ;;  %v2911_v47 = vmul.f32 %v8863_v4, %v8825_v55  ;;  %v2962_v10 = vrot.slane %v2912_v17, 1  ;;  %v2958_v9 = vsel %vm498_vm0, %v2956_v3, %v2957_v30  ;;  %v2915_v17 = vmul.f32 %v8888_v49, %v8825_v55  ;;  %v8907_v30 = vld [vmem:[%s7384_s21 + $0x20] sm:$0xff]  ;;  %v8914_v3 = vld [vmem:[%s7384_s21 + $0x8] sm:$0xff] }
 0x1ff   : > { %v8911_v16 = vmul.f32 %v8907_v30, %v8868_v12  ;;  %v8918_v32 = vmul.f32 %v8914_v3, %v8868_v12  ;;  %v8965_v29 = vmul.f32 %v8914_v3, %v8937_v51 }
 0x200   : > { %v8872_v27 = vpop.permute.xlu1 %2346  ;;  %v8874_v37 = vpop.permute.xlu0 %2344  ;;  %v2961_v52 = vrot.slane %v2911_v47, 1  ;;  %v2965_v35 = vsel %vm498_vm0, %v2962_v10, %v2964_v22  ;;  %v2967_v18 = vrot.slane %v2915_v17, 1  ;;  %v2917_v22 = vmul.f32 %v8951_v50, %v8825_v55 }
 0x201   : > { %15666 = vst [vmem:[#allocation184_spill] sm:$0xff] %v8872_v27  ;;  %15667 = vst [vmem:[#allocation185_spill] sm:$0xff] %v8874_v37  ;;  %v8895_v37 = vld [vmem:[%s7384_s21 + $0x60] sm:$0xff]  ;;  %v8922_v27 = vmul.f32 %v8836_v44, %v8868_v12 }
 0x202   : > { %2872 = vrot.lane.b32.xlu1 %v2841_v21, %s7339_s22  ;;  %2870 = vrot.lane.b32.xlu0 %v2839_v25, %s7339_s22  ;;  %v2914_v21 = vmul.f32 %v8895_v37, %v8825_v55  ;;  %v8900_v25 = vld [vmem:[%s7384_s21] sm:$0xff]  ;;  %15668 = vst [vmem:[#allocation186_spill] sm:$0xff] %v8911_v16  ;;  %15669 = vst [vmem:[#allocation187_spill] sm:$0xff] %v8918_v32  ;;  %v2970_v41 = vsel %vm498_vm0, %v2967_v18, %v2969_v54 }
 0x203   : > { %v8904_v47 = vmul.f32 %v8900_v25, %v8868_v12  ;;  %15670 = vst [vmem:[#allocation188_spill] sm:$0xff] %v8922_v27  ;;  %v450_v36 = vmul.f32 %v8900_v25, %v8937_v51  ;;  %v9021_v54 = vmul.f32 %v8998_v39, %v8868_v12 }
 0x204   : > { %v8924_v13 = vpop.permute.xlu1 %2350  ;;  %v8926_v15 = vpop.permute.xlu0 %2348  ;;  %v2966_v7 = vrot.slane %v2914_v21, 1  ;;  %v8978_v21 = vmul.f32 %v8895_v37, %v8868_v12 }
 0x205   : > { %15671 = vst [vmem:[#allocation189_spill] sm:$0xff] %v8924_v13  ;;  %15672 = vst [vmem:[#allocation190_spill] sm:$0xff] %v8926_v15  ;;  %v2963_v13 = vsel %vm498_vm0, %v2961_v52, %v2962_v10  ;;  %v8944_v15 = vld [vmem:[%s7384_s21 + $0x80] sm:$0xff]  ;;  %v8957_v10 = vmul.f32 %v8863_v4, %v8868_v12  ;;  %v8968_v52 = vld [vmem:[%s7384_s21 + $0x10] sm:$0x3] }
 0x206   : > { %2998 = vrot.lane.b32.xlu1 %v2960_v6, %s7340_s24  ;;  %2996 = vrot.lane.b32.xlu0 %v2958_v9, %s7340_s24  ;;  %v2918_v63 = vmul.f32 %v8944_v15, %v8825_v55  ;;  %v8961_v6 = vmul.f32 %v8888_v49, %v8868_v12  ;;  %v452_v9 = vmul.f32 %v8968_v52, %v8937_v51 }
 0x207   : > { %15675 = vst [vmem:[#allocation193_spill] sm:$0xff] %v8957_v10  ;;  %15679 = vst [vmem:[#allocation197_spill] sm:$0xff] %v8978_v21  ;;  %v8982_v0 = vmul.f32 %v8944_v15, %v8868_v12 }
 0x208   : > { %15676 = vst [vmem:[#allocation194_spill] sm:$0xff] %v8961_v6  ;;  %v8972_v17 = vpop.permute.xlu1 %2354  ;;  %v8974_v42 = vpop.permute.xlu0 %2352  ;;  %15685 = vst [vmem:[#allocation203_spill] sm:$0xff] %v9021_v54  ;;  %v2976_v54 = vrot.slane %v2920_v24, 1  ;;  %v9066_v6 = vld [vmem:[%s7384_s21 + $0x40] sm:$0x3] }
 0x209   : > { %15677 = vst [vmem:[#allocation195_spill] sm:$0xff] %v8972_v17  ;;  %15678 = vst [vmem:[#allocation196_spill] sm:$0xff] %v8974_v42  ;;  %v8993_v17 = vmul.f32 %v8951_v50, %v8868_v12  ;;  %v2972_v42 = vrot.slane %v2918_v63, 1  ;;  %v9013_v63 = vmul.f32 %v8907_v30, %v8937_v51 }
 0x20a   : > { %15680 = vst [vmem:[#allocation198_spill] sm:$0xff] %v8982_v0  ;;  %3002 = vrot.lane.b32.xlu1 %v2965_v35, %s7340_s24  ;;  %3000 = vrot.lane.b32.xlu0 %v2963_v13, %s7340_s24  ;;  %v2971_v0 = vrot.slane %v2917_v22, 1  ;;  %v502_v13 = vrot.slane %v452_v9, 1  ;;  %v2979_v22 = vrot.slane %v2922_v40, 1  ;;  %v9029_v9 = vmul.f32 %v8787_v20, %v8868_v12  ;;  %v9032_v35 = vld [vmem:[%s7384_s21 + $0x28] sm:$0x3] }
 0x20b   : > { %15681 = vst [vmem:[#allocation199_spill] sm:$0xff] %v8993_v17  ;;  %v2968_v17 = vsel %vm498_vm0, %v2966_v7, %v2967_v18  ;;  %v9025_v18 = vmul.f32 %v8780_v1, %v8868_v12  ;;  %v2977_v7 = vrot.slane %v2921_v59, 1  ;;  %15688 = vst [vmem:[#allocation206_spill] sm:$0xff] %v9032_v35  ;;  %v2924_v40 = vmul.f32 %v8780_v1, %v8825_v55  ;;  %v9043_v12 = vld [vmem:[%s7384_s21 + $0xb8] sm:$0x3] }
 0x20c   : > { %v9015_v61 = vpop.permute.xlu1 %2358  ;;  %v9017_v21 = vpop.permute.xlu0 %2356  ;;  %15687 = vst [vmem:[#allocation205_spill] sm:$0xff] %v9029_v9  ;;  %v2973_v59 = vsel %vm498_vm0, %v2971_v0, %v2972_v42  ;;  %v2925_v9 = vmul.f32 %v9043_v12, %v8825_v55  ;;  %v505_v24 = vrot.slane %v9013_v63, 1  ;;  %v453_v0 = vmul.f32 %v8877_v56, %v8937_v51 }
 0x20d   : > { %15683 = vst [vmem:[#allocation201_spill] sm:$0xff] %v9015_v61  ;;  %15684 = vst [vmem:[#allocation202_spill] sm:$0xff] %v9017_v21  ;;  %v455_v61 = vmul.f32 %v9032_v35, %v8937_v51  ;;  %v2975_v21 = vsel %vm498_vm0, %v2972_v42, %v2974_v28  ;;  %v499_v28 = vrot.slane %v450_v36, 1  ;;  %v456_v36 = vmul.f32 %v8843_v38, %v8937_v51 }
 0x20e   : > { %15686 = vst [vmem:[#allocation204_spill] sm:$0xff] %v9025_v18  ;;  %3006 = vrot.lane.b32.xlu1 %v2970_v41, %s7340_s24  ;;  %3004 = vrot.lane.b32.xlu0 %v2968_v17, %s7340_s24  ;;  %v2923_v18 = vmul.f32 %v8787_v20, %v8825_v55  ;;  %v15689_v41 = vrot.slane %v8965_v29, 1  ;;  %v2980_v63 = vsel %vm498_vm0, %v2977_v7, %v2979_v22  ;;  %v2982_v10 = vrot.slane %v2924_v40, 1 }
 0x20f   : > { %v2984_v43 = vrot.slane %v2925_v9, 1  ;;  %v504_v22 = vrot.slane %v453_v0, 1  ;;  %v2930_v0 = vmul.f32 %v8825_v55, %v8633_v48  ;;  %v509_v31 = vrot.slane %v456_v36, 1 }
 0x210   : > { %v9052_v17 = vsel %vm498_vm0, %v15689_v41, %v502_v13  ;;  %v9057_v42 = vpop.permute.xlu1 %2362  ;;  %v9059_v23 = vpop.permute.xlu0 %2360  ;;  %v458_v13 = vmul.f32 %v9066_v6, %v8937_v51  ;;  %v507_v41 = vrot.slane %v455_v61, 1  ;;  %v2981_v53 = vrot.slane %v2923_v18, 1 }
 0x211   : > { %15690 = vst [vmem:[#allocation207_spill] sm:$0xff] %v9052_v17  ;;  %15691 = vst [vmem:[#allocation208_spill] sm:$0xff] %v9057_v42  ;;  %v2927_v42 = vmul.f32 %v8707_v5, %v8825_v55  ;;  %v9079_v17 = vld [vmem:[%s7384_s21 + $0xd0] sm:$0x3]  ;;  %v2926_v61 = vmul.f32 %v8711_v14, %v8825_v55  ;;  %v510_v18 = vrot.slane %v457_v60, 1  ;;  %v15696_v60 = vrot.slane %v8965_v29, 1 }
 0x212   : > { %15692 = vst [vmem:[#allocation209_spill] sm:$0xff] %v9059_v23  ;;  %3010 = vrot.lane.b32.xlu1 %v2975_v21, %s7340_s24  ;;  %3008 = vrot.lane.b32.xlu0 %v2973_v59, %s7340_s24  ;;  %v2978_v23 = vsel %vm498_vm0, %v2976_v54, %v2977_v7  ;;  %v2928_v45 = vmul.f32 %v9079_v17, %v8825_v55  ;;  %v9088_v59 = vld [vmem:[%s7384_s21 + $0x58] sm:$0x3]  ;;  %v512_v9 = vrot.slane %v458_v13, 1 }
 0x213   : > { %v460_v21 = vmul.f32 %v8854_v26, %v8937_v51  ;;  %15693 = vst [vmem:[#allocation210_spill] sm:$0xff] %v9088_v59  ;;  %v461_v54 = vmul.f32 %v9088_v59, %v8937_v51  ;;  %v459_v7 = vmul.f32 %v8863_v4, %v8937_v51  ;;  %v2987_v27 = vrot.slane %v2927_v42, 1 }
 0x214   : > { %v9094_v33 = vpop.permute.xlu1 %2366  ;;  %v9096_v40 = vpop.permute.xlu0 %2364  ;;  %v2989_v11 = vrot.slane %v2928_v45, 1  ;;  %v9109_v13 = vsel %vm498_vm0, %v499_v28, %v15696_v60  ;;  %v2983_v32 = vsel %vm498_vm0, %v2981_v53, %v2982_v10  ;;  %v2986_v8 = vrot.slane %v2926_v61, 1 }
 0x215   : > { %15694 = vst [vmem:[#allocation211_spill] sm:$0xff] %v9094_v33  ;;  %15695 = vst [vmem:[#allocation212_spill] sm:$0xff] %v9096_v40  ;;  %v2929_v33 = vmul.f32 %v8825_v55, %v8636_v19  ;;  %v2985_v40 = vsel %vm498_vm0, %v2982_v10, %v2984_v43  ;;  %v515_v36 = vrot.slane %v460_v21, 1  ;;  %v517_v16 = vrot.slane %v461_v54, 1 }
 0x216   : > { %3014 = vrot.lane.b32.xlu1 %v2980_v63, %s7340_s24  ;;  %3012 = vrot.lane.b32.xlu0 %v2978_v23, %s7340_s24  ;;  %15697 = vst [vmem:[#allocation213_spill] sm:$0xff] %v9109_v13  ;;  %v514_v63 = vrot.slane %v459_v7, 1  ;;  %v9118_v45 = vstv %s9061_s15  ;;  %v9121_v55 = vsel %vm498_vm0, %v505_v24, %v507_v41  ;;  %v9124_v29 = vsel %vm498_vm0, %v504_v22, %v505_v24  ;;  %v9164_v7 = vld [vmem:[%s7384_s21 + $0x88] sm:$0x3]  ;;  %s12885_s15 = sld [smem:[#allocation2 + $0x2c]] }
 0x217   : > { %15700 = vst [vmem:[#allocation216_spill] sm:$0xff] %v9121_v55  ;;  %15701 = vst [vmem:[#allocation217_spill] sm:$0xff] %v9124_v29  ;;  %v2992_v43 = vrot.slane %v2930_v0, 1  ;;  %v2994_v28 = vrot.slane %v2931_v2, 1  ;;  %v9127_v53 = vsel %vm498_vm0, %v510_v18, %v512_v9  ;;  %v9130_v10 = vsel %vm498_vm0, %v509_v31, %v510_v18 }
 0x218   : > { %v9113_v58 = vpop.permute.xlu1 %2470  ;;  %v9115_v23 = vpop.permute.xlu0 %2468  ;;  %15702 = vst [vmem:[#allocation218_spill] sm:$0xff] %v9127_v53  ;;  %15703 = vst [vmem:[#allocation219_spill] sm:$0xff] %v9130_v10  ;;  %v2990_v42 = vsel %vm498_vm0, %v2987_v27, %v2989_v11  ;;  %v2991_v41 = vrot.slane %v2929_v33, 1  ;;  %v2988_v24 = vsel %vm498_vm0, %v2986_v8, %v2987_v27  ;;  %v3185_v61 = vmul.f32 %v8836_v44, %v9118_v45  ;;  %v9151_v33 = vld [vmem:[%s7384_s21 + $0x70] sm:$0x3] }
 0x219   : > { %15698 = vst [vmem:[#allocation214_spill] sm:$0xff] %v9113_v58  ;;  %15699 = vst [vmem:[#allocation215_spill] sm:$0xff] %v9115_v23  ;;  %v3186_v2 = vmul.f32 %v9066_v6, %v9118_v45  ;;  %v3184_v31 = vmul.f32 %v8843_v38, %v9118_v45  ;;  %v9143_v22 = vsel %vm498_vm0, %v515_v36, %v517_v16 }
 0x21a   : > { %3018 = vrot.lane.b32.xlu1 %v2985_v40, %s7340_s24  ;;  %3016 = vrot.lane.b32.xlu0 %v2983_v32, %s7340_s24  ;;  %15704 = vst [vmem:[#allocation220_spill] sm:$0xff] %v9143_v22  ;;  %v9146_v32 = vsel %vm498_vm0, %v514_v63, %v515_v36  ;;  %v463_v11 = vmul.f32 %v8888_v49, %v8937_v51  ;;  %15706 = vst [vmem:[#allocation222_spill] sm:$0xff] %v9151_v33  ;;  %v3233_v36 = vrot.slane %v3185_v61, 2 }
 0x21b   : > { %15705 = vst [vmem:[#allocation221_spill] sm:$0xff] %v9146_v32  ;;  %v464_v8 = vmul.f32 %v9151_v33, %v8937_v51  ;;  %v462_v54 = vmul.f32 %v8895_v37, %v8937_v51  ;;  %v466_v16 = vmul.f32 %v8944_v15, %v8937_v51  ;;  %15709 = vst [vmem:[#allocation225_spill] sm:$0xff] %v9164_v7  ;;  %v3235_v63 = vrot.slane %v3186_v2, 2 }
 0x21c   : > { %v9155_v27 = vpop.permute.xlu1 %2474  ;;  %v9157_v21 = vpop.permute.xlu0 %2472  ;;  %v467_v40 = vmul.f32 %v9164_v7, %v8937_v51  ;;  %v2995_v18 = vsel %vm498_vm0, %v2992_v43, %v2994_v28  ;;  %v2993_v9 = vsel %vm498_vm0, %v2991_v41, %v2992_v43  ;;  %v3188_v0 = vmul.f32 %v8854_v26, %v9118_v45  ;;  %v9183_v43 = vld [vmem:[%s7384_s21 + $0xa0] sm:$0x3] }
 0x21d   : > { %15707 = vst [vmem:[#allocation223_spill] sm:$0xff] %v9155_v27  ;;  %15708 = vst [vmem:[#allocation224_spill] sm:$0xff] %v9157_v21  ;;  %v3189_v60 = vmul.f32 %v9088_v59, %v9118_v45  ;;  %v3232_v21 = vrot.slane %v3184_v31, 2  ;;  %v3187_v27 = vmul.f32 %v8863_v4, %v9118_v45  ;;  %v520_v23 = vrot.slane %v463_v11, 1 }
 0x21e   : > { %3022 = vrot.lane.b32.xlu1 %v2990_v42, %s7340_s24  ;;  %3020 = vrot.lane.b32.xlu0 %v2988_v24, %s7340_s24  ;;  %v465_v28 = vmul.f32 %v8951_v50, %v8937_v51  ;;  %v469_v42 = vmul.f32 %v8985_v34, %v8937_v51  ;;  %15710 = vst [vmem:[#allocation226_spill] sm:$0xff] %v9183_v43  ;;  %v522_v2 = vrot.slane %v464_v8, 1  ;;  %v519_v31 = vrot.slane %v462_v54, 1 }
 0x21f   : > { %v470_v41 = vmul.f32 %v9183_v43, %v8937_v51  ;;  %v3191_v11 = vmul.f32 %v8888_v49, %v9118_v45  ;;  %v3192_v58 = vmul.f32 %v9151_v33, %v9118_v45  ;;  %v525_v32 = vrot.slane %v466_v16, 1 }
 0x220   : > { %v9187_v24 = vpop.permute.xlu1 %2478  ;;  %v9189_v61 = vpop.permute.xlu0 %2476  ;;  %v3238_v22 = vrot.slane %v3188_v0, 2  ;;  %v3240_v10 = vrot.slane %v3189_v60, 2  ;;  %v527_v8 = vrot.slane %v467_v40, 1  ;;  %v3236_v54 = vsel %vm929_vm1, %v3233_v36, %v3235_v63 }
 0x221   : > { %15711 = vst [vmem:[#allocation227_spill] sm:$0xff] %v9187_v24  ;;  %15712 = vst [vmem:[#allocation228_spill] sm:$0xff] %v9189_v61  ;;  %v3190_v61 = vmul.f32 %v8895_v37, %v9118_v45  ;;  %v3234_v24 = vsel %vm929_vm1, %v3232_v21, %v3233_v36  ;;  %v3237_v53 = vrot.slane %v3187_v27, 2  ;;  %v524_v29 = vrot.slane %v465_v28, 1 }
 0x222   : > { %3026 = vrot.lane.b32.xlu1 %v2995_v18, %s7340_s24  ;;  %3024 = vrot.lane.b32.xlu0 %v2993_v9, %s7340_s24  ;;  %v530_v55 = vrot.slane %v469_v42, 1  ;;  %v532_v13 = vrot.slane %v470_v41, 1  ;;  %v468_v16 = vmul.f32 %v8998_v39, %v8937_v51  ;;  %v9210_v0 = vsel %vm498_vm0, %v520_v23, %v522_v2 }
 0x223   : > { %v9214_v40 = vmul.f32 %v8780_v1, %v8937_v51  ;;  %v3243_v60 = vrot.slane %v3191_v11, 2  ;;  %v3245_v21 = vrot.slane %v3192_v58, 2  ;;  %v9217_v27 = vsel %vm498_vm0, %v519_v31, %v520_v23 }
 0x224   : > { %v9205_v18 = vpop.permute.xlu1 %2482  ;;  %v9207_v9 = vpop.permute.xlu0 %2480  ;;  %v473_v36 = vmul.f32 %v9043_v12, %v8937_v51  ;;  %v3241_v63 = vsel %vm929_vm1, %v3238_v22, %v3240_v10  ;;  %v3242_v28 = vrot.slane %v3190_v61, 2  ;;  %v3239_v42 = vsel %vm929_vm1, %v3237_v53, %v3238_v22 }
 0x225   : > { %15713 = vst [vmem:[#allocation229_spill] sm:$0xff] %v9205_v18  ;;  %15714 = vst [vmem:[#allocation230_spill] sm:$0xff] %v9207_v9  ;;  %v3194_v41 = vmul.f32 %v8944_v15, %v9118_v45  ;;  %v3195_v58 = vmul.f32 %v9164_v7, %v9118_v45  ;;  %v3193_v23 = vmul.f32 %v8951_v50, %v9118_v45  ;;  %v535_v61 = vrot.slane %v9214_v40, 1 }
 0x226   : > { %3274 = vrot.lane.b32.xlu1 %v3236_v54, %s7339_s22  ;;  %3272 = vrot.lane.b32.xlu0 %v3234_v24, %s7339_s22  ;;  %v9232_v2 = vsel %vm498_vm0, %v525_v32, %v527_v8  ;;  %v9235_v31 = vsel %vm498_vm0, %v524_v29, %v525_v32  ;;  %v9238_v10 = vsel %vm498_vm0, %v530_v55, %v532_v13  ;;  %v529_v24 = vrot.slane %v468_v16, 1 }
 0x227   : > { %v471_v11 = vmul.f32 %v8787_v20, %v8937_v51  ;;  %v9248_v54 = vstv %s9191_s16  ;;  %v3246_v8 = vsel %vm929_vm1, %v3243_v60, %v3245_v21  ;;  %v537_v9 = vrot.slane %v473_v36, 1  ;;  %s12985_s16 = sld [smem:[#allocation2 + $0x24]] }
 0x228   : > { %v9240_v53 = vpop.permute.xlu1 %2486  ;;  %v9242_v22 = vpop.permute.xlu0 %2484  ;;  %v3244_v13 = vsel %vm929_vm1, %v3242_v28, %v3243_v60  ;;  %v3197_v29 = vmul.f32 %v8985_v34, %v9118_v45  ;;  %v3198_v32 = vmul.f32 %v9183_v43, %v9118_v45  ;;  %v3248_v16 = vrot.slane %v3194_v41, 2 }
 0x229   : > { %15715 = vst [vmem:[#allocation231_spill] sm:$0xff] %v9240_v53  ;;  %15716 = vst [vmem:[#allocation232_spill] sm:$0xff] %v9242_v22  ;;  %v3250_v40 = vrot.slane %v3195_v58, 2  ;;  %v3247_v51 = vrot.slane %v3193_v23, 2  ;;  %v3196_v22 = vmul.f32 %v8998_v39, %v9118_v45  ;;  %v9261_v21 = vsel %vm498_vm0, %v529_v24, %v530_v55 }
 0x22a   : > { %3278 = vrot.lane.b32.xlu1 %v3241_v63, %s7339_s22  ;;  %3276 = vrot.lane.b32.xlu0 %v3239_v42, %s7339_s22  ;;  %15717 = vst [vmem:[#allocation233_spill] sm:$0xff] %v9261_v21  ;;  %v882_v36 = vmul.f32 %v8914_v3, %v9248_v54  ;;  %v883_v60 = vmul.f32 %v8968_v52, %v9248_v54  ;;  %v534_v58 = vrot.slane %v471_v11, 1  ;;  %v3255_v23 = vrot.slane %v3198_v32, 2 }
 0x22b   : > { %v881_v63 = vmul.f32 %v8900_v25, %v9248_v54  ;;  %v9275_v41 = vmul.f32 %v8907_v30, %v9248_v54  ;;  %v886_v55 = vmul.f32 %v9032_v35, %v9248_v54  ;;  %v3200_v3 = vmul.f32 %v8780_v1, %v9118_v45 }
 0x22c   : > { %v9269_v28 = vpop.permute.xlu1 %2490  ;;  %v9271_v42 = vpop.permute.xlu0 %2488  ;;  %v3201_v52 = vmul.f32 %v9043_v12, %v9118_v45  ;;  %v3253_v25 = vrot.slane %v3197_v29, 2  ;;  %v3199_v24 = vmul.f32 %v8787_v20, %v9118_v45  ;;  %v3249_v53 = vsel %vm929_vm1, %v3247_v51, %v3248_v16 }
 0x22d   : > { %15718 = vst [vmem:[#allocation234_spill] sm:$0xff] %v9269_v28  ;;  %15719 = vst [vmem:[#allocation235_spill] sm:$0xff] %v9271_v42  ;;  %v9288_v42 = vsel %vm498_vm0, %v535_v61, %v537_v9  ;;  %v3251_v28 = vsel %vm929_vm1, %v3248_v16, %v3250_v40  ;;  %v3252_v18 = vrot.slane %v3196_v22, 2  ;;  %v931_v11 = vrot.slane %v882_v36, 2 }
 0x22e   : > { %3282 = vrot.lane.b32.xlu1 %v3246_v8, %s7339_s22  ;;  %3280 = vrot.lane.b32.xlu0 %v3244_v13, %s7339_s22  ;;  %15720 = vst [vmem:[#allocation236_spill] sm:$0xff] %v9288_v42  ;;  %v933_v35 = vrot.slane %v883_v60, 2  ;;  %v930_v8 = vrot.slane %v881_v63, 2  ;;  %v884_v13 = vmul.f32 %v8877_v56, %v9248_v54  ;;  %v936_v9 = vrot.slane %v9275_v41, 2 }
 0x22f   : > { %v938_v42 = vrot.slane %v886_v55, 2  ;;  %v3258_v21 = vrot.slane %v3200_v3, 2  ;;  %v3260_v40 = vrot.slane %v3201_v52, 2  ;;  %v9302_v16 = vsel %vm498_vm0, %v534_v58, %v535_v61 }
 0x230   : > { %v9296_v29 = vpop.permute.xlu1 %2494  ;;  %v9298_v32 = vpop.permute.xlu0 %2492  ;;  %v9306_v22 = vmul.f32 %v8836_v44, %v9248_v54  ;;  %v3256_v51 = vsel %vm929_vm1, %v3253_v25, %v3255_v23  ;;  %v3257_v36 = vrot.slane %v3199_v24, 2  ;;  %v3254_v60 = vsel %vm929_vm1, %v3252_v18, %v3253_v25 }
 0x231   : > { %15721 = vst [vmem:[#allocation237_spill] sm:$0xff] %v9296_v29  ;;  %15722 = vst [vmem:[#allocation238_spill] sm:$0xff] %v9298_v32  ;;  %v3203_v63 = vmul.f32 %v8707_v5, %v9118_v45  ;;  %v3204_v61 = vmul.f32 %v9079_v17, %v9118_v45  ;;  %v3202_v41 = vmul.f32 %v8711_v14, %v9118_v45 }
 0x232   : > { %3286 = vrot.lane.b32.xlu1 %v3251_v28, %s7339_s22  ;;  %3284 = vrot.lane.b32.xlu0 %v3249_v53, %s7339_s22  ;;  %v9319_v55 = vsel %vm929_vm1, %v931_v11, %v933_v35  ;;  %v9322_v28 = vsel %vm929_vm1, %v930_v8, %v931_v11  ;;  %v935_v53 = vrot.slane %v884_v13, 2  ;;  %v889_v3 = vmul.f32 %v9066_v6, %v9248_v54 }
 0x233   : > { %v9331_v52 = vsel %vm929_vm1, %v936_v9, %v938_v42  ;;  %v887_v14 = vmul.f32 %v8843_v38, %v9248_v54  ;;  %v3261_v35 = vsel %vm929_vm1, %v3258_v21, %v3260_v40  ;;  %v3206_v58 = vmul.f32 %v9118_v45, %v8633_v48 }
 0x234   : > { %v9326_v18 = vpop.permute.xlu1 %2498  ;;  %v9328_v5 = vpop.permute.xlu0 %2496  ;;  %15725 = vst [vmem:[#allocation241_spill] sm:$0xff] %v9331_v52  ;;  %v941_v25 = vrot.slane %v9306_v22, 2  ;;  %v3259_v23 = vsel %vm929_vm1, %v3257_v36, %v3258_v21  ;;  %v3207_v42 = vmul.f32 %v9118_v45, %v8811_v46  ;;  %v3205_v24 = vmul.f32 %v9118_v45, %v8636_v19 }
 0x235   : > { %15723 = vst [vmem:[#allocation239_spill] sm:$0xff] %v9326_v18  ;;  %15724 = vst [vmem:[#allocation240_spill] sm:$0xff] %v9328_v5  ;;  %v3263_v11 = vrot.slane %v3203_v63, 2  ;;  %v3265_v8 = vrot.slane %v3204_v61, 2  ;;  %v3262_v13 = vrot.slane %v3202_v41, 2  ;;  %v9347_v40 = vstv %s9292_s17  ;;  %s13204_s17 = sld [smem:[#allocation2 + $0x27]] }
 0x236   : > { %3290 = vrot.lane.b32.xlu1 %v3256_v51, %s7339_s22  ;;  %3288 = vrot.lane.b32.xlu0 %v3254_v60, %s7339_s22  ;;  %v943_v48 = vrot.slane %v889_v3, 2  ;;  %v891_v22 = vmul.f32 %v8854_v26, %v9248_v54  ;;  %v892_v51 = vmul.f32 %v9088_v59, %v9248_v54  ;;  %v890_v21 = vmul.f32 %v8863_v4, %v9248_v54 }
 0x237   : > { %v9360_v19 = vsel %vm929_vm1, %v935_v53, %v936_v9  ;;  %v9364_v45 = vmul.f32 %v8888_v49, %v9248_v54  ;;  %v895_v63 = vmul.f32 %v9151_v33, %v9248_v54  ;;  %v3268_v61 = vrot.slane %v3206_v58, 2 }
 0x238   : > { %v9355_v36 = vpop.permute.xlu1 %2568  ;;  %v9357_v60 = vpop.permute.xlu0 %2566  ;;  %15728 = vst [vmem:[#allocation244_spill] sm:$0xff] %v9360_v19  ;;  %v3270_v41 = vrot.slane %v3207_v42, 2  ;;  %v3267_v3 = vrot.slane %v3205_v24, 2  ;;  %v3339_v5 = vmul.f32 %v8836_v44, %v9347_v40  ;;  %v3340_v9 = vmul.f32 %v9066_v6, %v9347_v40  ;;  %v15795_v19 = vld [vmem:[#allocation25_spill] sm:$0xff] }
 0x239   : > { %15726 = vst [vmem:[#allocation242_spill] sm:$0xff] %v9355_v36  ;;  %15727 = vst [vmem:[#allocation243_spill] sm:$0xff] %v9357_v60  ;;  %v940_v53 = vrot.slane %v887_v14, 2  ;;  %v3266_v18 = vsel %vm929_vm1, %v3263_v11, %v3265_v8  ;;  %v3264_v32 = vsel %vm929_vm1, %v3262_v13, %v3263_v11  ;;  %v3338_v58 = vmul.f32 %v8843_v38, %v9347_v40 }
 0x23a   : > { %3294 = vrot.lane.b32.xlu1 %v3261_v35, %s7339_s22  ;;  %3292 = vrot.lane.b32.xlu0 %v3259_v23, %s7339_s22  ;;  %v9379_v35 = vsel %vm929_vm1, %v941_v25, %v943_v48  ;;  %v946_v23 = vrot.slane %v891_v22, 2  ;;  %v948_v42 = vrot.slane %v892_v51, 2  ;;  %v945_v24 = vrot.slane %v890_v21, 2 }
 0x23b   : > { %15729 = vst [vmem:[#allocation245_spill] sm:$0xff] %v9379_v35  ;;  %v951_v36 = vrot.slane %v9364_v45, 2  ;;  %v953_v14 = vrot.slane %v895_v63, 2  ;;  %v893_v8 = vmul.f32 %v8895_v37, %v9248_v54  ;;  %v9390_v11 = vmul.f32 %v8944_v15, %v9248_v54 }
 0x23c   : > { %v9381_v29 = vpop.permute.xlu1 %2572  ;;  %v9383_v60 = vpop.permute.xlu0 %2570  ;;  %v3271_v13 = vsel %vm929_vm1, %v3268_v61, %v3270_v41  ;;  %v3269_v48 = vsel %vm929_vm1, %v3267_v3, %v3268_v61  ;;  %v3387_v22 = vrot.slane %v3339_v5, 2  ;;  %v3389_v51 = vrot.slane %v3340_v9, 2 }
 0x23d   : > { %15730 = vst [vmem:[#allocation246_spill] sm:$0xff] %v9381_v29  ;;  %15731 = vst [vmem:[#allocation247_spill] sm:$0xff] %v9383_v60  ;;  %v3386_v21 = vrot.slane %v3338_v58, 2  ;;  %v3342_v45 = vmul.f32 %v8854_v26, %v9347_v40  ;;  %v3343_v63 = vmul.f32 %v9088_v59, %v9347_v40  ;;  %v3341_v60 = vmul.f32 %v8863_v4, %v9347_v40 }
 0x23e   : > { %3298 = vrot.lane.b32.xlu1 %v3266_v18, %s7339_s22  ;;  %3296 = vrot.lane.b32.xlu0 %v3264_v32, %s7339_s22  ;;  %v9403_v18 = vsel %vm929_vm1, %v940_v53, %v941_v25  ;;  %v9406_v32 = vsel %vm929_vm1, %v946_v23, %v948_v42  ;;  %v9409_v61 = vsel %vm929_vm1, %v945_v24, %v946_v23  ;;  %v950_v58 = vrot.slane %v893_v8, 2 }
 0x23f   : > { %15732 = vst [vmem:[#allocation248_spill] sm:$0xff] %v9403_v18  ;;  %15733 = vst [vmem:[#allocation249_spill] sm:$0xff] %v9406_v32  ;;  %v898_v5 = vmul.f32 %v9164_v7, %v9248_v54  ;;  %v9418_v9 = vsel %vm929_vm1, %v951_v36, %v953_v14  ;;  %v896_v25 = vmul.f32 %v8951_v50, %v9248_v54  ;;  %v956_v23 = vrot.slane %v9390_v11, 2 }
 0x240   : > { %15734 = vst [vmem:[#allocation250_spill] sm:$0xff] %v9409_v61  ;;  %v9413_v41 = vpop.permute.xlu1 %2576  ;;  %v9415_v3 = vpop.permute.xlu0 %2574  ;;  %15737 = vst [vmem:[#allocation253_spill] sm:$0xff] %v9418_v9  ;;  %v3345_v53 = vmul.f32 %v8888_v49, %v9347_v40  ;;  %v3390_v42 = vsel %vm929_vm1, %v3387_v22, %v3389_v51  ;;  %v3346_v24 = vmul.f32 %v9151_v33, %v9347_v40  ;;  %v3391_v29 = vrot.slane %v3341_v60, 2 }
 0x241   : > { %15735 = vst [vmem:[#allocation251_spill] sm:$0xff] %v9413_v41  ;;  %15736 = vst [vmem:[#allocation252_spill] sm:$0xff] %v9415_v3  ;;  %v3344_v14 = vmul.f32 %v8895_v37, %v9347_v40  ;;  %v3388_v8 = vsel %vm929_vm1, %v3386_v21, %v3387_v22  ;;  %v3392_v3 = vrot.slane %v3342_v45, 2  ;;  %v3394_v41 = vrot.slane %v3343_v63, 2 }
 0x242   : > { %3302 = vrot.lane.b32.xlu1 %v3271_v13, %s7339_s22  ;;  %3300 = vrot.lane.b32.xlu0 %v3269_v48, %s7339_s22  ;;  %v958_v9 = vrot.slane %v898_v5, 2  ;;  %v900_v11 = vmul.f32 %v8985_v34, %v9248_v54  ;;  %v901_v13 = vmul.f32 %v9183_v43, %v9248_v54  ;;  %v899_v48 = vmul.f32 %v8998_v39, %v9248_v54 }
 0x243   : > { %v903_v22 = vmul.f32 %v8780_v1, %v9248_v54  ;;  %v904_v60 = vmul.f32 %v9043_v12, %v9248_v54  ;;  %v902_v21 = vmul.f32 %v8787_v20, %v9248_v54  ;;  %v3397_v45 = vrot.slane %v3345_v53, 2 }
 0x244   : > { %v9439_v51 = vpop.permute.xlu1 %2580  ;;  %v9441_v33 = vpop.permute.xlu0 %2578  ;;  %v3399_v63 = vrot.slane %v3346_v24, 2  ;;  %v3396_v5 = vrot.slane %v3344_v14, 2  ;;  %v9456_v61 = vsel %vm929_vm1, %v950_v58, %v951_v36  ;;  %v3395_v32 = vsel %vm929_vm1, %v3392_v3, %v3394_v41 }
 0x245   : > { %15738 = vst [vmem:[#allocation254_spill] sm:$0xff] %v9439_v51  ;;  %15739 = vst [vmem:[#allocation255_spill] sm:$0xff] %v9441_v33  ;;  %v3348_v51 = vmul.f32 %v8944_v15, %v9347_v40  ;;  %v3349_v33 = vmul.f32 %v9164_v7, %v9347_v40  ;;  %v3393_v54 = vsel %vm929_vm1, %v3391_v29, %v3392_v3  ;;  %v963_v24 = vrot.slane %v901_v13, 2 }
 0x246   : > { %3428 = vrot.lane.b32.xlu1 %v3390_v42, %s7340_s24  ;;  %3426 = vrot.lane.b32.xlu0 %v3388_v8, %s7340_s24  ;;  %15740 = vst [vmem:[#allocation256_spill] sm:$0xff] %v9456_v61  ;;  %v3347_v53 = vmul.f32 %v8951_v50, %v9347_v40  ;;  %v955_v42 = vrot.slane %v896_v25, 2  ;;  %v961_v8 = vrot.slane %v900_v11, 2  ;;  %v960_v14 = vrot.slane %v899_v48, 2 }
 0x247   : > { %v9467_v7 = vsel %vm929_vm1, %v956_v23, %v958_v9  ;;  %v966_v36 = vrot.slane %v903_v22, 2  ;;  %v968_v58 = vrot.slane %v904_v60, 2  ;;  %v965_v61 = vrot.slane %v902_v21, 2 }
 0x248   : > { %v9462_v18 = vpop.permute.xlu1 %2584  ;;  %v9464_v35 = vpop.permute.xlu0 %2582  ;;  %15743 = vst [vmem:[#allocation259_spill] sm:$0xff] %v9467_v7  ;;  %v3400_v29 = vsel %vm929_vm1, %v3397_v45, %v3399_v63  ;;  %v3398_v41 = vsel %vm929_vm1, %v3396_v5, %v3397_v45  ;;  %v3402_v3 = vrot.slane %v3348_v51, 2  ;;  %v3404_v25 = vrot.slane %v3349_v33, 2  ;;  %v15749_v45 = vld [vmem:[#allocation5_spill] sm:$0xff] }
 0x249   : > { %15741 = vst [vmem:[#allocation257_spill] sm:$0xff] %v9462_v18  ;;  %15742 = vst [vmem:[#allocation258_spill] sm:$0xff] %v9464_v35  ;;  %v3401_v11 = vrot.slane %v3347_v53, 2  ;;  %v3351_v13 = vmul.f32 %v8985_v34, %v9347_v40  ;;  %v3352_v9 = vmul.f32 %v9183_v43, %v9347_v40  ;;  %v3350_v48 = vmul.f32 %v8998_v39, %v9347_v40  ;;  %v15767_v18 = vld [vmem:[#allocation12_spill] sm:$0xff] }
 0x24a   : > { %3432 = vrot.lane.b32.xlu1 %v3395_v32, %s7340_s24  ;;  %3430 = vrot.lane.b32.xlu0 %v3393_v54, %s7340_s24  ;;  %v9481_v32 = vadd.f32 %v7678_v57, %v8881_v62  ;;  %v9484_v22 = vsel %vm929_vm1, %v955_v42, %v956_v23  ;;  %v9487_v51 = vsel %vm929_vm1, %v961_v8, %v963_v24  ;;  %v15752_v24 = vld [vmem:[#allocation186_spill] sm:$0xff]  ;;  %v9581_v7 = vstv %s9504_s18  ;;  %s13259_s18 = sld [smem:[#allocation2 + $0x2e]] }
 0x24b   : > { %15744 = vst [vmem:[#allocation260_spill] sm:$0xff] %v9484_v22  ;;  %15745 = vst [vmem:[#allocation261_spill] sm:$0xff] %v9487_v51  ;;  %v9490_v33 = vsel %vm929_vm1, %v960_v14, %v961_v8  ;;  %v334_v63 = vadd.f32 %v15749_v45, %v8904_v47  ;;  %v9499_v5 = vsel %vm929_vm1, %v966_v36, %v968_v58  ;;  %v3407_v53 = vrot.slane %v3351_v13, 2  ;;  %v15755_v58 = vld [vmem:[#allocation7_spill] sm:$0xff]  ;;  %v15784_v51 = vld [vmem:[#allocation18_spill] sm:$0xff] }
 0x24c   : > { %15746 = vst [vmem:[#allocation262_spill] sm:$0xff] %v9490_v33  ;;  %v9492_v60 = vpop.permute.xlu1 %2588  ;;  %v9494_v21 = vpop.permute.xlu0 %2586  ;;  %15750 = vst [vmem:[#allocation5_spill] sm:$0xff] %v9499_v5  ;;  %v9502_v57 = vsel %vm929_vm1, %v965_v61, %v966_v36  ;;  %v3354_v62 = vmul.f32 %v8780_v1, %v9347_v40  ;;  %v3405_v23 = vsel %vm929_vm1, %v3402_v3, %v3404_v25  ;;  %v3409_v42 = vrot.slane %v3352_v9, 2  ;;  %v15753_v1 = vld [vmem:[#allocation6_spill] sm:$0xff]  ;;  %v15754_v36 = vld [vmem:[#allocation187_spill] sm:$0xff] }
 0x24d   : > { %15747 = vst [vmem:[#allocation263_spill] sm:$0xff] %v9492_v60  ;;  %15748 = vst [vmem:[#allocation264_spill] sm:$0xff] %v9494_v21  ;;  %v3355_v47 = vmul.f32 %v9043_v12, %v9347_v40  ;;  %v3353_v54 = vmul.f32 %v8787_v20, %v9347_v40  ;;  %v3403_v61 = vsel %vm929_vm1, %v3401_v11, %v3402_v3  ;;  %v3406_v8 = vrot.slane %v3350_v48, 2  ;;  %v15757_v25 = vld [vmem:[#allocation8_spill] sm:$0xff]  ;;  %v15758_v21 = vld [vmem:[#allocation191_spill] sm:$0xff] }
 0x24e   : > { %15751 = vst [vmem:[#allocation265_spill] sm:$0xff] %v9502_v57  ;;  %3436 = vrot.lane.b32.xlu1 %v3400_v29, %s7340_s24  ;;  %3434 = vrot.lane.b32.xlu0 %v3398_v41, %s7340_s24  ;;  %v337_v14 = vadd.f32 %v15753_v1, %v15752_v24  ;;  %v335_v29 = vadd.f32 %v15755_v58, %v15754_v36  ;;  %v15756_v41 = vld [vmem:[#allocation188_spill] sm:$0xff]  ;;  %v15759_v12 = vld [vmem:[#allocation9_spill] sm:$0xff]  ;;  %v15763_v11 = vld [vmem:[#allocation10_spill] sm:$0xff]  ;;  %v3412_v58 = vrot.slane %v3354_v62, 2 }
 0x24f   : > { %v339_v45 = vadd.f32 %v15757_v25, %v15756_v41  ;;  %v338_v60 = vadd.f32 %v15759_v12, %v15758_v21  ;;  %v15762_v3 = vld [vmem:[#allocation192_spill] sm:$0xff]  ;;  %v15764_v9 = vld [vmem:[#allocation193_spill] sm:$0xff]  ;;  %v15765_v48 = vld [vmem:[#allocation11_spill] sm:$0xff]  ;;  %v3414_v21 = vrot.slane %v3355_v47, 2  ;;  %v3411_v41 = vrot.slane %v3353_v54, 2 }
 0x250   : > { %v9524_v35 = vpop.permute.xlu1 %2592  ;;  %v9526_v20 = vpop.permute.xlu0 %2590  ;;  %v341_v13 = vadd.f32 %v15763_v11, %v15762_v3  ;;  %v340_v24 = vadd.f32 %v15765_v48, %v15764_v9  ;;  %v15766_v1 = vld [vmem:[#allocation194_spill] sm:$0xff]  ;;  %v3358_v3 = vmul.f32 %v9079_v17, %v9347_v40  ;;  %v15769_v11 = vld [vmem:[#allocation197_spill] sm:$0xff]  ;;  %v3410_v62 = vsel %vm929_vm1, %v3407_v53, %v3409_v42  ;;  %v15776_v17 = vld [vmem:[#allocation200_spill] sm:$0xff] }
 0x251   : > { %15760 = vst [vmem:[#allocation186_spill] sm:$0xff] %v9524_v35  ;;  %15761 = vst [vmem:[#allocation6_spill] sm:$0xff] %v9526_v20  ;;  %v9534_v36 = vadd.f32 %v15767_v18, %v15766_v1  ;;  %v9539_v25 = vld [vmem:[%s7384_s21 + $0xc8] sm:$0xff]  ;;  %v15770_v9 = vld [vmem:[#allocation13_spill] sm:$0xff]  ;;  %v436_v52 = vadd.f32 %v15795_v19, %v338_v60 }
 0x252   : > { %3440 = vrot.lane.b32.xlu1 %v3405_v23, %s7340_s24  ;;  %3438 = vrot.lane.b32.xlu0 %v3403_v61, %s7340_s24  ;;  %15768 = vst [vmem:[#allocation187_spill] sm:$0xff] %v9539_v25  ;;  %v3357_v12 = vmul.f32 %v9539_v25, %v9347_v40  ;;  %v342_v18 = vadd.f32 %v15770_v9, %v15769_v11  ;;  %v9550_v48 = vld [vmem:[%s7384_s21 + $0xc0] sm:$0xff]  ;;  %v15772_v54 = vld [vmem:[#allocation198_spill] sm:$0xff]  ;;  %v15774_v20 = vld [vmem:[#allocation199_spill] sm:$0xff] }
 0x253   : > { %v3408_v23 = vsel %vm929_vm1, %v3406_v8, %v3407_v53  ;;  %15771 = vst [vmem:[#allocation7_spill] sm:$0xff] %v9550_v48  ;;  %v3356_v47 = vmul.f32 %v9550_v48, %v9347_v40  ;;  %v15773_v61 = vld [vmem:[#allocation14_spill] sm:$0xff]  ;;  %v15775_v35 = vld [vmem:[#allocation15_spill] sm:$0xff]  ;;  %v15777_v57 = vld [vmem:[#allocation16_spill] sm:$0xff] }
 0x254   : > { %v9556_v1 = vadd.f32 %v15773_v61, %v15772_v54  ;;  %v9560_v43 = vadd.f32 %v15775_v35, %v15774_v20  ;;  %v9564_v11 = vadd.f32 %v15777_v57, %v15776_v17  ;;  %v15778_v42 = vld [vmem:[#allocation20_spill] sm:$0xff]  ;;  %v9567_v8 = vpop.permute.xlu1 %2596  ;;  %v9569_v9 = vpop.permute.xlu0 %2594  ;;  %v15781_v5 = vld [vmem:[#allocation203_spill] sm:$0xff]  ;;  %v15782_v33 = vld [vmem:[#allocation17_spill] sm:$0xff]  ;;  %v3415_v57 = vsel %vm929_vm1, %v3412_v58, %v3414_v21 }
 0x255   : > { %v433_v53 = vadd.f32 %v15778_v42, %v335_v29  ;;  %15779 = vst [vmem:[#allocation188_spill] sm:$0xff] %v9567_v8  ;;  %15780 = vst [vmem:[#allocation8_spill] sm:$0xff] %v9569_v9  ;;  %v9573_v54 = vadd.f32 %v15782_v33, %v15781_v5  ;;  %v15783_v61 = vld [vmem:[#allocation204_spill] sm:$0xff]  ;;  %v15785_v20 = vld [vmem:[#allocation21_spill] sm:$0xff]  ;;  %v3413_v29 = vsel %vm929_vm1, %v3411_v41, %v3412_v58  ;;  %v3417_v17 = vrot.slane %v3357_v12, 2 }
 0x256   : > { %v9577_v35 = vadd.f32 %v15784_v51, %v15783_v61  ;;  %v432_v22 = vadd.f32 %v15785_v20, %v334_v63  ;;  %3444 = vrot.lane.b32.xlu1 %v3410_v62, %s7340_s24  ;;  %3442 = vrot.lane.b32.xlu0 %v3408_v23, %s7340_s24  ;;  %v3419_v42 = vrot.slane %v3358_v3, 2  ;;  %v3416_v33 = vrot.slane %v3356_v47, 2  ;;  %v7161_v5 = vld [vmem:[%s7384_s21 + $0xe0] sm:$0xff]  ;;  %v7162_v63 = vld [vmem:[%s7384_s21 + $0xd8] sm:$0xff]  ;;  %v15787_v23 = vld [vmem:[#allocation19_spill] sm:$0xff] }
 0x257   : > { %v3360_v9 = vmul.f32 %v7161_v5, %v9347_v40  ;;  %v3361_v51 = vmul.f32 %v9347_v40, %v8811_v46  ;;  %v3359_v61 = vmul.f32 %v7162_v63, %v9347_v40  ;;  %v15786_v62 = vld [vmem:[#allocation205_spill] sm:$0xff]  ;;  %v15788_v21 = vld [vmem:[#allocation207_spill] sm:$0xff]  ;;  %v15789_v58 = vld [vmem:[#allocation22_spill] sm:$0xff] }
 0x258   : > { %v348_v20 = vadd.f32 %v15787_v23, %v15786_v62  ;;  %v9598_v8 = vadd.f32 %v15788_v21, %v433_v53  ;;  %v435_v41 = vadd.f32 %v15789_v58, %v337_v14  ;;  %v15790_v12 = vld [vmem:[#allocation23_spill] sm:$0xff]  ;;  %v9603_v47 = vpop.permute.xlu1 %2844  ;;  %v9605_v5 = vpop.permute.xlu0 %2842  ;;  %v15793_v46 = vld [vmem:[#allocation213_spill] sm:$0xff]  ;;  %v15794_v40 = vld [vmem:[#allocation24_spill] sm:$0xff]  ;;  %v9614_v53 = vmul.f32 %v8907_v30, %v9581_v7 }
 0x259   : > { %v434_v3 = vadd.f32 %v15790_v12, %v9481_v32  ;;  %15791 = vst [vmem:[#allocation191_spill] sm:$0xff] %v9603_v47  ;;  %15792 = vst [vmem:[#allocation9_spill] sm:$0xff] %v9605_v5  ;;  %v9608_v59 = vadd.f32 %v15793_v46, %v432_v22  ;;  %v437_v63 = vadd.f32 %v15794_v40, %v339_v45  ;;  %v15796_v62 = vld [vmem:[#allocation26_spill] sm:$0xff]  ;;  %v3422_v23 = vrot.slane %v3360_v9, 2  ;;  %v15797_v21 = vld [vmem:[#allocation216_spill] sm:$0xff] }
 0x25a   : > { %v439_v14 = vadd.f32 %v15796_v62, %v341_v13  ;;  %v9619_v32 = vmul.f32 %v8877_v56, %v9581_v7  ;;  %3448 = vrot.lane.b32.xlu1 %v3415_v57, %s7340_s24  ;;  %3446 = vrot.lane.b32.xlu0 %v3413_v29, %s7340_s24  ;;  %v3420_v22 = vsel %vm929_vm1, %v3417_v17, %v3419_v42  ;;  %v3424_v19 = vrot.slane %v3361_v51, 2  ;;  %v15798_v58 = vld [vmem:[#allocation217_spill] sm:$0xff]  ;;  %v15799_v12 = vld [vmem:[#allocation27_spill] sm:$0xff]  ;;  %v9669_v62 = vld [vmem:[%s7384_s21 + $0xf8] sm:$0xff] }
 0x25b   : > { %v3418_v45 = vsel %vm929_vm1, %v3416_v33, %v3417_v17  ;;  %v3421_v60 = vrot.slane %v3359_v61, 2  ;;  %v9626_v30 = vadd.f32 %v15797_v21, %v435_v41  ;;  %v9629_v13 = vadd.f32 %v15798_v58, %v434_v3  ;;  %v15803_v17 = vld [vmem:[#allocation218_spill] sm:$0xff]  ;;  %v15804_v33 = vld [vmem:[#allocation219_spill] sm:$0xff]  ;;  %v15805_v61 = vld [vmem:[#allocation28_spill] sm:$0xff] }
 0x25c   : > { %v438_v56 = vadd.f32 %v15799_v12, %v340_v24  ;;  %v9634_v57 = vmul.f32 %v8836_v44, %v9581_v7  ;;  %v9636_v29 = vpop.permute.xlu1 %2848  ;;  %v9638_v9 = vpop.permute.xlu0 %2846  ;;  %v9641_v42 = vadd.f32 %v15803_v17, %v437_v63  ;;  %v9644_v51 = vadd.f32 %v15804_v33, %v436_v52  ;;  %v15807_v44 = vld [vmem:[#allocation220_spill] sm:$0xff]  ;;  %v15810_v52 = vld [vmem:[#allocation29_spill] sm:$0xff]  ;;  %v15820_v33 = vld [vmem:[#allocation34_spill] sm:$0xff] }
 0x25d   : > { %15801 = vst [vmem:[#allocation10_spill] sm:$0xff] %v9636_v29  ;;  %15802 = vst [vmem:[#allocation193_spill] sm:$0xff] %v9638_v9  ;;  %v441_v24 = vadd.f32 %v15805_v61, %v9534_v36  ;;  %v9650_v41 = vmul.f32 %v8843_v38, %v9581_v7  ;;  %v9653_v3 = vadd.f32 %v15807_v44, %v439_v14  ;;  %v9672_v14 = vstv %s9593_s19  ;;  %v15811_v21 = vld [vmem:[#allocation221_spill] sm:$0xff]  ;;  %v15851_v29 = vld [vmem:[#allocation52_spill] sm:$0xff]  ;;  %s13551_s19 = sld [smem:[#allocation2 + $0x2a]] }
 0x25e   : > { %15800 = vst [vmem:[#allocation192_spill] sm:$0xff] %v9634_v57  ;;  %v9657_v46 = vmul.f32 %v8854_v26, %v9581_v7  ;;  %v9661_v40 = vmul.f32 %v8863_v4, %v9581_v7  ;;  %3452 = vrot.lane.b32.xlu1 %v3420_v22, %s7340_s24  ;;  %3450 = vrot.lane.b32.xlu0 %v3418_v45, %s7340_s24  ;;  %v9675_v26 = vld [vmem:[%s7384_s21 + $0xf0] sm:$0xff]  ;;  %v15812_v4 = vld [vmem:[#allocation30_spill] sm:$0xff]  ;;  %v15818_v17 = vld [vmem:[#allocation33_spill] sm:$0xff] }
 0x25f   : > { %15806 = vst [vmem:[#allocation11_spill] sm:$0xff] %v9650_v41  ;;  %v440_v36 = vadd.f32 %v15810_v52, %v342_v18  ;;  %v3425_v38 = vsel %vm929_vm1, %v3422_v23, %v3424_v19  ;;  %v3423_v63 = vsel %vm929_vm1, %v3421_v60, %v3422_v23  ;;  %v561_v58 = vadd.f32 %v15811_v21, %v438_v56  ;;  %v15813_v22 = vld [vmem:[#allocation31_spill] sm:$0xff]  ;;  %v15817_v56 = vld [vmem:[#allocation32_spill] sm:$0xff]  ;;  %v15852_v47 = vld [vmem:[#allocation53_spill] sm:$0xff] }
 0x260   : > { %15808 = vst [vmem:[#allocation194_spill] sm:$0xff] %v9657_v46  ;;  %15809 = vst [vmem:[#allocation12_spill] sm:$0xff] %v9661_v40  ;;  %v443_v12 = vadd.f32 %v15812_v4, %v9556_v1  ;;  %v442_v45 = vadd.f32 %v15813_v22, %v9560_v43  ;;  %v9684_v18 = vmul.f32 %v8888_v49, %v9581_v7  ;;  %v9688_v23 = vpop.permute.xlu1 %2852  ;;  %v9690_v19 = vpop.permute.xlu0 %2850  ;;  %v9720_v52 = vld [vmem:[%s7384_s21 + $0x110] sm:$0xff]  ;;  %v15828_v4 = vld [vmem:[#allocation233_spill] sm:$0xff] }
 0x261   : > { %15815 = vst [vmem:[#allocation13_spill] sm:$0xff] %v9688_v23  ;;  %15816 = vst [vmem:[#allocation198_spill] sm:$0xff] %v9690_v19  ;;  %v564_v60 = vadd.f32 %v9210_v0, %v441_v24  ;;  %v445_v1 = vadd.f32 %v15817_v56, %v9564_v11  ;;  %v444_v43 = vadd.f32 %v15818_v17, %v9573_v54  ;;  %v15821_v24 = vld [vmem:[#allocation35_spill] sm:$0xff]  ;;  %v15832_v22 = vld [vmem:[#allocation236_spill] sm:$0xff] }
 0x262   : > { %15814 = vst [vmem:[#allocation197_spill] sm:$0xff] %v9684_v18  ;;  %v9699_v49 = vmul.f32 %v8895_v37, %v9581_v7  ;;  %v447_v61 = vadd.f32 %v15820_v33, %v9577_v35  ;;  %3456 = vrot.lane.b32.xlu1 %v3425_v38, %s7340_s24  ;;  %3454 = vrot.lane.b32.xlu0 %v3423_v63, %s7340_s24  ;;  %v9723_v38 = vld [vmem:[%s7384_s21 + $0x108] sm:$0xff]  ;;  %v15833_v17 = vld [vmem:[#allocation36_spill] sm:$0xff]  ;;  %v15845_v23 = vld [vmem:[#allocation43_spill] sm:$0xff] }
 0x263   : > { %v3527_v0 = vmul.f32 %v9672_v14, %v9669_v62  ;;  %v3526_v11 = vmul.f32 %v9672_v14, %v9675_v26  ;;  %v563_v54 = vadd.f32 %v9217_v27, %v440_v36  ;;  %v446_v37 = vadd.f32 %v15821_v24, %v348_v20  ;;  %v15837_v24 = vld [vmem:[#allocation37_spill] sm:$0xff]  ;;  %v9980_v41 = vld [vmem:[%s7384_s21 + $0x68] sm:$0xff] }
 0x264   : > { %15819 = vst [vmem:[#allocation14_spill] sm:$0xff] %v9699_v49  ;;  %v9713_v44 = vmul.f32 %v8944_v15, %v9581_v7  ;;  %v9717_v35 = vmul.f32 %v8951_v50, %v9581_v7  ;;  %v566_v63 = vadd.f32 %v9232_v2, %v443_v12  ;;  %v565_v21 = vadd.f32 %v9235_v31, %v442_v45  ;;  %v9735_v20 = vpop.permute.xlu1 %2856  ;;  %v9737_v50 = vpop.permute.xlu0 %2854  ;;  %v9742_v12 = vld [vmem:[%s7384_s21 + $0xb0] sm:$0xff]  ;;  %v9749_v31 = vld [vmem:[%s7384_s21 + $0xa8] sm:$0xff]  ;;  %v15891_v18 = vld [vmem:[#allocation253_spill] sm:$0xff] }
 0x265   : > { %v9729_v27 = vmul.f32 %v8985_v34, %v9581_v7  ;;  %v9733_v15 = vmul.f32 %v8998_v39, %v9581_v7  ;;  %15826 = vst [vmem:[#allocation20_spill] sm:$0xff] %v9735_v20  ;;  %15827 = vst [vmem:[#allocation203_spill] sm:$0xff] %v9737_v50  ;;  %v568_v36 = vadd.f32 %v9238_v10, %v445_v1  ;;  %v15842_v20 = vld [vmem:[#allocation40_spill] sm:$0xff] }
 0x266   : > { %15822 = vst [vmem:[#allocation199_spill] sm:$0xff] %v9713_v44  ;;  %15823 = vst [vmem:[#allocation15_spill] sm:$0xff] %v9717_v35  ;;  %v567_v2 = vadd.f32 %v15828_v4, %v444_v43  ;;  %v9746_v34 = vmul.f32 %v9742_v12, %v9581_v7  ;;  %v9753_v39 = vmul.f32 %v9749_v31, %v9581_v7  ;;  %3560 = vrot.lane.b32.xlu1 %v3527_v0, %s7339_s22  ;;  %v9774_v0 = vld [vmem:[%s7384_s21 + $0x128] sm:$0xff] }
 0x267   : > { %15824 = vst [vmem:[#allocation200_spill] sm:$0xff] %v9729_v27  ;;  %15825 = vst [vmem:[#allocation16_spill] sm:$0xff] %v9733_v15  ;;  %v570_v45 = vadd.f32 %v15832_v22, %v447_v61  ;;  %3558 = vrot.lane.b32.xlu0 %v3526_v11, %s7339_s22  ;;  %v3529_v10 = vmul.f32 %v9672_v14, %v9720_v52  ;;  %v3528_v56 = vmul.f32 %v9672_v14, %v9723_v38  ;;  %v9777_v11 = vld [vmem:[%s7384_s21 + $0x120] sm:$0xff]  ;;  %v9940_v44 = vld [vmem:[%s7384_s21 + $0x48] sm:$0xff] }
 0x268   : > { %15829 = vst [vmem:[#allocation17_spill] sm:$0xff] %v9746_v34  ;;  %15830 = vst [vmem:[#allocation204_spill] sm:$0xff] %v9749_v31  ;;  %v569_v1 = vadd.f32 %v9302_v16, %v446_v37  ;;  %v710_v43 = vadd.f32 %v15833_v17, %v9598_v8  ;;  %v9767_v33 = vmul.f32 %v9539_v25, %v9581_v7  ;;  %v15838_v16 = vld [vmem:[#allocation38_spill] sm:$0xff]  ;;  %v15839_v8 = vld [vmem:[#allocation39_spill] sm:$0xff]  ;;  %v9786_v17 = vstv %s9686_s20  ;;  %v9788_v50 = vpop.permute.xlu1 %2860  ;;  %s13576_s20 = sld [smem:[#allocation2 + $0x2f]] }
 0x269   : > { %15831 = vst [vmem:[#allocation18_spill] sm:$0xff] %v9753_v39  ;;  %v9771_v61 = vmul.f32 %v9550_v48, %v9581_v7  ;;  %15836 = vst [vmem:[#allocation19_spill] sm:$0xff] %v9777_v11  ;;  %v709_v4 = vadd.f32 %v15837_v24, %v9608_v59  ;;  %v712_v37 = vadd.f32 %v15838_v16, %v9626_v30  ;;  %v9790_v7 = vpop.permute.xlu0 %2858  ;;  %v15843_v59 = vld [vmem:[#allocation41_spill] sm:$0xff]  ;;  %v15844_v30 = vld [vmem:[#allocation42_spill] sm:$0xff] }
 0x26a   : > { %15834 = vst [vmem:[#allocation21_spill] sm:$0xff] %v9767_v33  ;;  %v711_v22 = vadd.f32 %v15839_v8, %v9629_v13  ;;  %15840 = vst [vmem:[#allocation207_spill] sm:$0xff] %v9788_v50  ;;  %v714_v19 = vadd.f32 %v15842_v20, %v9641_v42  ;;  %v713_v24 = vadd.f32 %v15843_v59, %v9644_v51  ;;  %v15846_v8 = vld [vmem:[#allocation44_spill] sm:$0xff]  ;;  %3564 = vrot.lane.b32.xlu1 %v3529_v10, %s7339_s22  ;;  %v15847_v20 = vld [vmem:[#allocation45_spill] sm:$0xff] }
 0x26b   : > { %15835 = vst [vmem:[#allocation205_spill] sm:$0xff] %v9771_v61  ;;  %15841 = vst [vmem:[#allocation22_spill] sm:$0xff] %v9790_v7  ;;  %v716_v16 = vadd.f32 %v15844_v30, %v9653_v3  ;;  %v715_v13 = vadd.f32 %v15845_v23, %v561_v58  ;;  %v718_v9 = vadd.f32 %v15846_v8, %v564_v60  ;;  %3562 = vrot.lane.b32.xlu0 %v3528_v56, %s7339_s22  ;;  %v9810_v51 = vld [vmem:[%s7384_s21 + $0x20] sm:$0xff]  ;;  %v15848_v58 = vld [vmem:[#allocation206_spill] sm:$0xff] }
 0x26c   : > { %v3531_v7 = vmul.f32 %v9672_v14, %v9774_v0  ;;  %v3530_v42 = vmul.f32 %v9672_v14, %v9777_v11  ;;  %v9807_v50 = vadd.f32 %v15847_v20, %v563_v54  ;;  %v1543_v3 = vmul.f32 %v9810_v51, %v9786_v17  ;;  %v9817_v60 = vld [vmem:[%s7384_s21 + $0x18] sm:$0xff]  ;;  %v9822_v56 = vld [vmem:[%s7384_s21 + $0x140] sm:$0xff]  ;;  %v15849_v54 = vld [vmem:[#allocation46_spill] sm:$0xff]  ;;  %15884 = vst [vmem:[#allocation30_spill] sm:$0xff] %v9940_v44 }
 0x26d   : > { %v1544_v23 = vmul.f32 %v15848_v58, %v9786_v17  ;;  %v1542_v10 = vmul.f32 %v9817_v60, %v9786_v17  ;;  %v9825_v59 = vld [vmem:[%s7384_s21 + $0x138] sm:$0xff]  ;;  %v9828_v30 = vadd.f32 %v15849_v54, %v566_v63  ;;  %v15850_v8 = vld [vmem:[#allocation47_spill] sm:$0xff]  ;;  %v864_v5 = vadd.f32 %v15851_v29, %v710_v43  ;;  %v9835_v58 = vpop.permute.xlu1 %2864  ;;  %v9837_v33 = vpop.permute.xlu0 %2862  ;;  %v15856_v15 = vld [vmem:[#allocation49_spill] sm:$0xff]  ;;  %15896 = vst [vmem:[#allocation233_spill] sm:$0xff] %v9980_v41 }
 0x26e   : > { %v9831_v20 = vadd.f32 %v15850_v8, %v565_v21  ;;  %v863_v61 = vadd.f32 %v15852_v47, %v709_v4  ;;  %15853 = vst [vmem:[#allocation23_spill] sm:$0xff] %v9835_v58  ;;  %15854 = vst [vmem:[#allocation213_spill] sm:$0xff] %v9837_v33  ;;  %v15855_v39 = vld [vmem:[#allocation48_spill] sm:$0xff]  ;;  %v9843_v27 = vadd.f32 %v15856_v15, %v567_v2  ;;  %v15857_v63 = vld [vmem:[#allocation54_spill] sm:$0xff]  ;;  %3568 = vrot.lane.b32.xlu1 %v3531_v7, %s7339_s22 }
 0x26f   : > { %v9840_v34 = vadd.f32 %v15855_v39, %v568_v36  ;;  %v866_v54 = vadd.f32 %v15857_v63, %v712_v37  ;;  %v9847_v21 = vld [vmem:[%s7384_s21 + $0x38] sm:$0xff]  ;;  %v15859_v47 = vld [vmem:[#allocation55_spill] sm:$0xff]  ;;  %3566 = vrot.lane.b32.xlu0 %v3530_v42, %s7339_s22  ;;  %v3533_v36 = vmul.f32 %v9672_v14, %v9822_v56  ;;  %v3532_v15 = vmul.f32 %v9672_v14, %v9825_v59  ;;  %v15860_v2 = vld [vmem:[#allocation50_spill] sm:$0xff] }
 0x270   : > { %15858 = vst [vmem:[#allocation24_spill] sm:$0xff] %v9847_v21  ;;  %v9851_v29 = vmul.f32 %v9847_v21, %v9786_v17  ;;  %v865_v43 = vadd.f32 %v15859_v47, %v711_v22  ;;  %v9861_v39 = vadd.f32 %v15860_v2, %v570_v45  ;;  %v1591_v4 = vrot.slane %v1543_v3, 1  ;;  %v9864_v63 = vld [vmem:[%s7384_s21 + $0x158] sm:$0xff]  ;;  %v9867_v33 = vld [vmem:[%s7384_s21 + $0x150] sm:$0xff]  ;;  %v15868_v58 = vld [vmem:[#allocation58_spill] sm:$0xff] }
 0x271   : > { %v1593_v37 = vrot.slane %v1544_v23, 1  ;;  %v1590_v8 = vrot.slane %v1542_v10, 1  ;;  %15861 = vst [vmem:[#allocation25_spill] sm:$0xff] %v9867_v33  ;;  %v15862_v22 = vld [vmem:[#allocation51_spill] sm:$0xff]  ;;  %v9873_v42 = vadd.f32 %v9319_v55, %v864_v5  ;;  %v9876_v47 = vadd.f32 %v9322_v28, %v863_v61  ;;  %v9880_v3 = vpop.permute.xlu1 %2868  ;;  %v9882_v23 = vpop.permute.xlu0 %2866  ;;  %v15865_v10 = vld [vmem:[#allocation241_spill] sm:$0xff]  ;;  %v15869_v61 = vld [vmem:[#allocation244_spill] sm:$0xff] }
 0x272   : > { %v9870_v7 = vadd.f32 %v15862_v22, %v569_v1  ;;  %v1547_v45 = vmul.f32 %v9066_v6, %v9786_v17  ;;  %15863 = vst [vmem:[#allocation26_spill] sm:$0xff] %v9880_v3  ;;  %15864 = vst [vmem:[#allocation216_spill] sm:$0xff] %v9882_v23  ;;  %v9885_v2 = vadd.f32 %v15865_v10, %v866_v54  ;;  %v15866_v1 = vld [vmem:[#allocation56_spill] sm:$0xff]  ;;  %v15867_v55 = vld [vmem:[#allocation57_spill] sm:$0xff]  ;;  %v1596_v6 = vrot.slane %v9851_v29, 1 }
 0x273   : > { %v868_v22 = vadd.f32 %v15866_v1, %v714_v19  ;;  %v867_v5 = vadd.f32 %v15867_v55, %v713_v24  ;;  %v870_v28 = vadd.f32 %v15868_v58, %v716_v16  ;;  %v9891_v35 = vadd.f32 %v15869_v61, %v865_v43  ;;  %3572 = vrot.lane.b32.xlu1 %v3533_v36, %s7339_s22  ;;  %v15870_v10 = vld [vmem:[#allocation59_spill] sm:$0xff]  ;;  %v15876_v1 = vld [vmem:[#allocation60_spill] sm:$0xff]  ;;  %v15881_v3 = vld [vmem:[#allocation245_spill] sm:$0xff] }
 0x274   : > { %3570 = vrot.lane.b32.xlu0 %v3532_v15, %s7339_s22  ;;  %v3535_v54 = vmul.f32 %v9672_v14, %v9864_v63  ;;  %v3534_v19 = vmul.f32 %v9672_v14, %v9867_v33  ;;  %v869_v24 = vadd.f32 %v15870_v10, %v715_v13  ;;  %v9902_v16 = vsel %vm498_vm0, %v1591_v4, %v1593_v37  ;;  %v9908_v29 = vld [vmem:[%s7384_s21 + $0x30] sm:$0xff]  ;;  %v9916_v15 = vld [vmem:[%s7384_s21 + $0x168] sm:$0xff] }
 0x275   : > { %15871 = vst [vmem:[#allocation217_spill] sm:$0xff] %v9902_v16  ;;  %v9905_v58 = vsel %vm498_vm0, %v1590_v8, %v1591_v4  ;;  %15873 = vst [vmem:[#allocation218_spill] sm:$0xff] %v9908_v29  ;;  %v1545_v43 = vmul.f32 %v9908_v29, %v9786_v17  ;;  %v9913_v36 = vld [vmem:[%s7384_s21 + $0x170] sm:$0xff]  ;;  %v872_v55 = vadd.f32 %v15876_v1, %v718_v9  ;;  %v1598_v61 = vrot.slane %v1547_v45, 1  ;;  %v15878_v4 = vld [vmem:[#allocation210_spill] sm:$0xff]  ;;  %v9926_v10 = vpop.permute.xlu1 %2872  ;;  %v9928_v23 = vpop.permute.xlu0 %2870 }
 0x276   : > { %15872 = vst [vmem:[#allocation27_spill] sm:$0xff] %v9905_v58  ;;  %15874 = vst [vmem:[#allocation219_spill] sm:$0xff] %v9913_v36  ;;  %v9920_v13 = vld [vmem:[%s7384_s21 + $0x50] sm:$0xff]  ;;  %v1550_v8 = vmul.f32 %v15878_v4, %v9786_v17  ;;  %v9931_v58 = vadd.f32 %v15881_v3, %v868_v22  ;;  %v15882_v16 = vld [vmem:[#allocation248_spill] sm:$0xff]  ;;  %v1548_v4 = vmul.f32 %v9940_v44, %v9786_v17 }
 0x277   : > { %15875 = vst [vmem:[#allocation28_spill] sm:$0xff] %v9916_v15  ;;  %15877 = vst [vmem:[#allocation220_spill] sm:$0xff] %v9920_v13  ;;  %v1549_v37 = vmul.f32 %v9920_v13, %v9786_v17  ;;  %v9934_v9 = vadd.f32 %v15882_v16, %v867_v5  ;;  %v15883_v45 = vld [vmem:[#allocation249_spill] sm:$0xff]  ;;  %3576 = vrot.lane.b32.xlu1 %v3535_v54, %s7339_s22  ;;  %v3537_v3 = vmul.f32 %v9672_v14, %v9913_v36  ;;  %v15886_v5 = vld [vmem:[#allocation250_spill] sm:$0xff] }
 0x278   : > { %15879 = vst [vmem:[#allocation29_spill] sm:$0xff] %v9926_v10  ;;  %15880 = vst [vmem:[#allocation221_spill] sm:$0xff] %v9928_v23  ;;  %v9937_v1 = vadd.f32 %v15883_v45, %v870_v28  ;;  %v15885_v10 = vld [vmem:[#allocation61_spill] sm:$0xff]  ;;  %3574 = vrot.lane.b32.xlu0 %v3534_v19, %s7339_s22  ;;  %v3536_v22 = vmul.f32 %v9672_v14, %v9916_v15  ;;  %v9953_v28 = vadd.f32 %v15886_v5, %v869_v24  ;;  %v15887_v16 = vld [vmem:[#allocation62_spill] sm:$0xff] }
 0x279   : > { %v871_v49 = vadd.f32 %v15885_v10, %v9807_v50  ;;  %v874_v45 = vadd.f32 %v15887_v16, %v9828_v30  ;;  %v15888_v23 = vld [vmem:[#allocation63_spill] sm:$0xff]  ;;  %v1595_v10 = vrot.slane %v1545_v43, 1  ;;  %v9960_v54 = vld [vmem:[%s7384_s21 + $0x188] sm:$0xff]  ;;  %v9963_v19 = vld [vmem:[%s7384_s21 + $0x180] sm:$0xff]  ;;  %v9968_v40 = vadd.f32 %v15891_v18, %v872_v55  ;;  %v9973_v30 = vpop.permute.xlu1 %2998  ;;  %v9975_v16 = vpop.permute.xlu0 %2996 }
 0x27a   : > { %v873_v50 = vadd.f32 %v15888_v23, %v9831_v20  ;;  %15889 = vst [vmem:[#allocation31_spill] sm:$0xff] %v9960_v54  ;;  %15890 = vst [vmem:[#allocation32_spill] sm:$0xff] %v9963_v19  ;;  %v9971_v46 = vsel %vm498_vm0, %v1596_v6, %v1598_v61  ;;  %v1601_v24 = vrot.slane %v1549_v37, 1  ;;  %v1603_v5 = vrot.slane %v1550_v8, 1  ;;  %v15895_v20 = vld [vmem:[#allocation64_spill] sm:$0xff]  ;;  %v15897_v55 = vld [vmem:[#allocation222_spill] sm:$0xff] }
 0x27b   : > { %15892 = vst [vmem:[#allocation33_spill] sm:$0xff] %v9971_v46  ;;  %15893 = vst [vmem:[#allocation34_spill] sm:$0xff] %v9973_v30  ;;  %v876_v23 = vadd.f32 %v15895_v20, %v9840_v34  ;;  %v1600_v43 = vrot.slane %v1548_v4, 1  ;;  %v1552_v18 = vmul.f32 %v9980_v41, %v9786_v17  ;;  %v1553_v61 = vmul.f32 %v15897_v55, %v9786_v17  ;;  %v15898_v37 = vld [vmem:[#allocation256_spill] sm:$0xff]  ;;  %v15899_v20 = vld [vmem:[#allocation259_spill] sm:$0xff] }
 0x27c   : > { %15894 = vst [vmem:[#allocation35_spill] sm:$0xff] %v9975_v16  ;;  %v9987_v8 = vadd.f32 %v15898_v37, %v871_v49  ;;  %3580 = vrot.lane.b32.xlu1 %v3537_v3, %s7339_s22  ;;  %3578 = vrot.lane.b32.xlu0 %v3536_v22, %s7339_s22  ;;  %v3539_v34 = vmul.f32 %v9672_v14, %v9960_v54  ;;  %v15900_v30 = vld [vmem:[#allocation260_spill] sm:$0xff]  ;;  %v10005_v55 = vld [vmem:[%s7384_s21 + $0x60] sm:$0xff] }
 0x27d   : > { %v3538_v4 = vmul.f32 %v9672_v14, %v9963_v19  ;;  %v9996_v16 = vadd.f32 %v15899_v20, %v874_v45  ;;  %v9999_v46 = vadd.f32 %v15900_v30, %v873_v50  ;;  %v10002_v49 = vsel %vm498_vm0, %v1595_v10, %v1596_v6  ;;  %15902 = vst [vmem:[#allocation36_spill] sm:$0xff] %v10005_v55  ;;  %v10010_v22 = vld [vmem:[%s7384_s21 + $0x1a0] sm:$0xff]  ;;  %v10013_v37 = vld [vmem:[%s7384_s21 + $0x198] sm:$0xff]  ;;  %v15906_v20 = vld [vmem:[#allocation66_spill] sm:$0xff]  ;;  %v10024_v10 = vpop.permute.xlu1 %3002 }
 0x27e   : > { %15901 = vst [vmem:[#allocation236_spill] sm:$0xff] %v10002_v49  ;;  %v1551_v3 = vmul.f32 %v10005_v55, %v9786_v17  ;;  %15903 = vst [vmem:[#allocation37_spill] sm:$0xff] %v10010_v22  ;;  %v15905_v19 = vld [vmem:[#allocation65_spill] sm:$0xff]  ;;  %v878_v50 = vadd.f32 %v15906_v20, %v9861_v39  ;;  %v15907_v30 = vld [vmem:[#allocation67_spill] sm:$0xff]  ;;  %v10022_v6 = vsel %vm498_vm0, %v1601_v24, %v1603_v5  ;;  %v10026_v49 = vpop.permute.xlu0 %3000  ;;  %v1608_v39 = vrot.slane %v1553_v61, 1 }
 0x27f   : > { %15904 = vst [vmem:[#allocation38_spill] sm:$0xff] %v10013_v37  ;;  %v875_v45 = vadd.f32 %v15905_v19, %v9843_v27  ;;  %v877_v54 = vadd.f32 %v15907_v30, %v9870_v7  ;;  %15908 = vst [vmem:[#allocation39_spill] sm:$0xff] %v10022_v6  ;;  %v15911_v55 = vld [vmem:[#allocation261_spill] sm:$0xff]  ;;  %v10032_v27 = vsel %vm498_vm0, %v1600_v43, %v1601_v24  ;;  %v1606_v19 = vrot.slane %v1552_v18, 1  ;;  %v10048_v61 = vld [vmem:[%s7384_s21 + $0x78] sm:$0xff] }
 0x280   : > { %15909 = vst [vmem:[#allocation40_spill] sm:$0xff] %v10024_v10  ;;  %15910 = vst [vmem:[#allocation41_spill] sm:$0xff] %v10026_v49  ;;  %v10029_v57 = vadd.f32 %v15911_v55, %v876_v23  ;;  %v10035_v20 = vld [vmem:[%s7384_s21 + $0x80] sm:$0xff]  ;;  %3584 = vrot.lane.b32.xlu1 %v3539_v34, %s7339_s22  ;;  %3582 = vrot.lane.b32.xlu0 %v3538_v4, %s7339_s22  ;;  %v3541_v5 = vmul.f32 %v9672_v14, %v10010_v22  ;;  %v1605_v24 = vrot.slane %v1551_v3, 1  ;;  %v15916_v34 = vld [vmem:[#allocation262_spill] sm:$0xff] }
 0x281   : > { %15912 = vst [vmem:[#allocation42_spill] sm:$0xff] %v10032_v27  ;;  %15913 = vst [vmem:[#allocation43_spill] sm:$0xff] %v10035_v20  ;;  %v1555_v7 = vmul.f32 %v10035_v20, %v9786_v17  ;;  %v3540_v23 = vmul.f32 %v9672_v14, %v10013_v37  ;;  %v15914_v43 = vld [vmem:[#allocation225_spill] sm:$0xff]  ;;  %v1554_v55 = vmul.f32 %v10048_v61, %v9786_v17  ;;  %v10053_v30 = vstv %s9965_s23  ;;  %v10065_v3 = vld [vmem:[%s7384_s21 + $0x98] sm:$0xff]  ;;  %v10071_v6 = vpop.permute.xlu1 %3006  ;;  %s13821_s23 = sld [smem:[#allocation2 + $0x31]] }
 0x282   : > { %v1556_v18 = vmul.f32 %v15914_v43, %v9786_v17  ;;  %15915 = vst [vmem:[#allocation44_spill] sm:$0xff] %v10048_v61  ;;  %v10056_v4 = vadd.f32 %v15916_v34, %v875_v45  ;;  %v15917_v49 = vld [vmem:[#allocation5_spill] sm:$0xff]  ;;  %15919 = vst [vmem:[#allocation45_spill] sm:$0xff] %v10065_v3  ;;  %v1558_v43 = vmul.f32 %v10065_v3, %v9786_v17  ;;  %v10073_v61 = vpop.permute.xlu0 %3004  ;;  %v15922_v45 = vld [vmem:[#allocation68_spill] sm:$0xff] }
 0x283   : > { %v10059_v10 = vadd.f32 %v15917_v49, %v878_v50  ;;  %v15918_v27 = vld [vmem:[#allocation265_spill] sm:$0xff]  ;;  %15920 = vst [vmem:[#allocation206_spill] sm:$0xff] %v10071_v6  ;;  %15921 = vst [vmem:[#allocation46_spill] sm:$0xff] %v10073_v61  ;;  %v10077_v34 = vadd.f32 %v15922_v45, %v9873_v42  ;;  %v1611_v37 = vrot.slane %v1555_v7, 1  ;;  %v10089_v22 = vld [vmem:[%s7384_s21 + $0x90] sm:$0xff]  ;;  %v3625_v42 = vmul.f32 %v10053_v30, %v9669_v62 }
 0x284   : > { %v10062_v14 = vadd.f32 %v15918_v27, %v877_v54  ;;  %v15923_v49 = vld [vmem:[#allocation69_spill] sm:$0xff]  ;;  %v10084_v54 = vsel %vm498_vm0, %v1606_v19, %v1608_v39  ;;  %v15925_v27 = vld [vmem:[#allocation226_spill] sm:$0xff]  ;;  %15926 = vst [vmem:[#allocation52_spill] sm:$0xff] %v10089_v22  ;;  %v1557_v61 = vmul.f32 %v10089_v22, %v9786_v17  ;;  %3588 = vrot.lane.b32.xlu1 %v3541_v5, %s7339_s22  ;;  %v1616_v6 = vrot.slane %v1558_v43, 1 }
 0x285   : > { %v10081_v50 = vadd.f32 %v15923_v49, %v9876_v47  ;;  %15924 = vst [vmem:[#allocation47_spill] sm:$0xff] %v10084_v54  ;;  %v1559_v3 = vmul.f32 %v15925_v27, %v9786_v17  ;;  %3586 = vrot.lane.b32.xlu0 %v3540_v23, %s7339_s22  ;;  %v3624_v47 = vmul.f32 %v10053_v30, %v9675_v26  ;;  %v15927_v39 = vld [vmem:[#allocation70_spill] sm:$0xff]  ;;  %v1613_v49 = vrot.slane %v1556_v18, 1  ;;  %v10109_v23 = vld [vmem:[%s7384_s21 + $0xb8] sm:$0x3]  ;;  %v10115_v20 = vpop.permute.xlu1 %3010 }
 0x286   : > { %v10101_v45 = vadd.f32 %v15927_v39, %v9885_v2  ;;  %v10104_v7 = vsel %vm498_vm0, %v1605_v24, %v1606_v19  ;;  %v1610_v27 = vrot.slane %v1554_v55, 1  ;;  %v1561_v5 = vmul.f32 %v9742_v12, %v9786_v17  ;;  %15929 = vst [vmem:[#allocation48_spill] sm:$0xff] %v10109_v23  ;;  %15930 = vst [vmem:[#allocation49_spill] sm:$0xff] %v10115_v20  ;;  %v10117_v2 = vpop.permute.xlu0 %3008  ;;  %v10122_v18 = vld [vmem:[%s7384_s21 + $0xd0] sm:$0x3] }
 0x287   : > { %15928 = vst [vmem:[#allocation53_spill] sm:$0xff] %v10104_v7  ;;  %v1562_v54 = vmul.f32 %v10109_v23, %v9786_v17  ;;  %v1560_v22 = vmul.f32 %v9749_v31, %v9786_v17  ;;  %15931 = vst [vmem:[#allocation54_spill] sm:$0xff] %v10117_v2  ;;  %v1618_v19 = vrot.slane %v1559_v3, 1  ;;  %v1564_v24 = vmul.f32 %v9539_v25, %v9786_v17  ;;  %v15933_v39 = vld [vmem:[#allocation71_spill] sm:$0xff] }
 0x288   : > { %15932 = vst [vmem:[#allocation55_spill] sm:$0xff] %v10122_v18  ;;  %v1565_v55 = vmul.f32 %v10122_v18, %v9786_v17  ;;  %v1563_v43 = vmul.f32 %v9550_v48, %v9786_v17  ;;  %v10130_v7 = vadd.f32 %v15933_v39, %v9891_v35  ;;  %v1615_v20 = vrot.slane %v1557_v61, 1  ;;  %3658 = vrot.lane.b32.xlu1 %v3625_v42, %s7340_s24  ;;  %v15934_v18 = vld [vmem:[#allocation72_spill] sm:$0xff]  ;;  %v15935_v17 = vld [vmem:[#allocation73_spill] sm:$0xff] }
 0x289   : > { %3656 = vrot.lane.b32.xlu0 %v3624_v47, %s7340_s24  ;;  %v3627_v3 = vmul.f32 %v10053_v30, %v9720_v52  ;;  %v3626_v2 = vmul.f32 %v10053_v30, %v9723_v38  ;;  %v10140_v25 = vadd.f32 %v15934_v18, %v9931_v58  ;;  %v10144_v48 = vadd.f32 %v15935_v17, %v9934_v9  ;;  %v10155_v23 = vpop.permute.xlu1 %3014 }
 0x28a   : > { %v10147_v35 = vsel %vm498_vm0, %v1611_v37, %v1613_v49  ;;  %v10150_v61 = vsel %vm498_vm0, %v1610_v27, %v1611_v37  ;;  %v1621_v42 = vrot.slane %v1561_v5, 1  ;;  %v1623_v47 = vrot.slane %v1562_v54, 1  ;;  %15938 = vst [vmem:[#allocation241_spill] sm:$0xff] %v10155_v23  ;;  %v10157_v58 = vpop.permute.xlu0 %3012  ;;  %v15942_v54 = vld [vmem:[#allocation74_spill] sm:$0xff]  ;;  %v15943_v5 = vld [vmem:[#allocation75_spill] sm:$0xff]  ;;  %v15957_v23 = vld [vmem:[#allocation81_spill] sm:$0xff] }
 0x28b   : > { %15936 = vst [vmem:[#allocation50_spill] sm:$0xff] %v10147_v35  ;;  %15937 = vst [vmem:[#allocation51_spill] sm:$0xff] %v10150_v61  ;;  %v1620_v39 = vrot.slane %v1560_v22, 1  ;;  %v10153_v31 = vstv %s10069_s25  ;;  %v10160_v18 = vsel %vm498_vm0, %v1616_v6, %v1618_v19  ;;  %v1626_v9 = vrot.slane %v1564_v24, 1  ;;  %v15944_v24 = vld [vmem:[#allocation76_spill] sm:$0xff]  ;;  %s14052_s25 = sld [smem:[#allocation2 + $0x2d]] }
 0x28c   : > { %15939 = vst [vmem:[#allocation56_spill] sm:$0xff] %v10157_v58  ;;  %15940 = vst [vmem:[#allocation57_spill] sm:$0xff] %v10160_v18  ;;  %v1628_v17 = vrot.slane %v1565_v55, 1  ;;  %v1625_v49 = vrot.slane %v1563_v43, 1  ;;  %v10163_v35 = vsel %vm498_vm0, %v1615_v20, %v1616_v6  ;;  %3662 = vrot.lane.b32.xlu1 %v3627_v3, %s7340_s24  ;;  %v3629_v22 = vmul.f32 %v10053_v30, %v9774_v0  ;;  %v7179_v20 = vld [vmem:[%s7384_s21 + $0x28] sm:$0x3] }
 0x28d   : > { %15941 = vst [vmem:[#allocation58_spill] sm:$0xff] %v10163_v35  ;;  %3660 = vrot.lane.b32.xlu0 %v3626_v2, %s7340_s24  ;;  %v3628_v37 = vmul.f32 %v10053_v30, %v9777_v11  ;;  %v10173_v27 = vadd.f32 %v15942_v54, %v9937_v1  ;;  %v10177_v19 = vadd.f32 %v15943_v5, %v9953_v28  ;;  %v15945_v43 = vld [vmem:[#allocation77_spill] sm:$0xff]  ;;  %v10197_v54 = vpop.permute.xlu1 %3018  ;;  %v15995_v35 = vld [vmem:[#allocation38_spill] sm:$0xff] }
 0x28e   : > { %v1973_v6 = vmul.f32 %v9810_v51, %v10153_v31  ;;  %v1974_v2 = vmul.f32 %v7179_v20, %v10153_v31  ;;  %v10185_v55 = vadd.f32 %v15944_v24, %v9968_v40  ;;  %v10189_v3 = vadd.f32 %v15945_v43, %v9987_v8  ;;  %15948 = vst [vmem:[#allocation60_spill] sm:$0xff] %v10197_v54  ;;  %v10199_v51 = vpop.permute.xlu0 %3016  ;;  %v10212_v20 = vld [vmem:[%s7384_s21 + $0x40] sm:$0x3]  ;;  %v15956_v54 = vld [vmem:[#allocation80_spill] sm:$0xff] }
 0x28f   : > { %v10192_v1 = vsel %vm498_vm0, %v1621_v42, %v1623_v47  ;;  %v10195_v28 = vsel %vm498_vm0, %v1620_v39, %v1621_v42  ;;  %15949 = vst [vmem:[#allocation210_spill] sm:$0xff] %v10199_v51  ;;  %v10202_v5 = vsel %vm498_vm0, %v1626_v9, %v1628_v17  ;;  %v10205_v40 = vsel %vm498_vm0, %v1625_v49, %v1626_v9  ;;  %v15954_v49 = vld [vmem:[#allocation84_spill] sm:$0xff] }
 0x290   : > { %15946 = vst [vmem:[#allocation244_spill] sm:$0xff] %v10192_v1  ;;  %15947 = vst [vmem:[#allocation59_spill] sm:$0xff] %v10195_v28  ;;  %v1972_v8 = vmul.f32 %v9817_v60, %v10153_v31  ;;  %v1976_v47 = vmul.f32 %v9847_v21, %v10153_v31  ;;  %v1977_v42 = vmul.f32 %v10212_v20, %v10153_v31  ;;  %3666 = vrot.lane.b32.xlu1 %v3629_v22, %s7340_s24  ;;  %v15953_v60 = vld [vmem:[#allocation78_spill] sm:$0xff]  ;;  %v15955_v22 = vld [vmem:[#allocation79_spill] sm:$0xff] }
 0x291   : > { %15950 = vst [vmem:[#allocation245_spill] sm:$0xff] %v10202_v5  ;;  %15951 = vst [vmem:[#allocation248_spill] sm:$0xff] %v10205_v40  ;;  %3664 = vrot.lane.b32.xlu0 %v3628_v37, %s7340_s24  ;;  %v3631_v39 = vmul.f32 %v10053_v30, %v9822_v56  ;;  %v3630_v9 = vmul.f32 %v10053_v30, %v9825_v59  ;;  %v10226_v17 = vadd.f32 %v15953_v60, %v9996_v16  ;;  %v10244_v60 = vpop.permute.xlu1 %3022 }
 0x292   : > { %15952 = vst [vmem:[#allocation249_spill] sm:$0xff] %v10212_v20  ;;  %v1295_v24 = vadd.f32 %v15954_v49, %v10077_v34  ;;  %v2021_v43 = vrot.slane %v1973_v6, 2  ;;  %v2023_v51 = vrot.slane %v1974_v2, 2  ;;  %v10232_v37 = vadd.f32 %v15955_v22, %v9999_v46  ;;  %15958 = vst [vmem:[#allocation61_spill] sm:$0xff] %v10244_v60  ;;  %v10246_v34 = vpop.permute.xlu0 %3020  ;;  %v15960_v6 = vld [vmem:[#allocation82_spill] sm:$0xff]  ;;  %v15961_v2 = vld [vmem:[#allocation83_spill] sm:$0xff] }
 0x293   : > { %v10236_v58 = vadd.f32 %v15956_v54, %v10029_v57  ;;  %v10240_v20 = vadd.f32 %v15957_v23, %v10056_v4  ;;  %v1975_v16 = vmul.f32 %v9908_v29, %v10153_v31  ;;  %15959 = vst [vmem:[#allocation250_spill] sm:$0xff] %v10246_v34  ;;  %v10250_v46 = vadd.f32 %v15960_v6, %v10059_v10  ;;  %v15962_v54 = vld [vmem:[#allocation85_spill] sm:$0xff] }
 0x294   : > { %v10254_v57 = vadd.f32 %v15961_v2, %v10062_v14  ;;  %v1294_v4 = vadd.f32 %v15962_v54, %v10081_v50  ;;  %v2020_v23 = vrot.slane %v1972_v8, 2  ;;  %v2026_v49 = vrot.slane %v1976_v47, 2  ;;  %3670 = vrot.lane.b32.xlu1 %v3631_v39, %s7340_s24  ;;  %v10273_v8 = vld [vmem:[%s7384_s21 + $0x58] sm:$0x3] }
 0x295   : > { %v2028_v22 = vrot.slane %v1977_v42, 2  ;;  %3668 = vrot.lane.b32.xlu0 %v3630_v9, %s7340_s24  ;;  %v3633_v34 = vmul.f32 %v10053_v30, %v9864_v63  ;;  %v3632_v10 = vmul.f32 %v10053_v30, %v9867_v33  ;;  %v10265_v14 = vadd.f32 %v9614_v53, %v1295_v24  ;;  %15964 = vst [vmem:[#allocation63_spill] sm:$0xff] %v10273_v8  ;;  %v15965_v42 = vld [vmem:[#allocation86_spill] sm:$0xff]  ;;  %v15966_v9 = vld [vmem:[#allocation87_spill] sm:$0xff]  ;;  %v10283_v24 = vpop.permute.xlu1 %3026 }
 0x296   : > { %v10268_v6 = vsel %vm929_vm1, %v2021_v43, %v2023_v51  ;;  %v1979_v50 = vmul.f32 %v9920_v13, %v10153_v31  ;;  %v1980_v47 = vmul.f32 %v10273_v8, %v10153_v31  ;;  %v1297_v39 = vadd.f32 %v15965_v42, %v10101_v45  ;;  %15967 = vst [vmem:[#allocation253_spill] sm:$0xff] %v10283_v24  ;;  %v10285_v54 = vpop.permute.xlu0 %3024 }
 0x297   : > { %15963 = vst [vmem:[#allocation62_spill] sm:$0xff] %v10268_v6  ;;  %v1296_v2 = vadd.f32 %v15966_v9, %v10130_v7  ;;  %v2025_v53 = vrot.slane %v1975_v16, 2  ;;  %v1978_v51 = vmul.f32 %v9940_v44, %v10153_v31  ;;  %15968 = vst [vmem:[#allocation64_spill] sm:$0xff] %v10285_v54  ;;  %v10288_v60 = vadd.f32 %v9619_v32, %v1294_v4  ;;  %v10298_v7 = vld [vmem:[%s7384_s21 + $0x70] sm:$0x3]  ;;  %v15972_v9 = vld [vmem:[#allocation88_spill] sm:$0xff] }
 0x298   : > { %v10291_v8 = vsel %vm929_vm1, %v2020_v23, %v2021_v43  ;;  %v10295_v45 = vmul.f32 %v9980_v41, %v10153_v31  ;;  %15970 = vst [vmem:[#allocation256_spill] sm:$0xff] %v10298_v7  ;;  %v1983_v16 = vmul.f32 %v10298_v7, %v10153_v31  ;;  %v10303_v42 = vsel %vm929_vm1, %v2026_v49, %v2028_v22  ;;  %v10312_v4 = vld [vmem:[%s7384_s21 + $0x100] sm:$0x3] }
 0x299   : > { %15969 = vst [vmem:[#allocation222_spill] sm:$0xff] %v10291_v8  ;;  %15971 = vst [vmem:[#allocation259_spill] sm:$0xff] %v10303_v42  ;;  %3674 = vrot.lane.b32.xlu1 %v3633_v34, %s7340_s24  ;;  %3672 = vrot.lane.b32.xlu0 %v3632_v10, %s7340_s24  ;;  %v3635_v32 = vmul.f32 %v10053_v30, %v9913_v36  ;;  %v3634_v43 = vmul.f32 %v10053_v30, %v9916_v15  ;;  %v10315_v23 = vstv %s10222_s26  ;;  %v15973_v22 = vld [vmem:[#allocation89_spill] sm:$0xff]  ;;  %v15974_v42 = vld [vmem:[#allocation192_spill] sm:$0xff]  ;;  %v10330_v28 = vpop.permute.xlu1 %3274  ;;  %s14057_s26 = sld [smem:[#allocation2 + $0x32]] }
 0x29a   : > { %v1299_v54 = vadd.f32 %v15972_v9, %v10140_v25  ;;  %v1298_v24 = vadd.f32 %v15973_v22, %v10144_v48  ;;  %v2031_v7 = vrot.slane %v1979_v50, 2  ;;  %v2033_v34 = vrot.slane %v1980_v47, 2  ;;  %v15975_v8 = vld [vmem:[#allocation11_spill] sm:$0xff]  ;;  %15977 = vst [vmem:[#allocation65_spill] sm:$0xff] %v10330_v28  ;;  %v10332_v1 = vpop.permute.xlu0 %3272  ;;  %v16001_v44 = vld [vmem:[#allocation93_spill] sm:$0xff] }
 0x29b   : > { %v10322_v10 = vadd.f32 %v15974_v42, %v1297_v39  ;;  %v10325_v6 = vadd.f32 %v15975_v8, %v1296_v2  ;;  %v10328_v40 = vsel %vm929_vm1, %v2025_v53, %v2026_v49  ;;  %v2030_v5 = vrot.slane %v1978_v51, 2  ;;  %15978 = vst [vmem:[#allocation66_spill] sm:$0xff] %v10332_v1  ;;  %v15979_v8 = vld [vmem:[#allocation90_spill] sm:$0xff]  ;;  %v15980_v49 = vld [vmem:[#allocation31_spill] sm:$0xff]  ;;  %v15981_v2 = vld [vmem:[#allocation32_spill] sm:$0xff] }
 0x29c   : > { %15976 = vst [vmem:[#allocation260_spill] sm:$0xff] %v10328_v40  ;;  %v2036_v25 = vrot.slane %v10295_v45, 2  ;;  %v2038_v9 = vrot.slane %v1983_v16, 2  ;;  %v3845_v48 = vmul.f32 %v10315_v23, %v9669_v62  ;;  %v3846_v50 = vmul.f32 %v10315_v23, %v10312_v4  ;;  %v15982_v51 = vld [vmem:[#allocation194_spill] sm:$0xff]  ;;  %v15983_v16 = vld [vmem:[#allocation12_spill] sm:$0xff] }
 0x29d   : > { %v1301_v47 = vadd.f32 %v15979_v8, %v10173_v27  ;;  %3678 = vrot.lane.b32.xlu1 %v3635_v32, %s7340_s24  ;;  %3676 = vrot.lane.b32.xlu0 %v3634_v43, %s7340_s24  ;;  %v3637_v39 = vmul.f32 %v10053_v30, %v15980_v49  ;;  %v3636_v53 = vmul.f32 %v10053_v30, %v15981_v2  ;;  %v15985_v32 = vld [vmem:[#allocation91_spill] sm:$0xff]  ;;  %v15987_v1 = vld [vmem:[#allocation36_spill] sm:$0xff] }
 0x29e   : > { %v10348_v45 = vadd.f32 %v15982_v51, %v1299_v54  ;;  %v10351_v42 = vadd.f32 %v15983_v16, %v1298_v24  ;;  %v10354_v22 = vsel %vm929_vm1, %v2031_v7, %v2033_v34  ;;  %v3844_v27 = vmul.f32 %v10315_v23, %v9675_v26  ;;  %v15988_v54 = vld [vmem:[#allocation43_spill] sm:$0xff]  ;;  %v10369_v24 = vpop.permute.xlu1 %3278  ;;  %v10371_v34 = vpop.permute.xlu0 %3276  ;;  %v10374_v16 = vld [vmem:[%s7384_s21 + $0x118] sm:$0x3] }
 0x29f   : > { %15984 = vst [vmem:[#allocation67_spill] sm:$0xff] %v10354_v22  ;;  %v1300_v43 = vadd.f32 %v15985_v32, %v10177_v19  ;;  %v10361_v8 = vsel %vm929_vm1, %v2030_v5, %v2031_v7  ;;  %v1981_v28 = vmul.f32 %v15987_v1, %v10153_v31  ;;  %v10367_v51 = vmul.f32 %v15988_v54, %v10153_v31  ;;  %v10380_v19 = vld [vmem:[%s7384_s21 + $0x88] sm:$0x3]  ;;  %v16000_v1 = vld [vmem:[#allocation92_spill] sm:$0xff] }
 0x2a0   : > { %15986 = vst [vmem:[#allocation261_spill] sm:$0xff] %v10361_v8  ;;  %15989 = vst [vmem:[#allocation225_spill] sm:$0xff] %v10369_v24  ;;  %v10377_v22 = vsel %vm929_vm1, %v2036_v25, %v2038_v9  ;;  %v1986_v5 = vmul.f32 %v10380_v19, %v10153_v31  ;;  %v3893_v7 = vrot.slane %v3845_v48, 1  ;;  %v3895_v32 = vrot.slane %v3846_v50, 1  ;;  %v15993_v8 = vld [vmem:[#allocation197_spill] sm:$0xff] }
 0x2a1   : > { %15990 = vst [vmem:[#allocation262_spill] sm:$0xff] %v10371_v34  ;;  %15991 = vst [vmem:[#allocation5_spill] sm:$0xff] %v10377_v22  ;;  %v10385_v40 = vadd.f32 %v15993_v8, %v1301_v47  ;;  %3682 = vrot.lane.b32.xlu1 %v3637_v39, %s7340_s24  ;;  %3680 = vrot.lane.b32.xlu0 %v3636_v53, %s7340_s24  ;;  %v15994_v34 = vld [vmem:[#allocation37_spill] sm:$0xff]  ;;  %v3638_v9 = vmul.f32 %v10053_v30, %v15995_v35  ;;  %v3892_v22 = vrot.slane %v3844_v27, 1  ;;  %v10400_v47 = vld [vmem:[%s7384_s21 + $0x130] sm:$0x3] }
 0x2a2   : > { %15992 = vst [vmem:[#allocation265_spill] sm:$0xff] %v10380_v19  ;;  %v3639_v24 = vmul.f32 %v10053_v30, %v15994_v34  ;;  %v3848_v18 = vmul.f32 %v10315_v23, %v9720_v52  ;;  %v3849_v48 = vmul.f32 %v10315_v23, %v10374_v16  ;;  %v3847_v50 = vmul.f32 %v10315_v23, %v9723_v38  ;;  %v15996_v39 = vld [vmem:[#allocation14_spill] sm:$0xff]  ;;  %v15997_v30 = vld [vmem:[#allocation44_spill] sm:$0xff]  ;;  %v10408_v61 = vpop.permute.xlu1 %3282  ;;  %v10410_v54 = vpop.permute.xlu0 %3280 }
 0x2a3   : > { %v10403_v53 = vadd.f32 %v15996_v39, %v1300_v43  ;;  %v2035_v8 = vrot.slane %v1981_v28, 2  ;;  %v2041_v19 = vrot.slane %v10367_v51, 2  ;;  %v1984_v27 = vmul.f32 %v15997_v30, %v10153_v31  ;;  %15998 = vst [vmem:[#allocation68_spill] sm:$0xff] %v10408_v61  ;;  %15999 = vst [vmem:[#allocation69_spill] sm:$0xff] %v10410_v54  ;;  %v16003_v39 = vld [vmem:[#allocation45_spill] sm:$0xff] }
 0x2a4   : > { %v1303_v41 = vadd.f32 %v16000_v1, %v10185_v55  ;;  %v1302_v13 = vadd.f32 %v16001_v44, %v10189_v3  ;;  %v2043_v29 = vrot.slane %v1986_v5, 2  ;;  %v3896_v43 = vsel %vm498_vm0, %v3893_v7, %v3895_v32  ;;  %v10426_v1 = vld [vmem:[%s7384_s21 + $0x148] sm:$0x3]  ;;  %v10437_v61 = vld [vmem:[%s7384_s21 + $0xa0] sm:$0x3] }
 0x2a5   : > { %3686 = vrot.lane.b32.xlu1 %v3639_v24, %s7340_s24  ;;  %3684 = vrot.lane.b32.xlu0 %v3638_v9, %s7340_s24  ;;  %v3851_v28 = vmul.f32 %v10315_v23, %v9774_v0  ;;  %v3852_v51 = vmul.f32 %v10315_v23, %v10400_v47  ;;  %v3850_v55 = vmul.f32 %v10315_v23, %v9777_v11  ;;  %v3898_v3 = vrot.slane %v3848_v18, 1  ;;  %v16007_v18 = vld [vmem:[#allocation199_spill] sm:$0xff] }
 0x2a6   : > { %v3894_v44 = vsel %vm498_vm0, %v3892_v22, %v3893_v7  ;;  %v3900_v5 = vrot.slane %v3849_v48, 1  ;;  %v3897_v32 = vrot.slane %v3847_v50, 1  ;;  %v10430_v24 = vsel %vm929_vm1, %v2035_v8, %v2036_v25  ;;  %16004 = vst [vmem:[#allocation70_spill] sm:$0xff] %v10437_v61  ;;  %v10441_v21 = vpop.permute.xlu1 %3286  ;;  %v10443_v11 = vpop.permute.xlu0 %3284  ;;  %v16009_v50 = vld [vmem:[#allocation52_spill] sm:$0xff] }
 0x2a7   : > { %16002 = vst [vmem:[#allocation226_spill] sm:$0xff] %v10430_v24  ;;  %v2040_v9 = vrot.slane %v1984_v27, 2  ;;  %v10434_v54 = vmul.f32 %v16003_v39, %v10153_v31  ;;  %v1989_v30 = vmul.f32 %v10437_v61, %v10153_v31  ;;  %16005 = vst [vmem:[#allocation71_spill] sm:$0xff] %v10441_v21  ;;  %v10446_v22 = vadd.f32 %v16007_v18, %v1303_v41  ;;  %v16011_v24 = vld [vmem:[#allocation94_spill] sm:$0xff] }
 0x2a8   : > { %16006 = vst [vmem:[#allocation72_spill] sm:$0xff] %v10443_v11  ;;  %v10449_v25 = vsel %vm929_vm1, %v2041_v19, %v2043_v29  ;;  %v3854_v7 = vmul.f32 %v10315_v23, %v9822_v56  ;;  %v3855_v48 = vmul.f32 %v10315_v23, %v10426_v1  ;;  %v10457_v8 = vmul.f32 %v16009_v50, %v10153_v31  ;;  %v16010_v29 = vld [vmem:[#allocation15_spill] sm:$0xff] }
 0x2a9   : > { %16008 = vst [vmem:[#allocation73_spill] sm:$0xff] %v10449_v25  ;;  %3934 = vrot.lane.b32.xlu1 %v3896_v43, %s7339_s22  ;;  %3932 = vrot.lane.b32.xlu0 %v3894_v44, %s7339_s22  ;;  %v3903_v41 = vrot.slane %v3851_v28, 1  ;;  %v3905_v27 = vrot.slane %v3852_v51, 1  ;;  %v3902_v18 = vrot.slane %v3850_v55, 1  ;;  %v10462_v11 = vadd.f32 %v16010_v29, %v1302_v13  ;;  %v16012_v43 = vld [vmem:[#allocation95_spill] sm:$0xff]  ;;  %v16019_v29 = vld [vmem:[#allocation200_spill] sm:$0xff] }
 0x2aa   : > { %v3901_v21 = vsel %vm498_vm0, %v3898_v3, %v3900_v5  ;;  %v3899_v61 = vsel %vm498_vm0, %v3897_v32, %v3898_v3  ;;  %v3853_v25 = vmul.f32 %v10315_v23, %v9825_v59  ;;  %v1305_v50 = vadd.f32 %v16011_v24, %v10226_v17  ;;  %v10473_v55 = vpop.permute.xlu1 %3290  ;;  %v10475_v13 = vpop.permute.xlu0 %3288  ;;  %v10478_v44 = vld [vmem:[%s7384_s21 + $0x160] sm:$0x3] }
 0x2ab   : > { %v1304_v39 = vadd.f32 %v16012_v43, %v10232_v37  ;;  %v2046_v28 = vrot.slane %v10434_v54, 2  ;;  %v2048_v51 = vrot.slane %v1989_v30, 2  ;;  %16013 = vst [vmem:[#allocation74_spill] sm:$0xff] %v10473_v55  ;;  %16014 = vst [vmem:[#allocation75_spill] sm:$0xff] %v10475_v13  ;;  %v10481_v3 = vsel %vm929_vm1, %v2040_v9, %v2041_v19  ;;  %v16017_v54 = vld [vmem:[#allocation48_spill] sm:$0xff]  ;;  %v16025_v55 = vld [vmem:[#allocation187_spill] sm:$0xff] }
 0x2ac   : > { %16015 = vst [vmem:[#allocation76_spill] sm:$0xff] %v10478_v44  ;;  %16016 = vst [vmem:[#allocation77_spill] sm:$0xff] %v10481_v3  ;;  %v10485_v5 = vmul.f32 %v9742_v12, %v10153_v31  ;;  %v3908_v17 = vrot.slane %v3854_v7, 1  ;;  %v3910_v32 = vrot.slane %v3855_v48, 1  ;;  %v2045_v37 = vrot.slane %v10457_v8, 2 }
 0x2ad   : > { %v1992_v30 = vmul.f32 %v16017_v54, %v10153_v31  ;;  %3938 = vrot.lane.b32.xlu1 %v3901_v21, %s7339_s22  ;;  %3936 = vrot.lane.b32.xlu0 %v3899_v61, %s7339_s22  ;;  %v3906_v24 = vsel %vm498_vm0, %v3903_v41, %v3905_v27  ;;  %v3904_v19 = vsel %vm498_vm0, %v3902_v18, %v3903_v41  ;;  %v3907_v9 = vrot.slane %v3853_v25, 1  ;;  %v10501_v8 = vld [vmem:[%s7384_s21 + $0x178] sm:$0x3] }
 0x2ae   : > { %v3857_v12 = vmul.f32 %v10315_v23, %v9864_v63  ;;  %v3858_v7 = vmul.f32 %v10315_v23, %v10478_v44  ;;  %v3856_v48 = vmul.f32 %v10315_v23, %v9867_v33  ;;  %16018 = vst [vmem:[#allocation78_spill] sm:$0xff] %v10501_v8  ;;  %v10504_v21 = vadd.f32 %v16019_v29, %v1305_v50  ;;  %v16020_v61 = vld [vmem:[#allocation16_spill] sm:$0xff]  ;;  %v10514_v43 = vpop.permute.xlu1 %3294  ;;  %v10516_v54 = vpop.permute.xlu0 %3292  ;;  %v16026_v29 = vld [vmem:[#allocation55_spill] sm:$0xff] }
 0x2af   : > { %v10507_v27 = vadd.f32 %v16020_v61, %v1304_v39  ;;  %v10510_v25 = vsel %vm929_vm1, %v2046_v28, %v2048_v51  ;;  %v16022_v41 = vld [vmem:[#allocation204_spill] sm:$0xff]  ;;  %16023 = vst [vmem:[#allocation79_spill] sm:$0xff] %v10514_v43  ;;  %16024 = vst [vmem:[#allocation80_spill] sm:$0xff] %v10516_v54  ;;  %v2051_v13 = vrot.slane %v10485_v5, 2  ;;  %v1994_v50 = vmul.f32 %v16025_v55, %v10153_v31  ;;  %v10533_v55 = vld [vmem:[%s7384_s21 + $0x190] sm:$0x3] }
 0x2b0   : > { %16021 = vst [vmem:[#allocation84_spill] sm:$0xff] %v10510_v25  ;;  %v1990_v18 = vmul.f32 %v16022_v41, %v10153_v31  ;;  %v1995_v3 = vmul.f32 %v16026_v29, %v10153_v31  ;;  %v3911_v39 = vsel %vm498_vm0, %v3908_v17, %v3910_v32  ;;  %v2053_v61 = vrot.slane %v1992_v30, 2  ;;  %16027 = vst [vmem:[#allocation81_spill] sm:$0xff] %v10533_v55  ;;  %v16029_v43 = vld [vmem:[#allocation97_spill] sm:$0xff] }
 0x2b1   : > { %3942 = vrot.lane.b32.xlu1 %v3906_v24, %s7339_s22  ;;  %3940 = vrot.lane.b32.xlu0 %v3904_v19, %s7339_s22  ;;  %v3860_v51 = vmul.f32 %v10315_v23, %v9913_v36  ;;  %v3861_v41 = vmul.f32 %v10315_v23, %v10501_v8  ;;  %v3859_v5 = vmul.f32 %v10315_v23, %v9916_v15  ;;  %v3913_v54 = vrot.slane %v3857_v12, 1  ;;  %v16028_v24 = vld [vmem:[#allocation96_spill] sm:$0xff]  ;;  %v16030_v8 = vld [vmem:[#allocation7_spill] sm:$0xff] }
 0x2b2   : > { %v3909_v29 = vsel %vm498_vm0, %v3907_v9, %v3908_v17  ;;  %v3915_v32 = vrot.slane %v3858_v7, 1  ;;  %v3912_v30 = vrot.slane %v3856_v48, 1  ;;  %v1307_v19 = vadd.f32 %v16028_v24, %v10236_v58  ;;  %v10544_v15 = vpop.permute.xlu1 %3298  ;;  %v10546_v44 = vpop.permute.xlu0 %3296 }
 0x2b3   : > { %v1306_v25 = vadd.f32 %v16029_v43, %v10240_v20  ;;  %v2050_v36 = vrot.slane %v1990_v18, 2  ;;  %v1993_v33 = vmul.f32 %v16030_v8, %v10153_v31  ;;  %16031 = vst [vmem:[#allocation82_spill] sm:$0xff] %v10544_v15  ;;  %16032 = vst [vmem:[#allocation83_spill] sm:$0xff] %v10546_v44  ;;  %v2056_v17 = vrot.slane %v1994_v50, 2  ;;  %v16033_v50 = vld [vmem:[#allocation98_spill] sm:$0xff] }
 0x2b4   : > { %v2058_v9 = vrot.slane %v1995_v3, 2  ;;  %v3863_v12 = vmul.f32 %v10315_v23, %v15980_v49  ;;  %v3864_v7 = vmul.f32 %v10315_v23, %v10533_v55  ;;  %v3918_v58 = vrot.slane %v3860_v51, 1  ;;  %v16034_v51 = vld [vmem:[#allocation99_spill] sm:$0xff] }
 0x2b5   : > { %3946 = vrot.lane.b32.xlu1 %v3911_v39, %s7339_s22  ;;  %3944 = vrot.lane.b32.xlu0 %v3909_v29, %s7339_s22  ;;  %v3920_v20 = vrot.slane %v3861_v41, 1  ;;  %v3917_v31 = vrot.slane %v3859_v5, 1  ;;  %v3862_v48 = vmul.f32 %v10315_v23, %v15981_v2  ;;  %v10557_v8 = vsel %vm929_vm1, %v2045_v37, %v2046_v28  ;;  %v16035_v5 = vld [vmem:[#allocation17_spill] sm:$0xff]  ;;  %v10574_v37 = vld [vmem:[%s7384_s21 + $0x1a8] sm:$0x3] }
 0x2b6   : > { %v10560_v3 = vsel %vm929_vm1, %v2051_v13, %v2053_v61  ;;  %v3916_v18 = vsel %vm498_vm0, %v3913_v54, %v3915_v32  ;;  %v3914_v43 = vsel %vm498_vm0, %v3912_v30, %v3913_v54  ;;  %v1309_v39 = vadd.f32 %v16033_v50, %v10250_v46  ;;  %v10569_v44 = vpop.permute.xlu1 %3302  ;;  %v10571_v28 = vpop.permute.xlu0 %3300  ;;  %16038 = vst [vmem:[#allocation87_spill] sm:$0xff] %v10574_v37  ;;  %v16039_v61 = vld [vmem:[#allocation18_spill] sm:$0xff] }
 0x2b7   : > { %v1308_v41 = vadd.f32 %v16034_v51, %v10254_v57  ;;  %v1341_v29 = vadd.f32 %v16035_v5, %v1307_v19  ;;  %v2055_v24 = vrot.slane %v1993_v33, 2  ;;  %16036 = vst [vmem:[#allocation85_spill] sm:$0xff] %v10569_v44  ;;  %16037 = vst [vmem:[#allocation86_spill] sm:$0xff] %v10571_v28  ;;  %v1340_v32 = vadd.f32 %v16039_v61, %v1306_v25  ;;  %v16045_v5 = vld [vmem:[#allocation101_spill] sm:$0xff]  ;;  %v16047_v44 = vld [vmem:[#allocation103_spill] sm:$0xff] }
 0x2b8   : > { %v10578_v54 = vsel %vm929_vm1, %v2050_v36, %v2051_v13  ;;  %v3923_v30 = vrot.slane %v3863_v12, 1  ;;  %v3925_v46 = vrot.slane %v3864_v7, 1  ;;  %v10581_v50 = vsel %vm929_vm1, %v2056_v17, %v2058_v9  ;;  %v16040_v12 = vld [vmem:[#allocation100_spill] sm:$0xff] }
 0x2b9   : > { %3950 = vrot.lane.b32.xlu1 %v3916_v18, %s7339_s22  ;;  %3948 = vrot.lane.b32.xlu0 %v3914_v43, %s7339_s22  ;;  %v3921_v33 = vsel %vm498_vm0, %v3918_v58, %v3920_v20  ;;  %v3919_v57 = vsel %vm498_vm0, %v3917_v31, %v3918_v58  ;;  %v3922_v19 = vrot.slane %v3862_v48, 1  ;;  %v3866_v25 = vmul.f32 %v10315_v23, %v15994_v34  ;;  %v16041_v18 = vld [vmem:[#allocation21_spill] sm:$0xff] }
 0x2ba   : > { %v3867_v36 = vmul.f32 %v10315_v23, %v10574_v37  ;;  %v3865_v13 = vmul.f32 %v10315_v23, %v15995_v35  ;;  %v10594_v9 = vstv %s10536_s27  ;;  %v1427_v7 = vadd.f32 %v16040_v12, %v10265_v14  ;;  %v16042_v20 = vld [vmem:[#allocation205_spill] sm:$0xff]  ;;  %v10603_v31 = vpop.permute.xlu1 %3428  ;;  %v10605_v48 = vpop.permute.xlu0 %3426  ;;  %v16046_v23 = vld [vmem:[#allocation102_spill] sm:$0xff]  ;;  %s14336_s27 = sld [smem:[#allocation2 + $0x34]] }
 0x2bb   : > { %v1343_v43 = vadd.f32 %v16041_v18, %v1309_v39  ;;  %v1342_v51 = vadd.f32 %v16042_v20, %v1308_v41  ;;  %v10601_v58 = vsel %vm929_vm1, %v2055_v24, %v2056_v17  ;;  %16043 = vst [vmem:[#allocation88_spill] sm:$0xff] %v10603_v31  ;;  %16044 = vst [vmem:[#allocation89_spill] sm:$0xff] %v10605_v48  ;;  %v16112_v48 = vld [vmem:[#allocation50_spill] sm:$0xff] }
 0x2bc   : > { %v1426_v61 = vadd.f32 %v16045_v5, %v10288_v60  ;;  %v1429_v28 = vadd.f32 %v16046_v23, %v10322_v10  ;;  %v1428_v14 = vadd.f32 %v16047_v44, %v10325_v6  ;;  %v3926_v39 = vsel %vm498_vm0, %v3923_v30, %v3925_v46  ;;  %v16048_v44 = vld [vmem:[#allocation104_spill] sm:$0xff] }
 0x2bd   : > { %3954 = vrot.lane.b32.xlu1 %v3921_v33, %s7339_s22  ;;  %3952 = vrot.lane.b32.xlu0 %v3919_v57, %s7339_s22  ;;  %v3924_v17 = vsel %vm498_vm0, %v3922_v19, %v3923_v30  ;;  %v3999_v41 = vmul.f32 %v10594_v9, %v9669_v62  ;;  %v4000_v60 = vmul.f32 %v10594_v9, %v10312_v4  ;;  %v3928_v10 = vrot.slane %v3866_v25, 1  ;;  %v16049_v33 = vld [vmem:[#allocation105_spill] sm:$0xff]  ;;  %v16050_v30 = vld [vmem:[#allocation106_spill] sm:$0xff]  ;;  %v16051_v62 = vld [vmem:[#allocation107_spill] sm:$0xff] }
 0x2be   : > { %v3930_v24 = vrot.slane %v3867_v36, 1  ;;  %v3927_v12 = vrot.slane %v3865_v13, 1  ;;  %v3998_v6 = vmul.f32 %v10594_v9, %v9675_v26  ;;  %v1431_v46 = vadd.f32 %v16048_v44, %v10348_v45  ;;  %v10637_v25 = vpop.permute.xlu1 %3432  ;;  %v10639_v36 = vpop.permute.xlu0 %3430  ;;  %v16054_v26 = vld [vmem:[#allocation108_spill] sm:$0xff]  ;;  %v16055_v45 = vld [vmem:[#allocation109_spill] sm:$0xff] }
 0x2bf   : > { %v1430_v57 = vadd.f32 %v16049_v33, %v10351_v42  ;;  %v10631_v19 = vadd.f32 %v16050_v30, %v10385_v40  ;;  %v10635_v18 = vadd.f32 %v16051_v62, %v10403_v53  ;;  %16052 = vst [vmem:[#allocation192_spill] sm:$0xff] %v10637_v25  ;;  %16053 = vst [vmem:[#allocation11_spill] sm:$0xff] %v10639_v36  ;;  %v16056_v53 = vld [vmem:[#allocation116_spill] sm:$0xff]  ;;  %v4047_v23 = vrot.slane %v3999_v41, 1  ;;  %v16060_v41 = vld [vmem:[#allocation113_spill] sm:$0xff] }
 0x2c0   : > { %v10643_v13 = vadd.f32 %v16054_v26, %v10446_v22  ;;  %v10647_v20 = vadd.f32 %v16055_v45, %v10462_v11  ;;  %v4002_v40 = vmul.f32 %v10594_v9, %v9720_v52  ;;  %v4003_v42 = vmul.f32 %v10594_v9, %v10374_v16  ;;  %v16057_v11 = vld [vmem:[#allocation110_spill] sm:$0xff]  ;;  %v16059_v26 = vld [vmem:[#allocation112_spill] sm:$0xff] }
 0x2c1   : > { %v1525_v5 = vadd.f32 %v16056_v53, %v1427_v7  ;;  %3958 = vrot.lane.b32.xlu1 %v3926_v39, %s7339_s22  ;;  %3956 = vrot.lane.b32.xlu0 %v3924_v17, %s7339_s22  ;;  %v4049_v22 = vrot.slane %v4000_v60, 1  ;;  %v4001_v44 = vmul.f32 %v10594_v9, %v9723_v38  ;;  %v10660_v33 = vadd.f32 %v16057_v11, %v10504_v21  ;;  %v16058_v7 = vld [vmem:[#allocation111_spill] sm:$0xff]  ;;  %v16061_v38 = vld [vmem:[#allocation117_spill] sm:$0xff] }
 0x2c2   : > { %v3931_v52 = vsel %vm498_vm0, %v3928_v10, %v3930_v24  ;;  %v3929_v30 = vsel %vm498_vm0, %v3927_v12, %v3928_v10  ;;  %v4046_v62 = vrot.slane %v3998_v6, 1  ;;  %v10666_v39 = vadd.f32 %v16058_v7, %v10507_v27  ;;  %v10675_v53 = vpop.permute.xlu1 %3436  ;;  %v10677_v21 = vpop.permute.xlu0 %3434  ;;  %v16064_v24 = vld [vmem:[#allocation114_spill] sm:$0xff]  ;;  %v16065_v6 = vld [vmem:[#allocation115_spill] sm:$0xff] }
 0x2c3   : > { %v10669_v17 = vadd.f32 %v16059_v26, %v1341_v29  ;;  %v10672_v60 = vadd.f32 %v16060_v41, %v1340_v32  ;;  %v1524_v45 = vadd.f32 %v16061_v38, %v1426_v61  ;;  %16062 = vst [vmem:[#allocation90_spill] sm:$0xff] %v10675_v53  ;;  %16063 = vst [vmem:[#allocation31_spill] sm:$0xff] %v10677_v21  ;;  %v10683_v10 = vstv %s10613_s28  ;;  %v16066_v29 = vld [vmem:[#allocation217_spill] sm:$0xff]  ;;  %s14488_s28 = sld [smem:[#allocation2 + $0x30]] }
 0x2c4   : > { %v10680_v11 = vadd.f32 %v16064_v24, %v1343_v43  ;;  %v4052_v12 = vrot.slane %v4002_v40, 1  ;;  %v4054_v27 = vrot.slane %v4003_v42, 1  ;;  %v10686_v7 = vadd.f32 %v16065_v6, %v1342_v51  ;;  %v16067_v51 = vld [vmem:[#allocation19_spill] sm:$0xff]  ;;  %v16076_v21 = vld [vmem:[#allocation121_spill] sm:$0xff] }
 0x2c5   : > { %v10689_v26 = vadd.f32 %v16066_v29, %v1525_v5  ;;  %3962 = vrot.lane.b32.xlu1 %v3931_v52, %s7339_s22  ;;  %3960 = vrot.lane.b32.xlu0 %v3929_v30, %s7339_s22  ;;  %v4050_v32 = vsel %vm498_vm0, %v4047_v23, %v4049_v22  ;;  %v4051_v61 = vrot.slane %v4001_v44, 1  ;;  %v4048_v43 = vsel %vm498_vm0, %v4046_v62, %v4047_v23  ;;  %v16068_v5 = vld [vmem:[#allocation118_spill] sm:$0xff]  ;;  %v16069_v24 = vld [vmem:[#allocation119_spill] sm:$0xff]  ;;  %v16071_v22 = vld [vmem:[#allocation24_spill] sm:$0xff] }
 0x2c6   : > { %v4005_v41 = vmul.f32 %v10594_v9, %v9774_v0  ;;  %v4006_v40 = vmul.f32 %v10594_v9, %v10400_v47  ;;  %v4004_v42 = vmul.f32 %v10594_v9, %v16067_v51  ;;  %v1527_v38 = vadd.f32 %v16068_v5, %v1429_v28  ;;  %v16070_v6 = vld [vmem:[#allocation27_spill] sm:$0xff]  ;;  %v10710_v23 = vpop.permute.xlu1 %3440  ;;  %v10712_v0 = vpop.permute.xlu0 %3438  ;;  %v16075_v62 = vld [vmem:[#allocation120_spill] sm:$0xff]  ;;  %v16077_v51 = vld [vmem:[#allocation218_spill] sm:$0xff] }
 0x2c7   : > { %v1526_v52 = vadd.f32 %v16069_v24, %v1428_v14  ;;  %v10704_v30 = vadd.f32 %v16070_v6, %v1524_v45  ;;  %v10708_v44 = vmul.f32 %v16071_v22, %v10683_v10  ;;  %16073 = vst [vmem:[#allocation194_spill] sm:$0xff] %v10710_v23  ;;  %16074 = vst [vmem:[#allocation12_spill] sm:$0xff] %v10712_v0  ;;  %v16079_v22 = vld [vmem:[#allocation33_spill] sm:$0xff] }
 0x2c8   : > { %v1529_v29 = vadd.f32 %v16075_v62, %v1431_v46  ;;  %v1528_v53 = vadd.f32 %v16076_v21, %v1430_v57  ;;  %v10718_v28 = vmul.f32 %v16077_v51, %v10683_v10  ;;  %v4055_v14 = vsel %vm498_vm0, %v4052_v12, %v4054_v27 }
 0x2c9   : > { %16072 = vst [vmem:[#allocation32_spill] sm:$0xff] %v10708_v44  ;;  %4088 = vrot.lane.b32.xlu1 %v4050_v32, %s7340_s24  ;;  %4086 = vrot.lane.b32.xlu0 %v4048_v43, %s7340_s24  ;;  %v4053_v45 = vsel %vm498_vm0, %v4051_v61, %v4052_v12  ;;  %v4008_v5 = vmul.f32 %v10594_v9, %v9822_v56  ;;  %v4057_v24 = vrot.slane %v4005_v41, 1  ;;  %v4059_v57 = vrot.slane %v4006_v40, 1  ;;  %v16080_v32 = vld [vmem:[#allocation236_spill] sm:$0xff]  ;;  %v16083_v56 = vld [vmem:[#allocation30_spill] sm:$0xff]  ;;  %v16173_v44 = vld [vmem:[#allocation147_spill] sm:$0xff] }
 0x2ca   : > { %16078 = vst [vmem:[#allocation91_spill] sm:$0xff] %v10718_v28  ;;  %v4009_v46 = vmul.f32 %v10594_v9, %v10426_v1  ;;  %v4056_v21 = vrot.slane %v4004_v42, 1  ;;  %v4007_v6 = vmul.f32 %v10594_v9, %v9825_v59  ;;  %v10731_v27 = vadd.f32 %v16079_v22, %v1527_v38  ;;  %v16081_v12 = vld [vmem:[#allocation220_spill] sm:$0xff]  ;;  %v10744_v41 = vpop.permute.xlu1 %3444  ;;  %v10746_v40 = vpop.permute.xlu0 %3442  ;;  %v16087_v59 = vld [vmem:[#allocation122_spill] sm:$0xff]  ;;  %v16088_v38 = vld [vmem:[#allocation123_spill] sm:$0xff] }
 0x2cb   : > { %v10734_v62 = vadd.f32 %v16080_v32, %v1526_v52  ;;  %v10738_v61 = vmul.f32 %v16081_v12, %v10683_v10  ;;  %v10742_v43 = vmul.f32 %v16083_v56, %v10683_v10  ;;  %16085 = vst [vmem:[#allocation38_spill] sm:$0xff] %v10744_v41  ;;  %16086 = vst [vmem:[#allocation14_spill] sm:$0xff] %v10746_v40  ;;  %v16089_v22 = vld [vmem:[#allocation76_spill] sm:$0xff]  ;;  %v16090_v12 = vld [vmem:[#allocation39_spill] sm:$0xff]  ;;  %v4062_v56 = vrot.slane %v4008_v5, 1 }
 0x2cc   : > { %v1531_v42 = vadd.f32 %v16087_v59, %v10631_v19  ;;  %v1530_v51 = vadd.f32 %v16088_v38, %v10635_v18  ;;  %v4011_v52 = vmul.f32 %v10594_v9, %v9864_v63  ;;  %v4012_v32 = vmul.f32 %v10594_v9, %v16089_v22  ;;  %v16091_v41 = vld [vmem:[#allocation25_spill] sm:$0xff]  ;;  %v16092_v59 = vld [vmem:[#allocation42_spill] sm:$0xff] }
 0x2cd   : > { %16082 = vst [vmem:[#allocation197_spill] sm:$0xff] %v10738_v61  ;;  %16084 = vst [vmem:[#allocation37_spill] sm:$0xff] %v10742_v43  ;;  %v10757_v0 = vadd.f32 %v16090_v12, %v1529_v29  ;;  %4092 = vrot.lane.b32.xlu1 %v4055_v14, %s7340_s24  ;;  %4090 = vrot.lane.b32.xlu0 %v4053_v45, %s7340_s24  ;;  %v4064_v40 = vrot.slane %v4009_v46, 1  ;;  %v4010_v19 = vmul.f32 %v10594_v9, %v16091_v41  ;;  %v16093_v29 = vld [vmem:[#allocation124_spill] sm:$0xff]  ;;  %v16094_v14 = vld [vmem:[#allocation125_spill] sm:$0xff] }
 0x2ce   : > { %v10764_v18 = vadd.f32 %v16092_v59, %v1528_v53  ;;  %v4060_v63 = vsel %vm498_vm0, %v4057_v24, %v4059_v57  ;;  %v4058_v38 = vsel %vm498_vm0, %v4056_v21, %v4057_v24  ;;  %v4061_v23 = vrot.slane %v4007_v6, 1  ;;  %v16095_v45 = vld [vmem:[#allocation233_spill] sm:$0xff]  ;;  %v16097_v46 = vld [vmem:[#allocation36_spill] sm:$0xff]  ;;  %v10780_v53 = vpop.permute.xlu1 %3448  ;;  %v10782_v57 = vpop.permute.xlu0 %3446  ;;  %v16101_v24 = vld [vmem:[#allocation47_spill] sm:$0xff] }
 0x2cf   : > { %v1533_v12 = vadd.f32 %v16093_v29, %v10643_v13  ;;  %v1532_v36 = vadd.f32 %v16094_v14, %v10647_v20  ;;  %v10774_v5 = vmul.f32 %v16095_v45, %v10683_v10  ;;  %v10778_v41 = vmul.f32 %v16097_v46, %v10683_v10  ;;  %16099 = vst [vmem:[#allocation199_spill] sm:$0xff] %v10780_v53  ;;  %v16102_v6 = vld [vmem:[#allocation53_spill] sm:$0xff]  ;;  %v16103_v29 = vld [vmem:[#allocation43_spill] sm:$0xff]  ;;  %v16105_v45 = vld [vmem:[#allocation44_spill] sm:$0xff] }
 0x2d0   : > { %16100 = vst [vmem:[#allocation15_spill] sm:$0xff] %v10782_v57  ;;  %v10785_v21 = vadd.f32 %v16101_v24, %v1531_v42  ;;  %v10788_v13 = vadd.f32 %v16102_v6, %v1530_v51  ;;  %v4067_v59 = vrot.slane %v4011_v52, 1  ;;  %v4069_v20 = vrot.slane %v4012_v32, 1  ;;  %v16107_v6 = vld [vmem:[#allocation219_spill] sm:$0xff]  ;;  %v16108_v32 = vld [vmem:[#allocation78_spill] sm:$0xff]  ;;  %v16109_v57 = vld [vmem:[#allocation28_spill] sm:$0xff] }
 0x2d1   : > { %16096 = vst [vmem:[#allocation92_spill] sm:$0xff] %v10774_v5  ;;  %16098 = vst [vmem:[#allocation93_spill] sm:$0xff] %v10778_v41  ;;  %v10792_v14 = vmul.f32 %v16103_v29, %v10683_v10  ;;  %v10796_v46 = vmul.f32 %v16105_v45, %v10683_v10  ;;  %4096 = vrot.lane.b32.xlu1 %v4060_v63, %s7340_s24  ;;  %4094 = vrot.lane.b32.xlu0 %v4058_v38, %s7340_s24  ;;  %v4066_v24 = vrot.slane %v4010_v19, 1  ;;  %v16110_v45 = vld [vmem:[#allocation126_spill] sm:$0xff]  ;;  %v16111_v63 = vld [vmem:[#allocation127_spill] sm:$0xff] }
 0x2d2   : > { %v4065_v42 = vsel %vm498_vm0, %v4062_v56, %v4064_v40  ;;  %v4063_v51 = vsel %vm498_vm0, %v4061_v23, %v4062_v56  ;;  %v4014_v52 = vmul.f32 %v10594_v9, %v16107_v6  ;;  %v4015_v29 = vmul.f32 %v10594_v9, %v16108_v32  ;;  %v16113_v19 = vld [vmem:[#allocation51_spill] sm:$0xff]  ;;  %v10818_v56 = vpop.permute.xlu1 %3452  ;;  %v10820_v6 = vpop.permute.xlu0 %3450  ;;  %v11047_v61 = vld [vmem:[%s7384_s21 + $0x38] sm:$0xff] }
 0x2d3   : > { %16104 = vst [vmem:[#allocation94_spill] sm:$0xff] %v10792_v14  ;;  %16106 = vst [vmem:[#allocation95_spill] sm:$0xff] %v10796_v46  ;;  %v4013_v53 = vmul.f32 %v10594_v9, %v16109_v57  ;;  %v1535_v25 = vadd.f32 %v16110_v45, %v10660_v33  ;;  %v1534_v38 = vadd.f32 %v16111_v63, %v10666_v39  ;;  %v16116_v57 = vld [vmem:[#allocation128_spill] sm:$0xff]  ;;  %v16117_v33 = vld [vmem:[#allocation45_spill] sm:$0xff]  ;;  %v11016_v41 = vstv %s10915_s30 }
 0x2d4   : > { %v10813_v40 = vadd.f32 %v16112_v48, %v1533_v12  ;;  %v10816_v23 = vadd.f32 %v16113_v19, %v1532_v36  ;;  %16114 = vst [vmem:[#allocation48_spill] sm:$0xff] %v10818_v56  ;;  %16115 = vst [vmem:[#allocation200_spill] sm:$0xff] %v10820_v6  ;;  %v1537_v31 = vadd.f32 %v16116_v57, %v10669_v17  ;;  %v16119_v48 = vld [vmem:[#allocation52_spill] sm:$0xff]  ;;  %v4072_v19 = vrot.slane %v4014_v52, 1  ;;  %v16122_v6 = vld [vmem:[#allocation57_spill] sm:$0xff] }
 0x2d5   : > { %v10828_v45 = vmul.f32 %v16117_v33, %v10683_v10  ;;  %v10832_v39 = vmul.f32 %v16119_v48, %v10683_v10  ;;  %v4070_v36 = vsel %vm498_vm0, %v4067_v59, %v4069_v20  ;;  %4100 = vrot.lane.b32.xlu1 %v4065_v42, %s7340_s24  ;;  %4098 = vrot.lane.b32.xlu0 %v4063_v51, %s7340_s24  ;;  %v4074_v57 = vrot.slane %v4015_v29, 1  ;;  %v16121_v20 = vld [vmem:[#allocation129_spill] sm:$0xff]  ;;  %v16153_v46 = vld [vmem:[#allocation136_spill] sm:$0xff] }
 0x2d6   : > { %v4068_v12 = vsel %vm498_vm0, %v4066_v24, %v4067_v59  ;;  %v4017_v17 = vmul.f32 %v10594_v9, %v15980_v49  ;;  %v4018_v63 = vmul.f32 %v10594_v9, %v10533_v55  ;;  %v4071_v33 = vrot.slane %v4013_v53, 1  ;;  %v16123_v59 = vld [vmem:[#allocation58_spill] sm:$0xff]  ;;  %v10853_v49 = vld [vmem:[%s7384_s21 + $0xb0] sm:$0xff]  ;;  %v10859_v52 = vpop.permute.xlu1 %3456  ;;  %v10861_v53 = vpop.permute.xlu0 %3454  ;;  %16167 = vst [vmem:[#allocation116_spill] sm:$0xff] %v11047_v61 }
 0x2d7   : > { %16118 = vst [vmem:[#allocation16_spill] sm:$0xff] %v10828_v45  ;;  %16120 = vst [vmem:[#allocation204_spill] sm:$0xff] %v10832_v39  ;;  %v4016_v48 = vmul.f32 %v10594_v9, %v15981_v2  ;;  %v1536_v42 = vadd.f32 %v16121_v20, %v10672_v60  ;;  %v10847_v51 = vadd.f32 %v16122_v6, %v1535_v25  ;;  %v16127_v2 = vld [vmem:[#allocation130_spill] sm:$0xff]  ;;  %v16128_v60 = vld [vmem:[#allocation131_spill] sm:$0xff] }
 0x2d8   : > { %v10850_v24 = vadd.f32 %v16123_v59, %v1534_v38  ;;  %v10857_v56 = vmul.f32 %v10853_v49, %v10683_v10  ;;  %16125 = vst [vmem:[#allocation55_spill] sm:$0xff] %v10859_v52  ;;  %16126 = vst [vmem:[#allocation96_spill] sm:$0xff] %v10861_v53  ;;  %v1539_v29 = vadd.f32 %v16127_v2, %v10680_v11  ;;  %v10872_v20 = vld [vmem:[%s7384_s21 + $0xa8] sm:$0xff]  ;;  %v4077_v11 = vrot.slane %v4017_v17, 1  ;;  %v16131_v2 = vld [vmem:[#allocation244_spill] sm:$0xff] }
 0x2d9   : > { %v1538_v25 = vadd.f32 %v16128_v60, %v10686_v7  ;;  %v4020_v38 = vmul.f32 %v10594_v9, %v15994_v34  ;;  %v4021_v6 = vmul.f32 %v10594_v9, %v10574_v37  ;;  %16129 = vst [vmem:[#allocation97_spill] sm:$0xff] %v10872_v20  ;;  %v10876_v59 = vmul.f32 %v10872_v20, %v10683_v10 }
 0x2da   : > { %16124 = vst [vmem:[#allocation187_spill] sm:$0xff] %v10857_v56  ;;  %4104 = vrot.lane.b32.xlu1 %v4070_v36, %s7340_s24  ;;  %4102 = vrot.lane.b32.xlu0 %v4068_v12, %s7340_s24  ;;  %v4079_v7 = vrot.slane %v4018_v63, 1  ;;  %v4019_v34 = vmul.f32 %v10594_v9, %v15995_v35  ;;  %v10883_v60 = vadd.f32 %v16131_v2, %v1537_v31  ;;  %v4076_v15 = vrot.slane %v4016_v48, 1  ;;  %v10891_v56 = vld [vmem:[%s7384_s21 + $0xc8] sm:$0xff]  ;;  %v10898_v35 = vld [vmem:[%s7384_s21 + $0xc0] sm:$0xff]  ;;  %v10904_v31 = vpop.permute.xlu1 %3560  ;;  %v10906_v17 = vpop.permute.xlu0 %3558 }
 0x2db   : > { %16130 = vst [vmem:[#allocation7_spill] sm:$0xff] %v10876_v59  ;;  %v4075_v53 = vsel %vm498_vm0, %v4072_v19, %v4074_v57  ;;  %v4073_v52 = vsel %vm498_vm0, %v4071_v33, %v4072_v19  ;;  %v16132_v59 = vld [vmem:[#allocation59_spill] sm:$0xff]  ;;  %16133 = vst [vmem:[#allocation98_spill] sm:$0xff] %v10891_v56  ;;  %v10895_v12 = vmul.f32 %v10891_v56, %v10683_v10  ;;  %v10909_v63 = vstv %s10822_s29  ;;  %v16139_v19 = vld [vmem:[#allocation245_spill] sm:$0xff]  ;;  %s14571_s29 = sld [smem:[#allocation2 + $0x35]] }
 0x2dc   : > { %v10888_v36 = vadd.f32 %v16132_v59, %v1536_v42  ;;  %16135 = vst [vmem:[#allocation17_spill] sm:$0xff] %v10898_v35  ;;  %v10902_v9 = vmul.f32 %v10898_v35, %v10683_v10  ;;  %16137 = vst [vmem:[#allocation100_spill] sm:$0xff] %v10904_v31  ;;  %v1661_v57 = vadd.f32 %v16139_v19, %v1539_v29  ;;  %v16140_v33 = vld [vmem:[#allocation248_spill] sm:$0xff]  ;;  %v4082_v42 = vrot.slane %v4020_v38, 1  ;;  %v10918_v2 = vld [vmem:[%s7384_s21 + $0xe0] sm:$0xff] }
 0x2dd   : > { %16134 = vst [vmem:[#allocation99_spill] sm:$0xff] %v10895_v12  ;;  %16138 = vst [vmem:[#allocation21_spill] sm:$0xff] %v10906_v17  ;;  %v10913_v48 = vadd.f32 %v16140_v33, %v1538_v25  ;;  %v4084_v59 = vrot.slane %v4021_v6, 1  ;;  %v10922_v31 = vmul.f32 %v10918_v2, %v10683_v10  ;;  %v10925_v17 = vld [vmem:[%s7384_s21 + $0xd8] sm:$0xff]  ;;  %v4080_v29 = vsel %vm498_vm0, %v4077_v11, %v4079_v7  ;;  %v16180_v35 = vld [vmem:[#allocation222_spill] sm:$0xff] }
 0x2de   : > { %16136 = vst [vmem:[#allocation18_spill] sm:$0xff] %v10902_v9  ;;  %16141 = vst [vmem:[#allocation205_spill] sm:$0xff] %v10918_v2  ;;  %v10929_v9 = vmul.f32 %v10925_v17, %v10683_v10  ;;  %4108 = vrot.lane.b32.xlu1 %v4075_v53, %s7340_s24  ;;  %4106 = vrot.lane.b32.xlu0 %v4073_v52, %s7340_s24  ;;  %v4081_v25 = vrot.slane %v4019_v34, 1  ;;  %v4078_v38 = vsel %vm498_vm0, %v4076_v15, %v4077_v11  ;;  %v10936_v6 = vld [vmem:[%s7384_s21 + $0xf8] sm:$0xff]  ;;  %v10943_v10 = vld [vmem:[%s7384_s21 + $0xf0] sm:$0xff]  ;;  %v10959_v39 = vpop.permute.xlu1 %3564  ;;  %v10961_v45 = vpop.permute.xlu0 %3562 }
 0x2df   : > { %16142 = vst [vmem:[#allocation101_spill] sm:$0xff] %v10922_v31  ;;  %16143 = vst [vmem:[#allocation102_spill] sm:$0xff] %v10925_v17  ;;  %v4275_v19 = vmul.f32 %v10936_v6, %v10909_v63  ;;  %v4276_v33 = vmul.f32 %v10909_v63, %v10312_v4  ;;  %v4274_v53 = vmul.f32 %v10943_v10, %v10909_v63  ;;  %v16147_v52 = vld [vmem:[#allocation132_spill] sm:$0xff]  ;;  %v16148_v34 = vld [vmem:[#allocation133_spill] sm:$0xff] }
 0x2e0   : > { %16144 = vst [vmem:[#allocation103_spill] sm:$0xff] %v10929_v9  ;;  %16145 = vst [vmem:[#allocation104_spill] sm:$0xff] %v10936_v6  ;;  %v1801_v7 = vadd.f32 %v16147_v52, %v10689_v26  ;;  %v1800_v15 = vadd.f32 %v16148_v34, %v10704_v30  ;;  %v16149_v11 = vld [vmem:[#allocation134_spill] sm:$0xff]  ;;  %v16150_v31 = vld [vmem:[#allocation135_spill] sm:$0xff]  ;;  %v10965_v14 = vadd.f32 %v16153_v46, %v10757_v0 }
 0x2e1   : > { %16146 = vst [vmem:[#allocation105_spill] sm:$0xff] %v10943_v10  ;;  %v10953_v9 = vadd.f32 %v16149_v11, %v10731_v27  ;;  %v10957_v12 = vadd.f32 %v16150_v31, %v10734_v62  ;;  %16151 = vst [vmem:[#allocation106_spill] sm:$0xff] %v10959_v39  ;;  %v16154_v26 = vld [vmem:[#allocation137_spill] sm:$0xff]  ;;  %v16155_v27 = vld [vmem:[#allocation138_spill] sm:$0xff]  ;;  %v4085_v62 = vsel %vm498_vm0, %v4082_v42, %v4084_v59  ;;  %v4325_v46 = vrot.slane %v4276_v33, 2 }
 0x2e2   : > { %16152 = vst [vmem:[#allocation107_spill] sm:$0xff] %v10961_v45  ;;  %v10969_v30 = vadd.f32 %v16154_v26, %v10764_v18  ;;  %v10973_v52 = vadd.f32 %v16155_v27, %v10785_v21  ;;  %4112 = vrot.lane.b32.xlu1 %v4080_v29, %s7340_s24  ;;  %4110 = vrot.lane.b32.xlu0 %v4078_v38, %s7340_s24  ;;  %v10980_v34 = vld [vmem:[%s7384_s21 + $0x110] sm:$0xff]  ;;  %v4323_v21 = vrot.slane %v4275_v19, 2  ;;  %v4322_v11 = vrot.slane %v4274_v53, 2  ;;  %v10987_v59 = vld [vmem:[%s7384_s21 + $0x108] sm:$0xff]  ;;  %v16157_v38 = vld [vmem:[#allocation140_spill] sm:$0xff]  ;;  %v11007_v53 = vpop.permute.xlu1 %3568  ;;  %v11009_v39 = vpop.permute.xlu0 %3566 }
 0x2e3   : > { %v4083_v31 = vsel %vm498_vm0, %v4081_v25, %v4082_v42  ;;  %v4278_v0 = vmul.f32 %v10980_v34, %v10909_v63  ;;  %v4279_v18 = vmul.f32 %v10909_v63, %v10374_v16  ;;  %v4277_v29 = vmul.f32 %v10987_v59, %v10909_v63  ;;  %v16156_v42 = vld [vmem:[#allocation139_spill] sm:$0xff]  ;;  %v16158_v27 = vld [vmem:[#allocation141_spill] sm:$0xff]  ;;  %v16159_v19 = vld [vmem:[#allocation142_spill] sm:$0xff]  ;;  %16160 = vst [vmem:[#allocation108_spill] sm:$0xff] %v11007_v53 }
 0x2e4   : > { %v10993_v25 = vadd.f32 %v16156_v42, %v10788_v13  ;;  %v10997_v26 = vadd.f32 %v16157_v38, %v10813_v40  ;;  %v11001_v45 = vadd.f32 %v16158_v27, %v10816_v23  ;;  %v11005_v33 = vadd.f32 %v16159_v19, %v10847_v51  ;;  %16161 = vst [vmem:[#allocation109_spill] sm:$0xff] %v11009_v39  ;;  %v16162_v13 = vld [vmem:[#allocation143_spill] sm:$0xff]  ;;  %v11019_v40 = vld [vmem:[%s7384_s21 + $0x128] sm:$0xff]  ;;  %v16163_v38 = vld [vmem:[#allocation144_spill] sm:$0xff] }
 0x2e5   : > { %v11013_v42 = vadd.f32 %v16162_v13, %v10850_v24  ;;  %v4281_v23 = vmul.f32 %v11019_v40, %v10909_v63  ;;  %v4282_v51 = vmul.f32 %v10909_v63, %v10400_v47  ;;  %v11027_v27 = vadd.f32 %v16163_v38, %v10883_v60  ;;  %v11032_v13 = vld [vmem:[%s7384_s21 + $0x120] sm:$0xff]  ;;  %v16165_v38 = vld [vmem:[#allocation146_spill] sm:$0xff] }
 0x2e6   : > { %4116 = vrot.lane.b32.xlu1 %v4085_v62, %s7340_s24  ;;  %4114 = vrot.lane.b32.xlu0 %v4083_v31, %s7340_s24  ;;  %v4328_v24 = vrot.slane %v4278_v0, 2  ;;  %v4330_v19 = vrot.slane %v4279_v18, 2  ;;  %v4280_v39 = vmul.f32 %v11032_v13, %v10909_v63  ;;  %v16164_v53 = vld [vmem:[#allocation145_spill] sm:$0xff]  ;;  %v4326_v43 = vsel %vm929_vm1, %v4323_v21, %v4325_v46  ;;  %v16166_v0 = vld [vmem:[#allocation148_spill] sm:$0xff]  ;;  %v11057_v46 = vpop.permute.xlu1 %3572 }
 0x2e7   : > { %v11038_v5 = vadd.f32 %v16164_v53, %v10888_v36  ;;  %v4324_v60 = vsel %vm929_vm1, %v4322_v11, %v4323_v21  ;;  %v4327_v62 = vrot.slane %v4277_v29, 2  ;;  %v11043_v31 = vadd.f32 %v16165_v38, %v1661_v57  ;;  %v16168_v36 = vld [vmem:[#allocation249_spill] sm:$0xff]  ;;  %16169 = vst [vmem:[#allocation110_spill] sm:$0xff] %v11057_v46  ;;  %v11059_v21 = vpop.permute.xlu0 %3570  ;;  %v11063_v29 = vld [vmem:[%s7384_s21 + $0x30] sm:$0xff]  ;;  %v11092_v46 = vld [vmem:[%s7384_s21 + $0x138] sm:$0xff] }
 0x2e8   : > { %v1955_v18 = vadd.f32 %v16166_v0, %v1801_v7  ;;  %v11051_v28 = vmul.f32 %v11047_v61, %v11016_v41  ;;  %v11055_v53 = vmul.f32 %v16168_v36, %v11016_v41  ;;  %16170 = vst [vmem:[#allocation111_spill] sm:$0xff] %v11059_v21  ;;  %v16171_v11 = vld [vmem:[#allocation149_spill] sm:$0xff]  ;;  %16172 = vst [vmem:[#allocation112_spill] sm:$0xff] %v11063_v29  ;;  %v4333_v38 = vrot.slane %v4281_v23, 2  ;;  %v11074_v61 = vld [vmem:[%s7384_s21 + $0x50] sm:$0xff] }
 0x2e9   : > { %v1954_v57 = vadd.f32 %v16171_v11, %v1800_v15  ;;  %v11067_v7 = vmul.f32 %v11063_v29, %v11016_v41  ;;  %v4335_v0 = vrot.slane %v4282_v51, 2  ;;  %v11071_v36 = vadd.f32 %v16173_v44, %v10913_v48  ;;  %16174 = vst [vmem:[#allocation113_spill] sm:$0xff] %v11074_v61  ;;  %v11085_v51 = vld [vmem:[%s7384_s21 + $0x140] sm:$0xff] }
 0x2ea   : > { %v11078_v21 = vmul.f32 %v11074_v61, %v11016_v41  ;;  %4364 = vrot.lane.b32.xlu1 %v4326_v43, %s7339_s22  ;;  %4362 = vrot.lane.b32.xlu0 %v4324_v60, %s7339_s22  ;;  %v4331_v15 = vsel %vm929_vm1, %v4328_v24, %v4330_v19  ;;  %v4332_v11 = vrot.slane %v4280_v39, 2  ;;  %v4329_v23 = vsel %vm929_vm1, %v4327_v62, %v4328_v24  ;;  %v16175_v60 = vld [vmem:[#allocation150_spill] sm:$0xff]  ;;  %v16176_v39 = vld [vmem:[#allocation151_spill] sm:$0xff]  ;;  %v11104_v17 = vpop.permute.xlu1 %3576 }
 0x2eb   : > { %v4284_v44 = vmul.f32 %v11085_v51, %v10909_v63  ;;  %v4285_v48 = vmul.f32 %v10909_v63, %v10426_v1  ;;  %v4283_v43 = vmul.f32 %v11092_v46, %v10909_v63  ;;  %v1957_v19 = vadd.f32 %v16175_v60, %v10953_v9  ;;  %v16177_v62 = vld [vmem:[#allocation62_spill] sm:$0xff]  ;;  %16178 = vst [vmem:[#allocation117_spill] sm:$0xff] %v11104_v17  ;;  %v11106_v2 = vpop.permute.xlu0 %3574  ;;  %v16186_v17 = vld [vmem:[#allocation63_spill] sm:$0xff] }
 0x2ec   : > { %v1956_v24 = vadd.f32 %v16176_v39, %v10957_v12  ;;  %v11101_v61 = vadd.f32 %v16177_v62, %v1955_v18  ;;  %v2681_v29 = vrot.slane %v11051_v28, 1  ;;  %16179 = vst [vmem:[#allocation114_spill] sm:$0xff] %v11106_v2  ;;  %v11109_v56 = vadd.f32 %v16180_v35, %v1954_v57  ;;  %v11119_v18 = vld [vmem:[%s7384_s21 + $0x158] sm:$0xff]  ;;  %v11126_v39 = vld [vmem:[%s7384_s21 + $0x150] sm:$0xff] }
 0x2ed   : > { %v2683_v20 = vrot.slane %v11055_v53, 1  ;;  %v2680_v9 = vrot.slane %v11067_v7, 1  ;;  %v4336_v60 = vsel %vm929_vm1, %v4333_v38, %v4335_v0  ;;  %v4334_v28 = vsel %vm929_vm1, %v4332_v11, %v4333_v38  ;;  %16181 = vst [vmem:[#allocation115_spill] sm:$0xff] %v11119_v18  ;;  %16182 = vst [vmem:[#allocation217_spill] sm:$0xff] %v11126_v39  ;;  %v16184_v11 = vld [vmem:[#allocation259_spill] sm:$0xff]  ;;  %v16185_v12 = vld [vmem:[#allocation260_spill] sm:$0xff] }
 0x2ee   : > { %4368 = vrot.lane.b32.xlu1 %v4331_v15, %s7339_s22  ;;  %4366 = vrot.lane.b32.xlu0 %v4329_v23, %s7339_s22  ;;  %v4287_v35 = vmul.f32 %v11119_v18, %v10909_v63  ;;  %v4288_v53 = vmul.f32 %v10909_v63, %v16089_v22  ;;  %v4338_v57 = vrot.slane %v4284_v44, 2  ;;  %v4340_v7 = vrot.slane %v4285_v48, 2  ;;  %v16183_v23 = vld [vmem:[#allocation152_spill] sm:$0xff]  ;;  %v11140_v48 = vpop.permute.xlu1 %3580  ;;  %v16189_v22 = vld [vmem:[#allocation153_spill] sm:$0xff]  ;;  %v16190_v18 = vld [vmem:[#allocation154_spill] sm:$0xff] }
 0x2ef   : > { %v4337_v0 = vrot.slane %v4283_v43, 2  ;;  %v4286_v15 = vmul.f32 %v11126_v39, %v10909_v63  ;;  %v1959_v38 = vadd.f32 %v16183_v23, %v10965_v14  ;;  %v11133_v62 = vadd.f32 %v16184_v11, %v1957_v19  ;;  %16187 = vst [vmem:[#allocation19_spill] sm:$0xff] %v11140_v48  ;;  %v11142_v43 = vpop.permute.xlu0 %3578  ;;  %v11149_v23 = vld [vmem:[%s7384_s21 + $0x170] sm:$0xff] }
 0x2f0   : > { %v11136_v2 = vadd.f32 %v16185_v12, %v1956_v24  ;;  %v2637_v44 = vmul.f32 %v16186_v17, %v11016_v41  ;;  %16188 = vst [vmem:[#allocation118_spill] sm:$0xff] %v11142_v43  ;;  %v1958_v39 = vadd.f32 %v16189_v22, %v10969_v30  ;;  %v1961_v14 = vadd.f32 %v16190_v18, %v10973_v52  ;;  %v16192_v17 = vld [vmem:[#allocation155_spill] sm:$0xff]  ;;  %v11160_v52 = vld [vmem:[%s7384_s21 + $0x168] sm:$0xff] }
 0x2f1   : > { %16191 = vst [vmem:[#allocation119_spill] sm:$0xff] %v11149_v23  ;;  %v4290_v19 = vmul.f32 %v11149_v23, %v10909_v63  ;;  %v4291_v24 = vmul.f32 %v10909_v63, %v16108_v32  ;;  %v1960_v12 = vadd.f32 %v16192_v17, %v10993_v25  ;;  %v4343_v22 = vrot.slane %v4287_v35, 2  ;;  %16193 = vst [vmem:[#allocation27_spill] sm:$0xff] %v11160_v52  ;;  %v11178_v17 = vld [vmem:[%s7384_s21 + $0x48] sm:$0xff] }
 0x2f2   : > { %4372 = vrot.lane.b32.xlu1 %v4336_v60, %s7339_s22  ;;  %4370 = vrot.lane.b32.xlu0 %v4334_v28, %s7339_s22  ;;  %v4345_v30 = vrot.slane %v4288_v53, 2  ;;  %v4289_v18 = vmul.f32 %v11160_v52, %v10909_v63  ;;  %v11165_v11 = vsel %vm498_vm0, %v2681_v29, %v2683_v20  ;;  %v4341_v43 = vsel %vm929_vm1, %v4338_v57, %v4340_v7  ;;  %v16195_v60 = vld [vmem:[#allocation67_spill] sm:$0xff] }
 0x2f3   : > { %16194 = vst [vmem:[#allocation24_spill] sm:$0xff] %v11165_v11  ;;  %v4339_v48 = vsel %vm929_vm1, %v4337_v0, %v4338_v57  ;;  %v4342_v25 = vrot.slane %v4286_v15, 2  ;;  %v11172_v28 = vadd.f32 %v16195_v60, %v1959_v38  ;;  %v11175_v35 = vsel %vm498_vm0, %v2680_v9, %v2681_v29  ;;  %16197 = vst [vmem:[#allocation121_spill] sm:$0xff] %v11178_v17  ;;  %v11182_v11 = vpop.permute.xlu1 %3584  ;;  %v11184_v7 = vpop.permute.xlu0 %3582  ;;  %v16200_v57 = vld [vmem:[#allocation261_spill] sm:$0xff]  ;;  %v11190_v15 = vld [vmem:[%s7384_s21 + $0x68] sm:$0xff] }
 0x2f4   : > { %16196 = vst [vmem:[#allocation120_spill] sm:$0xff] %v11175_v35  ;;  %v2688_v53 = vrot.slane %v2637_v44, 1  ;;  %v2635_v20 = vmul.f32 %v11178_v17, %v11016_v41  ;;  %16198 = vst [vmem:[#allocation218_spill] sm:$0xff] %v11182_v11  ;;  %v11187_v0 = vadd.f32 %v16200_v57, %v1958_v39  ;;  %v11194_v29 = vmul.f32 %v11190_v15, %v11016_v41  ;;  %v16202_v44 = vld [vmem:[#allocation5_spill] sm:$0xff]  ;;  %v16204_v35 = vld [vmem:[#allocation226_spill] sm:$0xff] }
 0x2f5   : > { %16199 = vst [vmem:[#allocation33_spill] sm:$0xff] %v11184_v7  ;;  %16201 = vst [vmem:[#allocation236_spill] sm:$0xff] %v11190_v15  ;;  %v4348_v9 = vrot.slane %v4290_v19, 2  ;;  %v4350_v38 = vrot.slane %v4291_v24, 2  ;;  %v11197_v60 = vadd.f32 %v16202_v44, %v1961_v14  ;;  %v11200_v17 = vadd.f32 %v16204_v35, %v1960_v12  ;;  %v11207_v11 = vld [vmem:[%s7384_s21 + $0x188] sm:$0xff]  ;;  %v11214_v24 = vld [vmem:[%s7384_s21 + $0x180] sm:$0xff] }
 0x2f6   : > { %4376 = vrot.lane.b32.xlu1 %v4341_v43, %s7339_s22  ;;  %4374 = vrot.lane.b32.xlu0 %v4339_v48, %s7339_s22  ;;  %v4346_v39 = vsel %vm929_vm1, %v4343_v22, %v4345_v30  ;;  %v4347_v57 = vrot.slane %v4289_v18, 2  ;;  %v4344_v7 = vsel %vm929_vm1, %v4342_v25, %v4343_v22  ;;  %16206 = vst [vmem:[#allocation122_spill] sm:$0xff] %v11207_v11  ;;  %16207 = vst [vmem:[#allocation123_spill] sm:$0xff] %v11214_v24  ;;  %v16208_v43 = vld [vmem:[#allocation156_spill] sm:$0xff] }
 0x2f7   : > { %16203 = vst [vmem:[#allocation220_spill] sm:$0xff] %v11197_v60  ;;  %16205 = vst [vmem:[#allocation30_spill] sm:$0xff] %v11200_v17  ;;  %v4293_v14 = vmul.f32 %v11207_v11, %v10909_v63  ;;  %v4294_v19 = vmul.f32 %v10909_v63, %v10533_v55  ;;  %v4292_v48 = vmul.f32 %v11214_v24, %v10909_v63  ;;  %v16209_v30 = vrot.slane %v11078_v21, 1  ;;  %v16211_v25 = vld [vmem:[#allocation256_spill] sm:$0xff]  ;;  %v11227_v44 = vpop.permute.xlu1 %3588  ;;  %v11229_v15 = vpop.permute.xlu0 %3586  ;;  %v16214_v17 = vld [vmem:[#allocation157_spill] sm:$0xff] }
 0x2f8   : > { %v1963_v12 = vadd.f32 %v16208_v43, %v10997_v26  ;;  %v2685_v18 = vrot.slane %v2635_v20, 1  ;;  %v2640_v35 = vmul.f32 %v16211_v25, %v11016_v41  ;;  %16212 = vst [vmem:[#allocation25_spill] sm:$0xff] %v11227_v44  ;;  %16213 = vst [vmem:[#allocation42_spill] sm:$0xff] %v11229_v15  ;;  %v1962_v60 = vadd.f32 %v16214_v17, %v11001_v45  ;;  %v11234_v24 = vld [vmem:[%s7384_s21 + $0x60] sm:$0xff]  ;;  %v11251_v25 = vld [vmem:[%s7384_s21 + $0x198] sm:$0xff] }
 0x2f9   : > { %v11223_v22 = vsel %vm498_vm0, %v16209_v30, %v2688_v53  ;;  %16215 = vst [vmem:[#allocation124_spill] sm:$0xff] %v11234_v24  ;;  %v2638_v26 = vmul.f32 %v11234_v24, %v11016_v41  ;;  %v4351_v53 = vsel %vm929_vm1, %v4348_v9, %v4350_v38  ;;  %v11240_v43 = vld [vmem:[%s7384_s21 + $0x1a0] sm:$0xff]  ;;  %v2691_v30 = vrot.slane %v11194_v29, 1  ;;  %v16217_v29 = vld [vmem:[#allocation158_spill] sm:$0xff] }
 0x2fa   : > { %16210 = vst [vmem:[#allocation39_spill] sm:$0xff] %v11223_v22  ;;  %16216 = vst [vmem:[#allocation125_spill] sm:$0xff] %v11240_v43  ;;  %v4296_v20 = vmul.f32 %v11240_v43, %v10909_v63  ;;  %4380 = vrot.lane.b32.xlu1 %v4346_v39, %s7339_s22  ;;  %4378 = vrot.lane.b32.xlu0 %v4344_v7, %s7339_s22  ;;  %v4349_v45 = vsel %vm929_vm1, %v4347_v57, %v4348_v9  ;;  %v4353_v15 = vrot.slane %v4293_v14, 2  ;;  %v16218_v7 = vld [vmem:[#allocation159_spill] sm:$0xff]  ;;  %v16219_v57 = vld [vmem:[#allocation73_spill] sm:$0xff] }
 0x2fb   : > { %v4297_v17 = vmul.f32 %v10909_v63, %v10574_v37  ;;  %v4295_v38 = vmul.f32 %v11251_v25, %v10909_v63  ;;  %v4355_v44 = vrot.slane %v4294_v19, 2  ;;  %v4352_v22 = vrot.slane %v4292_v48, 2  ;;  %v11265_v55 = vpop.permute.xlu1 %3658  ;;  %v11267_v11 = vpop.permute.xlu0 %3656  ;;  %v16222_v63 = vld [vmem:[#allocation77_spill] sm:$0xff] }
 0x2fc   : > { %v11256_v24 = vstv %s11169_s3  ;;  %v1965_v39 = vadd.f32 %v16217_v29, %v11005_v33  ;;  %v1964_v9 = vadd.f32 %v16218_v7, %v11013_v42  ;;  %v11263_v43 = vadd.f32 %v16219_v57, %v1963_v12  ;;  %16220 = vst [vmem:[#allocation233_spill] sm:$0xff] %v11265_v55  ;;  %16221 = vst [vmem:[#allocation36_spill] sm:$0xff] %v11267_v11  ;;  %v11273_v48 = vld [vmem:[%s7384_s21 + $0x80] sm:$0xff]  ;;  %v16240_v11 = vld [vmem:[#allocation164_spill] sm:$0xff] }
 0x2fd   : > { %v2693_v37 = vrot.slane %v2640_v35, 1  ;;  %v11270_v14 = vadd.f32 %v16222_v63, %v1962_v60  ;;  %v2690_v19 = vrot.slane %v2638_v26, 1  ;;  %v11277_v33 = vmul.f32 %v11273_v48, %v11016_v41  ;;  %v16251_v55 = vld [vmem:[#allocation76_spill] sm:$0xff] }
 0x2fe   : > { %v4358_v29 = vrot.slane %v4296_v20, 2  ;;  %4384 = vrot.lane.b32.xlu1 %v4351_v53, %s7339_s22  ;;  %4382 = vrot.lane.b32.xlu0 %v4349_v45, %s7339_s22  ;;  %v4360_v42 = vrot.slane %v4297_v17, 2  ;;  %v4357_v12 = vrot.slane %v4295_v38, 2  ;;  %v4429_v35 = vmul.f32 %v10936_v6, %v11256_v24  ;;  %v16225_v45 = vld [vmem:[#allocation160_spill] sm:$0xff] }
 0x2ff   : > { %v4430_v60 = vmul.f32 %v11256_v24, %v10312_v4  ;;  %v16223_v26 = vrot.slane %v11078_v21, 1  ;;  %v4356_v57 = vsel %vm929_vm1, %v4353_v15, %v4355_v44  ;;  %v4354_v20 = vsel %vm929_vm1, %v4352_v22, %v4353_v15  ;;  %v16226_v38 = vld [vmem:[#allocation84_spill] sm:$0xff]  ;;  %v11307_v44 = vpop.permute.xlu0 %3660  ;;  %v16230_v15 = vld [vmem:[#allocation161_spill] sm:$0xff] }
 0x300   : > { %v4428_v53 = vmul.f32 %v10943_v10, %v11256_v24  ;;  %v1967_v17 = vadd.f32 %v16225_v45, %v11027_v27  ;;  %v11297_v63 = vadd.f32 %v16226_v38, %v1965_v39  ;;  %v11300_v4 = vadd.f32 %v10557_v8, %v1964_v9  ;;  %16229 = vst [vmem:[#allocation44_spill] sm:$0xff] %v11307_v44  ;;  %v16232_v27 = vld [vmem:[#allocation265_spill] sm:$0xff] }
 0x301   : > { %v11288_v7 = vsel %vm498_vm0, %v2685_v18, %v16223_v26  ;;  %v11303_v21 = vsel %vm498_vm0, %v2691_v30, %v2693_v37  ;;  %v11305_v18 = vpop.permute.xlu1 %3662  ;;  %v1966_v22 = vadd.f32 %v16230_v15, %v11038_v5  ;;  %v11312_v26 = vsel %vm498_vm0, %v2690_v19, %v2691_v30 }
 0x302   : > { %16224 = vst [vmem:[#allocation47_spill] sm:$0xff] %v11288_v7  ;;  %16227 = vst [vmem:[#allocation53_spill] sm:$0xff] %v11303_v21  ;;  %v2643_v39 = vmul.f32 %v16232_v27, %v11016_v41  ;;  %4388 = vrot.lane.b32.xlu1 %v4356_v57, %s7339_s22  ;;  %4386 = vrot.lane.b32.xlu0 %v4354_v20, %s7339_s22  ;;  %v4361_v37 = vsel %vm929_vm1, %v4358_v29, %v4360_v42  ;;  %v4477_v45 = vrot.slane %v4429_v35, 2  ;;  %v16233_v57 = vld [vmem:[#allocation162_spill] sm:$0xff]  ;;  %v16234_v42 = vld [vmem:[#allocation163_spill] sm:$0xff] }
 0x303   : > { %16228 = vst [vmem:[#allocation43_spill] sm:$0xff] %v11305_v18  ;;  %16231 = vst [vmem:[#allocation219_spill] sm:$0xff] %v11312_v26  ;;  %v4359_v9 = vsel %vm929_vm1, %v4357_v12, %v4358_v29  ;;  %v4479_v5 = vrot.slane %v4430_v60, 2  ;;  %v4476_v38 = vrot.slane %v4428_v53, 2  ;;  %v4432_v30 = vmul.f32 %v10980_v34, %v11256_v24  ;;  %v11335_v12 = vld [vmem:[%s7384_s21 + $0x78] sm:$0xff] }
 0x304   : > { %v4433_v19 = vmul.f32 %v11256_v24, %v10374_v16  ;;  %v4431_v15 = vmul.f32 %v10987_v59, %v11256_v24  ;;  %v1969_v20 = vadd.f32 %v16233_v57, %v11043_v31  ;;  %v1968_v27 = vadd.f32 %v16234_v42, %v11071_v36  ;;  %v11341_v16 = vpop.permute.xlu0 %3664  ;;  %v11347_v31 = vld [vmem:[%s7384_s21 + $0x98] sm:$0xff] }
 0x305   : > { %v11332_v29 = vadd.f32 %v10560_v3, %v1967_v17  ;;  %v2641_v35 = vmul.f32 %v11335_v12, %v11016_v41  ;;  %v11339_v60 = vpop.permute.xlu1 %3666  ;;  %16236 = vst [vmem:[#allocation28_spill] sm:$0xff] %v11341_v16  ;;  %v11344_v53 = vadd.f32 %v10578_v54, %v1966_v22  ;;  %v2698_v8 = vrot.slane %v2643_v39, 1 }
 0x306   : > { %16235 = vst [vmem:[#allocation78_spill] sm:$0xff] %v11339_v60  ;;  %v2645_v36 = vmul.f32 %v11347_v31, %v11016_v41  ;;  %v4435_v3 = vmul.f32 %v11019_v40, %v11256_v24  ;;  %4392 = vrot.lane.b32.xlu1 %v4361_v37, %s7339_s22  ;;  %4390 = vrot.lane.b32.xlu0 %v4359_v9, %s7339_s22  ;;  %v4482_v57 = vrot.slane %v4432_v30, 2  ;;  %v4484_v42 = vrot.slane %v4433_v19, 2  ;;  %v11383_v30 = vld [vmem:[%s7384_s21 + $0x90] sm:$0xff] }
 0x307   : > { %v4480_v17 = vsel %vm929_vm1, %v4477_v45, %v4479_v5  ;;  %v4436_v54 = vmul.f32 %v11256_v24, %v10400_v47  ;;  %v4434_v22 = vmul.f32 %v11032_v13, %v11256_v24  ;;  %v4478_v39 = vsel %vm929_vm1, %v4476_v38, %v4477_v45  ;;  %v16237_v5 = vld [vmem:[#allocation70_spill] sm:$0xff] }
 0x308   : > { %v4481_v16 = vrot.slane %v4431_v15, 2  ;;  %v11362_v60 = vadd.f32 %v10581_v50, %v1969_v20  ;;  %v11365_v37 = vadd.f32 %v10601_v58, %v1968_v27  ;;  %v2695_v9 = vrot.slane %v2641_v35, 1  ;;  %v11371_v47 = vpop.permute.xlu0 %3668 }
 0x309   : > { %v2646_v44 = vmul.f32 %v16237_v5, %v11016_v41  ;;  %v11369_v18 = vpop.permute.xlu1 %3670  ;;  %16239 = vst [vmem:[#allocation127_spill] sm:$0xff] %v11371_v47  ;;  %v11375_v45 = vadd.f32 %v16240_v11, %v11101_v61  ;;  %v16241_v38 = vrot.slane %v11277_v33, 1  ;;  %v2644_v58 = vmul.f32 %v11383_v30, %v11016_v41  ;;  %v11406_v5 = vld [vmem:[%s7384_s21 + $0xb8] sm:$0x3] }
 0x30a   : > { %16238 = vst [vmem:[#allocation126_spill] sm:$0xff] %v11369_v18  ;;  %v4487_v19 = vrot.slane %v4435_v3, 2  ;;  %4518 = vrot.lane.b32.xlu1 %v4480_v17, %s7340_s24  ;;  %4516 = vrot.lane.b32.xlu0 %v4478_v39, %s7340_s24  ;;  %v4489_v15 = vrot.slane %v4436_v54, 2  ;;  %v4486_v20 = vrot.slane %v4434_v22, 2  ;;  %v4438_v61 = vmul.f32 %v11085_v51, %v11256_v24 }
 0x30b   : > { %v11380_v50 = vsel %vm498_vm0, %v16241_v38, %v2698_v8  ;;  %v4439_v11 = vmul.f32 %v11256_v24, %v10426_v1  ;;  %v16243_v8 = vld [vmem:[#allocation165_spill] sm:$0xff]  ;;  %v4485_v35 = vsel %vm929_vm1, %v4482_v57, %v4484_v42  ;;  %v4483_v3 = vsel %vm929_vm1, %v4481_v16, %v4482_v57  ;;  %v16246_v16 = vld [vmem:[#allocation166_spill] sm:$0xff] }
 0x30c   : > { %16242 = vst [vmem:[#allocation50_spill] sm:$0xff] %v11380_v50  ;;  %v11395_v27 = vadd.f32 %v16243_v8, %v11109_v56  ;;  %v4437_v17 = vmul.f32 %v11092_v46, %v11256_v24  ;;  %v2701_v39 = vrot.slane %v2645_v36, 1  ;;  %v2703_v54 = vrot.slane %v2646_v44, 1  ;;  %v11412_v38 = vpop.permute.xlu0 %3672  ;;  %v16247_v36 = vld [vmem:[#allocation167_spill] sm:$0xff] }
 0x30d   : > { %v11403_v22 = vmul.f32 %v10853_v49, %v11016_v41  ;;  %v2649_v1 = vmul.f32 %v11406_v5, %v11016_v41  ;;  %v11410_v56 = vpop.permute.xlu1 %3674  ;;  %16245 = vst [vmem:[#allocation128_spill] sm:$0xff] %v11412_v38  ;;  %v11416_v57 = vadd.f32 %v16246_v16, %v11133_v62  ;;  %v11420_v44 = vadd.f32 %v16247_v36, %v11136_v2  ;;  %v16250_v2 = vld [vmem:[#allocation115_spill] sm:$0xff] }
 0x30e   : > { %16244 = vst [vmem:[#allocation51_spill] sm:$0xff] %v11410_v56  ;;  %v16248_v42 = vrot.slane %v11277_v33, 1  ;;  %v2700_v47 = vrot.slane %v2644_v58, 1  ;;  %4522 = vrot.lane.b32.xlu1 %v4485_v35, %s7340_s24  ;;  %4520 = vrot.lane.b32.xlu0 %v4483_v3, %s7340_s24  ;;  %v4490_v38 = vsel %vm929_vm1, %v4487_v19, %v4489_v15  ;;  %v4488_v56 = vsel %vm929_vm1, %v4486_v20, %v4487_v19  ;;  %v16254_v19 = vld [vmem:[#allocation97_spill] sm:$0xff] }
 0x30f   : > { %v4492_v62 = vrot.slane %v4438_v61, 2  ;;  %v4494_v16 = vrot.slane %v4439_v11, 2  ;;  %v4491_v18 = vrot.slane %v4437_v17, 2  ;;  %v4441_v36 = vmul.f32 %v16250_v2, %v11256_v24  ;;  %v16257_v17 = vld [vmem:[#allocation168_spill] sm:$0xff] }
 0x310   : > { %v11425_v8 = vsel %vm498_vm0, %v2695_v9, %v16248_v42  ;;  %v4442_v33 = vmul.f32 %v11256_v24, %v16251_v55  ;;  %v16252_v9 = vld [vmem:[#allocation217_spill] sm:$0xff]  ;;  %v11438_v35 = vsel %vm498_vm0, %v2701_v39, %v2703_v54  ;;  %v2706_v3 = vrot.slane %v11403_v22, 1  ;;  %v11445_v11 = vpop.permute.xlu0 %3676  ;;  %v16259_v54 = vld [vmem:[#allocation98_spill] sm:$0xff] }
 0x311   : > { %16249 = vst [vmem:[#allocation45_spill] sm:$0xff] %v11425_v8  ;;  %v4440_v58 = vmul.f32 %v16252_v9, %v11256_v24  ;;  %16253 = vst [vmem:[#allocation52_spill] sm:$0xff] %v11438_v35  ;;  %v2708_v15 = vrot.slane %v2649_v1, 1  ;;  %v2647_v20 = vmul.f32 %v16254_v19, %v11016_v41  ;;  %v11443_v61 = vpop.permute.xlu1 %3678  ;;  %v11449_v42 = vadd.f32 %v16257_v17, %v11172_v28 }
 0x312   : > { %16255 = vst [vmem:[#allocation129_spill] sm:$0xff] %v11443_v61  ;;  %16256 = vst [vmem:[#allocation57_spill] sm:$0xff] %v11445_v11  ;;  %v11452_v55 = vsel %vm498_vm0, %v2700_v47, %v2701_v39  ;;  %v2651_v35 = vmul.f32 %v16259_v54, %v11016_v41  ;;  %v4444_v22 = vmul.f32 %v11149_v23, %v11256_v24  ;;  %4526 = vrot.lane.b32.xlu1 %v4490_v38, %s7340_s24 }
 0x313   : > { %16258 = vst [vmem:[#allocation58_spill] sm:$0xff] %v11452_v55  ;;  %4524 = vrot.lane.b32.xlu0 %v4488_v56, %s7340_s24  ;;  %v4495_v1 = vsel %vm929_vm1, %v4492_v62, %v4494_v16  ;;  %v4445_v28 = vmul.f32 %v11256_v24, %v16108_v32  ;;  %v4443_v47 = vmul.f32 %v11160_v52, %v11256_v24  ;;  %v4497_v17 = vrot.slane %v4441_v36, 2  ;;  %v16260_v55 = vld [vmem:[#allocation169_spill] sm:$0xff]  ;;  %v11473_v56 = vld [vmem:[%s7384_s21 + $0xd0] sm:$0x3] }
 0x314   : > { %v4493_v39 = vsel %vm929_vm1, %v4491_v18, %v4492_v62  ;;  %v4499_v11 = vrot.slane %v4442_v33, 2  ;;  %v4496_v61 = vrot.slane %v4440_v58, 2  ;;  %v11470_v8 = vadd.f32 %v16260_v55, %v11187_v0  ;;  %v16261_v32 = vld [vmem:[#allocation17_spill] sm:$0xff]  ;;  %v11481_v21 = vpop.permute.xlu0 %3680  ;;  %v11489_v36 = vld [vmem:[%s7384_s21 + $0xe8] sm:$0x3] }
 0x315   : > { %v2705_v38 = vrot.slane %v2647_v20, 1  ;;  %v2652_v16 = vmul.f32 %v11473_v56, %v11016_v41  ;;  %v2650_v50 = vmul.f32 %v16261_v32, %v11016_v41  ;;  %v11479_v26 = vpop.permute.xlu1 %3682  ;;  %16263 = vst [vmem:[#allocation131_spill] sm:$0xff] %v11481_v21  ;;  %v11484_v18 = vsel %vm498_vm0, %v2706_v3, %v2708_v15  ;;  %v16265_v62 = vld [vmem:[#allocation205_spill] sm:$0xff]  ;;  %16266 = vst [vmem:[#allocation59_spill] sm:$0xff] %v11489_v36  ;;  %v16267_v21 = vld [vmem:[#allocation122_spill] sm:$0xff] }
 0x316   : > { %16262 = vst [vmem:[#allocation130_spill] sm:$0xff] %v11479_v26  ;;  %16264 = vst [vmem:[#allocation244_spill] sm:$0xff] %v11484_v18  ;;  %v2654_v0 = vmul.f32 %v16265_v62, %v11016_v41  ;;  %v2655_v33 = vmul.f32 %v11489_v36, %v11016_v41  ;;  %v4502_v58 = vrot.slane %v4444_v22, 2  ;;  %4530 = vrot.lane.b32.xlu1 %v4495_v1, %s7340_s24  ;;  %v4504_v20 = vrot.slane %v4445_v28, 2  ;;  %v16268_v26 = vld [vmem:[#allocation81_spill] sm:$0xff]  ;;  %v16269_v22 = vld [vmem:[#allocation123_spill] sm:$0xff] }
 0x317   : > { %4528 = vrot.lane.b32.xlu0 %v4493_v39, %s7340_s24  ;;  %v4501_v55 = vrot.slane %v4443_v47, 2  ;;  %v4447_v15 = vmul.f32 %v16267_v21, %v11256_v24  ;;  %v4448_v18 = vmul.f32 %v11256_v24, %v16268_v26  ;;  %v2711_v7 = vrot.slane %v2651_v35, 1  ;;  %v16271_v39 = vld [vmem:[#allocation102_spill] sm:$0xff]  ;;  %v16274_v26 = vld [vmem:[#allocation220_spill] sm:$0xff] }
 0x318   : > { %v4500_v10 = vsel %vm929_vm1, %v4497_v17, %v4499_v11  ;;  %v4498_v6 = vsel %vm929_vm1, %v4496_v61, %v4497_v17  ;;  %v4446_v52 = vmul.f32 %v16269_v22, %v11256_v24  ;;  %v11504_v1 = vsel %vm498_vm0, %v2705_v38, %v2706_v3  ;;  %v11510_v36 = vpop.permute.xlu0 %3684  ;;  %v16275_v35 = vld [vmem:[#allocation170_spill] sm:$0xff] }
 0x319   : > { %16270 = vst [vmem:[#allocation245_spill] sm:$0xff] %v11504_v1  ;;  %v2713_v28 = vrot.slane %v2652_v16, 1  ;;  %v2710_v47 = vrot.slane %v2650_v50, 1  ;;  %v2653_v23 = vmul.f32 %v16271_v39, %v11016_v41  ;;  %v11508_v21 = vpop.permute.xlu1 %3686  ;;  %16273 = vst [vmem:[#allocation132_spill] sm:$0xff] %v11510_v36  ;;  %v11514_v11 = vadd.f32 %v16275_v35, %v16274_v26  ;;  %v16276_v36 = vld [vmem:[#allocation125_spill] sm:$0xff]  ;;  %v16277_v35 = vld [vmem:[#allocation87_spill] sm:$0xff] }
 0x31a   : > { %16272 = vst [vmem:[#allocation248_spill] sm:$0xff] %v11508_v21  ;;  %v2716_v61 = vrot.slane %v2654_v0, 1  ;;  %v2718_v17 = vrot.slane %v2655_v33, 1  ;;  %v11517_v62 = vstv %s11456_s4  ;;  %4534 = vrot.lane.b32.xlu1 %v4500_v10, %s7340_s24  ;;  %v4505_v50 = vsel %vm929_vm1, %v4502_v58, %v4504_v20  ;;  %v16279_v10 = vld [vmem:[#allocation171_spill] sm:$0xff]  ;;  %v16283_v21 = vld [vmem:[#allocation173_spill] sm:$0xff] }
 0x31b   : > { %4532 = vrot.lane.b32.xlu0 %v4498_v6, %s7340_s24  ;;  %v4503_v41 = vsel %vm929_vm1, %v4501_v55, %v4502_v58  ;;  %v4507_v3 = vrot.slane %v4447_v15, 2  ;;  %v4509_v38 = vrot.slane %v4448_v18, 2  ;;  %v4506_v16 = vrot.slane %v4446_v52, 2  ;;  %v16278_v6 = vld [vmem:[#allocation30_spill] sm:$0xff] }
 0x31c   : > { %v4450_v26 = vmul.f32 %v16276_v36, %v11256_v24  ;;  %v4451_v0 = vmul.f32 %v11256_v24, %v16277_v35  ;;  %v4449_v33 = vmul.f32 %v11251_v25, %v11256_v24  ;;  %v11533_v20 = vadd.f32 %v16279_v10, %v16278_v6  ;;  %v11543_v15 = vpop.permute.xlu0 %3932  ;;  %v16282_v35 = vld [vmem:[#allocation172_spill] sm:$0xff]  ;;  %v7220_v10 = vld [vmem:[%s7384_s21 + $0x40] sm:$0x3] }
 0x31d   : > { %v11536_v58 = vsel %vm498_vm0, %v2711_v7, %v2713_v28  ;;  %v11539_v52 = vsel %vm498_vm0, %v2710_v47, %v2711_v7  ;;  %v2715_v18 = vrot.slane %v2653_v23, 1  ;;  %v11541_v55 = vpop.permute.xlu1 %3934  ;;  %16281 = vst [vmem:[#allocation134_spill] sm:$0xff] %v11543_v15  ;;  %v11547_v24 = vadd.f32 %v16282_v35, %v11263_v43  ;;  %v16284_v6 = vld [vmem:[#allocation116_spill] sm:$0xff] }
 0x31e   : > { %16280 = vst [vmem:[#allocation133_spill] sm:$0xff] %v11541_v55  ;;  %v11551_v1 = vadd.f32 %v16283_v21, %v11270_v14  ;;  %v3063_v28 = vmul.f32 %v16284_v6, %v11517_v62  ;;  %v3064_v7 = vmul.f32 %v7220_v10, %v11517_v62  ;;  %v11558_v23 = vsel %vm498_vm0, %v2716_v61, %v2718_v17  ;;  %v16286_v47 = vld [vmem:[#allocation112_spill] sm:$0xff]  ;;  %v16287_v55 = vld [vmem:[#allocation174_spill] sm:$0xff] }
 0x31f   : > { %16285 = vst [vmem:[#allocation135_spill] sm:$0xff] %v11558_v23  ;;  %v3062_v15 = vmul.f32 %v16286_v47, %v11517_v62  ;;  %4538 = vrot.lane.b32.xlu1 %v4505_v50, %s7340_s24  ;;  %4536 = vrot.lane.b32.xlu0 %v4503_v41, %s7340_s24  ;;  %v4510_v43 = vsel %vm929_vm1, %v4507_v3, %v4509_v38  ;;  %v4512_v21 = vrot.slane %v4450_v26, 2  ;;  %v4514_v35 = vrot.slane %v4451_v0, 2  ;;  %v16289_v47 = vld [vmem:[#allocation113_spill] sm:$0xff]  ;;  %v7221_v50 = vld [vmem:[%s7384_s21 + $0x58] sm:$0x3] }
 0x320   : > { %v4508_v14 = vsel %vm929_vm1, %v4506_v16, %v4507_v3  ;;  %v4511_v6 = vrot.slane %v4449_v33, 2  ;;  %v11568_v10 = vadd.f32 %v16287_v55, %v11297_v63  ;;  %v11571_v17 = vsel %vm498_vm0, %v2715_v18, %v2716_v61  ;;  %v11581_v3 = vpop.permute.xlu0 %3936  ;;  %v16292_v16 = vld [vmem:[#allocation175_spill] sm:$0xff]  ;;  %v16293_v63 = vld [vmem:[#allocation176_spill] sm:$0xff]  ;;  %v16294_v18 = vld [vmem:[#allocation177_spill] sm:$0xff] }
 0x321   : > { %16288 = vst [vmem:[#allocation136_spill] sm:$0xff] %v11571_v17  ;;  %v11575_v23 = vmul.f32 %v16289_v47, %v11517_v62  ;;  %v3067_v41 = vmul.f32 %v7221_v50, %v11517_v62  ;;  %v11579_v38 = vpop.permute.xlu1 %3938  ;;  %16291 = vst [vmem:[#allocation138_spill] sm:$0xff] %v11581_v3  ;;  %v11585_v26 = vadd.f32 %v16292_v16, %v11300_v4  ;;  %v3111_v0 = vrot.slane %v3063_v28, 2  ;;  %v16295_v47 = vld [vmem:[#allocation180_spill] sm:$0xff]  ;;  %v16297_v4 = vld [vmem:[#allocation121_spill] sm:$0xff] }
 0x322   : > { %16290 = vst [vmem:[#allocation137_spill] sm:$0xff] %v11579_v38  ;;  %v11589_v61 = vadd.f32 %v16293_v63, %v11332_v29  ;;  %v3113_v33 = vrot.slane %v3064_v7, 2  ;;  %v11593_v55 = vadd.f32 %v16294_v18, %v11344_v53  ;;  %v2385_v50 = vadd.f32 %v16295_v47, %v11375_v45  ;;  %v16296_v38 = vld [vmem:[#allocation181_spill] sm:$0xff]  ;;  %v16298_v45 = vld [vmem:[#allocation178_spill] sm:$0xff]  ;;  %v7222_v47 = vld [vmem:[%s7384_s21 + $0x70] sm:$0x3] }
 0x323   : > { %v2384_v3 = vadd.f32 %v16296_v38, %v11395_v27  ;;  %v3110_v17 = vrot.slane %v3062_v15, 2  ;;  %4542 = vrot.lane.b32.xlu1 %v4510_v43, %s7340_s24  ;;  %4540 = vrot.lane.b32.xlu0 %v4508_v14, %s7340_s24  ;;  %v3065_v29 = vmul.f32 %v16297_v4, %v11517_v62  ;;  %v4515_v28 = vsel %vm929_vm1, %v4512_v21, %v4514_v35  ;;  %v16299_v27 = vld [vmem:[#allocation179_spill] sm:$0xff]  ;;  %v16302_v35 = vld [vmem:[#allocation182_spill] sm:$0xff]  ;;  %v16306_v4 = vld [vmem:[#allocation32_spill] sm:$0xff] }
 0x324   : > { %v4513_v53 = vsel %vm929_vm1, %v4511_v6, %v4512_v21  ;;  %v11606_v7 = vstv %s11529_s5  ;;  %v11610_v16 = vadd.f32 %v16298_v45, %v11362_v60  ;;  %v11614_v15 = vadd.f32 %v16299_v27, %v11365_v37  ;;  %v11619_v63 = vpop.permute.xlu0 %3940  ;;  %v16304_v60 = vld [vmem:[#allocation236_spill] sm:$0xff]  ;;  %v16307_v27 = vld [vmem:[#allocation91_spill] sm:$0xff] }
 0x325   : > { %v3116_v43 = vrot.slane %v11575_v23, 2  ;;  %v3118_v14 = vrot.slane %v3067_v41, 2  ;;  %v11617_v38 = vpop.permute.xlu1 %3942  ;;  %16301 = vst [vmem:[#allocation140_spill] sm:$0xff] %v11619_v63  ;;  %v2387_v21 = vadd.f32 %v16302_v35, %v11416_v57  ;;  %v11624_v6 = vsel %vm929_vm1, %v3111_v0, %v3113_v33  ;;  %v16305_v23 = vld [vmem:[#allocation183_spill] sm:$0xff]  ;;  %v7223_v63 = vld [vmem:[%s7384_s21 + $0x88] sm:$0x3] }
 0x326   : > { %16300 = vst [vmem:[#allocation139_spill] sm:$0xff] %v11617_v38  ;;  %16303 = vst [vmem:[#allocation141_spill] sm:$0xff] %v11624_v6  ;;  %v3069_v18 = vmul.f32 %v16304_v60, %v11517_v62  ;;  %v3070_v37 = vmul.f32 %v7222_v47, %v11517_v62  ;;  %v2386_v41 = vadd.f32 %v16305_v23, %v11420_v44  ;;  %v3115_v44 = vrot.slane %v3065_v29, 2 }
 0x327   : > { %4546 = vrot.lane.b32.xlu1 %v4515_v28, %s7340_s24  ;;  %4544 = vrot.lane.b32.xlu0 %v4513_v53, %s7340_s24  ;;  %v4617_v57 = vmul.f32 %v10980_v34, %v11606_v7  ;;  %v4616_v33 = vmul.f32 %v10987_v59, %v11606_v7  ;;  %v11639_v45 = vadd.f32 %v16306_v4, %v2385_v50  ;;  %v16310_v53 = vld [vmem:[#allocation124_spill] sm:$0xff] }
 0x328   : > { %v11642_v35 = vadd.f32 %v16307_v27, %v2384_v3  ;;  %v11645_v60 = vsel %vm929_vm1, %v3110_v17, %v3111_v0  ;;  %v11648_v28 = vsel %vm929_vm1, %v3116_v43, %v3118_v14  ;;  %v3068_v47 = vmul.f32 %v16310_v53, %v11517_v62  ;;  %v11658_v3 = vpop.permute.xlu0 %3944  ;;  %v16313_v17 = vld [vmem:[#allocation197_spill] sm:$0xff] }
 0x329   : > { %16308 = vst [vmem:[#allocation142_spill] sm:$0xff] %v11645_v60  ;;  %16309 = vst [vmem:[#allocation143_spill] sm:$0xff] %v11648_v28  ;;  %v3072_v23 = vmul.f32 %v11273_v48, %v11517_v62  ;;  %v3073_v50 = vmul.f32 %v7223_v63, %v11517_v62  ;;  %v11656_v4 = vpop.permute.xlu1 %3946  ;;  %v11661_v0 = vadd.f32 %v16313_v17, %v2387_v21  ;;  %v3121_v29 = vrot.slane %v3069_v18, 2  ;;  %v16314_v53 = vld [vmem:[#allocation37_spill] sm:$0xff]  ;;  %v16315_v21 = vld [vmem:[#allocation184_spill] sm:$0xff] }
 0x32a   : > { %16311 = vst [vmem:[#allocation144_spill] sm:$0xff] %v11656_v4  ;;  %16312 = vst [vmem:[#allocation145_spill] sm:$0xff] %v11658_v3  ;;  %v3123_v14 = vrot.slane %v3070_v37, 2  ;;  %v3071_v27 = vmul.f32 %v11335_v12, %v11517_v62  ;;  %v11666_v38 = vadd.f32 %v16314_v53, %v2386_v41  ;;  %v4619_v48 = vmul.f32 %v11019_v40, %v11606_v7  ;;  %v16316_v37 = vld [vmem:[#allocation185_spill] sm:$0xff] }
 0x32b   : > { %4650 = vrot.lane.b32.xlu1 %v4617_v57, %s7339_s22  ;;  %4648 = vrot.lane.b32.xlu0 %v4616_v33, %s7339_s22  ;;  %v4618_v63 = vmul.f32 %v11032_v13, %v11606_v7  ;;  %v2389_v18 = vadd.f32 %v16315_v21, %v11449_v42  ;;  %v2388_v17 = vadd.f32 %v16316_v37, %v11470_v8  ;;  %v7224_v41 = vld [vmem:[%s7384_s21 + $0xa0] sm:$0x3]  ;;  %v3120_v3 = vrot.slane %v3068_v47, 2  ;;  %v16320_v42 = vld [vmem:[#allocation190_spill] sm:$0xff] }
 0x32c   : > { %v11680_v12 = vmul.f32 %v11347_v31, %v11517_v62  ;;  %v3076_v57 = vmul.f32 %v7224_v41, %v11517_v62  ;;  %v16317_v33 = vld [vmem:[#allocation189_spill] sm:$0xff]  ;;  %v3126_v4 = vrot.slane %v3072_v23, 2  ;;  %v3128_v28 = vrot.slane %v3073_v50, 2  ;;  %v11688_v6 = vpop.permute.xlu0 %3948  ;;  %v16321_v23 = vld [vmem:[#allocation92_spill] sm:$0xff]  ;;  %v16324_v41 = vld [vmem:[#allocation94_spill] sm:$0xff] }
 0x32d   : > { %v2391_v53 = vadd.f32 %v16317_v33, %v11514_v11  ;;  %v11686_v60 = vpop.permute.xlu1 %3950  ;;  %16319 = vst [vmem:[#allocation148_spill] sm:$0xff] %v11688_v6  ;;  %v2390_v8 = vadd.f32 %v16320_v42, %v11533_v20  ;;  %v11693_v21 = vsel %vm929_vm1, %v3115_v44, %v3116_v43  ;;  %v11696_v31 = vsel %vm929_vm1, %v3121_v29, %v3123_v14  ;;  %v16322_v44 = vld [vmem:[#allocation93_spill] sm:$0xff] }
 0x32e   : > { %16318 = vst [vmem:[#allocation146_spill] sm:$0xff] %v11686_v60  ;;  %v3125_v37 = vrot.slane %v3071_v27, 2  ;;  %v3074_v11 = vmul.f32 %v11383_v30, %v11517_v62  ;;  %v4621_v47 = vmul.f32 %v11085_v51, %v11606_v7  ;;  %v4620_v20 = vmul.f32 %v11092_v46, %v11606_v7  ;;  %v16323_v30 = vld [vmem:[#allocation195_spill] sm:$0xff] }
 0x32f   : > { %4654 = vrot.lane.b32.xlu1 %v4619_v48, %s7339_s22  ;;  %4652 = vrot.lane.b32.xlu0 %v4618_v63, %s7339_s22  ;;  %v11707_v43 = vadd.f32 %v16321_v23, %v2389_v18  ;;  %v11710_v50 = vadd.f32 %v16322_v44, %v2388_v17  ;;  %v3131_v14 = vrot.slane %v11680_v12, 2  ;;  %v3133_v27 = vrot.slane %v3076_v57, 2  ;;  %v16328_v17 = vld [vmem:[#allocation196_spill] sm:$0xff]  ;;  %v16329_v57 = vld [vmem:[#allocation95_spill] sm:$0xff] }
 0x330   : > { %v2393_v48 = vadd.f32 %v16323_v30, %v11547_v24  ;;  %v11716_v63 = vadd.f32 %v16324_v41, %v2391_v53  ;;  %v11719_v33 = vsel %vm929_vm1, %v3120_v3, %v3121_v29  ;;  %v11722_v42 = vsel %vm929_vm1, %v3126_v4, %v3128_v28  ;;  %v11726_v23 = vpop.permute.xlu0 %3952  ;;  %v16346_v60 = vld [vmem:[#allocation211_spill] sm:$0xff] }
 0x331   : > { %16325 = vst [vmem:[#allocation249_spill] sm:$0xff] %v11722_v42  ;;  %v11724_v18 = vpop.permute.xlu1 %3954  ;;  %16327 = vst [vmem:[#allocation147_spill] sm:$0xff] %v11726_v23  ;;  %v2392_v12 = vadd.f32 %v16328_v17, %v11551_v1  ;;  %v11731_v44 = vadd.f32 %v16329_v57, %v2390_v8  ;;  %v11734_v24 = vsel %vm929_vm1, %v3125_v37, %v3126_v4  ;;  %v3130_v29 = vrot.slane %v3074_v11, 2  ;;  %v16332_v37 = vld [vmem:[#allocation16_spill] sm:$0xff] }
 0x332   : > { %16326 = vst [vmem:[#allocation149_spill] sm:$0xff] %v11724_v18  ;;  %16330 = vst [vmem:[#allocation150_spill] sm:$0xff] %v11734_v24  ;;  %v3078_v3 = vmul.f32 %v10853_v49, %v11517_v62  ;;  %v3079_v28 = vmul.f32 %v11406_v5, %v11517_v62  ;;  %v4623_v1 = vmul.f32 %v16250_v2, %v11606_v7  ;;  %v16347_v24 = vld [vmem:[#allocation212_spill] sm:$0xff] }
 0x333   : > { %4658 = vrot.lane.b32.xlu1 %v4621_v47, %s7339_s22  ;;  %4656 = vrot.lane.b32.xlu0 %v4620_v20, %s7339_s22  ;;  %v4622_v53 = vmul.f32 %v16252_v9, %v11606_v7  ;;  %v11747_v4 = vsel %vm929_vm1, %v3131_v14, %v3133_v27  ;;  %v3077_v49 = vmul.f32 %v16254_v19, %v11517_v62  ;;  %v16333_v20 = vld [vmem:[#allocation205_spill] sm:$0xff]  ;;  %v16334_v27 = vld [vmem:[#allocation59_spill] sm:$0xff] }
 0x334   : > { %16331 = vst [vmem:[#allocation151_spill] sm:$0xff] %v11747_v4  ;;  %v3081_v8 = vmul.f32 %v16259_v54, %v11517_v62  ;;  %v3082_v5 = vmul.f32 %v11473_v56, %v11517_v62  ;;  %v11756_v11 = vadd.f32 %v16332_v37, %v2393_v48  ;;  %v3080_v47 = vmul.f32 %v16261_v32, %v11517_v62  ;;  %v11766_v19 = vpop.permute.xlu0 %3956  ;;  %v16337_v54 = vld [vmem:[#allocation201_spill] sm:$0xff]  ;;  %v16338_v56 = vld [vmem:[#allocation204_spill] sm:$0xff]  ;;  %v16339_v32 = vld [vmem:[#allocation202_spill] sm:$0xff] }
 0x335   : > { %v3084_v30 = vmul.f32 %v16333_v20, %v11517_v62  ;;  %v3085_v41 = vmul.f32 %v16334_v27, %v11517_v62  ;;  %v11764_v17 = vpop.permute.xlu1 %3958  ;;  %16336 = vst [vmem:[#allocation222_spill] sm:$0xff] %v11766_v19  ;;  %v2395_v57 = vadd.f32 %v16337_v54, %v11568_v10  ;;  %v2426_v23 = vadd.f32 %v16338_v56, %v2392_v12  ;;  %v16340_v27 = vld [vmem:[#allocation119_spill] sm:$0xff]  ;;  %v16342_v12 = vld [vmem:[#allocation208_spill] sm:$0xff] }
 0x336   : > { %16335 = vst [vmem:[#allocation62_spill] sm:$0xff] %v11764_v17  ;;  %v3136_v48 = vrot.slane %v3078_v3, 2  ;;  %v3083_v37 = vmul.f32 %v16271_v39, %v11517_v62  ;;  %v2394_v18 = vadd.f32 %v16339_v32, %v11585_v26  ;;  %v3138_v20 = vrot.slane %v3079_v28, 2  ;;  %v16341_v17 = vld [vmem:[#allocation27_spill] sm:$0xff]  ;;  %v16343_v39 = vld [vmem:[#allocation209_spill] sm:$0xff] }
 0x337   : > { %4662 = vrot.lane.b32.xlu1 %v4623_v1, %s7339_s22  ;;  %4660 = vrot.lane.b32.xlu0 %v4622_v53, %s7339_s22  ;;  %v4625_v19 = vmul.f32 %v16340_v27, %v11606_v7  ;;  %v4624_v10 = vmul.f32 %v16341_v17, %v11606_v7  ;;  %v2397_v3 = vadd.f32 %v16342_v12, %v11589_v61  ;;  %v3135_v54 = vrot.slane %v3077_v49, 2 }
 0x338   : > { %v3141_v56 = vrot.slane %v3081_v8, 2  ;;  %v3143_v62 = vrot.slane %v3082_v5, 2  ;;  %v2396_v26 = vadd.f32 %v16343_v39, %v11593_v55  ;;  %v3140_v28 = vrot.slane %v3080_v47, 2  ;;  %v11787_v53 = vpop.permute.xlu0 %3960  ;;  %v16348_v55 = vld [vmem:[#allocation122_spill] sm:$0xff] }
 0x339   : > { %v3146_v32 = vrot.slane %v3084_v30, 2  ;;  %v3148_v1 = vrot.slane %v3085_v41, 2  ;;  %v11785_v6 = vpop.permute.xlu1 %3962  ;;  %16345 = vst [vmem:[#allocation259_spill] sm:$0xff] %v11787_v53  ;;  %v2399_v4 = vadd.f32 %v16346_v60, %v11610_v16  ;;  %v2398_v42 = vadd.f32 %v16347_v24, %v11614_v15  ;;  %v16349_v15 = vld [vmem:[#allocation187_spill] sm:$0xff] }
 0x33a   : > { %16344 = vst [vmem:[#allocation152_spill] sm:$0xff] %v11785_v6  ;;  %v11794_v61 = vsel %vm929_vm1, %v3130_v29, %v3131_v14  ;;  %v3145_v49 = vrot.slane %v3083_v37, 2  ;;  %v11797_v8 = vsel %vm929_vm1, %v3136_v48, %v3138_v20  ;;  %v4627_v5 = vmul.f32 %v16348_v55, %v11606_v7  ;;  %v16350_v14 = vld [vmem:[#allocation7_spill] sm:$0xff]  ;;  %v16373_v6 = vld [vmem:[#allocation242_spill] sm:$0xff] }
 0x33b   : > { %4666 = vrot.lane.b32.xlu1 %v4625_v19, %s7339_s22  ;;  %4664 = vrot.lane.b32.xlu0 %v4624_v10, %s7339_s22  ;;  %v4626_v16 = vmul.f32 %v16269_v22, %v11606_v7  ;;  %v2429_v60 = vadd.f32 %v16349_v15, %v2395_v57  ;;  %v2428_v24 = vadd.f32 %v16350_v14, %v2394_v18  ;;  %v16351_v30 = vld [vmem:[#allocation99_spill] sm:$0xff]  ;;  %v16352_v19 = vld [vmem:[#allocation18_spill] sm:$0xff] }
 0x33c   : > { %v11810_v29 = vsel %vm929_vm1, %v3135_v54, %v3136_v48  ;;  %v11813_v47 = vsel %vm929_vm1, %v3141_v56, %v3143_v62  ;;  %v2431_v41 = vadd.f32 %v16351_v30, %v2397_v3  ;;  %v2430_v37 = vadd.f32 %v16352_v19, %v2396_v26  ;;  %v11827_v57 = vpop.permute.xlu0 %4086  ;;  %v16356_v48 = vld [vmem:[#allocation214_spill] sm:$0xff]  ;;  %v16357_v54 = vld [vmem:[#allocation101_spill] sm:$0xff]  ;;  %v16358_v3 = vld [vmem:[#allocation103_spill] sm:$0xff] }
 0x33d   : > { %v11820_v20 = vsel %vm929_vm1, %v3140_v28, %v3141_v56  ;;  %v11823_v10 = vsel %vm929_vm1, %v3146_v32, %v3148_v1  ;;  %v11825_v18 = vpop.permute.xlu1 %4088  ;;  %16355 = vst [vmem:[#allocation153_spill] sm:$0xff] %v11827_v57  ;;  %v2517_v12 = vadd.f32 %v16356_v48, %v11639_v45  ;;  %v2433_v62 = vadd.f32 %v16357_v54, %v2399_v4  ;;  %v16360_v56 = vld [vmem:[#allocation215_spill] sm:$0xff]  ;;  %v16365_v19 = vld [vmem:[#allocation229_spill] sm:$0xff]  ;;  %v16366_v54 = vld [vmem:[#allocation230_spill] sm:$0xff] }
 0x33e   : > { %16353 = vst [vmem:[#allocation260_spill] sm:$0xff] %v11823_v10  ;;  %16354 = vst [vmem:[#allocation63_spill] sm:$0xff] %v11825_v18  ;;  %v2432_v39 = vadd.f32 %v16358_v3, %v2398_v42  ;;  %v11834_v26 = vsel %vm929_vm1, %v3145_v49, %v3146_v32  ;;  %v2516_v28 = vadd.f32 %v16360_v56, %v11642_v35  ;;  %v16361_v4 = vld [vmem:[#allocation223_spill] sm:$0xff]  ;;  %v16362_v42 = vld [vmem:[#allocation224_spill] sm:$0xff] }
 0x33f   : > { %16359 = vst [vmem:[#allocation154_spill] sm:$0xff] %v11834_v26  ;;  %4670 = vrot.lane.b32.xlu1 %v4627_v5, %s7339_s22  ;;  %4668 = vrot.lane.b32.xlu0 %v4626_v16, %s7339_s22  ;;  %v4629_v1 = vmul.f32 %v16276_v36, %v11606_v7  ;;  %v4628_v45 = vmul.f32 %v11251_v25, %v11606_v7  ;;  %v16363_v49 = vld [vmem:[#allocation227_spill] sm:$0xff]  ;;  %v16364_v5 = vld [vmem:[#allocation228_spill] sm:$0xff]  ;;  %v16375_v18 = vld [vmem:[#allocation237_spill] sm:$0xff] }
 0x340   : > { %v2519_v15 = vadd.f32 %v16361_v4, %v11661_v0  ;;  %v2518_v32 = vadd.f32 %v16362_v42, %v11666_v38  ;;  %v2521_v35 = vadd.f32 %v16363_v49, %v11707_v43  ;;  %v2520_v14 = vadd.f32 %v16364_v5, %v11710_v50  ;;  %v11853_v16 = vld [vmem:[%s7384_s21 + $0x1b8] sm:$0xff]  ;;  %v11856_v30 = vld [vmem:[%s7384_s21 + $0x1b0] sm:$0xff]  ;;  %v11867_v42 = vpop.permute.xlu0 %4090  ;;  %v16371_v50 = vld [vmem:[#allocation234_spill] sm:$0xff] }
 0x341   : > { %v2523_v48 = vadd.f32 %v16365_v19, %v11716_v63  ;;  %v2522_v0 = vadd.f32 %v16366_v54, %v11731_v44  ;;  %v16367_v3 = vld [vmem:[#allocation231_spill] sm:$0xff]  ;;  %v16368_v56 = vld [vmem:[#allocation232_spill] sm:$0xff]  ;;  %v11865_v43 = vpop.permute.xlu1 %4092  ;;  %16370 = vst [vmem:[#allocation67_spill] sm:$0xff] %v11867_v42  ;;  %v2527_v49 = vadd.f32 %v16371_v50, %v2429_v60  ;;  %v2615_v57 = vadd.f32 %v16373_v6, %v2517_v12  ;;  %v16376_v60 = vld [vmem:[#allocation238_spill] sm:$0xff] }
 0x342   : > { %v2525_v38 = vadd.f32 %v16367_v3, %v11756_v11  ;;  %v2524_v4 = vadd.f32 %v16368_v56, %v2426_v23  ;;  %16369 = vst [vmem:[#allocation155_spill] sm:$0xff] %v11865_v43  ;;  %v16372_v5 = vld [vmem:[#allocation235_spill] sm:$0xff]  ;;  %v2529_v44 = vadd.f32 %v16375_v18, %v2431_v41  ;;  %v11875_v54 = vstv %s11799_s6  ;;  %v16377_v3 = vld [vmem:[#allocation246_spill] sm:$0xff]  ;;  %v16380_v50 = vld [vmem:[#allocation240_spill] sm:$0xff] }
 0x343   : > { %v2526_v53 = vadd.f32 %v16372_v5, %v2428_v24  ;;  %v16374_v63 = vld [vmem:[#allocation243_spill] sm:$0xff]  ;;  %4674 = vrot.lane.b32.xlu1 %v4629_v1, %s7339_s22  ;;  %4672 = vrot.lane.b32.xlu0 %v4628_v45, %s7339_s22  ;;  %v4631_v23 = vmul.f32 %v11606_v7, %v11853_v16  ;;  %v4630_v11 = vmul.f32 %v11606_v7, %v11856_v30  ;;  %v11887_v56 = vstv %s11815_s7  ;;  %v16385_v7 = vld [vmem:[#allocation254_spill] sm:$0xff] }
 0x344   : > { %v2614_v19 = vadd.f32 %v16374_v63, %v2516_v28  ;;  %v2528_v24 = vadd.f32 %v16376_v60, %v2430_v37  ;;  %v2617_v6 = vadd.f32 %v16377_v3, %v2519_v15  ;;  %v16378_v12 = vld [vmem:[#allocation247_spill] sm:$0xff]  ;;  %v2530_v1 = vadd.f32 %v16380_v50, %v2432_v39  ;;  %v16382_v63 = vld [vmem:[#allocation252_spill] sm:$0xff]  ;;  %v11895_v26 = vpop.permute.xlu0 %4094 }
 0x345   : > { %v2616_v28 = vadd.f32 %v16378_v12, %v2518_v32  ;;  %v16379_v41 = vld [vmem:[#allocation239_spill] sm:$0xff]  ;;  %v2618_v42 = vadd.f32 %v16382_v63, %v2520_v14  ;;  %v11893_v43 = vpop.permute.xlu1 %4096  ;;  %16384 = vst [vmem:[#allocation5_spill] sm:$0xff] %v11895_v26  ;;  %v2621_v37 = vadd.f32 %v16385_v7, %v2523_v48  ;;  %v16386_v60 = vld [vmem:[#allocation24_spill] sm:$0xff]  ;;  %v11919_v63 = vmul.f32 %v10980_v34, %v11875_v54  ;;  %v16396_v7 = vld [vmem:[#allocation257_spill] sm:$0xff] }
 0x346   : > { %v2531_v18 = vadd.f32 %v16379_v41, %v2433_v62  ;;  %v16381_v5 = vld [vmem:[#allocation251_spill] sm:$0xff]  ;;  %16383 = vst [vmem:[#allocation261_spill] sm:$0xff] %v11893_v43  ;;  %v2737_v15 = vadd.f32 %v16386_v60, %v2615_v57  ;;  %v16387_v3 = vld [vmem:[#allocation120_spill] sm:$0xff]  ;;  %v16390_v62 = vld [vmem:[#allocation105_spill] sm:$0xff]  ;;  %v4714_v57 = vmul.f32 %v10987_v59, %v11887_v56 }
 0x347   : > { %v2619_v45 = vadd.f32 %v16381_v5, %v2521_v35  ;;  %v2736_v32 = vadd.f32 %v16387_v3, %v2614_v19  ;;  %v16388_v12 = vld [vmem:[#allocation104_spill] sm:$0xff]  ;;  %v11906_v39 = vmul.f32 %v16390_v62, %v11875_v54  ;;  %4678 = vrot.lane.b32.xlu1 %v4631_v23, %s7339_s22  ;;  %4676 = vrot.lane.b32.xlu0 %v4630_v11, %s7339_s22  ;;  %v16392_v14 = vld [vmem:[#allocation255_spill] sm:$0xff]  ;;  %v16397_v60 = vld [vmem:[#allocation53_spill] sm:$0xff] }
 0x348   : > { %v11902_v10 = vmul.f32 %v16388_v12, %v11875_v54  ;;  %v4715_v35 = vmul.f32 %v10980_v34, %v11887_v56  ;;  %v2620_v48 = vadd.f32 %v16392_v14, %v2522_v0  ;;  %v16393_v19 = vld [vmem:[#allocation39_spill] sm:$0xff]  ;;  %16395 = vst [vmem:[#allocation256_spill] sm:$0xff] %v11919_v63  ;;  %v2623_v23 = vadd.f32 %v16396_v7, %v2525_v38  ;;  %v11930_v0 = vpop.permute.xlu0 %4098  ;;  %v16403_v14 = vld [vmem:[#allocation50_spill] sm:$0xff]  ;;  %v16439_v43 = vld [vmem:[#allocation20_spill] sm:$0xff] }
 0x349   : > { %16391 = vst [vmem:[#allocation156_spill] sm:$0xff] %v11906_v39  ;;  %v2739_v41 = vadd.f32 %v16393_v19, %v2617_v6  ;;  %v16394_v50 = vld [vmem:[#allocation47_spill] sm:$0xff]  ;;  %v2741_v11 = vadd.f32 %v16397_v60, %v2619_v45  ;;  %v11926_v62 = vmul.f32 %v10987_v59, %v11875_v54  ;;  %v11928_v26 = vpop.permute.xlu1 %4100  ;;  %16401 = vst [vmem:[#allocation159_spill] sm:$0xff] %v11930_v0  ;;  %v16402_v6 = vld [vmem:[#allocation258_spill] sm:$0xff] }
 0x34a   : > { %16389 = vst [vmem:[#allocation226_spill] sm:$0xff] %v11902_v10  ;;  %v2738_v5 = vadd.f32 %v16394_v50, %v2616_v28  ;;  %v16398_v3 = vld [vmem:[#allocation219_spill] sm:$0xff]  ;;  %16400 = vst [vmem:[#allocation158_spill] sm:$0xff] %v11928_v26  ;;  %v2622_v28 = vadd.f32 %v16402_v6, %v2524_v4  ;;  %v2743_v19 = vadd.f32 %v16403_v14, %v2621_v37  ;;  %v16407_v37 = vld [vmem:[#allocation264_spill] sm:$0xff] }
 0x34b   : > { %v2740_v12 = vadd.f32 %v16398_v3, %v2618_v42  ;;  %16399 = vst [vmem:[#allocation157_spill] sm:$0xff] %v11926_v62  ;;  %v11936_v34 = vmul.f32 %v11019_v40, %v11875_v54  ;;  %v11940_v38 = vmul.f32 %v11032_v13, %v11875_v54  ;;  %v16406_v42 = vld [vmem:[#allocation263_spill] sm:$0xff]  ;;  %4748 = vrot.lane.b32.xlu1 %v4715_v35, %s7340_s24  ;;  %v16408_v7 = vld [vmem:[#allocation186_spill] sm:$0xff]  ;;  %v16409_v3 = vld [vmem:[#allocation45_spill] sm:$0xff] }
 0x34c   : > { %v2625_v45 = vadd.f32 %v16406_v42, %v2527_v49  ;;  %4746 = vrot.lane.b32.xlu0 %v4714_v57, %s7340_s24  ;;  %v4717_v59 = vmul.f32 %v11019_v40, %v11887_v56  ;;  %v4716_v4 = vmul.f32 %v11032_v13, %v11887_v56  ;;  %v2624_v50 = vadd.f32 %v16407_v37, %v2526_v53  ;;  %v16411_v14 = vld [vmem:[#allocation6_spill] sm:$0xff]  ;;  %v16412_v42 = vld [vmem:[#allocation188_spill] sm:$0xff]  ;;  %v11967_v53 = vpop.permute.xlu0 %4102 }
 0x34d   : > { %16404 = vst [vmem:[#allocation73_spill] sm:$0xff] %v11936_v34  ;;  %16405 = vst [vmem:[#allocation77_spill] sm:$0xff] %v11940_v38  ;;  %v2627_v60 = vadd.f32 %v16408_v7, %v2529_v44  ;;  %v2742_v6 = vadd.f32 %v16409_v3, %v2620_v48  ;;  %v11956_v49 = vmul.f32 %v11085_v51, %v11875_v54  ;;  %v16413_v0 = vld [vmem:[#allocation52_spill] sm:$0xff]  ;;  %v11965_v13 = vpop.permute.xlu1 %4104  ;;  %v16418_v37 = vld [vmem:[#allocation58_spill] sm:$0xff] }
 0x34e   : > { %v2626_v35 = vadd.f32 %v16411_v14, %v2528_v24  ;;  %v2629_v57 = vadd.f32 %v16412_v42, %v2531_v18  ;;  %v2745_v26 = vadd.f32 %v16413_v0, %v2623_v23  ;;  %v11963_v40 = vmul.f32 %v11092_v46, %v11875_v54  ;;  %16415 = vst [vmem:[#allocation161_spill] sm:$0xff] %v11965_v13  ;;  %v16417_v44 = vld [vmem:[#allocation8_spill] sm:$0xff] }
 0x34f   : > { %16410 = vst [vmem:[#allocation160_spill] sm:$0xff] %v11956_v49  ;;  %16416 = vst [vmem:[#allocation265_spill] sm:$0xff] %v11967_v53  ;;  %v2628_v48 = vadd.f32 %v16417_v44, %v2530_v1  ;;  %v2744_v7 = vadd.f32 %v16418_v37, %v2622_v28  ;;  %v11973_v3 = vmul.f32 %v16250_v2, %v11875_v54  ;;  %v16421_v18 = vld [vmem:[#allocation244_spill] sm:$0xff]  ;;  %4752 = vrot.lane.b32.xlu1 %v4717_v59, %s7340_s24  ;;  %v16422_v28 = vld [vmem:[#allocation245_spill] sm:$0xff] }
 0x350   : > { %16414 = vst [vmem:[#allocation84_spill] sm:$0xff] %v11963_v40  ;;  %v11977_v24 = vmul.f32 %v16252_v9, %v11875_v54  ;;  %v2747_v23 = vadd.f32 %v16421_v18, %v2625_v45  ;;  %4750 = vrot.lane.b32.xlu0 %v4716_v4, %s7340_s24  ;;  %v4719_v0 = vmul.f32 %v11085_v51, %v11887_v56  ;;  %v16425_v4 = vld [vmem:[#allocation135_spill] sm:$0xff]  ;;  %v12022_v13 = vstv %s11943_s8  ;;  %v16479_v40 = vld [vmem:[#allocation210_spill] sm:$0xff] }
 0x351   : > { %16419 = vst [vmem:[#allocation162_spill] sm:$0xff] %v11973_v3  ;;  %v4718_v1 = vmul.f32 %v11092_v46, %v11887_v56  ;;  %v2746_v14 = vadd.f32 %v16422_v28, %v2624_v50  ;;  %v2749_v42 = vadd.f32 %v11536_v58, %v2627_v60  ;;  %v11990_v44 = vmul.f32 %v16340_v27, %v11875_v54  ;;  %v12006_v58 = vpop.permute.xlu1 %4108  ;;  %v12008_v60 = vpop.permute.xlu0 %4106  ;;  %v16430_v37 = vld [vmem:[#allocation191_spill] sm:$0xff]  ;;  %v16431_v28 = vld [vmem:[#allocation136_spill] sm:$0xff] }
 0x352   : > { %16420 = vst [vmem:[#allocation163_spill] sm:$0xff] %v11977_v24  ;;  %v11994_v45 = vmul.f32 %v16341_v17, %v11875_v54  ;;  %v2748_v59 = vadd.f32 %v11539_v52, %v2626_v35  ;;  %v2751_v51 = vadd.f32 %v16425_v4, %v2629_v57  ;;  %v12000_v46 = vmul.f32 %v16348_v55, %v11875_v54  ;;  %v16434_v57 = vld [vmem:[#allocation9_spill] sm:$0xff] }
 0x353   : > { %16423 = vst [vmem:[#allocation70_spill] sm:$0xff] %v11990_v44  ;;  %v12004_v50 = vmul.f32 %v16269_v22, %v11875_v54  ;;  %16428 = vst [vmem:[#allocation167_spill] sm:$0xff] %v12006_v58  ;;  %v2891_v18 = vadd.f32 %v16430_v37, %v2737_v15  ;;  %v2750_v53 = vadd.f32 %v16431_v28, %v2628_v48  ;;  %4756 = vrot.lane.b32.xlu1 %v4719_v0, %s7340_s24  ;;  %v16438_v0 = vld [vmem:[#allocation198_spill] sm:$0xff] }
 0x354   : > { %16424 = vst [vmem:[#allocation164_spill] sm:$0xff] %v11994_v45  ;;  %16426 = vst [vmem:[#allocation165_spill] sm:$0xff] %v12000_v46  ;;  %v12014_v52 = vmul.f32 %v16276_v36, %v11875_v54  ;;  %v12018_v35 = vmul.f32 %v11251_v25, %v11875_v54  ;;  %v2890_v4 = vadd.f32 %v16434_v57, %v2736_v32  ;;  %4754 = vrot.lane.b32.xlu0 %v4718_v1, %s7340_s24  ;;  %v16435_v54 = vld [vmem:[#allocation10_spill] sm:$0xff]  ;;  %v16436_v32 = vld [vmem:[#allocation193_spill] sm:$0xff] }
 0x355   : > { %16427 = vst [vmem:[#allocation166_spill] sm:$0xff] %v12004_v50  ;;  %16429 = vst [vmem:[#allocation115_spill] sm:$0xff] %v12008_v60  ;;  %v4721_v15 = vmul.f32 %v16250_v2, %v11887_v56  ;;  %v4720_v48 = vmul.f32 %v16252_v9, %v11887_v56  ;;  %v2893_v37 = vadd.f32 %v16435_v54, %v2739_v41  ;;  %v16437_v57 = vld [vmem:[#allocation13_spill] sm:$0xff]  ;;  %v16441_v2 = vld [vmem:[#allocation207_spill] sm:$0xff]  ;;  %v12044_v45 = vpop.permute.xlu1 %4112  ;;  %v12046_v44 = vpop.permute.xlu0 %4110 }
 0x356   : > { %16432 = vst [vmem:[#allocation76_spill] sm:$0xff] %v12014_v52  ;;  %16433 = vst [vmem:[#allocation217_spill] sm:$0xff] %v12018_v35  ;;  %v2892_v28 = vadd.f32 %v16436_v32, %v2738_v5  ;;  %v2895_v60 = vadd.f32 %v16437_v57, %v2741_v11  ;;  %v2894_v58 = vadd.f32 %v16438_v0, %v2740_v12  ;;  %v16440_v35 = vld [vmem:[#allocation203_spill] sm:$0xff]  ;;  %v16442_v46 = vld [vmem:[#allocation22_spill] sm:$0xff] }
 0x357   : > { %v2897_v1 = vadd.f32 %v16439_v43, %v2743_v19  ;;  %v2896_v52 = vadd.f32 %v16440_v35, %v2742_v6  ;;  %v12039_v50 = vadd.f32 %v16441_v2, %v2745_v26  ;;  %v12042_v9 = vadd.f32 %v16442_v46, %v2744_v7  ;;  %16443 = vst [vmem:[#allocation97_spill] sm:$0xff] %v12044_v45  ;;  %v16445_v41 = vld [vmem:[#allocation34_spill] sm:$0xff]  ;;  %v12050_v54 = vld [vmem:[%s7384_s21 + $0xf8] sm:$0xff]  ;;  %v12055_v43 = vld [vmem:[%s7384_s21 + $0x100] sm:$0x3] }
 0x358   : > { %16444 = vst [vmem:[#allocation168_spill] sm:$0xff] %v12046_v44  ;;  %v3045_v5 = vadd.f32 %v16445_v41, %v2891_v18  ;;  %v3723_v11 = vmul.f32 %v12050_v54, %v12022_v13  ;;  %v3724_v26 = vmul.f32 %v12055_v43, %v12022_v13  ;;  %v12060_v12 = vld [vmem:[%s7384_s21 + $0xf0] sm:$0xff]  ;;  %4760 = vrot.lane.b32.xlu1 %v4721_v15, %s7340_s24  ;;  %v16447_v35 = vld [vmem:[#allocation213_spill] sm:$0xff]  ;;  %v16448_v57 = vld [vmem:[#allocation26_spill] sm:$0xff] }
 0x359   : > { %v3722_v19 = vmul.f32 %v12060_v12, %v12022_v13  ;;  %v16446_v6 = vld [vmem:[#allocation23_spill] sm:$0xff]  ;;  %4758 = vrot.lane.b32.xlu0 %v4720_v48, %s7340_s24  ;;  %v4723_v46 = vmul.f32 %v16340_v27, %v11887_v56  ;;  %v4722_v18 = vmul.f32 %v16341_v17, %v11887_v56  ;;  %v12074_v32 = vadd.f32 %v16447_v35, %v2746_v14  ;;  %v16450_v41 = vld [vmem:[#allocation40_spill] sm:$0xff]  ;;  %v16452_v48 = vld [vmem:[#allocation29_spill] sm:$0xff]  ;;  %v12091_v35 = vpop.permute.xlu1 %4116 }
 0x35a   : > { %v12065_v7 = vadd.f32 %v16446_v6, %v2747_v23  ;;  %v12077_v0 = vadd.f32 %v16448_v57, %v2749_v42  ;;  %v16449_v2 = vld [vmem:[#allocation35_spill] sm:$0xff]  ;;  %v3047_v6 = vadd.f32 %v16450_v41, %v2893_v37  ;;  %v16451_v15 = vld [vmem:[#allocation216_spill] sm:$0xff]  ;;  %v12085_v27 = vadd.f32 %v16452_v48, %v2751_v51  ;;  %v16453_v45 = vld [vmem:[#allocation221_spill] sm:$0xff]  ;;  %16455 = vst [vmem:[#allocation98_spill] sm:$0xff] %v12091_v35  ;;  %v12093_v42 = vpop.permute.xlu0 %4114 }
 0x35b   : > { %v3044_v23 = vadd.f32 %v16449_v2, %v2890_v4  ;;  %v12082_v44 = vadd.f32 %v16451_v15, %v2748_v59  ;;  %v12088_v24 = vadd.f32 %v16453_v45, %v2750_v53  ;;  %v16454_v17 = vld [vmem:[#allocation41_spill] sm:$0xff]  ;;  %16456 = vst [vmem:[#allocation169_spill] sm:$0xff] %v12093_v42  ;;  %v3771_v37 = vrot.slane %v3723_v11, 1  ;;  %v12099_v41 = vld [vmem:[%s7384_s21 + $0x110] sm:$0xff]  ;;  %v16460_v15 = vld [vmem:[#allocation142_spill] sm:$0xff] }
 0x35c   : > { %v3046_v14 = vadd.f32 %v16454_v17, %v2892_v28  ;;  %v16457_v57 = vld [vmem:[#allocation141_spill] sm:$0xff]  ;;  %v3773_v2 = vrot.slane %v3724_v26, 1  ;;  %v3770_v59 = vrot.slane %v3722_v19, 1  ;;  %v12103_v51 = vmul.f32 %v12099_v41, %v12022_v13  ;;  %4764 = vrot.lane.b32.xlu1 %v4723_v46, %s7340_s24  ;;  %v16459_v26 = vld [vmem:[#allocation46_spill] sm:$0xff]  ;;  %v16461_v17 = vld [vmem:[#allocation143_spill] sm:$0xff] }
 0x35d   : > { %v12096_v4 = vadd.f32 %v16457_v57, %v3045_v5  ;;  %4762 = vrot.lane.b32.xlu0 %v4722_v18, %s7340_s24  ;;  %v4725_v53 = vmul.f32 %v16348_v55, %v11887_v56  ;;  %v4724_v45 = vmul.f32 %v16269_v22, %v11887_v56  ;;  %v12112_v28 = vstv %s12030_s11  ;;  %v16458_v5 = vld [vmem:[#allocation206_spill] sm:$0xff]  ;;  %v16462_v18 = vld [vmem:[#allocation49_spill] sm:$0xff]  ;;  %v12128_v22 = vld [vmem:[%s7384_s21 + $0x118] sm:$0x3] }
 0x35e   : > { %v3049_v11 = vadd.f32 %v16458_v5, %v2895_v60  ;;  %v3048_v19 = vadd.f32 %v16459_v26, %v2894_v58  ;;  %v12117_v48 = vadd.f32 %v16460_v15, %v3044_v23  ;;  %v12120_v46 = vadd.f32 %v16461_v17, %v3047_v6  ;;  %v16463_v42 = vld [vmem:[#allocation54_spill] sm:$0xff]  ;;  %v12132_v58 = vpop.permute.xlu1 %4364  ;;  %v12134_v23 = vpop.permute.xlu0 %4362 }
 0x35f   : > { %v3051_v57 = vadd.f32 %v16462_v18, %v2897_v1  ;;  %v3050_v55 = vadd.f32 %v16463_v42, %v2896_v52  ;;  %v12125_v35 = vadd.f32 %v11693_v21, %v3046_v14  ;;  %v3727_v60 = vmul.f32 %v12128_v22, %v12022_v13  ;;  %16464 = vst [vmem:[#allocation17_spill] sm:$0xff] %v12132_v58  ;;  %v12148_v42 = vld [vmem:[%s7384_s21 + $0x108] sm:$0xff] }
 0x360   : > { %16465 = vst [vmem:[#allocation81_spill] sm:$0xff] %v12134_v23  ;;  %v12137_v6 = vsel %vm498_vm0, %v3771_v37, %v3773_v2  ;;  %v12140_v1 = vsel %vm498_vm0, %v3770_v59, %v3771_v37  ;;  %v4935_v21 = vmul.f32 %v12099_v41, %v12112_v28  ;;  %v4936_v52 = vmul.f32 %v12128_v22, %v12112_v28  ;;  %v12165_v26 = vld [vmem:[%s7384_s21 + $0x128] sm:$0xff]  ;;  %v16473_v23 = vld [vmem:[#allocation56_spill] sm:$0xff] }
 0x361   : > { %16466 = vst [vmem:[#allocation123_spill] sm:$0xff] %v12137_v6  ;;  %16467 = vst [vmem:[#allocation102_spill] sm:$0xff] %v12140_v1  ;;  %v3776_v14 = vrot.slane %v12103_v51, 1  ;;  %v3725_v5 = vmul.f32 %v12148_v42, %v12022_v13  ;;  %4768 = vrot.lane.b32.xlu1 %v4725_v53, %s7340_s24  ;;  %4766 = vrot.lane.b32.xlu0 %v4724_v45, %s7340_s24  ;;  %v4727_v37 = vmul.f32 %v16276_v36, %v11887_v56  ;;  %v16468_v36 = vld [vmem:[#allocation241_spill] sm:$0xff]  ;;  %v12188_v1 = vld [vmem:[%s7384_s21 + $0x130] sm:$0x3] }
 0x362   : > { %v4726_v2 = vmul.f32 %v11251_v25, %v11887_v56  ;;  %v12159_v59 = vadd.f32 %v11696_v31, %v3049_v11  ;;  %v12162_v51 = vadd.f32 %v11719_v33, %v3048_v19  ;;  %v12169_v53 = vmul.f32 %v12165_v26, %v12022_v13  ;;  %v16469_v25 = vld [vmem:[#allocation249_spill] sm:$0xff]  ;;  %v16470_v31 = vld [vmem:[#allocation150_spill] sm:$0xff]  ;;  %v12181_v19 = vpop.permute.xlu1 %4368  ;;  %v12183_v18 = vpop.permute.xlu0 %4366 }
 0x363   : > { %v4934_v45 = vmul.f32 %v12148_v42, %v12112_v28  ;;  %v3053_v15 = vadd.f32 %v16468_v36, %v12039_v50  ;;  %v12176_v17 = vadd.f32 %v16469_v25, %v3051_v57  ;;  %v12179_v11 = vadd.f32 %v16470_v31, %v3050_v55  ;;  %16471 = vst [vmem:[#allocation220_spill] sm:$0xff] %v12181_v19  ;;  %v12193_v25 = vld [vmem:[%s7384_s21 + $0x120] sm:$0xff]  ;;  %v16475_v31 = vld [vmem:[#allocation151_spill] sm:$0xff] }
 0x364   : > { %v3778_v33 = vrot.slane %v3727_v60, 1  ;;  %16472 = vst [vmem:[#allocation170_spill] sm:$0xff] %v12183_v18  ;;  %v3052_v58 = vadd.f32 %v16473_v23, %v12042_v9  ;;  %v3730_v6 = vmul.f32 %v12188_v1, %v12022_v13  ;;  %v4983_v50 = vrot.slane %v4935_v21, 1 }
 0x365   : > { %v4985_v36 = vrot.slane %v4936_v52, 1  ;;  %v3775_v57 = vrot.slane %v3725_v5, 1  ;;  %v3728_v55 = vmul.f32 %v12193_v25, %v12022_v13  ;;  %4772 = vrot.lane.b32.xlu1 %v4727_v37, %s7340_s24  ;;  %4770 = vrot.lane.b32.xlu0 %v4726_v2, %s7340_s24  ;;  %v4729_v9 = vmul.f32 %v11887_v56, %v11853_v16  ;;  %v16474_v37 = vld [vmem:[#allocation60_spill] sm:$0xff] }
 0x366   : > { %v4728_v60 = vmul.f32 %v11887_v56, %v11856_v30  ;;  %v4982_v23 = vrot.slane %v4934_v45, 1  ;;  %v4938_v21 = vmul.f32 %v12165_v26, %v12112_v28  ;;  %v4939_v52 = vmul.f32 %v12188_v1, %v12112_v28  ;;  %v12218_v19 = vpop.permute.xlu1 %4372  ;;  %v12220_v3 = vpop.permute.xlu0 %4370 }
 0x367   : > { %v4937_v5 = vmul.f32 %v12193_v25, %v12112_v28  ;;  %v3055_v2 = vadd.f32 %v16474_v37, %v12065_v7  ;;  %v12212_v18 = vadd.f32 %v16475_v31, %v3053_v15  ;;  %v12215_v56 = vsel %vm498_vm0, %v3776_v14, %v3778_v33  ;;  %16477 = vst [vmem:[#allocation87_spill] sm:$0xff] %v12218_v19  ;;  %v12231_v33 = vld [vmem:[%s7384_s21 + $0x140] sm:$0xff]  ;;  %v12236_v31 = vld [vmem:[%s7384_s21 + $0x148] sm:$0x3] }
 0x368   : > { %16476 = vst [vmem:[#allocation125_spill] sm:$0xff] %v12215_v56  ;;  %v3781_v45 = vrot.slane %v12169_v53, 1  ;;  %16478 = vst [vmem:[#allocation30_spill] sm:$0xff] %v12220_v3  ;;  %v3054_v49 = vadd.f32 %v16479_v40, %v12074_v32  ;;  %v12225_v38 = vadd.f32 %v11794_v61, %v3052_v58  ;;  %v3783_v7 = vrot.slane %v3730_v6, 1  ;;  %v12241_v40 = vld [vmem:[%s7384_s21 + $0x138] sm:$0xff] }
 0x369   : > { %v4986_v15 = vsel %vm498_vm0, %v4983_v50, %v4985_v36  ;;  %v3780_v37 = vrot.slane %v3728_v55, 1  ;;  %4776 = vrot.lane.b32.xlu1 %v4729_v9, %s7340_s24  ;;  %4774 = vrot.lane.b32.xlu0 %v4728_v60, %s7340_s24  ;;  %v4941_v53 = vmul.f32 %v12231_v33, %v12112_v28  ;;  %v4942_v61 = vmul.f32 %v12236_v31, %v12112_v28  ;;  %v16480_v9 = vld [vmem:[#allocation61_spill] sm:$0xff] }
 0x36a   : > { %v4940_v32 = vmul.f32 %v12241_v40, %v12112_v28  ;;  %v4984_v58 = vsel %vm498_vm0, %v4982_v23, %v4983_v50  ;;  %v4988_v6 = vrot.slane %v4938_v21, 1  ;;  %v4990_v36 = vrot.slane %v4939_v52, 1  ;;  %v12258_v34 = vpop.permute.xlu1 %4376  ;;  %v12260_v62 = vpop.permute.xlu0 %4374 }
 0x36b   : > { %v4987_v55 = vrot.slane %v4937_v5, 1  ;;  %v3057_v60 = vadd.f32 %v16480_v9, %v12077_v0  ;;  %v12249_v3 = vadd.f32 %v11797_v8, %v3055_v2  ;;  %v12252_v19 = vsel %vm498_vm0, %v3775_v57, %v3776_v14  ;;  %16482 = vst [vmem:[#allocation172_spill] sm:$0xff] %v12258_v34  ;;  %16483 = vst [vmem:[#allocation173_spill] sm:$0xff] %v12260_v62  ;;  %v12268_v8 = vld [vmem:[%s7384_s21 + $0x158] sm:$0xff]  ;;  %v12273_v57 = vld [vmem:[%s7384_s21 + $0x160] sm:$0x3] }
 0x36c   : > { %16481 = vst [vmem:[#allocation171_spill] sm:$0xff] %v12252_v19  ;;  %v12256_v56 = vmul.f32 %v12231_v33, %v12022_v13  ;;  %v12263_v50 = vadd.f32 %v11810_v29, %v3054_v49  ;;  %v3733_v0 = vmul.f32 %v12236_v31, %v12022_v13  ;;  %v4944_v14 = vmul.f32 %v12268_v8, %v12112_v28  ;;  %v12288_v62 = vld [vmem:[%s7384_s21 + $0x150] sm:$0xff]  ;;  %v16486_v34 = vld [vmem:[#allocation250_spill] sm:$0xff] }
 0x36d   : > { %v4945_v23 = vmul.f32 %v12273_v57, %v12112_v28  ;;  %v12278_v21 = vsel %vm498_vm0, %v3781_v45, %v3783_v7  ;;  %5024 = vrot.lane.b32.xlu1 %v4986_v15, %s7339_s22  ;;  %5022 = vrot.lane.b32.xlu0 %v4984_v58, %s7339_s22  ;;  %v4993_v29 = vrot.slane %v4941_v53, 1  ;;  %v4995_v49 = vrot.slane %v4942_v61, 1  ;;  %v16487_v58 = vld [vmem:[#allocation253_spill] sm:$0xff] }
 0x36e   : > { %16484 = vst [vmem:[#allocation116_spill] sm:$0xff] %v12278_v21  ;;  %v4992_v52 = vrot.slane %v4940_v32, 1  ;;  %v12283_v5 = vsel %vm498_vm0, %v3780_v37, %v3781_v45  ;;  %v4991_v2 = vsel %vm498_vm0, %v4988_v6, %v4990_v36  ;;  %v4989_v9 = vsel %vm498_vm0, %v4987_v55, %v4988_v6  ;;  %v12300_v37 = vpop.permute.xlu1 %4380  ;;  %v12302_v32 = vpop.permute.xlu0 %4378  ;;  %v16490_v6 = vld [vmem:[#allocation64_spill] sm:$0xff]  ;;  %v12313_v45 = vld [vmem:[%s7384_s21 + $0x170] sm:$0xff] }
 0x36f   : > { %16485 = vst [vmem:[#allocation112_spill] sm:$0xff] %v12283_v5  ;;  %v4943_v7 = vmul.f32 %v12288_v62, %v12112_v28  ;;  %v3056_v15 = vadd.f32 %v16486_v34, %v12082_v44  ;;  %v3059_v53 = vadd.f32 %v16487_v58, %v12085_v27  ;;  %v12297_v61 = vadd.f32 %v11813_v47, %v3057_v60 }
 0x370   : > { %16488 = vst [vmem:[#allocation174_spill] sm:$0xff] %v12300_v37  ;;  %16489 = vst [vmem:[#allocation113_spill] sm:$0xff] %v12302_v32  ;;  %v3058_v36 = vadd.f32 %v16490_v6, %v12088_v24  ;;  %v3788_v55 = vrot.slane %v3733_v0, 1  ;;  %v4998_v34 = vrot.slane %v4944_v14, 1  ;;  %v5000_v44 = vrot.slane %v4945_v23, 1  ;;  %v12323_v23 = vld [vmem:[%s7384_s21 + $0x168] sm:$0xff] }
 0x371   : > { %v3731_v27 = vmul.f32 %v12241_v40, %v12022_v13  ;;  %5028 = vrot.lane.b32.xlu1 %v4991_v2, %s7339_s22  ;;  %5026 = vrot.lane.b32.xlu0 %v4989_v9, %s7339_s22  ;;  %v4996_v47 = vsel %vm498_vm0, %v4993_v29, %v4995_v49  ;;  %v4994_v60 = vsel %vm498_vm0, %v4992_v52, %v4993_v29  ;;  %v4997_v58 = vrot.slane %v4943_v7, 1  ;;  %v12318_v0 = vld [vmem:[%s7384_s21 + $0x178] sm:$0x3]  ;;  %v16497_v37 = vld [vmem:[#allocation65_spill] sm:$0xff] }
 0x372   : > { %16491 = vst [vmem:[#allocation175_spill] sm:$0xff] %v12313_v45  ;;  %v4947_v24 = vmul.f32 %v12313_v45, %v12112_v28  ;;  %16492 = vst [vmem:[#allocation176_spill] sm:$0xff] %v12318_v0  ;;  %v4948_v14 = vmul.f32 %v12318_v0, %v12112_v28  ;;  %v4946_v2 = vmul.f32 %v12323_v23, %v12112_v28  ;;  %v16493_v49 = vld [vmem:[#allocation260_spill] sm:$0xff]  ;;  %v12339_v6 = vpop.permute.xlu1 %4384  ;;  %v12341_v32 = vpop.permute.xlu0 %4382 }
 0x373   : > { %v12328_v29 = vadd.f32 %v11820_v20, %v3056_v15  ;;  %v12331_v52 = vadd.f32 %v16493_v49, %v3059_v53  ;;  %v12335_v9 = vmul.f32 %v12268_v8, %v12022_v13  ;;  %v3736_v7 = vmul.f32 %v12273_v57, %v12022_v13  ;;  %16495 = vst [vmem:[#allocation180_spill] sm:$0xff] %v12339_v6  ;;  %v16499_v20 = vld [vmem:[#allocation154_spill] sm:$0xff] }
 0x374   : > { %16496 = vst [vmem:[#allocation181_spill] sm:$0xff] %v12341_v32  ;;  %v12345_v5 = vadd.f32 %v16497_v37, %v12096_v4  ;;  %v12348_v15 = vadd.f32 %v16499_v20, %v3058_v36  ;;  %v16501_v53 = vrot.slane %v12256_v56, 1  ;;  %v5001_v21 = vsel %vm498_vm0, %v4998_v34, %v5000_v44  ;;  %v12359_v32 = vld [vmem:[%s7384_s21 + $0x188] sm:$0xff]  ;;  %v12364_v37 = vld [vmem:[%s7384_s21 + $0x190] sm:$0x3] }
 0x375   : > { %16494 = vst [vmem:[#allocation177_spill] sm:$0xff] %v12331_v52  ;;  %v3785_v19 = vrot.slane %v3731_v27, 1  ;;  %5032 = vrot.lane.b32.xlu1 %v4996_v47, %s7339_s22  ;;  %5030 = vrot.lane.b32.xlu0 %v4994_v60, %s7339_s22  ;;  %v4950_v4 = vmul.f32 %v12359_v32, %v12112_v28  ;;  %v4951_v36 = vmul.f32 %v12364_v37, %v12112_v28  ;;  %v5003_v47 = vrot.slane %v4947_v24, 1  ;;  %v16507_v52 = vld [vmem:[#allocation225_spill] sm:$0xff] }
 0x376   : > { %16498 = vst [vmem:[#allocation121_spill] sm:$0xff] %v12345_v5  ;;  %16500 = vst [vmem:[#allocation178_spill] sm:$0xff] %v12348_v15  ;;  %v12353_v49 = vsel %vm498_vm0, %v16501_v53, %v3788_v55  ;;  %v12369_v55 = vld [vmem:[%s7384_s21 + $0x180] sm:$0xff]  ;;  %v4999_v27 = vsel %vm498_vm0, %v4997_v58, %v4998_v34  ;;  %v5005_v60 = vrot.slane %v4948_v14, 1  ;;  %v5002_v20 = vrot.slane %v4946_v2, 1  ;;  %v12383_v39 = vpop.permute.xlu1 %4388  ;;  %v12385_v10 = vpop.permute.xlu0 %4386  ;;  %v16505_v34 = vld [vmem:[#allocation66_spill] sm:$0xff] }
 0x377   : > { %16502 = vst [vmem:[#allocation179_spill] sm:$0xff] %v12353_v49  ;;  %v4949_v44 = vmul.f32 %v12369_v55, %v12112_v28  ;;  %v3791_v53 = vrot.slane %v12335_v9, 1  ;;  %v3793_v6 = vrot.slane %v3736_v7, 1  ;;  %v3734_v49 = vmul.f32 %v12288_v62, %v12022_v13  ;;  %16503 = vst [vmem:[#allocation182_spill] sm:$0xff] %v12383_v39  ;;  %v12394_v14 = vld [vmem:[%s7384_s21 + $0x1a0] sm:$0xff]  ;;  %v12406_v39 = vld [vmem:[%s7384_s21 + $0x198] sm:$0xff] }
 0x378   : > { %v12381_v63 = vmul.f32 %v12313_v45, %v12022_v13  ;;  %16504 = vst [vmem:[#allocation236_spill] sm:$0xff] %v12385_v10  ;;  %v12389_v58 = vadd.f32 %v16505_v34, %v12117_v48  ;;  %v3739_v24 = vmul.f32 %v12318_v0, %v12022_v13  ;;  %v4953_v2 = vmul.f32 %v12394_v14, %v12112_v28  ;;  %v12399_v9 = vld [vmem:[%s7384_s21 + $0x1a8] sm:$0x3] }
 0x379   : > { %v4954_v7 = vmul.f32 %v12399_v9, %v12112_v28  ;;  %5036 = vrot.lane.b32.xlu1 %v5001_v21, %s7339_s22  ;;  %5034 = vrot.lane.b32.xlu0 %v4999_v27, %s7339_s22  ;;  %v5008_v48 = vrot.slane %v4950_v4, 1  ;;  %v5010_v34 = vrot.slane %v4951_v36, 1  ;;  %v5007_v10 = vrot.slane %v4949_v44, 1  ;;  %v16510_v36 = vld [vmem:[#allocation262_spill] sm:$0xff] }
 0x37a   : > { %16506 = vst [vmem:[#allocation183_spill] sm:$0xff] %v12389_v58  ;;  %v4952_v15 = vmul.f32 %v12406_v39, %v12112_v28  ;;  %v12412_v0 = vadd.f32 %v16507_v52, %v12120_v46  ;;  %v16508_v45 = vrot.slane %v12256_v56, 1  ;;  %v5006_v21 = vsel %vm498_vm0, %v5003_v47, %v5005_v60  ;;  %v12429_v52 = vpop.permute.xlu1 %4392  ;;  %v12431_v56 = vpop.permute.xlu0 %4390 }
 0x37b   : > { %v5004_v4 = vsel %vm498_vm0, %v5002_v20, %v5003_v47  ;;  %v12423_v44 = vadd.f32 %v16510_v36, %v12125_v35  ;;  %v12426_v27 = vsel %vm498_vm0, %v3791_v53, %v3793_v6  ;;  %v3790_v5 = vrot.slane %v3734_v49, 1  ;;  %16512 = vst [vmem:[#allocation124_spill] sm:$0xff] %v12429_v52  ;;  %16513 = vst [vmem:[#allocation197_spill] sm:$0xff] %v12431_v56 }
 0x37c   : > { %v12417_v58 = vsel %vm498_vm0, %v3785_v19, %v16508_v45  ;;  %16511 = vst [vmem:[#allocation91_spill] sm:$0xff] %v12426_v27  ;;  %v3796_v46 = vrot.slane %v12381_v63, 1  ;;  %v12434_v19 = vld [vmem:[%s7384_s21 + $0x1c0] sm:$0x3]  ;;  %v3798_v45 = vrot.slane %v3739_v24, 1  ;;  %v3737_v47 = vmul.f32 %v12323_v23, %v12022_v13 }
 0x37d   : > { %16509 = vst [vmem:[#allocation32_spill] sm:$0xff] %v12417_v58  ;;  %16514 = vst [vmem:[#allocation37_spill] sm:$0xff] %v12434_v19  ;;  %v5013_v60 = vrot.slane %v4953_v2, 1  ;;  %v5015_v35 = vrot.slane %v4954_v7, 1  ;;  %v3741_v6 = vmul.f32 %v12359_v32, %v12022_v13  ;;  %5040 = vrot.lane.b32.xlu1 %v5006_v21, %s7339_s22  ;;  %5038 = vrot.lane.b32.xlu0 %v5004_v4, %s7339_s22  ;;  %v5012_v20 = vrot.slane %v4952_v15, 1  ;;  %v16515_v21 = vld [vmem:[#allocation68_spill] sm:$0xff] }
 0x37e   : > { %v5011_v63 = vsel %vm498_vm0, %v5008_v48, %v5010_v34  ;;  %v5009_v49 = vsel %vm498_vm0, %v5007_v10, %v5008_v48  ;;  %v4956_v24 = vmul.f32 %v12112_v28, %v11853_v16  ;;  %v4957_v36 = vmul.f32 %v12112_v28, %v12434_v19  ;;  %v16516_v34 = vld [vmem:[#allocation69_spill] sm:$0xff]  ;;  %v12466_v48 = vpop.permute.xlu1 %4518  ;;  %v12468_v52 = vpop.permute.xlu0 %4516 }
 0x37f   : > { %v4955_v2 = vmul.f32 %v12112_v28, %v11856_v30  ;;  %v12451_v7 = vstv %s12374_s12  ;;  %v12455_v56 = vadd.f32 %v16515_v21, %v12159_v59  ;;  %v12459_v4 = vadd.f32 %v16516_v34, %v12162_v51  ;;  %16518 = vst [vmem:[#allocation185_spill] sm:$0xff] %v12466_v48  ;;  %16519 = vst [vmem:[#allocation189_spill] sm:$0xff] %v12468_v52 }
 0x380   : > { %v12462_v10 = vsel %vm498_vm0, %v3790_v5, %v3791_v53  ;;  %v3742_v15 = vmul.f32 %v12364_v37, %v12022_v13  ;;  %v12471_v28 = vsel %vm498_vm0, %v3796_v46, %v3798_v45  ;;  %v3795_v27 = vrot.slane %v3737_v47, 1 }
 0x381   : > { %16517 = vst [vmem:[#allocation184_spill] sm:$0xff] %v12462_v10  ;;  %16520 = vst [vmem:[#allocation190_spill] sm:$0xff] %v12471_v28  ;;  %v3740_v59 = vmul.f32 %v12369_v55, %v12022_v13  ;;  %v5016_v51 = vsel %vm498_vm0, %v5013_v60, %v5015_v35  ;;  %v3801_v5 = vrot.slane %v3741_v6, 1  ;;  %5044 = vrot.lane.b32.xlu1 %v5011_v63, %s7339_s22  ;;  %5042 = vrot.lane.b32.xlu0 %v5009_v49, %s7339_s22  ;;  %v16524_v28 = vld [vmem:[#allocation71_spill] sm:$0xff] }
 0x382   : > { %v5014_v53 = vsel %vm498_vm0, %v5012_v20, %v5013_v60  ;;  %v5089_v21 = vmul.f32 %v12099_v41, %v12451_v7  ;;  %v5090_v45 = vmul.f32 %v12128_v22, %v12451_v7  ;;  %v5018_v47 = vrot.slane %v4956_v24, 1  ;;  %v12493_v49 = vpop.permute.xlu1 %4522  ;;  %v12495_v20 = vpop.permute.xlu0 %4520 }
 0x383   : > { %v5020_v34 = vrot.slane %v4957_v36, 1  ;;  %v5017_v52 = vrot.slane %v4955_v2, 1  ;;  %v5088_v48 = vmul.f32 %v12148_v42, %v12451_v7  ;;  %v3803_v35 = vrot.slane %v3742_v15, 1  ;;  %16521 = vst [vmem:[#allocation92_spill] sm:$0xff] %v12493_v49  ;;  %16522 = vst [vmem:[#allocation93_spill] sm:$0xff] %v12495_v20 }
 0x384   : > { %v3744_v6 = vmul.f32 %v12394_v14, %v12022_v13  ;;  %v3745_v63 = vmul.f32 %v12399_v9, %v12022_v13  ;;  %v3743_v60 = vmul.f32 %v12406_v39, %v12022_v13  ;;  %v12498_v24 = vsel %vm498_vm0, %v3795_v27, %v3796_v46  ;;  %v16526_v46 = vld [vmem:[#allocation72_spill] sm:$0xff] }
 0x385   : > { %16523 = vst [vmem:[#allocation195_spill] sm:$0xff] %v12498_v24  ;;  %v3800_v36 = vrot.slane %v3740_v59, 1  ;;  %v5092_v2 = vmul.f32 %v12165_v26, %v12451_v7  ;;  %v5093_v15 = vmul.f32 %v12188_v1, %v12451_v7  ;;  %v12506_v10 = vadd.f32 %v16524_v28, %v12176_v17  ;;  %5048 = vrot.lane.b32.xlu1 %v5016_v51, %s7339_s22 }
 0x386   : > { %5046 = vrot.lane.b32.xlu0 %v5014_v53, %s7339_s22  ;;  %v5137_v13 = vrot.slane %v5089_v21, 1  ;;  %v5139_v20 = vrot.slane %v5090_v45, 1  ;;  %v5091_v27 = vmul.f32 %v12193_v25, %v12451_v7  ;;  %v12514_v59 = vadd.f32 %v16526_v46, %v12179_v11  ;;  %v12521_v21 = vpop.permute.xlu1 %4526  ;;  %v12523_v45 = vpop.permute.xlu0 %4524 }
 0x387   : > { %16525 = vst [vmem:[#allocation94_spill] sm:$0xff] %v12506_v10  ;;  %v5021_v49 = vsel %vm498_vm0, %v5018_v47, %v5020_v34  ;;  %v5019_v24 = vsel %vm498_vm0, %v5017_v52, %v5018_v47  ;;  %v5136_v17 = vrot.slane %v5088_v48, 1  ;;  %v12519_v28 = vsel %vm498_vm0, %v3801_v5, %v3803_v35  ;;  %16528 = vst [vmem:[#allocation95_spill] sm:$0xff] %v12521_v21  ;;  %v16531_v52 = vld [vmem:[#allocation74_spill] sm:$0xff]  ;;  %v16532_v47 = vld [vmem:[#allocation75_spill] sm:$0xff] }
 0x388   : > { %16527 = vst [vmem:[#allocation196_spill] sm:$0xff] %v12519_v28  ;;  %v3806_v51 = vrot.slane %v3744_v6, 1  ;;  %v3808_v58 = vrot.slane %v3745_v63, 1  ;;  %v3805_v53 = vrot.slane %v3743_v60, 1  ;;  %16529 = vst [vmem:[#allocation16_spill] sm:$0xff] %v12523_v45  ;;  %v12526_v10 = vsel %vm498_vm0, %v3800_v36, %v3801_v5  ;;  %v16548_v21 = vld [vmem:[#allocation175_spill] sm:$0xff] }
 0x389   : > { %16530 = vst [vmem:[#allocation205_spill] sm:$0xff] %v12526_v10  ;;  %v12529_v11 = vstv %s12475_s13  ;;  %v5142_v46 = vrot.slane %v5092_v2, 1  ;;  %v5144_v34 = vrot.slane %v5093_v15, 1  ;;  %v12533_v48 = vadd.f32 %v16531_v52, %v12212_v18  ;;  %5052 = vrot.lane.b32.xlu1 %v5021_v49, %s7339_s22  ;;  %v16552_v10 = vld [vmem:[#allocation178_spill] sm:$0xff] }
 0x38a   : > { %v12537_v35 = vadd.f32 %v16532_v47, %v12225_v38  ;;  %5050 = vrot.lane.b32.xlu0 %v5019_v24, %s7339_s22  ;;  %v5140_v6 = vsel %vm498_vm0, %v5137_v13, %v5139_v20  ;;  %v5141_v5 = vrot.slane %v5091_v27, 1  ;;  %v5138_v63 = vsel %vm498_vm0, %v5136_v17, %v5137_v13  ;;  %v12561_v2 = vpop.permute.xlu1 %4530  ;;  %v12563_v15 = vpop.permute.xlu0 %4528  ;;  %v16537_v13 = vld [vmem:[#allocation79_spill] sm:$0xff]  ;;  %v16553_v28 = vld [vmem:[#allocation86_spill] sm:$0xff] }
 0x38b   : > { %v5095_v60 = vmul.f32 %v12231_v33, %v12451_v7  ;;  %v5096_v18 = vmul.f32 %v12236_v31, %v12451_v7  ;;  %v5094_v36 = vmul.f32 %v12241_v40, %v12451_v7  ;;  %v12550_v38 = vsel %vm498_vm0, %v3806_v51, %v3808_v58  ;;  %16535 = vst [vmem:[#allocation204_spill] sm:$0xff] %v12561_v2  ;;  %v16538_v58 = vld [vmem:[#allocation80_spill] sm:$0xff]  ;;  %v16547_v2 = vld [vmem:[#allocation89_spill] sm:$0xff] }
 0x38c   : > { %16533 = vst [vmem:[#allocation59_spill] sm:$0xff] %v12550_v38  ;;  %v12553_v49 = vsel %vm498_vm0, %v3805_v53, %v3806_v51  ;;  %v12557_v20 = vmul.f32 %v12050_v54, %v12529_v11  ;;  %v4154_v24 = vmul.f32 %v12055_v43, %v12529_v11  ;;  %16536 = vst [vmem:[#allocation202_spill] sm:$0xff] %v12563_v15  ;;  %v16539_v51 = vld [vmem:[#allocation82_spill] sm:$0xff]  ;;  %v16546_v15 = vld [vmem:[#allocation183_spill] sm:$0xff] }
 0x38d   : > { %16534 = vst [vmem:[#allocation201_spill] sm:$0xff] %v12553_v49  ;;  %v12567_v27 = vadd.f32 %v16537_v13, %v12249_v3  ;;  %v12571_v17 = vadd.f32 %v16538_v58, %v12263_v50  ;;  %v12575_v53 = vadd.f32 %v16539_v51, %v12297_v61  ;;  %v5145_v54 = vsel %vm498_vm0, %v5142_v46, %v5144_v34  ;;  %v16540_v34 = vld [vmem:[#allocation83_spill] sm:$0xff] }
 0x38e   : > { %5178 = vrot.lane.b32.xlu1 %v5140_v6, %s7340_s24  ;;  %5176 = vrot.lane.b32.xlu0 %v5138_v63, %s7340_s24  ;;  %v5143_v43 = vsel %vm498_vm0, %v5141_v5, %v5142_v46  ;;  %v5098_v3 = vmul.f32 %v12268_v8, %v12451_v7  ;;  %v5099_v52 = vmul.f32 %v12273_v57, %v12451_v7  ;;  %v5147_v50 = vrot.slane %v5095_v60, 1  ;;  %v12594_v5 = vpop.permute.xlu1 %4534  ;;  %v12596_v51 = vpop.permute.xlu0 %4532  ;;  %v16544_v60 = vld [vmem:[#allocation121_spill] sm:$0xff] }
 0x38f   : > { %v5149_v47 = vrot.slane %v5096_v18, 1  ;;  %v5146_v13 = vrot.slane %v5094_v36, 1  ;;  %v5097_v61 = vmul.f32 %v12288_v62, %v12451_v7  ;;  %v12589_v58 = vadd.f32 %v16540_v34, %v12328_v29  ;;  %16542 = vst [vmem:[#allocation27_spill] sm:$0xff] %v12594_v5  ;;  %16543 = vst [vmem:[#allocation208_spill] sm:$0xff] %v12596_v51  ;;  %v16545_v18 = vld [vmem:[#allocation88_spill] sm:$0xff] }
 0x390   : > { %v4201_v6 = vrot.slane %v12557_v20, 2  ;;  %v4203_v63 = vrot.slane %v4154_v24, 2  ;;  %v4152_v46 = vmul.f32 %v12060_v12, %v12529_v11  ;;  %v3475_v36 = vadd.f32 %v16545_v18, %v16544_v60  ;;  %v16549_v34 = vld [vmem:[#allocation176_spill] sm:$0xff] }
 0x391   : > { %16541 = vst [vmem:[#allocation119_spill] sm:$0xff] %v12589_v58  ;;  %v3474_v45 = vadd.f32 %v16547_v2, %v16546_v15  ;;  %v5101_v29 = vmul.f32 %v16548_v21, %v12451_v7  ;;  %v5102_v20 = vmul.f32 %v16549_v34, %v12451_v7  ;;  %v12608_v24 = vmul.f32 %v12099_v41, %v12529_v11  ;;  %v16550_v2 = vld [vmem:[#allocation177_spill] sm:$0xff] }
 0x392   : > { %5182 = vrot.lane.b32.xlu1 %v5145_v54, %s7340_s24  ;;  %5180 = vrot.lane.b32.xlu0 %v5143_v43, %s7340_s24  ;;  %v5152_v12 = vrot.slane %v5098_v3, 1  ;;  %v5154_v51 = vrot.slane %v5099_v52, 1  ;;  %v5100_v60 = vmul.f32 %v12323_v23, %v12451_v7  ;;  %v16551_v15 = vld [vmem:[#allocation85_spill] sm:$0xff]  ;;  %v5150_v5 = vsel %vm498_vm0, %v5147_v50, %v5149_v47  ;;  %v12629_v52 = vpop.permute.xlu1 %4538 }
 0x393   : > { %v12616_v18 = vadd.f32 %v16551_v15, %v16550_v2  ;;  %v5148_v49 = vsel %vm498_vm0, %v5146_v13, %v5147_v50  ;;  %v5151_v38 = vrot.slane %v5097_v61, 1  ;;  %v12622_v58 = vadd.f32 %v16553_v28, %v16552_v10  ;;  %16555 = vst [vmem:[#allocation211_spill] sm:$0xff] %v12629_v52  ;;  %v12631_v2 = vpop.permute.xlu0 %4536  ;;  %v16557_v15 = vld [vmem:[#allocation226_spill] sm:$0xff]  ;;  %v16559_v50 = vld [vmem:[#allocation156_spill] sm:$0xff] }
 0x394   : > { %v12625_v54 = vsel %vm929_vm1, %v4201_v6, %v4203_v63  ;;  %v4200_v43 = vrot.slane %v4152_v46, 2  ;;  %v4157_v3 = vmul.f32 %v12128_v22, %v12529_v11  ;;  %16556 = vst [vmem:[#allocation212_spill] sm:$0xff] %v12631_v2  ;;  %v12634_v47 = vadd.f32 %v16557_v15, %v3475_v36 }
 0x395   : > { %16554 = vst [vmem:[#allocation209_spill] sm:$0xff] %v12625_v54  ;;  %v12637_v13 = vadd.f32 %v16559_v50, %v3474_v45  ;;  %v5157_v61 = vrot.slane %v5101_v29, 1  ;;  %v5159_v10 = vrot.slane %v5102_v20, 1  ;;  %v4206_v28 = vrot.slane %v12608_v24, 2  ;;  %v16561_v24 = vld [vmem:[#allocation192_spill] sm:$0xff] }
 0x396   : > { %16558 = vst [vmem:[#allocation122_spill] sm:$0xff] %v12634_v47  ;;  %v4155_v63 = vmul.f32 %v12148_v42, %v12529_v11  ;;  %5186 = vrot.lane.b32.xlu1 %v5150_v5, %s7340_s24  ;;  %5184 = vrot.lane.b32.xlu0 %v5148_v49, %s7340_s24  ;;  %v5155_v46 = vsel %vm498_vm0, %v5152_v12, %v5154_v51  ;;  %v5156_v2 = vrot.slane %v5100_v60, 1  ;;  %v4208_v5 = vrot.slane %v4157_v3, 2  ;;  %v16564_v60 = vld [vmem:[#allocation11_spill] sm:$0xff] }
 0x397   : > { %16560 = vst [vmem:[#allocation187_spill] sm:$0xff] %v12637_v13  ;;  %v5153_v36 = vsel %vm498_vm0, %v5151_v38, %v5152_v12  ;;  %v5104_v45 = vmul.f32 %v12359_v32, %v12451_v7  ;;  %v5105_v29 = vmul.f32 %v12364_v37, %v12451_v7  ;;  %v5103_v20 = vmul.f32 %v12369_v55, %v12451_v7  ;;  %v12658_v38 = vpop.permute.xlu1 %4542  ;;  %v12660_v12 = vpop.permute.xlu0 %4540  ;;  %v16570_v13 = vld [vmem:[#allocation90_spill] sm:$0xff] }
 0x398   : > { %v3477_v15 = vadd.f32 %v16561_v24, %v12412_v0  ;;  %v4159_v49 = vmul.f32 %v12165_v26, %v12529_v11  ;;  %v4160_v51 = vmul.f32 %v12188_v1, %v12529_v11  ;;  %16562 = vst [vmem:[#allocation7_spill] sm:$0xff] %v12658_v38  ;;  %16563 = vst [vmem:[#allocation99_spill] sm:$0xff] %v12660_v12  ;;  %v4205_v24 = vrot.slane %v4155_v63, 2 }
 0x399   : > { %v3476_v50 = vadd.f32 %v16564_v60, %v12423_v44  ;;  %v12667_v52 = vsel %vm929_vm1, %v4200_v43, %v4201_v6  ;;  %v4158_v0 = vmul.f32 %v12193_v25, %v12529_v11  ;;  %v5160_v3 = vsel %vm498_vm0, %v5157_v61, %v5159_v10  ;;  %v16566_v10 = vld [vmem:[#allocation256_spill] sm:$0xff] }
 0x39a   : > { %16565 = vst [vmem:[#allocation18_spill] sm:$0xff] %v12667_v52  ;;  %5190 = vrot.lane.b32.xlu1 %v5155_v46, %s7340_s24  ;;  %5188 = vrot.lane.b32.xlu0 %v5153_v36, %s7340_s24  ;;  %v5158_v12 = vsel %vm498_vm0, %v5156_v2, %v5157_v61  ;;  %v5107_v38 = vmul.f32 %v12394_v14, %v12451_v7  ;;  %v5162_v6 = vrot.slane %v5104_v45, 1  ;;  %v5164_v43 = vrot.slane %v5105_v29, 1  ;;  %v16571_v29 = vld [vmem:[#allocation31_spill] sm:$0xff] }
 0x39b   : > { %v5108_v44 = vmul.f32 %v12399_v9, %v12451_v7  ;;  %v5161_v60 = vrot.slane %v5103_v20, 1  ;;  %v5106_v52 = vmul.f32 %v12406_v39, %v12451_v7  ;;  %v12682_v63 = vadd.f32 %v16566_v10, %v3477_v15  ;;  %v12687_v61 = vpop.permute.xlu1 %4546  ;;  %v12689_v54 = vpop.permute.xlu0 %4544 }
 0x39c   : > { %v12685_v46 = vsel %vm929_vm1, %v4206_v28, %v4208_v5  ;;  %v4211_v36 = vrot.slane %v4159_v49, 2  ;;  %v4213_v2 = vrot.slane %v4160_v51, 2  ;;  %16568 = vst [vmem:[#allocation101_spill] sm:$0xff] %v12687_v61  ;;  %16569 = vst [vmem:[#allocation103_spill] sm:$0xff] %v12689_v54  ;;  %v3479_v45 = vadd.f32 %v16570_v13, %v12455_v56  ;;  %v16572_v13 = vld [vmem:[#allocation157_spill] sm:$0xff] }
 0x39d   : > { %16567 = vst [vmem:[#allocation214_spill] sm:$0xff] %v12685_v46  ;;  %v3478_v20 = vadd.f32 %v16571_v29, %v12459_v4  ;;  %v5110_v47 = vmul.f32 %v12451_v7, %v11853_v16  ;;  %v5111_v15 = vmul.f32 %v12451_v7, %v12434_v19  ;;  %v4210_v5 = vrot.slane %v4158_v0, 2 }
 0x39e   : > { %5194 = vrot.lane.b32.xlu1 %v5160_v3, %s7340_s24  ;;  %5192 = vrot.lane.b32.xlu0 %v5158_v12, %s7340_s24  ;;  %v5167_v49 = vrot.slane %v5107_v38, 1  ;;  %v5169_v51 = vrot.slane %v5108_v44, 1  ;;  %v5109_v56 = vmul.f32 %v12451_v7, %v11856_v30  ;;  %v12704_v10 = vadd.f32 %v16572_v13, %v3476_v50  ;;  %v16576_v50 = vld [vmem:[#allocation73_spill] sm:$0xff] }
 0x39f   : > { %v5165_v4 = vsel %vm498_vm0, %v5162_v6, %v5164_v43  ;;  %v5163_v16 = vsel %vm498_vm0, %v5161_v60, %v5162_v6  ;;  %v5166_v29 = vrot.slane %v5106_v52, 1  ;;  %v12709_v54 = vsel %vm929_vm1, %v4205_v24, %v4206_v28  ;;  %v12715_v12 = vpop.permute.xlu1 %4650  ;;  %v12717_v30 = vpop.permute.xlu0 %4648  ;;  %v16578_v44 = vld [vmem:[#allocation77_spill] sm:$0xff] }
 0x3a0   : > { %16573 = vst [vmem:[#allocation215_spill] sm:$0xff] %v12709_v54  ;;  %v4162_v0 = vmul.f32 %v12231_v33, %v12529_v11  ;;  %v4163_v38 = vmul.f32 %v12236_v31, %v12529_v11  ;;  %16574 = vst [vmem:[#allocation223_spill] sm:$0xff] %v12715_v12  ;;  %v12720_v7 = vstv %s12662_s14  ;;  %v12723_v3 = vadd.f32 %v16576_v50, %v3479_v45  ;;  %v16584_v50 = vld [vmem:[#allocation12_spill] sm:$0xff] }
 0x3a1   : > { %16575 = vst [vmem:[#allocation224_spill] sm:$0xff] %v12717_v30  ;;  %v12726_v52 = vsel %vm929_vm1, %v4211_v36, %v4213_v2  ;;  %v5172_v28 = vrot.slane %v5110_v47, 1  ;;  %v5174_v24 = vrot.slane %v5111_v15, 1  ;;  %v12729_v6 = vadd.f32 %v16578_v44, %v3478_v20  ;;  %v16591_v54 = vld [vmem:[#allocation84_spill] sm:$0xff] }
 0x3a2   : > { %16577 = vst [vmem:[#allocation227_spill] sm:$0xff] %v12726_v52  ;;  %v12732_v43 = vsel %vm929_vm1, %v4210_v5, %v4211_v36  ;;  %5198 = vrot.lane.b32.xlu1 %v5165_v4, %s7340_s24  ;;  %5196 = vrot.lane.b32.xlu0 %v5163_v16, %s7340_s24  ;;  %v5170_v60 = vsel %vm498_vm0, %v5167_v49, %v5169_v51  ;;  %v5171_v13 = vrot.slane %v5109_v56, 1  ;;  %v4216_v36 = vrot.slane %v4162_v0, 2  ;;  %v16582_v4 = vld [vmem:[#allocation94_spill] sm:$0xff] }
 0x3a3   : > { %16579 = vst [vmem:[#allocation228_spill] sm:$0xff] %v12732_v43  ;;  %v5168_v45 = vsel %vm498_vm0, %v5166_v29, %v5167_v49  ;;  %v5365_v2 = vmul.f32 %v12099_v41, %v12720_v7  ;;  %v5366_v47 = vmul.f32 %v12128_v22, %v12720_v7  ;;  %v5364_v20 = vmul.f32 %v12148_v42, %v12720_v7  ;;  %v12750_v56 = vpop.permute.xlu1 %4654  ;;  %v12752_v49 = vpop.permute.xlu0 %4652  ;;  %v16583_v16 = vld [vmem:[#allocation194_spill] sm:$0xff] }
 0x3a4   : > { %v4218_v15 = vrot.slane %v4163_v38, 2  ;;  %v4161_v5 = vmul.f32 %v12241_v40, %v12529_v11  ;;  %v12748_v51 = vmul.f32 %v12268_v8, %v12529_v11  ;;  %16580 = vst [vmem:[#allocation229_spill] sm:$0xff] %v12750_v56  ;;  %16581 = vst [vmem:[#allocation230_spill] sm:$0xff] %v12752_v49  ;;  %v3481_v29 = vadd.f32 %v16583_v16, %v16582_v4 }
 0x3a5   : > { %v3480_v44 = vadd.f32 %v16584_v50, %v12514_v59  ;;  %v4166_v0 = vmul.f32 %v12273_v57, %v12529_v11  ;;  %v5175_v38 = vsel %vm498_vm0, %v5172_v28, %v5174_v24  ;;  %v5173_v30 = vsel %vm498_vm0, %v5171_v13, %v5172_v28 }
 0x3a6   : > { %5202 = vrot.lane.b32.xlu1 %v5170_v60, %s7340_s24  ;;  %5200 = vrot.lane.b32.xlu0 %v5168_v45, %s7340_s24  ;;  %v5368_v49 = vmul.f32 %v12165_v26, %v12720_v7  ;;  %v5369_v4 = vmul.f32 %v12188_v1, %v12720_v7  ;;  %v5413_v16 = vrot.slane %v5365_v2, 2  ;;  %v5415_v56 = vrot.slane %v5366_v47, 2  ;;  %v16588_v2 = vld [vmem:[#allocation38_spill] sm:$0xff] }
 0x3a7   : > { %v5412_v59 = vrot.slane %v5364_v20, 2  ;;  %v5367_v50 = vmul.f32 %v12193_v25, %v12720_v7  ;;  %v12771_v24 = vsel %vm929_vm1, %v4216_v36, %v4218_v15  ;;  %v4215_v60 = vrot.slane %v4161_v5, 2  ;;  %v12776_v13 = vpop.permute.xlu1 %4658  ;;  %v12778_v12 = vpop.permute.xlu0 %4656  ;;  %v16589_v5 = vld [vmem:[#allocation14_spill] sm:$0xff] }
 0x3a8   : > { %16585 = vst [vmem:[#allocation231_spill] sm:$0xff] %v12771_v24  ;;  %v4221_v45 = vrot.slane %v12748_v51, 2  ;;  %v4164_v28 = vmul.f32 %v12288_v62, %v12529_v11  ;;  %16586 = vst [vmem:[#allocation232_spill] sm:$0xff] %v12776_v13  ;;  %v3483_v47 = vadd.f32 %v16588_v2, %v12533_v48  ;;  %v4223_v20 = vrot.slane %v4166_v0, 2  ;;  %v16590_v48 = vld [vmem:[#allocation160_spill] sm:$0xff] }
 0x3a9   : > { %16587 = vst [vmem:[#allocation234_spill] sm:$0xff] %v12778_v12  ;;  %v5371_v61 = vmul.f32 %v12231_v33, %v12720_v7  ;;  %v5372_v15 = vmul.f32 %v12236_v31, %v12720_v7  ;;  %v3482_v51 = vadd.f32 %v16589_v5, %v12537_v35  ;;  %v5418_v13 = vrot.slane %v5368_v49, 2 }
 0x3aa   : > { %5206 = vrot.lane.b32.xlu1 %v5175_v38, %s7340_s24  ;;  %5204 = vrot.lane.b32.xlu0 %v5173_v30, %s7340_s24  ;;  %v5420_v24 = vrot.slane %v5369_v4, 2  ;;  %v5370_v12 = vmul.f32 %v12241_v40, %v12720_v7  ;;  %v12793_v0 = vadd.f32 %v16590_v48, %v3481_v29  ;;  %v5416_v2 = vsel %vm929_vm1, %v5413_v16, %v5415_v56 }
 0x3ab   : > { %v5414_v43 = vsel %vm929_vm1, %v5412_v59, %v5413_v16  ;;  %v5417_v52 = vrot.slane %v5367_v50, 2  ;;  %v12798_v46 = vadd.f32 %v16591_v54, %v3480_v44  ;;  %v12801_v35 = vsel %vm929_vm1, %v4215_v60, %v4216_v36  ;;  %v12807_v38 = vpop.permute.xlu1 %4662  ;;  %v12809_v29 = vpop.permute.xlu0 %4660  ;;  %v16596_v44 = vld [vmem:[#allocation162_spill] sm:$0xff]  ;;  %v16597_v36 = vld [vmem:[#allocation163_spill] sm:$0xff] }
 0x3ac   : > { %16592 = vst [vmem:[#allocation235_spill] sm:$0xff] %v12801_v35  ;;  %v4168_v30 = vmul.f32 %v16548_v21, %v12529_v11  ;;  %v4169_v49 = vmul.f32 %v16549_v34, %v12529_v11  ;;  %16593 = vst [vmem:[#allocation242_spill] sm:$0xff] %v12807_v38  ;;  %v12812_v56 = vsel %vm929_vm1, %v4221_v45, %v4223_v20  ;;  %v4220_v4 = vrot.slane %v4164_v28, 2  ;;  %v16598_v20 = vld [vmem:[#allocation199_spill] sm:$0xff] }
 0x3ad   : > { %16594 = vst [vmem:[#allocation243_spill] sm:$0xff] %v12809_v29  ;;  %16595 = vst [vmem:[#allocation237_spill] sm:$0xff] %v12812_v56  ;;  %v5423_v16 = vrot.slane %v5371_v61, 2  ;;  %v5425_v54 = vrot.slane %v5372_v15, 2  ;;  %v12815_v59 = vadd.f32 %v16596_v44, %v3483_v47  ;;  %v12818_v50 = vadd.f32 %v16597_v36, %v3482_v51  ;;  %v16602_v29 = vld [vmem:[#allocation70_spill] sm:$0xff]  ;;  %v12930_v56 = vld [vmem:[%s7384_s21 + $0x1b8] sm:$0xff] }
 0x3ae   : > { %5454 = vrot.lane.b32.xlu1 %v5416_v2, %s7339_s22  ;;  %5452 = vrot.lane.b32.xlu0 %v5414_v43, %s7339_s22  ;;  %v5421_v60 = vsel %vm929_vm1, %v5418_v13, %v5420_v24  ;;  %v5422_v5 = vrot.slane %v5370_v12, 2  ;;  %v5419_v48 = vsel %vm929_vm1, %v5417_v52, %v5418_v13  ;;  %v5374_v28 = vmul.f32 %v12268_v8, %v12720_v7  ;;  %v16601_v24 = vld [vmem:[#allocation15_spill] sm:$0xff] }
 0x3af   : > { %v5375_v61 = vmul.f32 %v12273_v57, %v12720_v7  ;;  %v5373_v47 = vmul.f32 %v12288_v62, %v12720_v7  ;;  %v3485_v15 = vadd.f32 %v16598_v20, %v12567_v27  ;;  %v4226_v51 = vrot.slane %v4168_v30, 2  ;;  %v12834_v12 = vpop.permute.xlu1 %4666  ;;  %v12836_v52 = vpop.permute.xlu0 %4664 }
 0x3b0   : > { %v4228_v2 = vrot.slane %v4169_v49, 2  ;;  %v4167_v43 = vmul.f32 %v12323_v23, %v12529_v11  ;;  %16599 = vst [vmem:[#allocation238_spill] sm:$0xff] %v12834_v12  ;;  %16600 = vst [vmem:[#allocation246_spill] sm:$0xff] %v12836_v52  ;;  %v3484_v13 = vadd.f32 %v16601_v24, %v12571_v17  ;;  %v12842_v44 = vmul.f32 %v12359_v32, %v12529_v11 }
 0x3b1   : > { %v4172_v36 = vmul.f32 %v12364_v37, %v12529_v11  ;;  %v5426_v27 = vsel %vm929_vm1, %v5423_v16, %v5425_v54  ;;  %v5424_v30 = vsel %vm929_vm1, %v5422_v5, %v5423_v16  ;;  %v5377_v49 = vmul.f32 %v16548_v21, %v12720_v7 }
 0x3b2   : > { %5458 = vrot.lane.b32.xlu1 %v5421_v60, %s7339_s22  ;;  %5456 = vrot.lane.b32.xlu0 %v5419_v48, %s7339_s22  ;;  %v5378_v17 = vmul.f32 %v16549_v34, %v12720_v7  ;;  %v5428_v20 = vrot.slane %v5374_v28, 2  ;;  %v5430_v24 = vrot.slane %v5375_v61, 2  ;;  %v5427_v52 = vrot.slane %v5373_v47, 2 }
 0x3b3   : > { %v5376_v12 = vmul.f32 %v12323_v23, %v12720_v7  ;;  %v12857_v54 = vadd.f32 %v16602_v29, %v3485_v15  ;;  %v12860_v60 = vsel %vm929_vm1, %v4220_v4, %v4221_v45  ;;  %v12863_v16 = vsel %vm929_vm1, %v4226_v51, %v4228_v2  ;;  %v12865_v48 = vpop.permute.xlu1 %4670  ;;  %v12867_v38 = vpop.permute.xlu0 %4668 }
 0x3b4   : > { %16603 = vst [vmem:[#allocation247_spill] sm:$0xff] %v12860_v60  ;;  %16604 = vst [vmem:[#allocation239_spill] sm:$0xff] %v12863_v16  ;;  %v4225_v5 = vrot.slane %v4167_v43, 2  ;;  %v4231_v28 = vrot.slane %v12842_v44, 2  ;;  %v4170_v61 = vmul.f32 %v12369_v55, %v12529_v11  ;;  %v5380_v29 = vmul.f32 %v12359_v32, %v12720_v7  ;;  %v16607_v43 = vld [vmem:[#allocation164_spill] sm:$0xff] }
 0x3b5   : > { %16605 = vst [vmem:[#allocation240_spill] sm:$0xff] %v12865_v48  ;;  %16606 = vst [vmem:[#allocation251_spill] sm:$0xff] %v12867_v38  ;;  %v5381_v45 = vmul.f32 %v12364_v37, %v12720_v7  ;;  %v4233_v4 = vrot.slane %v4172_v36, 2  ;;  %v5433_v47 = vrot.slane %v5377_v49, 2  ;;  %v5435_v15 = vrot.slane %v5378_v17, 2  ;;  %v16608_v36 = vld [vmem:[#allocation48_spill] sm:$0xff] }
 0x3b6   : > { %5462 = vrot.lane.b32.xlu1 %v5426_v27, %s7339_s22  ;;  %5460 = vrot.lane.b32.xlu0 %v5424_v30, %s7339_s22  ;;  %v5379_v2 = vmul.f32 %v12369_v55, %v12720_v7  ;;  %v12881_v44 = vadd.f32 %v16607_v43, %v3484_v13  ;;  %v5431_v38 = vsel %vm929_vm1, %v5428_v20, %v5430_v24  ;;  %v5432_v16 = vrot.slane %v5376_v12, 2  ;;  %v16613_v12 = vld [vmem:[#allocation200_spill] sm:$0xff] }
 0x3b7   : > { %v5429_v48 = vsel %vm929_vm1, %v5427_v52, %v5428_v20  ;;  %v3487_v27 = vadd.f32 %v16608_v36, %v12575_v53  ;;  %v12890_v30 = vsel %vm929_vm1, %v4225_v5, %v4226_v51  ;;  %v4174_v49 = vmul.f32 %v12394_v14, %v12529_v11  ;;  %v12896_v17 = vpop.permute.xlu1 %4674  ;;  %v12898_v24 = vpop.permute.xlu0 %4672  ;;  %v16612_v52 = vld [vmem:[#allocation119_spill] sm:$0xff] }
 0x3b8   : > { %16609 = vst [vmem:[#allocation252_spill] sm:$0xff] %v12890_v30  ;;  %v4175_v13 = vmul.f32 %v12399_v9, %v12529_v11  ;;  %16610 = vst [vmem:[#allocation254_spill] sm:$0xff] %v12896_v17  ;;  %v3486_v20 = vadd.f32 %v16613_v12, %v16612_v52  ;;  %v4173_v43 = vmul.f32 %v12406_v39, %v12529_v11  ;;  %v5438_v53 = vrot.slane %v5380_v29, 2 }
 0x3b9   : > { %16611 = vst [vmem:[#allocation24_spill] sm:$0xff] %v12898_v24  ;;  %v5440_v36 = vrot.slane %v5381_v45, 2  ;;  %v12905_v51 = vsel %vm929_vm1, %v4231_v28, %v4233_v4  ;;  %v4230_v5 = vrot.slane %v4170_v61, 2  ;;  %v5436_v17 = vsel %vm929_vm1, %v5433_v47, %v5435_v15  ;;  %v16615_v61 = vld [vmem:[#allocation55_spill] sm:$0xff] }
 0x3ba   : > { %16614 = vst [vmem:[#allocation120_spill] sm:$0xff] %v12905_v51  ;;  %5466 = vrot.lane.b32.xlu1 %v5431_v38, %s7339_s22  ;;  %5464 = vrot.lane.b32.xlu0 %v5429_v48, %s7339_s22  ;;  %v5437_v24 = vrot.slane %v5379_v2, 2  ;;  %v5434_v30 = vsel %vm929_vm1, %v5432_v16, %v5433_v47  ;;  %v5383_v52 = vmul.f32 %v12394_v14, %v12720_v7  ;;  %v16616_v48 = vld [vmem:[#allocation165_spill] sm:$0xff]  ;;  %v4236_v4 = vrot.slane %v4174_v49, 2  ;;  %v16619_v47 = vld [vmem:[#allocation96_spill] sm:$0xff] }
 0x3bb   : > { %v5384_v11 = vmul.f32 %v12399_v9, %v12720_v7  ;;  %v5382_v29 = vmul.f32 %v12406_v39, %v12720_v7  ;;  %v3489_v38 = vadd.f32 %v16615_v61, %v12616_v18  ;;  %v12920_v45 = vadd.f32 %v16616_v48, %v3487_v27  ;;  %v12922_v2 = vpop.permute.xlu1 %4678  ;;  %v12924_v16 = vpop.permute.xlu0 %4676 }
 0x3bc   : > { %v4238_v15 = vrot.slane %v4175_v13, 2  ;;  %16617 = vst [vmem:[#allocation104_spill] sm:$0xff] %v12922_v2  ;;  %16618 = vst [vmem:[#allocation105_spill] sm:$0xff] %v12924_v16  ;;  %v3488_v12 = vadd.f32 %v16619_v47, %v12622_v58  ;;  %v4235_v51 = vrot.slane %v4173_v43, 2  ;;  %v5441_v60 = vsel %vm929_vm1, %v5438_v53, %v5440_v36  ;;  %v12940_v13 = vld [vmem:[%s7384_s21 + $0x1b0] sm:$0xff]  ;;  %v16621_v47 = vld [vmem:[#allocation166_spill] sm:$0xff] }
 0x3bd   : > { %v5386_v18 = vmul.f32 %v12930_v56, %v12720_v7  ;;  %v5439_v27 = vsel %vm929_vm1, %v5437_v24, %v5438_v53  ;;  %v5387_v49 = vmul.f32 %v12720_v7, %v12434_v19  ;;  %16620 = vst [vmem:[#allocation255_spill] sm:$0xff] %v12940_v13  ;;  %v5385_v58 = vmul.f32 %v12940_v13, %v12720_v7  ;;  %v16625_v7 = vld [vmem:[#allocation122_spill] sm:$0xff] }
 0x3be   : > { %5470 = vrot.lane.b32.xlu1 %v5436_v17, %s7339_s22  ;;  %5468 = vrot.lane.b32.xlu0 %v5434_v30, %s7339_s22  ;;  %v5443_v43 = vrot.slane %v5383_v52, 2  ;;  %v5445_v36 = vrot.slane %v5384_v11, 2  ;;  %v5442_v61 = vrot.slane %v5382_v29, 2  ;;  %v12945_v48 = vstv %s12885_s15  ;;  %v16622_v17 = vld [vmem:[#allocation76_spill] sm:$0xff]  ;;  %v16627_v29 = vld [vmem:[#allocation217_spill] sm:$0xff] }
 0x3bf   : > { %v3520_v16 = vadd.f32 %v16621_v47, %v3486_v20  ;;  %v3523_v2 = vadd.f32 %v16622_v17, %v3489_v38  ;;  %v12950_v30 = vsel %vm929_vm1, %v4230_v5, %v4231_v28  ;;  %v12953_v24 = vsel %vm929_vm1, %v4236_v4, %v4238_v15  ;;  %v12955_v53 = vpop.permute.xlu1 %4748  ;;  %v12957_v35 = vpop.permute.xlu0 %4746  ;;  %v16626_v52 = vld [vmem:[#allocation100_spill] sm:$0xff]  ;;  %v16628_v47 = vld [vmem:[#allocation187_spill] sm:$0xff]  ;;  %v16629_v17 = vld [vmem:[#allocation21_spill] sm:$0xff] }
 0x3c0   : > { %16623 = vst [vmem:[#allocation39_spill] sm:$0xff] %v12955_v53  ;;  %16624 = vst [vmem:[#allocation47_spill] sm:$0xff] %v12957_v35  ;;  %v3607_v11 = vadd.f32 %v16626_v52, %v16625_v7  ;;  %v3522_v13 = vadd.f32 %v16627_v29, %v3488_v12  ;;  %v12963_v19 = vsel %vm929_vm1, %v4235_v51, %v4236_v4  ;;  %v5448_v20 = vrot.slane %v5386_v18, 2  ;;  %v16630_v4 = vld [vmem:[#allocation106_spill] sm:$0xff]  ;;  %v16705_v35 = vld [vmem:[#allocation59_spill] sm:$0xff] }
 0x3c1   : > { %v5450_v28 = vrot.slane %v5387_v49, 2  ;;  %v5447_v5 = vrot.slane %v5385_v58, 2  ;;  %v5519_v38 = vmul.f32 %v12099_v41, %v12945_v48  ;;  %v5520_v15 = vmul.f32 %v12128_v22, %v12945_v48  ;;  %v16632_v41 = vld [vmem:[#allocation108_spill] sm:$0xff]  ;;  %v16633_v22 = vld [vmem:[#allocation109_spill] sm:$0xff] }
 0x3c2   : > { %5474 = vrot.lane.b32.xlu1 %v5441_v60, %s7339_s22  ;;  %5472 = vrot.lane.b32.xlu0 %v5439_v27, %s7339_s22  ;;  %v3606_v7 = vadd.f32 %v16629_v17, %v16628_v47  ;;  %v5446_v12 = vsel %vm929_vm1, %v5443_v43, %v5445_v36  ;;  %v5444_v51 = vsel %vm929_vm1, %v5442_v61, %v5443_v43  ;;  %v16631_v27 = vld [vmem:[#allocation107_spill] sm:$0xff] }
 0x3c3   : > { %v5518_v60 = vmul.f32 %v12148_v42, %v12945_v48  ;;  %v3609_v18 = vadd.f32 %v16630_v4, %v12682_v63  ;;  %v3608_v49 = vadd.f32 %v16631_v27, %v12704_v10  ;;  %v3611_v58 = vadd.f32 %v16632_v41, %v12723_v3  ;;  %v12987_v36 = vpop.permute.xlu1 %4752  ;;  %v12989_v43 = vpop.permute.xlu0 %4750  ;;  %v16636_v42 = vld [vmem:[#allocation110_spill] sm:$0xff]  ;;  %v16637_v63 = vld [vmem:[#allocation111_spill] sm:$0xff]  ;;  %v16638_v10 = vld [vmem:[#allocation117_spill] sm:$0xff] }
 0x3c4   : > { %v3610_v52 = vadd.f32 %v16633_v22, %v12729_v6  ;;  %16634 = vst [vmem:[#allocation257_spill] sm:$0xff] %v12987_v36  ;;  %16635 = vst [vmem:[#allocation53_spill] sm:$0xff] %v12989_v43  ;;  %v3613_v61 = vadd.f32 %v16636_v42, %v12793_v0  ;;  %v12995_v29 = vadd.f32 %v16637_v63, %v12798_v46  ;;  %v16639_v3 = vld [vmem:[#allocation114_spill] sm:$0xff]  ;;  %v5567_v4 = vrot.slane %v5519_v38, 2  ;;  %v16643_v38 = vld [vmem:[#allocation33_spill] sm:$0xff] }
 0x3c5   : > { %v12999_v47 = vadd.f32 %v16638_v10, %v12815_v59  ;;  %v13003_v6 = vadd.f32 %v16639_v3, %v12818_v50  ;;  %v5451_v17 = vsel %vm929_vm1, %v5448_v20, %v5450_v28  ;;  %v5449_v0 = vsel %vm929_vm1, %v5447_v5, %v5448_v20  ;;  %v16641_v28 = vld [vmem:[#allocation118_spill] sm:$0xff]  ;;  %v16648_v63 = vld [vmem:[#allocation36_spill] sm:$0xff]  ;;  %v16695_v43 = vld [vmem:[#allocation195_spill] sm:$0xff] }
 0x3c6   : > { %5478 = vrot.lane.b32.xlu1 %v5446_v12, %s7339_s22  ;;  %5476 = vrot.lane.b32.xlu0 %v5444_v51, %s7339_s22  ;;  %v5569_v27 = vrot.slane %v5520_v15, 2  ;;  %v5566_v46 = vrot.slane %v5518_v60, 2  ;;  %v5522_v41 = vmul.f32 %v12165_v26, %v12945_v48  ;;  %v5523_v59 = vmul.f32 %v12188_v1, %v12945_v48  ;;  %v16640_v12 = vld [vmem:[#allocation19_spill] sm:$0xff]  ;;  %v16642_v20 = vld [vmem:[#allocation218_spill] sm:$0xff] }
 0x3c7   : > { %v5521_v50 = vmul.f32 %v12193_v25, %v12945_v48  ;;  %v13017_v22 = vadd.f32 %v16640_v12, %v12857_v54  ;;  %v13021_v51 = vadd.f32 %v16641_v28, %v12881_v44  ;;  %v13025_v5 = vadd.f32 %v16642_v20, %v12920_v45  ;;  %v13030_v15 = vpop.permute.xlu1 %4756  ;;  %v13032_v1 = vpop.permute.xlu0 %4754  ;;  %v16646_v25 = vld [vmem:[#allocation25_spill] sm:$0xff]  ;;  %v16649_v28 = vld [vmem:[#allocation42_spill] sm:$0xff] }
 0x3c8   : > { %v13028_v26 = vadd.f32 %v16643_v38, %v3520_v16  ;;  %16644 = vst [vmem:[#allocation219_spill] sm:$0xff] %v13030_v15  ;;  %16645 = vst [vmem:[#allocation258_spill] sm:$0xff] %v13032_v1  ;;  %v13035_v60 = vadd.f32 %v16646_v25, %v3523_v2  ;;  %v16647_v54 = vld [vmem:[#allocation233_spill] sm:$0xff]  ;;  %v3704_v44 = vadd.f32 %v16648_v63, %v3606_v7  ;;  %v5574_v12 = vrot.slane %v5523_v59, 2 }
 0x3c9   : > { %v3705_v42 = vadd.f32 %v16647_v54, %v3607_v11  ;;  %v5525_v10 = vmul.f32 %v12231_v33, %v12945_v48  ;;  %v5570_v45 = vsel %vm929_vm1, %v5567_v4, %v5569_v27  ;;  %v5526_v16 = vmul.f32 %v12236_v31, %v12945_v48  ;;  %v16650_v33 = vld [vmem:[#allocation43_spill] sm:$0xff] }
 0x3ca   : > { %5482 = vrot.lane.b32.xlu1 %v5451_v17, %s7339_s22  ;;  %5480 = vrot.lane.b32.xlu0 %v5449_v0, %s7339_s22  ;;  %v5524_v2 = vmul.f32 %v12241_v40, %v12945_v48  ;;  %v5568_v3 = vsel %vm929_vm1, %v5566_v46, %v5567_v4  ;;  %v5572_v11 = vrot.slane %v5522_v41, 2  ;;  %v5571_v7 = vrot.slane %v5521_v50, 2  ;;  %v16651_v0 = vld [vmem:[#allocation44_spill] sm:$0xff]  ;;  %v16654_v40 = vld [vmem:[#allocation78_spill] sm:$0xff]  ;;  %v16655_v4 = vld [vmem:[#allocation123_spill] sm:$0xff] }
 0x3cb   : > { %v13050_v20 = vadd.f32 %v16649_v28, %v3522_v13  ;;  %v3707_v17 = vadd.f32 %v16650_v33, %v3609_v18  ;;  %v3706_v38 = vadd.f32 %v16651_v0, %v3608_v49  ;;  %v13055_v27 = vstv %s12985_s16  ;;  %v13057_v25 = vpop.permute.xlu1 %4760  ;;  %v13059_v31 = vpop.permute.xlu0 %4758  ;;  %v16656_v41 = vld [vmem:[#allocation102_spill] sm:$0xff] }
 0x3cc   : > { %16652 = vst [vmem:[#allocation50_spill] sm:$0xff] %v13057_v25  ;;  %16653 = vst [vmem:[#allocation263_spill] sm:$0xff] %v13059_v31  ;;  %v3709_v54 = vadd.f32 %v16654_v40, %v3611_v58  ;;  %v13063_v46 = vadd.f32 %v16655_v4, %v3705_v42  ;;  %v13066_v59 = vadd.f32 %v16656_v41, %v3704_v44  ;;  %v5577_v13 = vrot.slane %v5525_v10, 2  ;;  %v13075_v42 = vld [vmem:[%s7384_s21 + $0x110] sm:$0xff]  ;;  %v13093_v33 = vld [vmem:[%s7384_s21 + $0x108] sm:$0xff] }
 0x3cd   : > { %v5579_v18 = vrot.slane %v5526_v16, 2  ;;  %v5576_v49 = vrot.slane %v5524_v2, 2  ;;  %v5528_v50 = vmul.f32 %v12268_v8, %v12945_v48  ;;  %v5529_v58 = vmul.f32 %v12273_v57, %v12945_v48  ;;  %v16657_v16 = vld [vmem:[#allocation28_spill] sm:$0xff]  ;;  %v16658_v2 = vld [vmem:[#allocation125_spill] sm:$0xff]  ;;  %v16659_v57 = vld [vmem:[#allocation171_spill] sm:$0xff] }
 0x3ce   : > { %5608 = vrot.lane.b32.xlu1 %v5570_v45, %s7340_s24  ;;  %5606 = vrot.lane.b32.xlu0 %v5568_v3, %s7340_s24  ;;  %v13079_v63 = vmul.f32 %v13075_v42, %v13055_v27  ;;  %v5575_v44 = vsel %vm929_vm1, %v5572_v11, %v5574_v12  ;;  %v5573_v10 = vsel %vm929_vm1, %v5571_v7, %v5572_v11  ;;  %v16662_v7 = vld [vmem:[#allocation126_spill] sm:$0xff]  ;;  %v16663_v40 = vld [vmem:[#allocation116_spill] sm:$0xff]  ;;  %v13115_v4 = vld [vmem:[%s7384_s21 + $0x120] sm:$0xff] }
 0x3cf   : > { %v5527_v45 = vmul.f32 %v12288_v62, %v12945_v48  ;;  %v3708_v8 = vadd.f32 %v16657_v16, %v3610_v52  ;;  %v13087_v3 = vadd.f32 %v16658_v2, %v3707_v17  ;;  %v13090_v28 = vadd.f32 %v16659_v57, %v3706_v38  ;;  %v13099_v12 = vpop.permute.xlu1 %4764  ;;  %v13101_v11 = vpop.permute.xlu0 %4762  ;;  %v13108_v17 = vld [vmem:[%s7384_s21 + $0x128] sm:$0xff]  ;;  %v16676_v25 = vld [vmem:[#allocation32_spill] sm:$0xff] }
 0x3d0   : > { %v13097_v0 = vmul.f32 %v13093_v33, %v13055_v27  ;;  %16660 = vst [vmem:[#allocation264_spill] sm:$0xff] %v13099_v12  ;;  %16661 = vst [vmem:[#allocation186_spill] sm:$0xff] %v13101_v11  ;;  %v3711_v62 = vadd.f32 %v16662_v7, %v3613_v61  ;;  %v13105_v52 = vadd.f32 %v16663_v40, %v3709_v54  ;;  %v5582_v16 = vrot.slane %v5528_v50, 2 }
 0x3d1   : > { %v13112_v38 = vmul.f32 %v13108_v17, %v13055_v27  ;;  %v13119_v41 = vmul.f32 %v13115_v4, %v13055_v27  ;;  %v5580_v61 = vsel %vm929_vm1, %v5577_v13, %v5579_v18  ;;  %v5578_v54 = vsel %vm929_vm1, %v5576_v49, %v5577_v13  ;;  %v13137_v18 = vld [vmem:[%s7384_s21 + $0x140] sm:$0xff]  ;;  %v13144_v49 = vld [vmem:[%s7384_s21 + $0x138] sm:$0xff] }
 0x3d2   : > { %5612 = vrot.lane.b32.xlu1 %v5575_v44, %s7340_s24  ;;  %5610 = vrot.lane.b32.xlu0 %v5573_v10, %s7340_s24  ;;  %v5584_v2 = vrot.slane %v5529_v58, 2  ;;  %v5581_v57 = vrot.slane %v5527_v45, 2  ;;  %v5531_v7 = vmul.f32 %v16548_v21, %v12945_v48  ;;  %v5532_v40 = vmul.f32 %v16549_v34, %v12945_v48  ;;  %v16666_v44 = vld [vmem:[#allocation127_spill] sm:$0xff]  ;;  %v16667_v10 = vld [vmem:[#allocation112_spill] sm:$0xff] }
 0x3d3   : > { %16664 = vst [vmem:[#allocation45_spill] sm:$0xff] %v13112_v38  ;;  %16665 = vst [vmem:[#allocation6_spill] sm:$0xff] %v13119_v41  ;;  %v5530_v11 = vmul.f32 %v12323_v23, %v12945_v48  ;;  %v3710_v12 = vadd.f32 %v16666_v44, %v12995_v29  ;;  %v13134_v31 = vadd.f32 %v16667_v10, %v3708_v8  ;;  %v13150_v34 = vpop.permute.xlu1 %4768  ;;  %v13152_v23 = vpop.permute.xlu0 %4766  ;;  %v16672_v29 = vld [vmem:[#allocation51_spill] sm:$0xff]  ;;  %v16673_v58 = vld [vmem:[#allocation128_spill] sm:$0xff] }
 0x3d4   : > { %v13141_v13 = vmul.f32 %v13137_v18, %v13055_v27  ;;  %v13148_v21 = vmul.f32 %v13144_v49, %v13055_v27  ;;  %16670 = vst [vmem:[#allocation8_spill] sm:$0xff] %v13150_v34  ;;  %16671 = vst [vmem:[#allocation58_spill] sm:$0xff] %v13152_v23  ;;  %v3713_v50 = vadd.f32 %v16672_v29, %v12999_v47  ;;  %v16674_v8 = vld [vmem:[#allocation179_spill] sm:$0xff]  ;;  %v5587_v29 = vrot.slane %v5531_v7, 2  ;;  %v16685_v7 = vld [vmem:[#allocation184_spill] sm:$0xff] }
 0x3d5   : > { %v3712_v45 = vadd.f32 %v16673_v58, %v13003_v6  ;;  %v13159_v44 = vadd.f32 %v16674_v8, %v3711_v62  ;;  %v5534_v10 = vmul.f32 %v12359_v32, %v12945_v48  ;;  %v5585_v23 = vsel %vm929_vm1, %v5582_v16, %v5584_v2  ;;  %v16675_v8 = vld [vmem:[#allocation129_spill] sm:$0xff]  ;;  %v16741_v38 = vld [vmem:[#allocation215_spill] sm:$0xff] }
 0x3d6   : > { %16668 = vst [vmem:[#allocation188_spill] sm:$0xff] %v13141_v13  ;;  %16669 = vst [vmem:[#allocation52_spill] sm:$0xff] %v13148_v21  ;;  %5616 = vrot.lane.b32.xlu1 %v5580_v61, %s7340_s24  ;;  %5614 = vrot.lane.b32.xlu0 %v5578_v54, %s7340_s24  ;;  %v5535_v34 = vmul.f32 %v12364_v37, %v12945_v48  ;;  %v5533_v47 = vmul.f32 %v12369_v55, %v12945_v48  ;;  %v5589_v62 = vrot.slane %v5532_v40, 2  ;;  %v13177_v54 = vld [vmem:[%s7384_s21 + $0x158] sm:$0xff]  ;;  %v13184_v37 = vld [vmem:[%s7384_s21 + $0x150] sm:$0xff] }
 0x3d7   : > { %v5583_v6 = vsel %vm929_vm1, %v5581_v57, %v5582_v16  ;;  %v5586_v58 = vrot.slane %v5530_v11, 2  ;;  %v3715_v32 = vadd.f32 %v16675_v8, %v13017_v22  ;;  %v13174_v61 = vadd.f32 %v16676_v25, %v3710_v12  ;;  %16677 = vst [vmem:[#allocation244_spill] sm:$0xff] %v13177_v54  ;;  %16679 = vst [vmem:[#allocation135_spill] sm:$0xff] %v13184_v37  ;;  %v13190_v11 = vpop.permute.xlu1 %4772  ;;  %v13192_v16 = vpop.permute.xlu0 %4770  ;;  %v16683_v22 = vld [vmem:[#allocation57_spill] sm:$0xff]  ;;  %v16684_v12 = vld [vmem:[#allocation91_spill] sm:$0xff] }
 0x3d8   : > { %v13181_v2 = vmul.f32 %v13177_v54, %v13055_v27  ;;  %v13188_v55 = vmul.f32 %v13184_v37, %v13055_v27  ;;  %16681 = vst [vmem:[#allocation136_spill] sm:$0xff] %v13190_v11  ;;  %16682 = vst [vmem:[#allocation9_spill] sm:$0xff] %v13192_v16  ;;  %v3714_v25 = vadd.f32 %v16683_v22, %v13021_v51  ;;  %v5592_v8 = vrot.slane %v5534_v10, 2  ;;  %v16689_v22 = vld [vmem:[#allocation190_spill] sm:$0xff] }
 0x3d9   : > { %v13197_v57 = vadd.f32 %v16684_v12, %v3713_v50  ;;  %v13200_v40 = vadd.f32 %v16685_v7, %v3712_v45  ;;  %v5594_v11 = vrot.slane %v5535_v34, 2  ;;  %v5591_v1 = vrot.slane %v5533_v47, 2  ;;  %v13211_v50 = vld [vmem:[%s7384_s21 + $0x170] sm:$0xff]  ;;  %v16687_v47 = vld [vmem:[#allocation130_spill] sm:$0xff] }
 0x3da   : > { %16678 = vst [vmem:[#allocation245_spill] sm:$0xff] %v13181_v2  ;;  %16680 = vst [vmem:[#allocation191_spill] sm:$0xff] %v13188_v55  ;;  %5620 = vrot.lane.b32.xlu1 %v5585_v23, %s7340_s24  ;;  %5618 = vrot.lane.b32.xlu0 %v5583_v6, %s7340_s24  ;;  %v5537_v16 = vmul.f32 %v12394_v14, %v12945_v48  ;;  %v5538_v51 = vmul.f32 %v12399_v9, %v12945_v48  ;;  %v16688_v6 = vld [vmem:[#allocation131_spill] sm:$0xff]  ;;  %v13227_v7 = vld [vmem:[%s7384_s21 + $0x168] sm:$0xff] }
 0x3db   : > { %v13215_v45 = vmul.f32 %v13211_v50, %v13055_v27  ;;  %v5590_v23 = vsel %vm929_vm1, %v5587_v29, %v5589_v62  ;;  %v5588_v10 = vsel %vm929_vm1, %v5586_v58, %v5587_v29  ;;  %v5536_v34 = vmul.f32 %v12406_v39, %v12945_v48  ;;  %v13233_v62 = vpop.permute.xlu1 %4776  ;;  %v13235_v29 = vpop.permute.xlu0 %4774  ;;  %v16693_v39 = vld [vmem:[#allocation248_spill] sm:$0xff]  ;;  %v16740_v13 = vld [vmem:[#allocation214_spill] sm:$0xff] }
 0x3dc   : > { %v3717_v14 = vadd.f32 %v16687_v47, %v13025_v5  ;;  %v3716_v9 = vadd.f32 %v16688_v6, %v13028_v26  ;;  %v3837_v12 = vadd.f32 %v16689_v22, %v3715_v32  ;;  %v13231_v15 = vmul.f32 %v13227_v7, %v13055_v27  ;;  %16691 = vst [vmem:[#allocation13_spill] sm:$0xff] %v13233_v62  ;;  %v16694_v5 = vld [vmem:[#allocation132_spill] sm:$0xff]  ;;  %v13243_v32 = vld [vmem:[%s7384_s21 + $0x188] sm:$0xff]  ;;  %v16698_v62 = vld [vmem:[#allocation255_spill] sm:$0xff] }
 0x3dd   : > { %16686 = vst [vmem:[#allocation10_spill] sm:$0xff] %v13215_v45  ;;  %16692 = vst [vmem:[#allocation198_spill] sm:$0xff] %v13235_v29  ;;  %v3719_v58 = vadd.f32 %v16693_v39, %v13035_v60  ;;  %v3718_v47 = vadd.f32 %v16694_v5, %v13050_v20  ;;  %v3836_v26 = vadd.f32 %v16695_v43, %v3714_v25  ;;  %v5597_v39 = vrot.slane %v5537_v16, 2  ;;  %v16697_v5 = vld [vmem:[#allocation37_spill] sm:$0xff]  ;;  %v16731_v45 = vld [vmem:[#allocation67_spill] sm:$0xff] }
 0x3de   : > { %16690 = vst [vmem:[#allocation193_spill] sm:$0xff] %v13231_v15  ;;  %v13247_v6 = vmul.f32 %v13243_v32, %v13055_v27  ;;  %5624 = vrot.lane.b32.xlu1 %v5590_v23, %s7340_s24  ;;  %5622 = vrot.lane.b32.xlu0 %v5588_v10, %s7340_s24  ;;  %v5595_v22 = vsel %vm929_vm1, %v5592_v8, %v5594_v11  ;;  %v5599_v20 = vrot.slane %v5538_v51, 2  ;;  %v5596_v43 = vrot.slane %v5536_v34, 2  ;;  %v16699_v23 = vld [vmem:[#allocation196_spill] sm:$0xff]  ;;  %v16700_v10 = vld [vmem:[#allocation205_spill] sm:$0xff] }
 0x3df   : > { %v5593_v60 = vsel %vm929_vm1, %v5591_v1, %v5592_v8  ;;  %v5540_v25 = vmul.f32 %v12930_v56, %v12945_v48  ;;  %v5541_v29 = vmul.f32 %v12945_v48, %v16697_v5  ;;  %v5539_v36 = vmul.f32 %v16698_v62, %v12945_v48  ;;  %v13264_v16 = vld [vmem:[%s7384_s21 + $0x180] sm:$0xff]  ;;  %v13277_v48 = vpop.permute.xlu1 %5024  ;;  %v13279_v5 = vpop.permute.xlu0 %5022 }
 0x3e0   : > { %16696 = vst [vmem:[#allocation20_spill] sm:$0xff] %v13247_v6  ;;  %v3839_v11 = vadd.f32 %v16699_v23, %v3717_v14  ;;  %v3838_v1 = vadd.f32 %v16700_v10, %v3716_v9  ;;  %v13268_v8 = vmul.f32 %v13264_v16, %v13055_v27  ;;  %v13271_v51 = vld [vmem:[%s7384_s21 + $0x1a0] sm:$0xff]  ;;  %16703 = vst [vmem:[#allocation22_spill] sm:$0xff] %v13277_v48  ;;  %v13284_v10 = vld [vmem:[%s7384_s21 + $0x198] sm:$0xff] }
 0x3e1   : > { %v13275_v34 = vmul.f32 %v13271_v51, %v13055_v27  ;;  %16704 = vst [vmem:[#allocation34_spill] sm:$0xff] %v13279_v5  ;;  %v3841_v14 = vadd.f32 %v16705_v35, %v3719_v58  ;;  %v16706_v23 = vld [vmem:[#allocation201_spill] sm:$0xff]  ;;  %v13288_v53 = vmul.f32 %v13284_v10, %v13055_v27  ;;  %v13298_v5 = vmul.f32 %v16698_v62, %v13055_v27 }
 0x3e2   : > { %16701 = vst [vmem:[#allocation203_spill] sm:$0xff] %v13268_v8  ;;  %v3840_v9 = vadd.f32 %v16706_v23, %v3718_v47  ;;  %v13292_v8 = vmul.f32 %v12930_v56, %v13055_v27  ;;  %v13301_v35 = vstv %s13204_s17  ;;  %5628 = vrot.lane.b32.xlu1 %v5595_v22, %s7340_s24  ;;  %5626 = vrot.lane.b32.xlu0 %v5593_v60, %s7340_s24  ;;  %v5602_v23 = vrot.slane %v5540_v25, 2  ;;  %v16712_v27 = vld [vmem:[#allocation137_spill] sm:$0xff]  ;;  %v16714_v22 = vld [vmem:[#allocation139_spill] sm:$0xff]  ;;  %v16720_v25 = vld [vmem:[#allocation146_spill] sm:$0xff] }
 0x3e3   : > { %16702 = vst [vmem:[#allocation207_spill] sm:$0xff] %v13275_v34  ;;  %16707 = vst [vmem:[#allocation23_spill] sm:$0xff] %v13288_v53  ;;  %v16709_v34 = vld [vmem:[#allocation133_spill] sm:$0xff]  ;;  %v5600_v58 = vsel %vm929_vm1, %v5597_v39, %v5599_v20  ;;  %v5598_v47 = vsel %vm929_vm1, %v5596_v43, %v5597_v39  ;;  %v5604_v48 = vrot.slane %v5541_v29, 2  ;;  %v16711_v53 = vld [vmem:[#allocation134_spill] sm:$0xff]  ;;  %v3985_v60 = vadd.f32 %v16714_v22, %v13105_v52  ;;  %v13315_v20 = vpop.permute.xlu1 %5028  ;;  %v13317_v39 = vpop.permute.xlu0 %5026 }
 0x3e4   : > { %16708 = vst [vmem:[#allocation213_spill] sm:$0xff] %v13292_v8  ;;  %v3981_v6 = vadd.f32 %v16709_v34, %v13063_v46  ;;  %16710 = vst [vmem:[#allocation26_spill] sm:$0xff] %v13298_v5  ;;  %v5601_v8 = vrot.slane %v5539_v36, 2  ;;  %v3980_v46 = vadd.f32 %v16711_v53, %v13066_v59  ;;  %v3983_v34 = vadd.f32 %v16712_v27, %v13087_v3  ;;  %v16713_v5 = vld [vmem:[#allocation138_spill] sm:$0xff]  ;;  %v16717_v36 = vld [vmem:[#allocation140_spill] sm:$0xff] }
 0x3e5   : > { %v3982_v15 = vadd.f32 %v16713_v5, %v13090_v28  ;;  %16715 = vst [vmem:[#allocation35_spill] sm:$0xff] %v13315_v20  ;;  %16716 = vst [vmem:[#allocation40_spill] sm:$0xff] %v13317_v39  ;;  %v3984_v29 = vadd.f32 %v16717_v36, %v13134_v31  ;;  %v16718_v43 = vld [vmem:[#allocation144_spill] sm:$0xff]  ;;  %v16719_v59 = vld [vmem:[#allocation145_spill] sm:$0xff]  ;;  %v3989_v28 = vadd.f32 %v16720_v25, %v13197_v57 }
 0x3e6   : > { %v3987_v53 = vadd.f32 %v16718_v43, %v13159_v44  ;;  %v3986_v3 = vadd.f32 %v16719_v59, %v13174_v61  ;;  %v16721_v5 = vld [vmem:[#allocation148_spill] sm:$0xff]  ;;  %v16722_v27 = vld [vmem:[#allocation149_spill] sm:$0xff]  ;;  %v4813_v39 = vmul.f32 %v13075_v42, %v13301_v35  ;;  %5632 = vrot.lane.b32.xlu1 %v5600_v58, %s7340_s24  ;;  %5630 = vrot.lane.b32.xlu0 %v5598_v47, %s7340_s24  ;;  %v16724_v43 = vld [vmem:[#allocation62_spill] sm:$0xff] }
 0x3e7   : > { %v3988_v52 = vadd.f32 %v16721_v5, %v13200_v40  ;;  %v13330_v22 = vadd.f32 %v16722_v27, %v3837_v12  ;;  %v13337_v31 = vld [vmem:[%s7384_s21 + $0x118] sm:$0x3]  ;;  %v5605_v61 = vsel %vm929_vm1, %v5602_v23, %v5604_v48  ;;  %v5603_v57 = vsel %vm929_vm1, %v5601_v8, %v5602_v23  ;;  %v16723_v12 = vld [vmem:[#allocation147_spill] sm:$0xff]  ;;  %v13355_v5 = vpop.permute.xlu1 %5032  ;;  %v13357_v27 = vpop.permute.xlu0 %5030  ;;  %v16728_v48 = vld [vmem:[#allocation222_spill] sm:$0xff] }
 0x3e8   : > { %v4814_v44 = vmul.f32 %v13337_v31, %v13301_v35  ;;  %v13344_v40 = vstv %s13259_s18  ;;  %v13347_v36 = vadd.f32 %v16723_v12, %v3836_v26  ;;  %v13350_v59 = vadd.f32 %v16724_v43, %v3839_v11  ;;  %v16725_v58 = vld [vmem:[#allocation63_spill] sm:$0xff]  ;;  %16726 = vst [vmem:[#allocation216_spill] sm:$0xff] %v13355_v5  ;;  %16727 = vst [vmem:[#allocation29_spill] sm:$0xff] %v13357_v27  ;;  %v16729_v23 = vld [vmem:[#allocation153_spill] sm:$0xff] }
 0x3e9   : > { %v4135_v25 = vadd.f32 %v16725_v58, %v3981_v6  ;;  %v4812_v47 = vmul.f32 %v13093_v33, %v13301_v35  ;;  %v13360_v8 = vadd.f32 %v16728_v48, %v3838_v1  ;;  %v4134_v20 = vadd.f32 %v16729_v23, %v3980_v46  ;;  %v16730_v26 = vld [vmem:[#allocation155_spill] sm:$0xff]  ;;  %v16732_v58 = vld [vmem:[#allocation152_spill] sm:$0xff]  ;;  %v16735_v27 = vld [vmem:[#allocation209_spill] sm:$0xff] }
 0x3ea   : > { %v4137_v12 = vadd.f32 %v16730_v26, %v3983_v34  ;;  %v4136_v11 = vadd.f32 %v16731_v45, %v3982_v15  ;;  %v13367_v6 = vmul.f32 %v13108_v17, %v13301_v35  ;;  %5636 = vrot.lane.b32.xlu1 %v5605_v61, %s7340_s24  ;;  %5634 = vrot.lane.b32.xlu0 %v5603_v57, %s7340_s24  ;;  %v4861_v34 = vrot.slane %v4813_v39, 1  ;;  %v13379_v15 = vld [vmem:[%s7384_s21 + $0x130] sm:$0x3]  ;;  %v16734_v26 = vld [vmem:[#allocation261_spill] sm:$0xff] }
 0x3eb   : > { %v5707_v43 = vmul.f32 %v13108_v17, %v13344_v40  ;;  %v5706_v1 = vmul.f32 %v13115_v4, %v13344_v40  ;;  %v13376_v46 = vadd.f32 %v16732_v58, %v3841_v14  ;;  %v4863_v48 = vrot.slane %v4814_v44, 1  ;;  %v16733_v23 = vld [vmem:[#allocation259_spill] sm:$0xff]  ;;  %v13388_v2 = vpop.permute.xlu1 %5036  ;;  %v13390_v21 = vpop.permute.xlu0 %5034  ;;  %v16738_v14 = vld [vmem:[#allocation5_spill] sm:$0xff]  ;;  %v16739_v44 = vld [vmem:[#allocation18_spill] sm:$0xff] }
 0x3ec   : > { %v4817_v45 = vmul.f32 %v13379_v15, %v13301_v35  ;;  %v3994_v61 = vadd.f32 %v16733_v23, %v3840_v9  ;;  %v4139_v57 = vadd.f32 %v16734_v26, %v3985_v60  ;;  %v13386_v5 = vadd.f32 %v16735_v27, %v4135_v25  ;;  %16736 = vst [vmem:[#allocation221_spill] sm:$0xff] %v13388_v2  ;;  %v16742_v60 = vld [vmem:[#allocation158_spill] sm:$0xff] }
 0x3ed   : > { %v4860_v55 = vrot.slane %v4812_v47, 1  ;;  %16737 = vst [vmem:[#allocation41_spill] sm:$0xff] %v13390_v21  ;;  %v4138_v39 = vadd.f32 %v16738_v14, %v3984_v29  ;;  %v13394_v58 = vadd.f32 %v16739_v44, %v4134_v20  ;;  %v13397_v41 = vadd.f32 %v16740_v13, %v4137_v12  ;;  %v16743_v13 = vld [vmem:[#allocation159_spill] sm:$0xff]  ;;  %v16745_v12 = vld [vmem:[#allocation161_spill] sm:$0xff]  ;;  %v16751_v44 = vld [vmem:[#allocation228_spill] sm:$0xff] }
 0x3ee   : > { %v13400_v9 = vadd.f32 %v16741_v38, %v4136_v11  ;;  %v4141_v23 = vadd.f32 %v16742_v60, %v3987_v53  ;;  %v4866_v25 = vrot.slane %v13367_v6, 1  ;;  %5740 = vrot.lane.b32.xlu1 %v5707_v43, %s7339_s22  ;;  %5738 = vrot.lane.b32.xlu0 %v5706_v1, %s7339_s22  ;;  %v5709_v29 = vmul.f32 %v13137_v18, %v13344_v40  ;;  %v16746_v6 = vld [vmem:[#allocation227_spill] sm:$0xff]  ;;  %v13463_v21 = vld [vmem:[%s7384_s21 + $0x160] sm:$0x3] }
 0x3ef   : > { %v5708_v20 = vmul.f32 %v13144_v49, %v13344_v40  ;;  %v4140_v47 = vadd.f32 %v16743_v13, %v3986_v3  ;;  %v13412_v38 = vsel %vm498_vm0, %v4861_v34, %v4863_v48  ;;  %v4868_v27 = vrot.slane %v4817_v45, 1  ;;  %v13425_v14 = vpop.permute.xlu1 %5040  ;;  %v13427_v3 = vpop.permute.xlu0 %5038  ;;  %v16750_v48 = vld [vmem:[#allocation265_spill] sm:$0xff]  ;;  %16757 = vst [vmem:[#allocation49_spill] sm:$0xff] %v13463_v21 }
 0x3f0   : > { %16744 = vst [vmem:[#allocation141_spill] sm:$0xff] %v13412_v38  ;;  %v4815_v53 = vmul.f32 %v13115_v4, %v13301_v35  ;;  %v4143_v11 = vadd.f32 %v16745_v12, %v3989_v28  ;;  %v13418_v43 = vadd.f32 %v16746_v6, %v4139_v57  ;;  %v13421_v1 = vsel %vm498_vm0, %v4860_v55, %v4861_v34  ;;  %v13434_v28 = vld [vmem:[%s7384_s21 + $0x148] sm:$0x3]  ;;  %v16752_v34 = vld [vmem:[#allocation231_spill] sm:$0xff] }
 0x3f1   : > { %16747 = vst [vmem:[#allocation206_spill] sm:$0xff] %v13421_v1  ;;  %v4819_v26 = vmul.f32 %v13137_v18, %v13301_v35  ;;  %16748 = vst [vmem:[#allocation46_spill] sm:$0xff] %v13425_v14  ;;  %v4142_v45 = vadd.f32 %v16750_v48, %v3988_v52  ;;  %v13431_v60 = vadd.f32 %v16751_v44, %v4138_v39  ;;  %v16753_v12 = vld [vmem:[#allocation167_spill] sm:$0xff]  ;;  %v16767_v1 = vld [vmem:[#allocation169_spill] sm:$0xff] }
 0x3f2   : > { %16749 = vst [vmem:[#allocation142_spill] sm:$0xff] %v13427_v3  ;;  %v4820_v57 = vmul.f32 %v13434_v28, %v13301_v35  ;;  %v4818_v55 = vmul.f32 %v13144_v49, %v13301_v35  ;;  %v13441_v13 = vadd.f32 %v16752_v34, %v4141_v23  ;;  %5744 = vrot.lane.b32.xlu1 %v5709_v29, %s7339_s22  ;;  %v16754_v48 = vld [vmem:[#allocation235_spill] sm:$0xff]  ;;  %v4865_v23 = vrot.slane %v4815_v53, 1  ;;  %v16756_v34 = vld [vmem:[#allocation237_spill] sm:$0xff] }
 0x3f3   : > { %5742 = vrot.lane.b32.xlu0 %v5708_v20, %s7339_s22  ;;  %v5711_v52 = vmul.f32 %v13177_v54, %v13344_v40  ;;  %v5710_v39 = vmul.f32 %v13184_v37, %v13344_v40  ;;  %v4145_v6 = vadd.f32 %v16753_v12, %v13330_v22  ;;  %v13452_v44 = vadd.f32 %v16754_v48, %v4140_v47  ;;  %v13467_v22 = vpop.permute.xlu1 %5044  ;;  %v13469_v47 = vpop.permute.xlu0 %5042  ;;  %v16761_v53 = vld [vmem:[#allocation247_spill] sm:$0xff] }
 0x3f4   : > { %v13455_v3 = vsel %vm498_vm0, %v4866_v25, %v4868_v27  ;;  %v13458_v29 = vadd.f32 %v16756_v34, %v4143_v11  ;;  %v4871_v20 = vrot.slane %v4819_v26, 1  ;;  %v4822_v14 = vmul.f32 %v13177_v54, %v13301_v35  ;;  %16758 = vst [vmem:[#allocation54_spill] sm:$0xff] %v13467_v22  ;;  %16759 = vst [vmem:[#allocation241_spill] sm:$0xff] %v13469_v47  ;;  %v16760_v27 = vld [vmem:[#allocation115_spill] sm:$0xff] }
 0x3f5   : > { %16755 = vst [vmem:[#allocation143_spill] sm:$0xff] %v13455_v3  ;;  %v4823_v2 = vmul.f32 %v13463_v21, %v13301_v35  ;;  %v4144_v12 = vadd.f32 %v16760_v27, %v13347_v36  ;;  %v13474_v48 = vadd.f32 %v16761_v53, %v4142_v45  ;;  %v4873_v11 = vrot.slane %v4820_v57, 1  ;;  %v16762_v36 = vld [vmem:[#allocation97_spill] sm:$0xff]  ;;  %v16763_v57 = vld [vmem:[#allocation168_spill] sm:$0xff]  ;;  %v16764_v27 = vld [vmem:[#allocation239_spill] sm:$0xff] }
 0x3f6   : > { %v4870_v26 = vrot.slane %v4818_v55, 1  ;;  %v4821_v34 = vmul.f32 %v13184_v37, %v13301_v35  ;;  %5748 = vrot.lane.b32.xlu1 %v5711_v52, %s7339_s22  ;;  %v5713_v22 = vmul.f32 %v13211_v50, %v13344_v40  ;;  %v5712_v47 = vmul.f32 %v13227_v7, %v13344_v40 }
 0x3f7   : > { %5746 = vrot.lane.b32.xlu0 %v5710_v39, %s7339_s22  ;;  %v4147_v45 = vadd.f32 %v16762_v36, %v13350_v59  ;;  %v4146_v55 = vadd.f32 %v16763_v57, %v13360_v8  ;;  %v13489_v53 = vadd.f32 %v16764_v27, %v4145_v6  ;;  %v13492_v52 = vsel %vm498_vm0, %v4865_v23, %v4866_v25  ;;  %v16766_v39 = vld [vmem:[#allocation98_spill] sm:$0xff]  ;;  %v13497_v54 = vpop.permute.xlu1 %5048  ;;  %v16770_v36 = vld [vmem:[#allocation252_spill] sm:$0xff] }
 0x3f8   : > { %16765 = vst [vmem:[#allocation249_spill] sm:$0xff] %v13492_v52  ;;  %v4149_v3 = vadd.f32 %v16766_v39, %v13376_v46  ;;  %v4148_v38 = vadd.f32 %v16767_v1, %v3994_v61  ;;  %v4876_v21 = vrot.slane %v4822_v14, 1  ;;  %v4878_v37 = vrot.slane %v4823_v2, 1  ;;  %16768 = vst [vmem:[#allocation150_spill] sm:$0xff] %v13497_v54  ;;  %v13499_v59 = vpop.permute.xlu0 %5046  ;;  %v13513_v1 = vld [vmem:[%s7384_s21 + $0x178] sm:$0x3] }
 0x3f9   : > { %16769 = vst [vmem:[#allocation56_spill] sm:$0xff] %v13499_v59  ;;  %v13502_v8 = vadd.f32 %v16770_v36, %v4144_v12  ;;  %v13505_v6 = vsel %vm498_vm0, %v4871_v20, %v4873_v11  ;;  %v13508_v25 = vsel %vm498_vm0, %v4870_v26, %v4871_v20  ;;  %v4825_v46 = vmul.f32 %v13211_v50, %v13301_v35  ;;  %v16773_v20 = vld [vmem:[#allocation120_spill] sm:$0xff] }
 0x3fa   : > { %16771 = vst [vmem:[#allocation60_spill] sm:$0xff] %v13505_v6  ;;  %16772 = vst [vmem:[#allocation151_spill] sm:$0xff] %v13508_v25  ;;  %v4875_v61 = vrot.slane %v4821_v34, 1  ;;  %v4826_v2 = vmul.f32 %v13513_v1, %v13301_v35  ;;  %5752 = vrot.lane.b32.xlu1 %v5713_v22, %s7339_s22  ;;  %v5715_v14 = vmul.f32 %v13243_v32, %v13344_v40  ;;  %v13531_v34 = vld [vmem:[%s7384_s21 + $0x190] sm:$0x3] }
 0x3fb   : > { %5750 = vrot.lane.b32.xlu0 %v5712_v47, %s7339_s22  ;;  %v5714_v23 = vmul.f32 %v13264_v16, %v13344_v40  ;;  %v13524_v12 = vadd.f32 %v16773_v20, %v4147_v45  ;;  %v4824_v11 = vmul.f32 %v13227_v7, %v13301_v35  ;;  %v4828_v26 = vmul.f32 %v13243_v32, %v13301_v35  ;;  %v13547_v39 = vpop.permute.xlu1 %5052  ;;  %v16777_v20 = vld [vmem:[#allocation17_spill] sm:$0xff] }
 0x3fc   : > { %v4829_v22 = vmul.f32 %v13531_v34, %v13301_v35  ;;  %v13536_v47 = vadd.f32 %v12950_v30, %v4146_v55  ;;  %v13539_v57 = vadd.f32 %v12953_v24, %v4149_v3  ;;  %v13542_v45 = vadd.f32 %v12963_v19, %v4148_v38  ;;  %16775 = vst [vmem:[#allocation61_spill] sm:$0xff] %v13547_v39  ;;  %v13549_v36 = vpop.permute.xlu0 %5050  ;;  %v16778_v30 = vld [vmem:[#allocation81_spill] sm:$0xff]  ;;  %v16780_v55 = vld [vmem:[#allocation220_spill] sm:$0xff] }
 0x3fd   : > { %v13545_v27 = vsel %vm498_vm0, %v4876_v21, %v4878_v37  ;;  %16776 = vst [vmem:[#allocation250_spill] sm:$0xff] %v13549_v36  ;;  %v13555_v59 = vadd.f32 %v16777_v20, %v13386_v5  ;;  %v13559_v24 = vadd.f32 %v16778_v30, %v13394_v58  ;;  %v4881_v19 = vrot.slane %v4825_v46, 1 }
 0x3fe   : > { %16774 = vst [vmem:[#allocation210_spill] sm:$0xff] %v13545_v27  ;;  %v4827_v37 = vmul.f32 %v13264_v16, %v13301_v35  ;;  %v13564_v38 = vsel %vm498_vm0, %v4875_v61, %v4876_v21  ;;  %v4883_v3 = vrot.slane %v4826_v2, 1  ;;  %5756 = vrot.lane.b32.xlu1 %v5715_v14, %s7339_s22  ;;  %v5717_v5 = vmul.f32 %v13271_v51, %v13344_v40  ;;  %v16781_v61 = vld [vmem:[#allocation170_spill] sm:$0xff] }
 0x3ff   : > { %16779 = vst [vmem:[#allocation253_spill] sm:$0xff] %v13564_v38  ;;  %5754 = vrot.lane.b32.xlu0 %v5714_v23, %s7339_s22  ;;  %v5716_v58 = vmul.f32 %v13284_v10, %v13344_v40  ;;  %v13574_v46 = vadd.f32 %v16780_v55, %v13397_v41  ;;  %v4880_v20 = vrot.slane %v4824_v11, 1  ;;  %v4886_v30 = vrot.slane %v4828_v26, 1  ;;  %v13585_v23 = vld [vmem:[%s7384_s21 + $0x1a8] sm:$0x3] }
 0x400   : > { %v4888_v21 = vrot.slane %v4829_v22, 1  ;;  %v13580_v2 = vadd.f32 %v16781_v61, %v13400_v9  ;;  %v4831_v14 = vmul.f32 %v13271_v51, %v13301_v35  ;;  %v4832_v36 = vmul.f32 %v13585_v23, %v13301_v35  ;;  %v13591_v11 = vpop.permute.xlu1 %5178  ;;  %v13593_v26 = vpop.permute.xlu0 %5176  ;;  %v13598_v55 = vld [vmem:[%s7384_s21 + $0x1c0] sm:$0x3] }
 0x401   : > { %v4830_v41 = vmul.f32 %v13284_v10, %v13301_v35  ;;  %16782 = vst [vmem:[#allocation64_spill] sm:$0xff] %v13591_v11  ;;  %16783 = vst [vmem:[#allocation260_spill] sm:$0xff] %v13593_v26  ;;  %v4885_v22 = vrot.slane %v4827_v37, 1  ;;  %v4834_v9 = vmul.f32 %v12930_v56, %v13301_v35  ;;  %v4835_v61 = vmul.f32 %v13598_v55, %v13301_v35  ;;  %v16785_v11 = vld [vmem:[#allocation87_spill] sm:$0xff] }
 0x402   : > { %v4833_v39 = vmul.f32 %v16698_v62, %v13301_v35  ;;  %v13605_v54 = vsel %vm498_vm0, %v4881_v19, %v4883_v3  ;;  %5760 = vrot.lane.b32.xlu1 %v5717_v5, %s7339_s22  ;;  %v5719_v37 = vmul.f32 %v12930_v56, %v13344_v40  ;;  %v5718_v26 = vmul.f32 %v16698_v62, %v13344_v40  ;;  %v16786_v35 = vld [vmem:[#allocation30_spill] sm:$0xff] }
 0x403   : > { %16784 = vst [vmem:[#allocation65_spill] sm:$0xff] %v13605_v54  ;;  %5758 = vrot.lane.b32.xlu0 %v5716_v58, %s7339_s22  ;;  %v13615_v38 = vadd.f32 %v16785_v11, %v13418_v43  ;;  %v13619_v27 = vadd.f32 %v16786_v35, %v13431_v60  ;;  %v13622_v3 = vsel %vm498_vm0, %v4880_v20, %v4881_v19  ;;  %v13628_v58 = vld [vmem:[%s7384_s21 + $0x1d0] sm:$0xff]  ;;  %v13631_v54 = vld [vmem:[%s7384_s21 + $0x1c8] sm:$0xff]  ;;  %v4891_v25 = vrot.slane %v4831_v14, 1 }
 0x404   : > { %16787 = vst [vmem:[#allocation154_spill] sm:$0xff] %v13622_v3  ;;  %v13625_v5 = vsel %vm498_vm0, %v4886_v30, %v4888_v21  ;;  %v4893_v6 = vrot.slane %v4832_v36, 1  ;;  %v4890_v52 = vrot.slane %v4830_v41, 1  ;;  %v13633_v43 = vpop.permute.xlu1 %5182  ;;  %v13635_v11 = vpop.permute.xlu0 %5180  ;;  %v13638_v60 = vstv %s13551_s19 }
 0x405   : > { %16788 = vst [vmem:[#allocation66_spill] sm:$0xff] %v13625_v5  ;;  %16789 = vst [vmem:[#allocation225_spill] sm:$0xff] %v13633_v43  ;;  %v13641_v19 = vsel %vm498_vm0, %v4885_v22, %v4886_v30  ;;  %v4896_v20 = vrot.slane %v4834_v9, 1  ;;  %v4898_v21 = vrot.slane %v4835_v61, 1  ;;  %v4895_v35 = vrot.slane %v4833_v39, 1  ;;  %v16792_v5 = vld [vmem:[#allocation172_spill] sm:$0xff] }
 0x406   : > { %16790 = vst [vmem:[#allocation262_spill] sm:$0xff] %v13635_v11  ;;  %16791 = vst [vmem:[#allocation68_spill] sm:$0xff] %v13641_v19  ;;  %v13645_v3 = vadd.f32 %v16792_v5, %v13441_v13  ;;  %5764 = vrot.lane.b32.xlu1 %v5719_v37, %s7339_s22  ;;  %v5721_v36 = vmul.f32 %v13344_v40, %v13628_v58  ;;  %v5720_v14 = vmul.f32 %v13344_v40, %v13631_v54  ;;  %v16793_v30 = vld [vmem:[#allocation173_spill] sm:$0xff]  ;;  %v16813_v43 = vld [vmem:[#allocation92_spill] sm:$0xff] }
 0x407   : > { %5762 = vrot.lane.b32.xlu0 %v5718_v26, %s7339_s22  ;;  %v13655_v41 = vadd.f32 %v16793_v30, %v13452_v44  ;;  %v13658_v22 = vstv %s13576_s20  ;;  %v5243_v13 = vmul.f32 %v13075_v42, %v13638_v60  ;;  %v5244_v39 = vmul.f32 %v13337_v31, %v13638_v60  ;;  %v16794_v26 = vld [vmem:[#allocation174_spill] sm:$0xff]  ;;  %v16795_v61 = vld [vmem:[#allocation113_spill] sm:$0xff]  ;;  %v16800_v31 = vld [vmem:[#allocation180_spill] sm:$0xff] }
 0x408   : > { %v13666_v9 = vadd.f32 %v16794_v26, %v13458_v29  ;;  %v13670_v37 = vadd.f32 %v16795_v61, %v13474_v48  ;;  %v13673_v40 = vsel %vm498_vm0, %v4891_v25, %v4893_v6  ;;  %v13676_v44 = vsel %vm498_vm0, %v4890_v52, %v4891_v25  ;;  %v13678_v5 = vpop.permute.xlu1 %5186  ;;  %v13680_v42 = vpop.permute.xlu0 %5184  ;;  %v16801_v29 = vld [vmem:[#allocation181_spill] sm:$0xff] }
 0x409   : > { %16796 = vst [vmem:[#allocation69_spill] sm:$0xff] %v13673_v40  ;;  %16797 = vst [vmem:[#allocation71_spill] sm:$0xff] %v13676_v44  ;;  %v13684_v30 = vadd.f32 %v16800_v31, %v13489_v53  ;;  %v13688_v26 = vadd.f32 %v16801_v29, %v13502_v8  ;;  %v13691_v48 = vsel %vm498_vm0, %v4896_v20, %v4898_v21  ;;  %v5291_v25 = vrot.slane %v5243_v13, 2  ;;  %v16806_v29 = vld [vmem:[#allocation185_spill] sm:$0xff] }
 0x40a   : > { %16798 = vst [vmem:[#allocation72_spill] sm:$0xff] %v13678_v5  ;;  %16799 = vst [vmem:[#allocation74_spill] sm:$0xff] %v13680_v42  ;;  %v13694_v6 = vsel %vm498_vm0, %v4895_v35, %v4896_v20  ;;  %5768 = vrot.lane.b32.xlu1 %v5721_v36, %s7339_s22  ;;  %v5805_v52 = vmul.f32 %v13108_v17, %v13658_v22  ;;  %v5804_v53 = vmul.f32 %v13115_v4, %v13658_v22  ;;  %v16804_v35 = vld [vmem:[#allocation182_spill] sm:$0xff]  ;;  %v16809_v5 = vld [vmem:[#allocation124_spill] sm:$0xff] }
 0x40b   : > { %16802 = vst [vmem:[#allocation75_spill] sm:$0xff] %v13691_v48  ;;  %16803 = vst [vmem:[#allocation79_spill] sm:$0xff] %v13694_v6  ;;  %5766 = vrot.lane.b32.xlu0 %v5720_v14, %s7339_s22  ;;  %v5242_v8 = vmul.f32 %v13093_v33, %v13638_v60  ;;  %v5293_v61 = vrot.slane %v5244_v39, 2  ;;  %v5246_v21 = vmul.f32 %v13108_v17, %v13638_v60  ;;  %v16805_v14 = vld [vmem:[#allocation236_spill] sm:$0xff]  ;;  %v16838_v19 = vld [vmem:[#allocation245_spill] sm:$0xff] }
 0x40c   : > { %v5247_v20 = vmul.f32 %v13379_v15, %v13638_v60  ;;  %v13710_v36 = vadd.f32 %v16804_v35, %v13524_v12  ;;  %v13714_v31 = vadd.f32 %v16805_v14, %v13536_v47  ;;  %v4565_v42 = vadd.f32 %v16806_v29, %v13555_v59  ;;  %v13718_v33 = vpop.permute.xlu1 %5190  ;;  %v13720_v13 = vpop.permute.xlu0 %5188  ;;  %v16810_v12 = vld [vmem:[#allocation189_spill] sm:$0xff] }
 0x40d   : > { %16807 = vst [vmem:[#allocation80_spill] sm:$0xff] %v13718_v33  ;;  %16808 = vst [vmem:[#allocation82_spill] sm:$0xff] %v13720_v13  ;;  %v5245_v39 = vmul.f32 %v13115_v4, %v13638_v60  ;;  %v13726_v11 = vadd.f32 %v16809_v5, %v13539_v57  ;;  %v4564_v35 = vadd.f32 %v16810_v12, %v13559_v24  ;;  %v16811_v14 = vld [vmem:[#allocation197_spill] sm:$0xff]  ;;  %v5290_v12 = vrot.slane %v5242_v8, 2 }
 0x40e   : > { %v13732_v47 = vmul.f32 %v13137_v18, %v13638_v60  ;;  %v5250_v59 = vmul.f32 %v13434_v28, %v13638_v60  ;;  %v13738_v29 = vadd.f32 %v16811_v14, %v13542_v45  ;;  %5838 = vrot.lane.b32.xlu1 %v5805_v52, %s7340_s24  ;;  %v5807_v57 = vmul.f32 %v13137_v18, %v13658_v22  ;;  %v16814_v14 = vld [vmem:[#allocation93_spill] sm:$0xff] }
 0x40f   : > { %5836 = vrot.lane.b32.xlu0 %v5804_v53, %s7340_s24  ;;  %v5806_v24 = vmul.f32 %v13144_v49, %v13658_v22  ;;  %v13747_v5 = vsel %vm929_vm1, %v5291_v25, %v5293_v61  ;;  %v5296_v13 = vrot.slane %v5246_v21, 2  ;;  %v5298_v33 = vrot.slane %v5247_v20, 2  ;;  %v16819_v20 = vld [vmem:[#allocation135_spill] sm:$0xff] }
 0x410   : > { %16812 = vst [vmem:[#allocation83_spill] sm:$0xff] %v13747_v5  ;;  %v4567_v45 = vadd.f32 %v16813_v43, %v13574_v46  ;;  %v4566_v52 = vadd.f32 %v16814_v14, %v13580_v2  ;;  %v13754_v53 = vadd.f32 %v13079_v63, %v4565_v42  ;;  %v13756_v6 = vpop.permute.xlu1 %5194  ;;  %v13758_v48 = vpop.permute.xlu0 %5192  ;;  %v5295_v44 = vrot.slane %v5245_v39, 2  ;;  %v16817_v43 = vld [vmem:[#allocation95_spill] sm:$0xff]  ;;  %v16818_v63 = vld [vmem:[#allocation244_spill] sm:$0xff]  ;;  %v16824_v14 = vld [vmem:[#allocation6_spill] sm:$0xff] }
 0x411   : > { %16815 = vst [vmem:[#allocation121_spill] sm:$0xff] %v13756_v6  ;;  %16816 = vst [vmem:[#allocation88_spill] sm:$0xff] %v13758_v48  ;;  %v13761_v61 = vadd.f32 %v13097_v0, %v4564_v35  ;;  %v5301_v8 = vrot.slane %v13732_v47, 2  ;;  %v5303_v21 = vrot.slane %v5250_v59, 2  ;;  %v5248_v46 = vmul.f32 %v13144_v49, %v13638_v60  ;;  %v16837_v5 = vld [vmem:[#allocation52_spill] sm:$0xff] }
 0x412   : > { %v4569_v2 = vadd.f32 %v16817_v43, %v13615_v38  ;;  %5842 = vrot.lane.b32.xlu1 %v5807_v57, %s7340_s24  ;;  %v5809_v42 = vmul.f32 %v16818_v63, %v13658_v22  ;;  %v5808_v0 = vmul.f32 %v16819_v20, %v13658_v22  ;;  %v13775_v39 = vsel %vm929_vm1, %v5290_v12, %v5291_v25  ;;  %v16822_v38 = vld [vmem:[#allocation49_spill] sm:$0xff]  ;;  %v16828_v12 = vld [vmem:[#allocation16_spill] sm:$0xff] }
 0x413   : > { %5840 = vrot.lane.b32.xlu0 %v5806_v24, %s7340_s24  ;;  %16820 = vst [vmem:[#allocation183_spill] sm:$0xff] %v13775_v39  ;;  %v13778_v35 = vsel %vm929_vm1, %v5296_v13, %v5298_v33  ;;  %v5252_v47 = vmul.f32 %v16818_v63, %v13638_v60  ;;  %v5253_v59 = vmul.f32 %v16822_v38, %v13638_v60  ;;  %v16823_v57 = vld [vmem:[#allocation45_spill] sm:$0xff] }
 0x414   : > { %16821 = vst [vmem:[#allocation89_spill] sm:$0xff] %v13778_v35  ;;  %v13785_v24 = vadd.f32 %v16823_v57, %v4567_v45  ;;  %v13788_v43 = vadd.f32 %v16824_v14, %v4566_v52  ;;  %v13790_v48 = vpop.permute.xlu1 %5198  ;;  %v13792_v6 = vpop.permute.xlu0 %5196  ;;  %v13795_v25 = vsel %vm929_vm1, %v5295_v44, %v5296_v13  ;;  %v5251_v33 = vmul.f32 %v16819_v20, %v13638_v60  ;;  %v16830_v57 = vld [vmem:[#allocation188_spill] sm:$0xff] }
 0x415   : > { %16825 = vst [vmem:[#allocation175_spill] sm:$0xff] %v13790_v48  ;;  %16826 = vst [vmem:[#allocation176_spill] sm:$0xff] %v13792_v6  ;;  %v4568_v35 = vadd.f32 %v16828_v12, %v13619_v27  ;;  %v13802_v39 = vsel %vm929_vm1, %v5301_v8, %v5303_v21  ;;  %v5255_v45 = vmul.f32 %v13211_v50, %v13638_v60  ;;  %v5300_v13 = vrot.slane %v5248_v46, 2  ;;  %v16831_v21 = vld [vmem:[#allocation204_spill] sm:$0xff]  ;;  %v16832_v6 = vld [vmem:[#allocation202_spill] sm:$0xff] }
 0x416   : > { %16827 = vst [vmem:[#allocation177_spill] sm:$0xff] %v13795_v25  ;;  %16829 = vst [vmem:[#allocation85_spill] sm:$0xff] %v13802_v39  ;;  %v5256_v52 = vmul.f32 %v13513_v1, %v13638_v60  ;;  %v13809_v14 = vadd.f32 %v16830_v57, %v4569_v2  ;;  %5846 = vrot.lane.b32.xlu1 %v5809_v42, %s7340_s24  ;;  %v5811_v44 = vmul.f32 %v13211_v50, %v13658_v22 }
 0x417   : > { %5844 = vrot.lane.b32.xlu0 %v5808_v0, %s7340_s24  ;;  %v5810_v27 = vmul.f32 %v13227_v7, %v13658_v22  ;;  %v4571_v12 = vadd.f32 %v16831_v21, %v13645_v3  ;;  %v4570_v48 = vadd.f32 %v16832_v6, %v13655_v41  ;;  %v5306_v39 = vrot.slane %v5252_v47, 2  ;;  %v16835_v41 = vld [vmem:[#allocation27_spill] sm:$0xff]  ;;  %v16836_v47 = vld [vmem:[#allocation208_spill] sm:$0xff] }
 0x418   : > { %v5308_v2 = vrot.slane %v5253_v59, 2  ;;  %v13823_v42 = vpop.permute.xlu1 %5202  ;;  %v13825_v0 = vpop.permute.xlu0 %5200  ;;  %v5305_v57 = vrot.slane %v5251_v33, 2  ;;  %v5254_v25 = vmul.f32 %v13227_v7, %v13638_v60  ;;  %v5258_v46 = vmul.f32 %v13243_v32, %v13638_v60 }
 0x419   : > { %16833 = vst [vmem:[#allocation178_spill] sm:$0xff] %v13823_v42  ;;  %16834 = vst [vmem:[#allocation86_spill] sm:$0xff] %v13825_v0  ;;  %v5259_v3 = vmul.f32 %v13531_v34, %v13638_v60  ;;  %v4573_v6 = vadd.f32 %v16835_v41, %v13666_v9  ;;  %v4572_v59 = vadd.f32 %v16836_v47, %v13670_v37  ;;  %v5311_v21 = vrot.slane %v5255_v45, 2  ;;  %v16839_v41 = vld [vmem:[#allocation191_spill] sm:$0xff] }
 0x41a   : > { %v5313_v42 = vrot.slane %v5256_v52, 2  ;;  %v13838_v0 = vadd.f32 %v16837_v5, %v4568_v35  ;;  %5850 = vrot.lane.b32.xlu1 %v5811_v44, %s7340_s24  ;;  %v5813_v33 = vmul.f32 %v13243_v32, %v13658_v22  ;;  %v5812_v40 = vmul.f32 %v13264_v16, %v13658_v22 }
 0x41b   : > { %5848 = vrot.lane.b32.xlu0 %v5810_v27, %s7340_s24  ;;  %v13847_v9 = vadd.f32 %v16838_v19, %v4571_v12  ;;  %v13850_v37 = vadd.f32 %v16839_v41, %v4570_v48  ;;  %v13853_v45 = vsel %vm929_vm1, %v5300_v13, %v5301_v8  ;;  %v13856_v5 = vsel %vm929_vm1, %v5306_v39, %v5308_v2  ;;  %v16844_v12 = vld [vmem:[#allocation10_spill] sm:$0xff]  ;;  %v16845_v41 = vld [vmem:[#allocation193_spill] sm:$0xff] }
 0x41c   : > { %16840 = vst [vmem:[#allocation226_spill] sm:$0xff] %v13853_v45  ;;  %16841 = vst [vmem:[#allocation156_spill] sm:$0xff] %v13856_v5  ;;  %v13858_v35 = vpop.permute.xlu1 %5206  ;;  %v13860_v52 = vpop.permute.xlu0 %5204  ;;  %v5310_v44 = vrot.slane %v5254_v25, 2  ;;  %v5316_v27 = vrot.slane %v5258_v46, 2  ;;  %v5318_v47 = vrot.slane %v5259_v3, 2  ;;  %v5257_v19 = vmul.f32 %v13264_v16, %v13638_v60  ;;  %v16848_v5 = vld [vmem:[#allocation211_spill] sm:$0xff] }
 0x41d   : > { %16842 = vst [vmem:[#allocation192_spill] sm:$0xff] %v13858_v35  ;;  %16843 = vst [vmem:[#allocation11_spill] sm:$0xff] %v13860_v52  ;;  %v13865_v48 = vadd.f32 %v16844_v12, %v4573_v6  ;;  %v13868_v8 = vadd.f32 %v16845_v41, %v4572_v59  ;;  %v13871_v13 = vsel %vm929_vm1, %v5305_v57, %v5306_v39  ;;  %v16849_v6 = vld [vmem:[#allocation212_spill] sm:$0xff]  ;;  %v13887_v57 = vstv %s13821_s23  ;;  %v16857_v45 = vld [vmem:[#allocation99_spill] sm:$0xff] }
 0x41e   : > { %16846 = vst [vmem:[#allocation256_spill] sm:$0xff] %v13871_v13  ;;  %v13874_v2 = vsel %vm929_vm1, %v5311_v21, %v5313_v42  ;;  %v4575_v25 = vadd.f32 %v16848_v5, %v13684_v30  ;;  %5854 = vrot.lane.b32.xlu1 %v5813_v33, %s7340_s24  ;;  %v5815_v46 = vmul.f32 %v13271_v51, %v13658_v22  ;;  %v5315_v12 = vrot.slane %v5257_v19, 2 }
 0x41f   : > { %16847 = vst [vmem:[#allocation90_spill] sm:$0xff] %v13874_v2  ;;  %5852 = vrot.lane.b32.xlu0 %v5812_v40, %s7340_s24  ;;  %v5814_v3 = vmul.f32 %v13284_v10, %v13658_v22  ;;  %v4574_v39 = vadd.f32 %v16849_v6, %v13688_v26  ;;  %v5261_v42 = vmul.f32 %v13271_v51, %v13638_v60 }
 0x420   : > { %v5262_v30 = vmul.f32 %v13585_v23, %v13638_v60  ;;  %v13893_v59 = vpop.permute.xlu1 %5454  ;;  %v13895_v40 = vpop.permute.xlu0 %5452  ;;  %v13898_v33 = vsel %vm929_vm1, %v5310_v44, %v5311_v21  ;;  %v13901_v5 = vsel %vm929_vm1, %v5316_v27, %v5318_v47  ;;  %v5260_v26 = vmul.f32 %v13284_v10, %v13638_v60 }
 0x421   : > { %16850 = vst [vmem:[#allocation31_spill] sm:$0xff] %v13893_v59  ;;  %16851 = vst [vmem:[#allocation157_spill] sm:$0xff] %v13895_v40  ;;  %v5817_v41 = vmul.f32 %v12930_v56, %v13658_v22  ;;  %v5816_v6 = vmul.f32 %v16698_v62, %v13658_v22  ;;  %v5264_v2 = vmul.f32 %v12930_v56, %v13638_v60  ;;  %v16855_v56 = vld [vmem:[#allocation203_spill] sm:$0xff]  ;;  %v5321_v40 = vrot.slane %v5261_v42, 2 }
 0x422   : > { %16852 = vst [vmem:[#allocation73_spill] sm:$0xff] %v13898_v33  ;;  %16853 = vst [vmem:[#allocation77_spill] sm:$0xff] %v13901_v5  ;;  %v5265_v21 = vmul.f32 %v13598_v55, %v13638_v60  ;;  %5858 = vrot.lane.b32.xlu1 %v5815_v46, %s7340_s24  ;;  %v6025_v44 = vmul.f32 %v13108_v17, %v13887_v57  ;;  %v6026_v47 = vmul.f32 %v13379_v15, %v13887_v57  ;;  %v16854_v5 = vld [vmem:[#allocation20_spill] sm:$0xff]  ;;  %v16856_v46 = vld [vmem:[#allocation7_spill] sm:$0xff] }
 0x423   : > { %5856 = vrot.lane.b32.xlu0 %v5814_v3, %s7340_s24  ;;  %v6024_v19 = vmul.f32 %v13115_v4, %v13887_v57  ;;  %v13922_v33 = vadd.f32 %v16854_v5, %v4575_v25  ;;  %v13925_v13 = vadd.f32 %v16855_v56, %v4574_v39  ;;  %v5323_v59 = vrot.slane %v5262_v30, 2  ;;  %v16867_v56 = vld [vmem:[#allocation23_spill] sm:$0xff] }
 0x424   : > { %v4577_v3 = vadd.f32 %v16856_v46, %v13710_v36  ;;  %v4576_v17 = vadd.f32 %v16857_v45, %v13714_v31  ;;  %v13931_v52 = vpop.permute.xlu1 %5458  ;;  %v13933_v35 = vpop.permute.xlu0 %5456  ;;  %v13936_v4 = vsel %vm929_vm1, %v5315_v12, %v5316_v27  ;;  %v5263_v25 = vmul.f32 %v16698_v62, %v13638_v60 }
 0x425   : > { %16858 = vst [vmem:[#allocation94_spill] sm:$0xff] %v13931_v52  ;;  %16859 = vst [vmem:[#allocation194_spill] sm:$0xff] %v13933_v35  ;;  %v5819_v39 = vmul.f32 %v13658_v22, %v13628_v58  ;;  %v5320_v42 = vrot.slane %v5260_v26, 2  ;;  %v5326_v30 = vrot.slane %v5264_v2, 2  ;;  %v5328_v5 = vrot.slane %v5265_v21, 2  ;;  %v16862_v26 = vld [vmem:[#allocation101_spill] sm:$0xff] }
 0x426   : > { %16860 = vst [vmem:[#allocation12_spill] sm:$0xff] %v13936_v4  ;;  %5862 = vrot.lane.b32.xlu1 %v5817_v41, %s7340_s24  ;;  %v5818_v36 = vmul.f32 %v13658_v22, %v13631_v54  ;;  %v6073_v31 = vrot.slane %v6025_v44, 1  ;;  %v6075_v45 = vrot.slane %v6026_v47, 1  ;;  %v6072_v27 = vrot.slane %v6024_v19, 1  ;;  %v16863_v22 = vld [vmem:[#allocation103_spill] sm:$0xff] }
 0x427   : > { %5860 = vrot.lane.b32.xlu0 %v5816_v6, %s7340_s24  ;;  %v6028_v12 = vmul.f32 %v13137_v18, %v13887_v57  ;;  %v6029_v62 = vmul.f32 %v13434_v28, %v13887_v57  ;;  %v6027_v60 = vmul.f32 %v13144_v49, %v13887_v57  ;;  %v13953_v2 = vsel %vm929_vm1, %v5321_v40, %v5323_v59  ;;  %v16864_v21 = vld [vmem:[#allocation207_spill] sm:$0xff] }
 0x428   : > { %16861 = vst [vmem:[#allocation38_spill] sm:$0xff] %v13953_v2  ;;  %v4579_v41 = vadd.f32 %v16862_v26, %v13726_v11  ;;  %v4578_v6 = vadd.f32 %v16863_v22, %v13738_v29  ;;  %v4611_v44 = vadd.f32 %v16864_v21, %v4577_v3  ;;  %v13960_v47 = vpop.permute.xlu1 %5462  ;;  %v13962_v18 = vpop.permute.xlu0 %5460  ;;  %v5325_v19 = vrot.slane %v5263_v25, 2  ;;  %v14261_v35 = vld [vmem:[%s7384_s21 + $0x170] sm:$0xff] }
 0x429   : > { %16865 = vst [vmem:[#allocation14_spill] sm:$0xff] %v13960_v47  ;;  %16866 = vst [vmem:[#allocation160_spill] sm:$0xff] %v13962_v18  ;;  %v4610_v46 = vadd.f32 %v16867_v56, %v4576_v17  ;;  %v6031_v49 = vmul.f32 %v16818_v63, %v13887_v57  ;;  %v13968_v59 = vsel %vm929_vm1, %v5320_v42, %v5321_v40  ;;  %v6078_v25 = vrot.slane %v6028_v12, 1  ;;  %v16869_v42 = vld [vmem:[#allocation223_spill] sm:$0xff] }
 0x42a   : > { %16868 = vst [vmem:[#allocation84_spill] sm:$0xff] %v13968_v59  ;;  %v13971_v11 = vsel %vm929_vm1, %v5326_v30, %v5328_v5  ;;  %5866 = vrot.lane.b32.xlu1 %v5819_v39, %s7340_s24  ;;  %v6076_v29 = vsel %vm498_vm0, %v6073_v31, %v6075_v45  ;;  %v6074_v3 = vsel %vm498_vm0, %v6072_v27, %v6073_v31  ;;  %v6080_v26 = vrot.slane %v6029_v62, 1  ;;  %v16870_v39 = vld [vmem:[#allocation213_spill] sm:$0xff]  ;;  %v16875_v62 = vld [vmem:[#allocation224_spill] sm:$0xff] }
 0x42b   : > { %5864 = vrot.lane.b32.xlu0 %v5818_v36, %s7340_s24  ;;  %v6032_v17 = vmul.f32 %v16822_v38, %v13887_v57  ;;  %v6077_v63 = vrot.slane %v6027_v60, 1  ;;  %v6030_v40 = vmul.f32 %v16819_v20, %v13887_v57  ;;  %v13983_v5 = vadd.f32 %v16869_v42, %v13754_v53  ;;  %v16871_v36 = vld [vmem:[#allocation26_spill] sm:$0xff]  ;;  %v16876_v60 = vld [vmem:[#allocation229_spill] sm:$0xff]  ;;  %16930 = vst [vmem:[#allocation117_spill] sm:$0xff] %v14261_v35 }
 0x42c   : > { %v13986_v22 = vadd.f32 %v16870_v39, %v4579_v41  ;;  %v13989_v45 = vadd.f32 %v16871_v36, %v4578_v6  ;;  %v13991_v31 = vpop.permute.xlu1 %5466  ;;  %v13993_v27 = vpop.permute.xlu0 %5464  ;;  %v13996_v12 = vsel %vm929_vm1, %v5325_v19, %v5326_v30  ;;  %v4696_v20 = vadd.f32 %v16875_v62, %v13761_v61  ;;  %v16877_v41 = vld [vmem:[#allocation230_spill] sm:$0xff]  ;;  %v16878_v19 = vld [vmem:[#allocation232_spill] sm:$0xff]  ;;  %v16881_v36 = vld [vmem:[#allocation243_spill] sm:$0xff] }
 0x42d   : > { %16872 = vst [vmem:[#allocation162_spill] sm:$0xff] %v13991_v31  ;;  %16873 = vst [vmem:[#allocation163_spill] sm:$0xff] %v13993_v27  ;;  %v14002_v53 = vadd.f32 %v16876_v60, %v13785_v24  ;;  %v14006_v21 = vadd.f32 %v16877_v41, %v13788_v43  ;;  %v6083_v6 = vrot.slane %v6031_v49, 1  ;;  %v6085_v56 = vrot.slane %v6032_v17, 1 }
 0x42e   : > { %16874 = vst [vmem:[#allocation199_spill] sm:$0xff] %v13996_v12  ;;  %6114 = vrot.lane.b32.xlu1 %v6076_v29, %s7339_s22  ;;  %v6034_v30 = vmul.f32 %v13211_v50, %v13887_v57  ;;  %v6035_v61 = vmul.f32 %v13513_v1, %v13887_v57  ;;  %v6033_v24 = vmul.f32 %v13227_v7, %v13887_v57  ;;  %v6082_v29 = vrot.slane %v6030_v40, 1  ;;  %v16880_v50 = vld [vmem:[#allocation242_spill] sm:$0xff] }
 0x42f   : > { %6112 = vrot.lane.b32.xlu0 %v6074_v3, %s7339_s22  ;;  %v14018_v42 = vadd.f32 %v16878_v19, %v13809_v14  ;;  %v6081_v43 = vsel %vm498_vm0, %v6078_v25, %v6080_v26  ;;  %v6079_v49 = vsel %vm498_vm0, %v6077_v63, %v6078_v25  ;;  %v16879_v3 = vld [vmem:[#allocation234_spill] sm:$0xff]  ;;  %v14028_v39 = vadd.f32 %v16880_v50, %v13847_v9 }
 0x430   : > { %v14024_v17 = vadd.f32 %v16879_v3, %v13838_v0  ;;  %v14032_v7 = vadd.f32 %v16881_v36, %v13850_v37  ;;  %v16882_v14 = vld [vmem:[#allocation238_spill] sm:$0xff]  ;;  %v14038_v26 = vpop.permute.xlu1 %5470  ;;  %v14040_v25 = vpop.permute.xlu0 %5468  ;;  %v6037_v9 = vmul.f32 %v13243_v32, %v13887_v57  ;;  %v6038_v40 = vmul.f32 %v13531_v34, %v13887_v57 }
 0x431   : > { %v14036_v62 = vadd.f32 %v16882_v14, %v13865_v48  ;;  %16883 = vst [vmem:[#allocation15_spill] sm:$0xff] %v14038_v26  ;;  %16884 = vst [vmem:[#allocation70_spill] sm:$0xff] %v14040_v25  ;;  %v16885_v63 = vld [vmem:[#allocation246_spill] sm:$0xff]  ;;  %v6036_v37 = vmul.f32 %v13264_v16, %v13887_v57  ;;  %v6086_v48 = vsel %vm498_vm0, %v6083_v6, %v6085_v56  ;;  %v6088_v60 = vrot.slane %v6034_v30, 1  ;;  %v16887_v30 = vld [vmem:[#allocation251_spill] sm:$0xff] }
 0x432   : > { %v14044_v0 = vadd.f32 %v16885_v63, %v13868_v8  ;;  %6118 = vrot.lane.b32.xlu1 %v6081_v43, %s7339_s22  ;;  %v6090_v8 = vrot.slane %v6035_v61, 1  ;;  %v6087_v41 = vrot.slane %v6033_v24, 1  ;;  %v6084_v32 = vsel %vm498_vm0, %v6082_v29, %v6083_v6  ;;  %v16888_v24 = vld [vmem:[#allocation254_spill] sm:$0xff]  ;;  %v16889_v6 = vld [vmem:[#allocation24_spill] sm:$0xff] }
 0x433   : > { %6116 = vrot.lane.b32.xlu0 %v6079_v49, %s7339_s22  ;;  %v6040_v19 = vmul.f32 %v13271_v51, %v13887_v57  ;;  %v6041_v16 = vmul.f32 %v13585_v23, %v13887_v57  ;;  %v6039_v43 = vmul.f32 %v13284_v10, %v13887_v57  ;;  %v16886_v49 = vld [vmem:[#allocation240_spill] sm:$0xff]  ;;  %v14072_v61 = vadd.f32 %v16887_v30, %v13925_v13 }
 0x434   : > { %v14068_v56 = vadd.f32 %v16886_v49, %v13922_v33  ;;  %v14075_v3 = vadd.f32 %v16888_v24, %v4611_v44  ;;  %v14078_v29 = vadd.f32 %v16889_v6, %v4610_v46  ;;  %v14080_v51 = vpop.permute.xlu1 %5474  ;;  %v14082_v50 = vpop.permute.xlu0 %5472  ;;  %v6093_v10 = vrot.slane %v6037_v9, 1  ;;  %v14085_v14 = vld [vmem:[%s7384_s21 + $0x1b8] sm:$0xff]  ;;  %v14096_v49 = vld [vmem:[%s7384_s21 + $0x1b0] sm:$0xff] }
 0x435   : > { %16890 = vst [vmem:[#allocation164_spill] sm:$0xff] %v14080_v51  ;;  %16891 = vst [vmem:[#allocation48_spill] sm:$0xff] %v14082_v50  ;;  %v6095_v36 = vrot.slane %v6038_v40, 1  ;;  %v6092_v33 = vrot.slane %v6036_v37, 1  ;;  %v6043_v13 = vmul.f32 %v14085_v14, %v13887_v57  ;;  %v6091_v44 = vsel %vm498_vm0, %v6088_v60, %v6090_v8  ;;  %v14101_v24 = vld [vmem:[%s7384_s21 + $0x1d8] sm:$0x3] }
 0x436   : > { %16892 = vst [vmem:[#allocation119_spill] sm:$0xff] %v14085_v14  ;;  %6122 = vrot.lane.b32.xlu1 %v6086_v48, %s7339_s22  ;;  %v6089_v46 = vsel %vm498_vm0, %v6087_v41, %v6088_v60  ;;  %v6044_v63 = vmul.f32 %v13598_v55, %v13887_v57  ;;  %v6098_v9 = vrot.slane %v6040_v19, 1  ;;  %v6100_v40 = vrot.slane %v6041_v16, 1  ;;  %16893 = vst [vmem:[#allocation200_spill] sm:$0xff] %v14096_v49  ;;  %v16894_v48 = vld [vmem:[#allocation104_spill] sm:$0xff]  ;;  %v16895_v60 = vld [vmem:[#allocation105_spill] sm:$0xff] }
 0x437   : > { %6120 = vrot.lane.b32.xlu0 %v6084_v32, %s7339_s22  ;;  %v6097_v37 = vrot.slane %v6039_v43, 1  ;;  %v6042_v30 = vmul.f32 %v14096_v49, %v13887_v57  ;;  %v14105_v8 = vadd.f32 %v16894_v48, %v13986_v22  ;;  %v14109_v41 = vadd.f32 %v16895_v60, %v13989_v45  ;;  %v16896_v32 = vld [vmem:[#allocation39_spill] sm:$0xff] }
 0x438   : > { %v4795_v19 = vadd.f32 %v16896_v32, %v13983_v5  ;;  %v16897_v16 = vld [vmem:[#allocation47_spill] sm:$0xff]  ;;  %v14114_v6 = vpop.permute.xlu1 %5478  ;;  %v14116_v59 = vpop.permute.xlu0 %5476  ;;  %v6096_v2 = vsel %vm498_vm0, %v6093_v10, %v6095_v36  ;;  %v6094_v50 = vsel %vm498_vm0, %v6092_v33, %v6093_v10  ;;  %v6103_v51 = vrot.slane %v6043_v13, 1  ;;  %v16902_v32 = vld [vmem:[#allocation141_spill] sm:$0xff] }
 0x439   : > { %v4794_v43 = vadd.f32 %v16897_v16, %v4696_v20  ;;  %16898 = vst [vmem:[#allocation55_spill] sm:$0xff] %v14114_v6  ;;  %16899 = vst [vmem:[#allocation165_spill] sm:$0xff] %v14116_v59  ;;  %v14121_v22 = vstv %s14052_s25  ;;  %v6105_v45 = vrot.slane %v6044_v63, 1  ;;  %v6046_v5 = vmul.f32 %v13887_v57, %v13628_v58  ;;  %v16901_v63 = vld [vmem:[#allocation53_spill] sm:$0xff]  ;;  %v16903_v59 = vld [vmem:[#allocation206_spill] sm:$0xff] }
 0x43a   : > { %6126 = vrot.lane.b32.xlu1 %v6091_v44, %s7339_s22  ;;  %v6047_v20 = vmul.f32 %v13887_v57, %v14101_v24  ;;  %v14130_v48 = vstv %s14057_s26  ;;  %v6101_v10 = vsel %vm498_vm0, %v6098_v9, %v6100_v40  ;;  %v6099_v36 = vsel %vm498_vm0, %v6097_v37, %v6098_v9  ;;  %v16900_v44 = vld [vmem:[#allocation257_spill] sm:$0xff]  ;;  %v14151_v9 = vld [vmem:[%s7384_s21 + $0x128] sm:$0xff] }
 0x43b   : > { %6124 = vrot.lane.b32.xlu0 %v6089_v46, %s7339_s22  ;;  %v6102_v33 = vrot.slane %v6042_v30, 1  ;;  %v6045_v13 = vmul.f32 %v13887_v57, %v13631_v54  ;;  %v4797_v46 = vadd.f32 %v16900_v44, %v14002_v53  ;;  %v4796_v60 = vadd.f32 %v16901_v63, %v14006_v21  ;;  %v14162_v37 = vld [vmem:[%s7384_s21 + $0x120] sm:$0xff]  ;;  %v16908_v44 = vld [vmem:[#allocation219_spill] sm:$0xff] }
 0x43c   : > { %v14141_v16 = vadd.f32 %v16902_v32, %v4795_v19  ;;  %v14144_v6 = vadd.f32 %v16903_v59, %v4794_v43  ;;  %v14146_v25 = vpop.permute.xlu1 %5482  ;;  %v14148_v40 = vpop.permute.xlu0 %5480  ;;  %v6179_v57 = vmul.f32 %v14151_v9, %v14130_v48  ;;  %v6180_v53 = vmul.f32 %v13379_v15, %v14130_v48  ;;  %v16909_v32 = vld [vmem:[#allocation258_spill] sm:$0xff] }
 0x43d   : > { %16904 = vst [vmem:[#allocation96_spill] sm:$0xff] %v14146_v25  ;;  %16905 = vst [vmem:[#allocation166_spill] sm:$0xff] %v14148_v40  ;;  %v14159_v21 = vmul.f32 %v14151_v9, %v14121_v22  ;;  %v14166_v59 = vmul.f32 %v14162_v37, %v14121_v22  ;;  %v6106_v30 = vsel %vm498_vm0, %v6103_v51, %v6105_v45  ;;  %v6108_v19 = vrot.slane %v6046_v5, 1  ;;  %v16959_v25 = vld [vmem:[#allocation71_spill] sm:$0xff] }
 0x43e   : > { %6130 = vrot.lane.b32.xlu1 %v6096_v2, %s7339_s22  ;;  %v6110_v15 = vrot.slane %v6047_v20, 1  ;;  %v6178_v43 = vmul.f32 %v14162_v37, %v14130_v48  ;;  %v4799_v63 = vadd.f32 %v16908_v44, %v14018_v42  ;;  %v4798_v26 = vadd.f32 %v16909_v32, %v14024_v17  ;;  %v16910_v2 = vld [vmem:[#allocation143_spill] sm:$0xff]  ;;  %v14189_v20 = vld [vmem:[%s7384_s21 + $0x140] sm:$0xff]  ;;  %v14196_v17 = vld [vmem:[%s7384_s21 + $0x138] sm:$0xff] }
 0x43f   : > { %16906 = vst [vmem:[#allocation76_spill] sm:$0xff] %v14159_v21  ;;  %16907 = vst [vmem:[#allocation122_spill] sm:$0xff] %v14166_v59  ;;  %6128 = vrot.lane.b32.xlu0 %v6094_v50, %s7339_s22  ;;  %v6104_v4 = vsel %vm498_vm0, %v6102_v33, %v6103_v51  ;;  %v6107_v27 = vrot.slane %v6045_v13, 1  ;;  %v14179_v31 = vadd.f32 %v16910_v2, %v4797_v46  ;;  %v16911_v50 = vld [vmem:[#allocation249_spill] sm:$0xff]  ;;  %v6227_v33 = vrot.slane %v6179_v57, 1  ;;  %v16917_v44 = vld [vmem:[#allocation50_spill] sm:$0xff] }
 0x440   : > { %v14182_v18 = vadd.f32 %v16911_v50, %v4796_v60  ;;  %v14184_v45 = vpop.permute.xlu1 %5608  ;;  %v14186_v5 = vpop.permute.xlu0 %5606  ;;  %v14193_v42 = vmul.f32 %v14189_v20, %v14121_v22  ;;  %16915 = vst [vmem:[#allocation21_spill] sm:$0xff] %v14196_v17  ;;  %v14200_v51 = vmul.f32 %v14196_v17, %v14121_v22  ;;  %v6229_v13 = vrot.slane %v6180_v53, 1  ;;  %v16918_v53 = vld [vmem:[#allocation263_spill] sm:$0xff]  ;;  %v16927_v21 = vld [vmem:[#allocation210_spill] sm:$0xff] }
 0x441   : > { %16912 = vst [vmem:[#allocation100_spill] sm:$0xff] %v14184_v45  ;;  %16913 = vst [vmem:[#allocation217_spill] sm:$0xff] %v14186_v5  ;;  %v6182_v46 = vmul.f32 %v14189_v20, %v14130_v48  ;;  %v6183_v60 = vmul.f32 %v13434_v28, %v14130_v48  ;;  %v4801_v32 = vadd.f32 %v16917_v44, %v14028_v39  ;;  %v6226_v50 = vrot.slane %v6178_v43, 1  ;;  %v16920_v28 = vld [vmem:[#allocation151_spill] sm:$0xff]  ;;  %v16949_v5 = vld [vmem:[#allocation68_spill] sm:$0xff] }
 0x442   : > { %16914 = vst [vmem:[#allocation187_spill] sm:$0xff] %v14193_v42  ;;  %16916 = vst [vmem:[#allocation106_spill] sm:$0xff] %v14200_v51  ;;  %6134 = vrot.lane.b32.xlu1 %v6101_v10, %s7339_s22  ;;  %v6111_v2 = vsel %vm498_vm0, %v6108_v19, %v6110_v15  ;;  %v6181_v57 = vmul.f32 %v14196_v17, %v14130_v48  ;;  %v4800_v51 = vadd.f32 %v16918_v53, %v14032_v7  ;;  %v16919_v42 = vld [vmem:[#allocation60_spill] sm:$0xff] }
 0x443   : > { %6132 = vrot.lane.b32.xlu0 %v6099_v36, %s7339_s22  ;;  %v14216_v47 = vadd.f32 %v16919_v42, %v4799_v63  ;;  %v14219_v59 = vadd.f32 %v16920_v28, %v4798_v26  ;;  %v6109_v39 = vsel %vm498_vm0, %v6107_v27, %v6108_v19  ;;  %v14227_v15 = vld [vmem:[%s7384_s21 + $0x158] sm:$0xff]  ;;  %v6186_v7 = vmul.f32 %v16822_v38, %v14130_v48  ;;  %v14238_v26 = vld [vmem:[%s7384_s21 + $0x150] sm:$0xff] }
 0x444   : > { %v14222_v10 = vpop.permute.xlu1 %5612  ;;  %v14224_v36 = vpop.permute.xlu0 %5610  ;;  %v6185_v43 = vmul.f32 %v14227_v15, %v14130_v48  ;;  %v14235_v63 = vmul.f32 %v14227_v15, %v14121_v22  ;;  %16924 = vst [vmem:[#allocation110_spill] sm:$0xff] %v14238_v26  ;;  %v14242_v27 = vmul.f32 %v14238_v26, %v14121_v22  ;;  %v6230_v19 = vsel %vm498_vm0, %v6227_v33, %v6229_v13  ;;  %v16926_v38 = vld [vmem:[#allocation264_spill] sm:$0xff]  ;;  %v16928_v13 = vld [vmem:[#allocation186_spill] sm:$0xff] }
 0x445   : > { %16921 = vst [vmem:[#allocation107_spill] sm:$0xff] %v14222_v10  ;;  %16922 = vst [vmem:[#allocation108_spill] sm:$0xff] %v14224_v36  ;;  %v6232_v42 = vrot.slane %v6182_v46, 1  ;;  %v6234_v44 = vrot.slane %v6183_v60, 1  ;;  %v6184_v53 = vmul.f32 %v14238_v26, %v14130_v48  ;;  %v4803_v28 = vadd.f32 %v16926_v38, %v14036_v62  ;;  %v16929_v60 = vld [vmem:[#allocation253_spill] sm:$0xff] }
 0x446   : > { %16923 = vst [vmem:[#allocation109_spill] sm:$0xff] %v14235_v63  ;;  %16925 = vst [vmem:[#allocation111_spill] sm:$0xff] %v14242_v27  ;;  %v14250_v36 = vadd.f32 %v16927_v21, %v4801_v32  ;;  %6138 = vrot.lane.b32.xlu1 %v6106_v30, %s7339_s22  ;;  %v6228_v63 = vsel %vm498_vm0, %v6226_v50, %v6227_v33  ;;  %v6231_v27 = vrot.slane %v6181_v57, 1  ;;  %v14268_v21 = vld [vmem:[%s7384_s21 + $0x168] sm:$0xff]  ;;  %v16936_v57 = vld [vmem:[#allocation8_spill] sm:$0xff] }
 0x447   : > { %6136 = vrot.lane.b32.xlu0 %v6104_v4, %s7339_s22  ;;  %v4802_v46 = vadd.f32 %v16928_v13, %v14044_v0  ;;  %v14258_v10 = vadd.f32 %v16929_v60, %v4800_v51  ;;  %v14265_v62 = vmul.f32 %v14261_v35, %v14121_v22  ;;  %16932 = vst [vmem:[#allocation19_spill] sm:$0xff] %v14268_v21  ;;  %v6237_v0 = vrot.slane %v6185_v43, 1 }
 0x448   : > { %v14272_v4 = vmul.f32 %v14268_v21, %v14121_v22  ;;  %v14274_v30 = vpop.permute.xlu1 %5616  ;;  %v14276_v33 = vpop.permute.xlu0 %5614  ;;  %v6239_v51 = vrot.slane %v6186_v7, 1  ;;  %v6188_v32 = vmul.f32 %v14261_v35, %v14130_v48  ;;  %v6189_v50 = vmul.f32 %v13513_v1, %v14130_v48  ;;  %v16938_v7 = vld [vmem:[#allocation65_spill] sm:$0xff] }
 0x449   : > { %16931 = vst [vmem:[#allocation114_spill] sm:$0xff] %v14265_v62  ;;  %16934 = vst [vmem:[#allocation218_spill] sm:$0xff] %v14274_v30  ;;  %v4805_v38 = vadd.f32 %v16936_v57, %v14068_v56  ;;  %v6235_v13 = vsel %vm498_vm0, %v6232_v42, %v6234_v44  ;;  %v6236_v60 = vrot.slane %v6184_v53, 1  ;;  %v16937_v62 = vld [vmem:[#allocation58_spill] sm:$0xff]  ;;  %v6233_v30 = vsel %vm498_vm0, %v6231_v27, %v6232_v42 }
 0x44a   : > { %16933 = vst [vmem:[#allocation118_spill] sm:$0xff] %v14272_v4  ;;  %16935 = vst [vmem:[#allocation33_spill] sm:$0xff] %v14276_v33  ;;  %v6187_v4 = vmul.f32 %v14268_v21, %v14130_v48  ;;  %v4804_v43 = vadd.f32 %v16937_v62, %v14072_v61  ;;  %v14290_v33 = vadd.f32 %v16938_v7, %v4803_v28  ;;  %6142 = vrot.lane.b32.xlu1 %v6111_v2, %s7339_s22  ;;  %v16939_v56 = vld [vmem:[#allocation154_spill] sm:$0xff]  ;;  %v14315_v62 = vld [vmem:[%s7384_s21 + $0x180] sm:$0xff] }
 0x44b   : > { %6140 = vrot.lane.b32.xlu0 %v6109_v39, %s7339_s22  ;;  %v14296_v57 = vadd.f32 %v16939_v56, %v4802_v46  ;;  %v14299_v44 = vld [vmem:[%s7384_s21 + $0x188] sm:$0xff]  ;;  %v6192_v61 = vmul.f32 %v13531_v34, %v14130_v48  ;;  %v6240_v27 = vsel %vm498_vm0, %v6237_v0, %v6239_v51  ;;  %v6242_v42 = vrot.slane %v6188_v32, 1  ;;  %16944 = vst [vmem:[#allocation43_spill] sm:$0xff] %v14315_v62  ;;  %v16947_v51 = vld [vmem:[#allocation136_spill] sm:$0xff] }
 0x44c   : > { %16940 = vst [vmem:[#allocation25_spill] sm:$0xff] %v14299_v44  ;;  %v6191_v53 = vmul.f32 %v14299_v44, %v14130_v48  ;;  %v14307_v28 = vmul.f32 %v14299_v44, %v14121_v22  ;;  %v14309_v2 = vpop.permute.xlu1 %5620  ;;  %v14311_v39 = vpop.permute.xlu0 %5618  ;;  %v6244_v46 = vrot.slane %v6189_v50, 1  ;;  %v14319_v7 = vmul.f32 %v14315_v62, %v14121_v22  ;;  %v16946_v34 = vld [vmem:[#allocation66_spill] sm:$0xff]  ;;  %v16948_v50 = vld [vmem:[#allocation9_spill] sm:$0xff] }
 0x44d   : > { %16942 = vst [vmem:[#allocation36_spill] sm:$0xff] %v14309_v2  ;;  %16943 = vst [vmem:[#allocation42_spill] sm:$0xff] %v14311_v39  ;;  %v14322_v56 = vadd.f32 %v16946_v34, %v4805_v38  ;;  %v6241_v52 = vrot.slane %v6187_v4, 1  ;;  %v6190_v39 = vmul.f32 %v14315_v62, %v14130_v48  ;;  %v4807_v32 = vadd.f32 %v16947_v51, %v14075_v3  ;;  %v14339_v38 = vld [vmem:[%s7384_s21 + $0x1a0] sm:$0xff] }
 0x44e   : > { %16941 = vst [vmem:[#allocation233_spill] sm:$0xff] %v14307_v28  ;;  %16945 = vst [vmem:[#allocation44_spill] sm:$0xff] %v14319_v7  ;;  %v6238_v28 = vsel %vm498_vm0, %v6236_v60, %v6237_v0  ;;  %v4806_v2 = vadd.f32 %v16948_v50, %v14078_v29  ;;  %v14332_v45 = vadd.f32 %v16949_v5, %v4804_v43  ;;  %6268 = vrot.lane.b32.xlu1 %v6230_v19, %s7340_s24  ;;  %v14351_v43 = vld [vmem:[%s7384_s21 + $0x198] sm:$0xff]  ;;  %v16956_v34 = vld [vmem:[#allocation13_spill] sm:$0xff] }
 0x44f   : > { %6266 = vrot.lane.b32.xlu0 %v6228_v63, %s7340_s24  ;;  %v6247_v4 = vrot.slane %v6191_v53, 1  ;;  %v6249_v0 = vrot.slane %v6192_v61, 1  ;;  %16950 = vst [vmem:[#allocation78_spill] sm:$0xff] %v14339_v38  ;;  %v6194_v60 = vmul.f32 %v14339_v38, %v14130_v48  ;;  %v6195_v3 = vmul.f32 %v13585_v23, %v14130_v48  ;;  %16953 = vst [vmem:[#allocation28_spill] sm:$0xff] %v14351_v43  ;;  %v16957_v50 = vld [vmem:[#allocation198_spill] sm:$0xff] }
 0x450   : > { %v14345_v29 = vpop.permute.xlu1 %5624  ;;  %v14347_v5 = vpop.permute.xlu0 %5622  ;;  %v6245_v19 = vsel %vm498_vm0, %v6242_v42, %v6244_v46  ;;  %v6193_v63 = vmul.f32 %v14351_v43, %v14130_v48  ;;  %v14357_v53 = vmul.f32 %v14339_v38, %v14121_v22  ;;  %v14361_v61 = vmul.f32 %v14351_v43, %v14121_v22 }
 0x451   : > { %16951 = vst [vmem:[#allocation123_spill] sm:$0xff] %v14345_v29  ;;  %16952 = vst [vmem:[#allocation102_spill] sm:$0xff] %v14347_v5  ;;  %v4809_v51 = vadd.f32 %v16956_v34, %v14105_v8  ;;  %v4808_v7 = vadd.f32 %v16957_v50, %v14109_v41  ;;  %v6243_v46 = vsel %vm498_vm0, %v6241_v52, %v6242_v42  ;;  %v6246_v5 = vrot.slane %v6190_v39, 1  ;;  %v16958_v29 = vld [vmem:[#allocation69_spill] sm:$0xff]  ;;  %v16967_v50 = vld [vmem:[#allocation22_spill] sm:$0xff] }
 0x452   : > { %16954 = vst [vmem:[#allocation125_spill] sm:$0xff] %v14357_v53  ;;  %16955 = vst [vmem:[#allocation171_spill] sm:$0xff] %v14361_v61  ;;  %v14369_v40 = vadd.f32 %v16958_v29, %v4807_v32  ;;  %v14372_v12 = vadd.f32 %v16959_v25, %v4806_v2  ;;  %6272 = vrot.lane.b32.xlu1 %v6235_v13, %s7340_s24  ;;  %v14378_v61 = vmul.f32 %v14085_v14, %v14121_v22  ;;  %v16964_v32 = vld [vmem:[#allocation75_spill] sm:$0xff] }
 0x453   : > { %6270 = vrot.lane.b32.xlu0 %v6233_v30, %s7340_s24  ;;  %v6250_v8 = vsel %vm498_vm0, %v6247_v4, %v6249_v0  ;;  %v6252_v41 = vrot.slane %v6194_v60, 1  ;;  %v6254_v34 = vrot.slane %v6195_v3, 1  ;;  %v14383_v52 = vmul.f32 %v14096_v49, %v14121_v22  ;;  %v16965_v60 = vld [vmem:[#allocation79_spill] sm:$0xff] }
 0x454   : > { %16960 = vst [vmem:[#allocation126_spill] sm:$0xff] %v14378_v61  ;;  %v14385_v39 = vpop.permute.xlu1 %5628  ;;  %v14387_v25 = vpop.permute.xlu0 %5626  ;;  %v6251_v13 = vrot.slane %v6193_v63, 1  ;;  %v6197_v30 = vmul.f32 %v14085_v14, %v14130_v48  ;;  %v6198_v2 = vmul.f32 %v13598_v55, %v14130_v48  ;;  %v6196_v42 = vmul.f32 %v14096_v49, %v14130_v48  ;;  %v16968_v55 = vld [vmem:[#allocation34_spill] sm:$0xff] }
 0x455   : > { %16961 = vst [vmem:[#allocation116_spill] sm:$0xff] %v14383_v52  ;;  %16962 = vst [vmem:[#allocation127_spill] sm:$0xff] %v14385_v39  ;;  %v14396_v0 = vadd.f32 %v16964_v32, %v4809_v51  ;;  %v14399_v3 = vadd.f32 %v16965_v60, %v4808_v7  ;;  %v6248_v29 = vsel %vm498_vm0, %v6246_v5, %v6247_v4  ;;  %v14417_v7 = vstv %s14336_s27 }
 0x456   : > { %16963 = vst [vmem:[#allocation112_spill] sm:$0xff] %v14387_v25  ;;  %v14404_v63 = vmul.f32 %v14121_v22, %v13628_v58  ;;  %v14408_v52 = vadd.f32 %v16967_v50, %v14141_v16  ;;  %v14412_v61 = vadd.f32 %v16968_v55, %v14144_v6  ;;  %6276 = vrot.lane.b32.xlu1 %v6240_v27, %s7340_s24  ;;  %v6259_v60 = vrot.slane %v6198_v2, 1  ;;  %v14457_v2 = vld [vmem:[%s7384_s21 + $0x148] sm:$0x3] }
 0x457   : > { %6274 = vrot.lane.b32.xlu0 %v6238_v28, %s7340_s24  ;;  %v14421_v4 = vmul.f32 %v14121_v22, %v13631_v54  ;;  %v6255_v5 = vsel %vm498_vm0, %v6252_v41, %v6254_v34  ;;  %v6200_v16 = vmul.f32 %v14130_v48, %v13628_v58  ;;  %v6201_v6 = vmul.f32 %v14130_v48, %v14101_v24  ;;  %v14438_v58 = vld [vmem:[%s7384_s21 + $0x130] sm:$0x3] }
 0x458   : > { %16966 = vst [vmem:[#allocation51_spill] sm:$0xff] %v14404_v63  ;;  %v6199_v51 = vmul.f32 %v14130_v48, %v13631_v54  ;;  %v14430_v27 = vpop.permute.xlu1 %5632  ;;  %v14432_v28 = vpop.permute.xlu0 %5630  ;;  %v6253_v32 = vsel %vm498_vm0, %v6251_v13, %v6252_v41  ;;  %v6257_v22 = vrot.slane %v6197_v30, 1  ;;  %v6256_v50 = vrot.slane %v6196_v42, 1  ;;  %16972 = vst [vmem:[#allocation32_spill] sm:$0xff] %v14438_v58  ;;  %v16974_v13 = vld [vmem:[#allocation40_spill] sm:$0xff] }
 0x459   : > { %16969 = vst [vmem:[#allocation128_spill] sm:$0xff] %v14421_v4  ;;  %16970 = vst [vmem:[#allocation179_spill] sm:$0xff] %v14430_v27  ;;  %v6455_v34 = vmul.f32 %v14151_v9, %v14417_v7  ;;  %v6456_v55 = vmul.f32 %v14438_v58, %v14417_v7  ;;  %v6454_v54 = vmul.f32 %v14162_v37, %v14417_v7  ;;  %v6262_v27 = vrot.slane %v6200_v16, 1 }
 0x45a   : > { %16971 = vst [vmem:[#allocation129_spill] sm:$0xff] %v14432_v28  ;;  %v6458_v48 = vmul.f32 %v14189_v20, %v14417_v7  ;;  %v16973_v28 = vld [vmem:[#allocation35_spill] sm:$0xff]  ;;  %v14452_v30 = vadd.f32 %v16974_v13, %v14182_v18  ;;  %6280 = vrot.lane.b32.xlu1 %v6245_v19, %s7340_s24  ;;  %16975 = vst [vmem:[#allocation57_spill] sm:$0xff] %v14457_v2  ;;  %v6459_v42 = vmul.f32 %v14457_v2, %v14417_v7  ;;  %v16977_v19 = vld [vmem:[#allocation29_spill] sm:$0xff] }
 0x45b   : > { %v14448_v41 = vadd.f32 %v16973_v28, %v14179_v31  ;;  %6278 = vrot.lane.b32.xlu0 %v6243_v46, %s7340_s24  ;;  %v6264_v53 = vrot.slane %v6201_v6, 1  ;;  %v6261_v25 = vrot.slane %v6199_v51, 1  ;;  %v6457_v31 = vmul.f32 %v14196_v17, %v14417_v7  ;;  %v16976_v28 = vld [vmem:[#allocation216_spill] sm:$0xff] }
 0x45c   : > { %v14465_v18 = vadd.f32 %v16976_v28, %v14216_v47  ;;  %v14469_v13 = vadd.f32 %v16977_v19, %v14219_v59  ;;  %v14471_v46 = vpop.permute.xlu1 %5636  ;;  %v14473_v39 = vpop.permute.xlu0 %5634  ;;  %v6260_v16 = vsel %vm498_vm0, %v6257_v22, %v6259_v60  ;;  %v6258_v6 = vsel %vm498_vm0, %v6256_v50, %v6257_v22  ;;  %v14482_v28 = vld [vmem:[%s7384_s21 + $0x160] sm:$0x3] }
 0x45d   : > { %v6503_v51 = vrot.slane %v6455_v34, 2  ;;  %v6505_v4 = vrot.slane %v6456_v55, 2  ;;  %v6502_v63 = vrot.slane %v6454_v54, 2  ;;  %v6508_v17 = vrot.slane %v6458_v48, 2  ;;  %16978 = vst [vmem:[#allocation91_spill] sm:$0xff] %v14482_v28  ;;  %v16979_v60 = vld [vmem:[#allocation221_spill] sm:$0xff] }
 0x45e   : > { %6284 = vrot.lane.b32.xlu1 %v6250_v8, %s7340_s24  ;;  %v6510_v47 = vrot.slane %v6459_v42, 2  ;;  %v6461_v59 = vmul.f32 %v14227_v15, %v14417_v7  ;;  %v6462_v19 = vmul.f32 %v14482_v28, %v14417_v7  ;;  %v6460_v22 = vmul.f32 %v14238_v26, %v14417_v7  ;;  %v16980_v55 = vld [vmem:[#allocation41_spill] sm:$0xff] }
 0x45f   : > { %6282 = vrot.lane.b32.xlu0 %v6248_v29, %s7340_s24  ;;  %v14492_v50 = vadd.f32 %v16979_v60, %v14250_v36  ;;  %v6265_v8 = vsel %vm498_vm0, %v6262_v27, %v6264_v53  ;;  %v6263_v29 = vsel %vm498_vm0, %v6261_v25, %v6262_v27  ;;  %v6507_v34 = vrot.slane %v6457_v31, 2  ;;  %v16981_v25 = vld [vmem:[#allocation46_spill] sm:$0xff] }
 0x460   : > { %v14498_v54 = vadd.f32 %v16980_v55, %v14258_v10  ;;  %v14500_v48 = vpop.permute.xlu1 %5740  ;;  %v14502_v42 = vpop.permute.xlu0 %5738  ;;  %v6464_v26 = vmul.f32 %v14261_v35, %v14417_v7  ;;  %v6465_v36 = vmul.f32 %v13513_v1, %v14417_v7  ;;  %v6463_v53 = vmul.f32 %v14268_v21, %v14417_v7  ;;  %v16982_v10 = vld [vmem:[#allocation142_spill] sm:$0xff] }
 0x461   : > { %v14512_v27 = vadd.f32 %v16981_v25, %v14290_v33  ;;  %v14516_v31 = vadd.f32 %v16982_v10, %v14296_v57  ;;  %v14519_v60 = vsel %vm929_vm1, %v6503_v51, %v6505_v4  ;;  %v14522_v55 = vsel %vm929_vm1, %v6502_v63, %v6503_v51  ;;  %v14535_v4 = vld [vmem:[%s7384_s21 + $0x190] sm:$0x3]  ;;  %v16985_v10 = vld [vmem:[#allocation241_spill] sm:$0xff] }
 0x462   : > { %6288 = vrot.lane.b32.xlu1 %v6255_v5, %s7340_s24  ;;  %v14527_v1 = vsel %vm929_vm1, %v6508_v17, %v6510_v47  ;;  %v6513_v21 = vrot.slane %v6461_v59, 2  ;;  %v6515_v33 = vrot.slane %v6462_v19, 2  ;;  %v6512_v25 = vrot.slane %v6460_v22, 2  ;;  %16983 = vst [vmem:[#allocation184_spill] sm:$0xff] %v14535_v4  ;;  %v16984_v22 = vld [vmem:[#allocation54_spill] sm:$0xff] }
 0x463   : > { %6286 = vrot.lane.b32.xlu0 %v6253_v32, %s7340_s24  ;;  %v14530_v35 = vsel %vm929_vm1, %v6507_v34, %v6508_v17  ;;  %v6467_v57 = vmul.f32 %v14299_v44, %v14417_v7  ;;  %v6468_v63 = vmul.f32 %v14535_v4, %v14417_v7  ;;  %v6466_v5 = vmul.f32 %v14315_v62, %v14417_v7 }
 0x464   : > { %v14541_v32 = vpop.permute.xlu1 %5744  ;;  %v6518_v47 = vrot.slane %v6464_v26, 2  ;;  %v6520_v59 = vrot.slane %v6465_v36, 2  ;;  %v6517_v17 = vrot.slane %v6463_v53, 2  ;;  %v6470_v19 = vmul.f32 %v14339_v38, %v14417_v7  ;;  %v16986_v26 = vld [vmem:[#allocation150_spill] sm:$0xff]  ;;  %v16988_v53 = vld [vmem:[#allocation56_spill] sm:$0xff] }
 0x465   : > { %v14543_v51 = vpop.permute.xlu0 %5742  ;;  %v14549_v34 = vadd.f32 %v16984_v22, %v14322_v56  ;;  %v14553_v4 = vadd.f32 %v16985_v10, %v14332_v45  ;;  %v6471_v62 = vmul.f32 %v13585_v23, %v14417_v7  ;;  %v6469_v44 = vmul.f32 %v14351_v43, %v14417_v7 }
 0x466   : > { %v14561_v36 = vadd.f32 %v16986_v26, %v14369_v40  ;;  %6292 = vrot.lane.b32.xlu1 %v6260_v16, %s7340_s24  ;;  %v14566_v56 = vsel %vm929_vm1, %v6513_v21, %v6515_v33  ;;  %v14569_v45 = vsel %vm929_vm1, %v6512_v25, %v6513_v21  ;;  %v14574_v23 = vstv %s14488_s28 }
 0x467   : > { %6290 = vrot.lane.b32.xlu0 %v6258_v6, %s7340_s24  ;;  %v14578_v22 = vadd.f32 %v16988_v53, %v14372_v12  ;;  %v6523_v40 = vrot.slane %v6467_v57, 2  ;;  %v6525_v10 = vrot.slane %v6468_v63, 2  ;;  %v6522_v16 = vrot.slane %v6466_v5, 2  ;;  %v16990_v6 = vld [vmem:[#allocation61_spill] sm:$0xff]  ;;  %v16993_v12 = vld [vmem:[#allocation64_spill] sm:$0xff]  ;;  %v16994_v53 = vld [vmem:[#allocation250_spill] sm:$0xff] }
 0x468   : > { %16987 = vst [vmem:[#allocation130_spill] sm:$0xff] %v14561_v36  ;;  %v5085_v26 = vadd.f32 %v16990_v6, %v14396_v0  ;;  %v14582_v33 = vpop.permute.xlu1 %5748  ;;  %v14587_v21 = vsel %vm929_vm1, %v6518_v47, %v6520_v59  ;;  %v14590_v25 = vsel %vm929_vm1, %v6517_v17, %v6518_v47  ;;  %v6528_v38 = vrot.slane %v6470_v19, 2  ;;  %v14605_v59 = vld [vmem:[%s7384_s21 + $0x1c0] sm:$0x3] }
 0x469   : > { %16989 = vst [vmem:[#allocation131_spill] sm:$0xff] %v14578_v22  ;;  %16991 = vst [vmem:[#allocation190_spill] sm:$0xff] %v14582_v33  ;;  %v14584_v43 = vpop.permute.xlu0 %5746  ;;  %v5225_v57 = vadd.f32 %v16993_v12, %v14408_v52  ;;  %v6530_v63 = vrot.slane %v6471_v62, 2  ;;  %v6527_v5 = vrot.slane %v6469_v44, 2  ;;  %v14596_v0 = vmul.f32 %v14151_v9, %v14574_v23 }
 0x46a   : > { %16992 = vst [vmem:[#allocation248_spill] sm:$0xff] %v14584_v43  ;;  %v5084_v6 = vadd.f32 %v16994_v53, %v14399_v3  ;;  %6296 = vrot.lane.b32.xlu1 %v6265_v8, %s7340_s24  ;;  %v6473_v47 = vmul.f32 %v14085_v14, %v14417_v7  ;;  %16995 = vst [vmem:[#allocation132_spill] sm:$0xff] %v14605_v59  ;;  %v6474_v62 = vmul.f32 %v14605_v59, %v14417_v7 }
 0x46b   : > { %6294 = vrot.lane.b32.xlu0 %v6263_v29, %s7340_s24  ;;  %v14610_v44 = vsel %vm929_vm1, %v6523_v40, %v6525_v10  ;;  %v14613_v52 = vsel %vm929_vm1, %v6522_v16, %v6523_v40  ;;  %v6472_v3 = vmul.f32 %v14096_v49, %v14417_v7  ;;  %v5904_v8 = vmul.f32 %v14438_v58, %v14574_v23  ;;  %v16996_v29 = vld [vmem:[#allocation260_spill] sm:$0xff]  ;;  %v14626_v10 = vld [vmem:[%s7384_s21 + $0x1d0] sm:$0xff] }
 0x46c   : > { %v5224_v17 = vadd.f32 %v16996_v29, %v14412_v61  ;;  %v14621_v19 = vpop.permute.xlu1 %5752  ;;  %16999 = vst [vmem:[#allocation255_spill] sm:$0xff] %v14626_v10  ;;  %v6476_v40 = vmul.f32 %v14626_v10, %v14417_v7  ;;  %v6477_v16 = vmul.f32 %v14417_v7, %v14101_v24  ;;  %v14634_v53 = vmul.f32 %v14162_v37, %v14574_v23  ;;  %v17000_v49 = vld [vmem:[#allocation83_spill] sm:$0xff] }
 0x46d   : > { %16997 = vst [vmem:[#allocation195_spill] sm:$0xff] %v14621_v19  ;;  %v14623_v12 = vpop.permute.xlu0 %5750  ;;  %v5347_v59 = vadd.f32 %v17000_v49, %v5225_v57  ;;  %v14638_v61 = vsel %vm929_vm1, %v6528_v38, %v6530_v63  ;;  %v14641_v29 = vsel %vm929_vm1, %v6527_v5, %v6528_v38  ;;  %v6533_v24 = vrot.slane %v6473_v47, 2  ;;  %v17002_v63 = vld [vmem:[#allocation192_spill] sm:$0xff]  ;;  %v17003_v5 = vld [vmem:[#allocation11_spill] sm:$0xff] }
 0x46e   : > { %16998 = vst [vmem:[#allocation37_spill] sm:$0xff] %v14623_v12  ;;  %6544 = vrot.lane.b32.xlu1 %v14519_v60, %s7339_s22  ;;  %v6535_v10 = vrot.slane %v6474_v62, 2  ;;  %v14649_v12 = vld [vmem:[%s7384_s21 + $0x1c8] sm:$0xff]  ;;  %v14654_v57 = vstv %s14571_s29  ;;  %v5239_v38 = vadd.f32 %v17002_v63, %v5085_v26  ;;  %v5238_v19 = vadd.f32 %v17003_v5, %v5084_v6  ;;  %v17004_v60 = vld [vmem:[#allocation225_spill] sm:$0xff] }
 0x46f   : > { %6542 = vrot.lane.b32.xlu0 %v14522_v55, %s7339_s22  ;;  %17001 = vst [vmem:[#allocation196_spill] sm:$0xff] %v14649_v12  ;;  %v6475_v49 = vmul.f32 %v14649_v12, %v14417_v7  ;;  %v6532_v14 = vrot.slane %v6472_v3, 2  ;;  %v5953_v22 = vrot.slane %v5904_v8, 1  ;;  %v5227_v36 = vadd.f32 %v17004_v60, %v14448_v41  ;;  %v17005_v55 = vld [vmem:[#allocation262_spill] sm:$0xff]  ;;  %v17006_v12 = vld [vmem:[#allocation183_spill] sm:$0xff] }
 0x470   : > { %v5226_v47 = vadd.f32 %v17005_v55, %v14452_v30  ;;  %v14662_v62 = vpop.permute.xlu1 %5756  ;;  %v6538_v33 = vrot.slane %v6476_v40, 2  ;;  %v6540_v7 = vrot.slane %v6477_v16, 2  ;;  %v5346_v28 = vadd.f32 %v17006_v12, %v5224_v17  ;;  %v17007_v30 = vld [vmem:[#allocation72_spill] sm:$0xff]  ;;  %v17008_v8 = vld [vmem:[#allocation74_spill] sm:$0xff]  ;;  %v17009_v40 = vld [vmem:[#allocation199_spill] sm:$0xff] }
 0x471   : > { %v14664_v43 = vpop.permute.xlu0 %5754  ;;  %v6609_v26 = vmul.f32 %v14151_v9, %v14654_v57  ;;  %v6610_v6 = vmul.f32 %v14438_v58, %v14654_v57  ;;  %v14673_v41 = vmul.f32 %v14189_v20, %v14574_v23  ;;  %v5229_v3 = vadd.f32 %v17007_v30, %v14465_v18 }
 0x472   : > { %v5228_v63 = vadd.f32 %v17008_v8, %v14469_v13  ;;  %6548 = vrot.lane.b32.xlu1 %v14527_v1, %s7339_s22  ;;  %v6537_v9 = vrot.slane %v6475_v49, 2  ;;  %v6608_v17 = vmul.f32 %v14162_v37, %v14654_v57  ;;  %v5361_v12 = vadd.f32 %v13971_v11, %v5239_v38  ;;  %v17010_v13 = vld [vmem:[#allocation89_spill] sm:$0xff] }
 0x473   : > { %6546 = vrot.lane.b32.xlu0 %v14530_v35, %s7339_s22  ;;  %v5360_v16 = vadd.f32 %v17009_v40, %v5238_v19  ;;  %v14688_v5 = vsel %vm929_vm1, %v6533_v24, %v6535_v10  ;;  %v14691_v18 = vsel %vm929_vm1, %v6532_v14, %v6533_v24  ;;  %v5349_v60 = vadd.f32 %v17010_v13, %v5227_v36  ;;  %v17011_v1 = vld [vmem:[#allocation177_spill] sm:$0xff]  ;;  %v17013_v10 = vld [vmem:[#allocation96_spill] sm:$0xff]  ;;  %v17014_v14 = vld [vmem:[#allocation166_spill] sm:$0xff] }
 0x474   : > { %v5348_v55 = vadd.f32 %v17011_v1, %v5226_v47  ;;  %v14695_v30 = vpop.permute.xlu1 %5760  ;;  %v14700_v37 = vsel %vm929_vm1, %v6538_v33, %v6540_v7  ;;  %v17012_v11 = vrot.slane %v14596_v0, 1  ;;  %v5515_v49 = vadd.f32 %v17013_v10, %v5361_v12  ;;  %v17015_v8 = vld [vmem:[#allocation85_spill] sm:$0xff]  ;;  %v17016_v40 = vld [vmem:[#allocation226_spill] sm:$0xff]  ;;  %v17017_v1 = vld [vmem:[#allocation31_spill] sm:$0xff] }
 0x475   : > { %v14697_v35 = vpop.permute.xlu0 %5758  ;;  %v5514_v24 = vadd.f32 %v17014_v14, %v5360_v16  ;;  %v6657_v38 = vrot.slane %v6609_v26, 2  ;;  %v6659_v36 = vrot.slane %v6610_v6, 2  ;;  %v5351_v47 = vadd.f32 %v17015_v8, %v5229_v3  ;;  %v17019_v3 = vld [vmem:[#allocation80_spill] sm:$0xff]  ;;  %v17025_v8 = vld [vmem:[#allocation194_spill] sm:$0xff] }
 0x476   : > { %v14705_v19 = vsel %vm498_vm0, %v17012_v11, %v5953_v22  ;;  %v5350_v13 = vadd.f32 %v17016_v40, %v5228_v63  ;;  %6552 = vrot.lane.b32.xlu1 %v14566_v56, %s7339_s22  ;;  %v14716_v7 = vsel %vm929_vm1, %v6537_v9, %v6538_v33  ;;  %v6656_v22 = vrot.slane %v6608_v17, 2  ;;  %v17018_v11 = vld [vmem:[#allocation157_spill] sm:$0xff]  ;;  %v17020_v56 = vld [vmem:[#allocation82_spill] sm:$0xff] }
 0x477   : > { %6550 = vrot.lane.b32.xlu0 %v14569_v45, %s7339_s22  ;;  %v5501_v12 = vadd.f32 %v17017_v1, %v5347_v59  ;;  %v5500_v16 = vadd.f32 %v17018_v11, %v5346_v28  ;;  %v5669_v26 = vadd.f32 %v14471_v46, %v5515_v49  ;;  %v5668_v6 = vadd.f32 %v14473_v39, %v5514_v24  ;;  %v17021_v28 = vld [vmem:[#allocation21_spill] sm:$0xff]  ;;  %v17022_v46 = vld [vmem:[#allocation100_spill] sm:$0xff]  ;;  %v17024_v49 = vld [vmem:[#allocation94_spill] sm:$0xff] }
 0x478   : > { %v5231_v63 = vadd.f32 %v17019_v3, %v14492_v50  ;;  %v5230_v10 = vadd.f32 %v17020_v56, %v14498_v54  ;;  %v14726_v14 = vpop.permute.xlu1 %5764  ;;  %v14732_v33 = vmul.f32 %v14457_v2, %v14574_v23  ;;  %v14736_v59 = vmul.f32 %v17021_v28, %v14574_v23  ;;  %v17023_v9 = vld [vmem:[#allocation217_spill] sm:$0xff]  ;;  %v17027_v11 = vld [vmem:[#allocation128_spill] sm:$0xff] }
 0x479   : > { %v14728_v45 = vpop.permute.xlu0 %5762  ;;  %v5655_v39 = vadd.f32 %v17022_v46, %v5501_v12  ;;  %v5654_v17 = vadd.f32 %v17023_v9, %v5500_v16  ;;  %v14741_v50 = vsel %vm929_vm1, %v6657_v38, %v6659_v36  ;;  %v14745_v54 = vmul.f32 %v14189_v20, %v14654_v57  ;;  %v17026_v12 = vld [vmem:[#allocation51_spill] sm:$0xff]  ;;  %v17031_v9 = vld [vmem:[#allocation108_spill] sm:$0xff] }
 0x47a   : > { %v5503_v24 = vadd.f32 %v17024_v49, %v5349_v60  ;;  %v5502_v40 = vadd.f32 %v17025_v8, %v5348_v55  ;;  %6556 = vrot.lane.b32.xlu1 %v14587_v21, %s7339_s22  ;;  %v6613_v1 = vmul.f32 %v14457_v2, %v14654_v57  ;;  %v5703_v36 = vadd.f32 %v17026_v12, %v5669_v26  ;;  %v17028_v55 = vld [vmem:[#allocation156_spill] sm:$0xff]  ;;  %v17030_v46 = vld [vmem:[#allocation107_spill] sm:$0xff] }
 0x47b   : > { %6554 = vrot.lane.b32.xlu0 %v14590_v25, %s7339_s22  ;;  %v5702_v16 = vadd.f32 %v17027_v11, %v5668_v6  ;;  %v14758_v20 = vsel %vm929_vm1, %v6656_v22, %v6657_v38  ;;  %v14762_v60 = vmul.f32 %v17021_v28, %v14654_v57  ;;  %v5353_v3 = vadd.f32 %v17028_v55, %v5231_v63  ;;  %v17029_v21 = vld [vmem:[#allocation256_spill] sm:$0xff]  ;;  %v17033_v6 = vld [vmem:[#allocation122_spill] sm:$0xff]  ;;  %v17034_v28 = vld [vmem:[#allocation121_spill] sm:$0xff] }
 0x47c   : > { %v5352_v56 = vadd.f32 %v17029_v21, %v5230_v10  ;;  %v5657_v25 = vadd.f32 %v17030_v46, %v5503_v24  ;;  %v5656_v49 = vadd.f32 %v17031_v9, %v5502_v40  ;;  %v5769_v8 = vpop.permute.xlu1 %5768  ;;  %v17032_v26 = vld [vmem:[#allocation76_spill] sm:$0xff]  ;;  %v5688_v11 = vadd.f32 %v17033_v6, %v5654_v17  ;;  %v17036_v17 = vld [vmem:[#allocation14_spill] sm:$0xff]  ;;  %v17038_v55 = vld [vmem:[#allocation175_spill] sm:$0xff] }
 0x47d   : > { %v5767_v2 = vpop.permute.xlu0 %5766  ;;  %v5689_v12 = vadd.f32 %v17032_v26, %v5655_v39  ;;  %v14770_v38 = vadd.f32 %v5769_v8, %v5703_v36  ;;  %v5233_v58 = vadd.f32 %v17034_v28, %v14512_v27  ;;  %v17035_v63 = vld [vmem:[#allocation88_spill] sm:$0xff]  ;;  %v6662_v39 = vrot.slane %v14745_v54, 2  ;;  %v17039_v21 = vld [vmem:[#allocation187_spill] sm:$0xff] }
 0x47e   : > { %v14772_v22 = vadd.f32 %v5767_v2, %v5702_v16  ;;  %v5232_v10 = vadd.f32 %v17035_v63, %v14516_v31  ;;  %6560 = vrot.lane.b32.xlu1 %v14610_v44, %s7339_s22  ;;  %v6664_v24 = vrot.slane %v6613_v1, 2  ;;  %v5505_v40 = vadd.f32 %v17036_v17, %v5351_v47  ;;  %v17037_v36 = vld [vmem:[#allocation160_spill] sm:$0xff]  ;;  %v17040_v44 = vld [vmem:[#allocation106_spill] sm:$0xff] }
 0x47f   : > { %6558 = vrot.lane.b32.xlu0 %v14613_v52, %s7339_s22  ;;  %v5504_v2 = vadd.f32 %v17037_v36, %v5350_v13  ;;  %v5787_v16 = vadd.f32 %v14500_v48, %v5689_v12  ;;  %v5786_v27 = vadd.f32 %v14502_v42, %v5688_v11  ;;  %v5235_v31 = vadd.f32 %v17038_v55, %v14549_v34  ;;  %v17041_v47 = vld [vmem:[#allocation218_spill] sm:$0xff]  ;;  %v17042_v13 = vld [vmem:[#allocation33_spill] sm:$0xff]  ;;  %v17043_v34 = vld [vmem:[#allocation176_spill] sm:$0xff] }
 0x480   : > { %v5691_v46 = vadd.f32 %v17039_v21, %v5657_v25  ;;  %v5690_v9 = vadd.f32 %v17040_v44, %v5656_v49  ;;  %v5839_v8 = vpop.permute.xlu1 %5838  ;;  %v14793_v54 = vmul.f32 %v14227_v15, %v14654_v57  ;;  %v5659_v1 = vadd.f32 %v17041_v47, %v5505_v40  ;;  %v17044_v25 = vld [vmem:[#allocation162_spill] sm:$0xff]  ;;  %v17045_v49 = vld [vmem:[#allocation163_spill] sm:$0xff] }
 0x481   : > { %v5837_v52 = vpop.permute.xlu0 %5836  ;;  %v5658_v26 = vadd.f32 %v17042_v13, %v5504_v2  ;;  %v14797_v48 = vadd.f32 %v5839_v8, %v5787_v16  ;;  %v5234_v12 = vadd.f32 %v17043_v34, %v14553_v4  ;;  %v5507_v6 = vadd.f32 %v17044_v25, %v5353_v3  ;;  %v17046_v4 = vld [vmem:[#allocation91_spill] sm:$0xff]  ;;  %v17048_v2 = vld [vmem:[#allocation73_spill] sm:$0xff]  ;;  %v17049_v16 = vld [vmem:[#allocation36_spill] sm:$0xff] }
 0x482   : > { %v14799_v42 = vadd.f32 %v5837_v52, %v5786_v27  ;;  %v5506_v11 = vadd.f32 %v17045_v49, %v5352_v56  ;;  %6564 = vrot.lane.b32.xlu1 %v14638_v61, %s7339_s22  ;;  %v5950_v28 = vrot.slane %v14634_v53, 1  ;;  %v5789_v63 = vadd.f32 %v14541_v32, %v5691_v46  ;;  %v17047_v56 = vld [vmem:[#allocation90_spill] sm:$0xff]  ;;  %v17051_v32 = vld [vmem:[#allocation109_spill] sm:$0xff]  ;;  %v17054_v13 = vld [vmem:[#allocation12_spill] sm:$0xff] }
 0x483   : > { %6562 = vrot.lane.b32.xlu0 %v14641_v29, %s7339_s22  ;;  %v5788_v17 = vadd.f32 %v14543_v51, %v5690_v9  ;;  %v14813_v40 = vsel %vm929_vm1, %v6662_v39, %v6664_v24  ;;  %v14817_v3 = vmul.f32 %v17046_v4, %v14654_v57  ;;  %v5355_v36 = vadd.f32 %v17047_v56, %v5233_v58  ;;  %v17050_v29 = vld [vmem:[#allocation42_spill] sm:$0xff]  ;;  %v17052_v51 = vld [vmem:[#allocation111_spill] sm:$0xff]  ;;  %v17053_v52 = vld [vmem:[#allocation77_spill] sm:$0xff] }
 0x484   : > { %v5354_v61 = vadd.f32 %v17048_v2, %v5232_v10  ;;  %v5661_v27 = vadd.f32 %v17049_v16, %v5507_v6  ;;  %v5660_v55 = vadd.f32 %v17050_v29, %v5506_v11  ;;  %v5843_v21 = vpop.permute.xlu1 %5842  ;;  %v5693_v46 = vadd.f32 %v17051_v32, %v5659_v1  ;;  %v17055_v1 = vld [vmem:[#allocation110_spill] sm:$0xff] }
 0x485   : > { %v5841_v44 = vpop.permute.xlu0 %5840  ;;  %v5692_v9 = vadd.f32 %v17052_v51, %v5658_v26  ;;  %v14825_v24 = vadd.f32 %v5843_v21, %v5789_v63  ;;  %v5357_v47 = vadd.f32 %v17053_v52, %v5235_v31  ;;  %v5356_v58 = vadd.f32 %v17054_v13, %v5234_v12  ;;  %v17056_v26 = vld [vmem:[#allocation15_spill] sm:$0xff]  ;;  %v17057_v6 = vld [vmem:[#allocation70_spill] sm:$0xff]  ;;  %v17059_v31 = vld [vmem:[#allocation248_spill] sm:$0xff] }
 0x486   : > { %v14827_v8 = vadd.f32 %v5841_v44, %v5788_v17  ;;  %6568 = vrot.lane.b32.xlu1 %v14688_v5, %s7339_s22  ;;  %v6661_v10 = vrot.slane %v14762_v60, 2  ;;  %v6614_v34 = vmul.f32 %v17055_v1, %v14654_v57  ;;  %v5509_v25 = vadd.f32 %v17056_v26, %v5355_v36  ;;  %v17058_v11 = vld [vmem:[#allocation190_spill] sm:$0xff]  ;;  %v17062_v5 = vld [vmem:[#allocation131_spill] sm:$0xff] }
 0x487   : > { %6566 = vrot.lane.b32.xlu0 %v14691_v18, %s7339_s22  ;;  %v5508_v49 = vadd.f32 %v17057_v6, %v5354_v61  ;;  %v5791_v63 = vadd.f32 %v17058_v11, %v5693_v46  ;;  %v5790_v17 = vadd.f32 %v17059_v31, %v5692_v9  ;;  %v17060_v12 = vld [vmem:[#allocation130_spill] sm:$0xff]  ;;  %v17066_v52 = vld [vmem:[#allocation123_spill] sm:$0xff]  ;;  %v17068_v9 = vld [vmem:[#allocation164_spill] sm:$0xff] }
 0x488   : > { %v17061_v56 = vld [vmem:[#allocation178_spill] sm:$0xff]  ;;  %v5847_v32 = vpop.permute.xlu1 %5846  ;;  %v5663_v36 = vadd.f32 %v17066_v52, %v5509_v25  ;;  %v5511_v6 = vadd.f32 %v17068_v9, %v5357_v47  ;;  %v17069_v11 = vld [vmem:[#allocation48_spill] sm:$0xff]  ;;  %v17070_v25 = vld [vmem:[#allocation195_spill] sm:$0xff]  ;;  %v6666_v47 = vrot.slane %v6614_v34, 2 }
 0x489   : > { %v5237_v2 = vadd.f32 %v17061_v56, %v17060_v12  ;;  %v17063_v16 = vld [vmem:[#allocation86_spill] sm:$0xff]  ;;  %v5845_v51 = vpop.permute.xlu0 %5844  ;;  %v14850_v26 = vadd.f32 %v5847_v32, %v5791_v63  ;;  %v5510_v31 = vadd.f32 %v17069_v11, %v5356_v58  ;;  %v17071_v63 = vld [vmem:[#allocation37_spill] sm:$0xff]  ;;  %v17080_v9 = vld [vmem:[#allocation55_spill] sm:$0xff] }
 0x48a   : > { %v5236_v29 = vadd.f32 %v17063_v16, %v17062_v5  ;;  %v17064_v18 = vld [vmem:[#allocation114_spill] sm:$0xff]  ;;  %v14852_v46 = vadd.f32 %v5845_v51, %v5790_v17  ;;  %6572 = vrot.lane.b32.xlu1 %v14700_v37, %s7339_s22  ;;  %v6669_v17 = vrot.slane %v14817_v3, 2  ;;  %v17073_v5 = vld [vmem:[#allocation84_spill] sm:$0xff]  ;;  %v17074_v37 = vld [vmem:[#allocation127_spill] sm:$0xff] }
 0x48b   : > { %v5695_v21 = vadd.f32 %v17064_v18, %v5661_v27  ;;  %v17065_v60 = vld [vmem:[#allocation118_spill] sm:$0xff]  ;;  %6570 = vrot.lane.b32.xlu0 %v14716_v7, %s7339_s22  ;;  %v6663_v27 = vsel %vm929_vm1, %v6661_v10, %v6662_v39  ;;  %v5665_v18 = vadd.f32 %v17074_v37, %v5511_v6  ;;  %v17076_v10 = vld [vmem:[#allocation233_spill] sm:$0xff]  ;;  %v17077_v51 = vld [vmem:[#allocation44_spill] sm:$0xff]  ;;  %s7018_s22 = sld [smem:[#allocation2 + $0x33]] }
 0x48c   : > { %v5694_v44 = vadd.f32 %v17065_v60, %v5660_v55  ;;  %v17067_v13 = vld [vmem:[#allocation102_spill] sm:$0xff]  ;;  %v6667_v55 = vrot.slane %v14793_v54, 2  ;;  %v5358_v16 = vadd.f32 %v17073_v5, %v5236_v29  ;;  %v17075_v60 = vld [vmem:[#allocation112_spill] sm:$0xff]  ;;  %v5851_v32 = vpop.permute.xlu1 %5850  ;;  %v5697_v54 = vadd.f32 %v17076_v10, %v5663_v36  ;;  %v17078_v3 = vld [vmem:[#allocation117_spill] sm:$0xff] }
 0x48d   : > { %v5662_v61 = vadd.f32 %v17067_v13, %v5508_v49  ;;  %v5793_v49 = vadd.f32 %v17070_v25, %v5695_v21  ;;  %v17072_v56 = vld [vmem:[#allocation38_spill] sm:$0xff]  ;;  %v5664_v7 = vadd.f32 %v17075_v60, %v5510_v31  ;;  %v5849_v39 = vpop.permute.xlu0 %5848  ;;  %v6618_v34 = vmul.f32 %v17078_v3, %v14654_v57  ;;  %v17079_v36 = vld [vmem:[#allocation19_spill] sm:$0xff]  ;;  %v17081_v11 = vld [vmem:[#allocation165_spill] sm:$0xff] }
 0x48e   : > { %v5792_v12 = vadd.f32 %v17071_v63, %v5694_v44  ;;  %v5359_v58 = vadd.f32 %v17072_v56, %v5237_v2  ;;  %6698 = vrot.lane.b32.xlu1 %v14741_v50, %s7340_s24  ;;  %v14882_v2 = vld [vmem:[%s7384_s21 + $0x178] sm:$0x3]  ;;  %v6617_v13 = vmul.f32 %v17079_v36, %v14654_v57  ;;  %v5512_v50 = vadd.f32 %v17081_v11, %v5358_v16  ;;  %v17082_v25 = vld [vmem:[#allocation125_spill] sm:$0xff]  ;;  %v17083_v63 = vld [vmem:[#allocation171_spill] sm:$0xff] }
 0x48f   : > { %v5696_v21 = vadd.f32 %v17077_v51, %v5662_v61  ;;  %v14871_v52 = vadd.f32 %v5851_v32, %v5793_v49  ;;  %6696 = vrot.lane.b32.xlu0 %v14758_v20, %s7340_s24  ;;  %v6619_v29 = vmul.f32 %v14882_v2, %v14654_v57  ;;  %v5956_v61 = vrot.slane %v14673_v41, 1  ;;  %v17084_v32 = vld [vmem:[#allocation179_spill] sm:$0xff]  ;;  %v17085_v10 = vld [vmem:[#allocation129_spill] sm:$0xff]  ;;  %v17087_v51 = vld [vmem:[#allocation184_spill] sm:$0xff] }
 0x490   : > { %v14873_v44 = vadd.f32 %v5849_v39, %v5792_v12  ;;  %v5513_v6 = vadd.f32 %v17080_v9, %v5359_v58  ;;  %v5795_v31 = vadd.f32 %v14662_v62, %v5697_v54  ;;  %v5699_v49 = vadd.f32 %v17082_v25, %v5665_v18  ;;  %v5855_v56 = vpop.permute.xlu1 %5854  ;;  %v17088_v9 = vld [vmem:[#allocation43_spill] sm:$0xff]  ;;  %v17092_v25 = vld [vmem:[#allocation116_spill] sm:$0xff] }
 0x491   : > { %v5794_v20 = vadd.f32 %v14664_v43, %v5696_v21  ;;  %v5698_v12 = vadd.f32 %v17083_v63, %v5664_v7  ;;  %v5853_v5 = vpop.permute.xlu0 %5852  ;;  %v6670_v37 = vsel %vm929_vm1, %v6667_v55, %v6669_v17  ;;  %v6668_v60 = vsel %vm929_vm1, %v6666_v47, %v6667_v55  ;;  %v17086_v17 = vld [vmem:[#allocation25_spill] sm:$0xff] }
 0x492   : > { %v5667_v39 = vadd.f32 %v17084_v32, %v5513_v6  ;;  %v5666_v58 = vadd.f32 %v17085_v10, %v5512_v50  ;;  %v14899_v16 = vadd.f32 %v5855_v56, %v5795_v31  ;;  %6702 = vrot.lane.b32.xlu1 %v14813_v40, %s7340_s24  ;;  %v6672_v43 = vrot.slane %v6618_v34, 2  ;;  %v17091_v31 = vld [vmem:[#allocation126_spill] sm:$0xff] }
 0x493   : > { %v14901_v62 = vadd.f32 %v5853_v5, %v5794_v20  ;;  %6700 = vrot.lane.b32.xlu0 %v6663_v27, %s7340_s24  ;;  %v6674_v18 = vrot.slane %v6619_v29, 2  ;;  %v6671_v7 = vrot.slane %v6617_v13, 2  ;;  %v6621_v55 = vmul.f32 %v17086_v17, %v14654_v57  ;;  %v17089_v27 = vld [vmem:[#allocation78_spill] sm:$0xff] }
 0x494   : > { %v5797_v47 = vadd.f32 %v14695_v30, %v5699_v49  ;;  %v5796_v54 = vadd.f32 %v14697_v35, %v5698_v12  ;;  %v6622_v21 = vmul.f32 %v17087_v51, %v14654_v57  ;;  %v6620_v6 = vmul.f32 %v17088_v9, %v14654_v57  ;;  %v5859_v11 = vpop.permute.xlu1 %5858  ;;  %v14917_v29 = vld [vmem:[%s7384_s21 + $0x1a8] sm:$0x3]  ;;  %v17090_v30 = vld [vmem:[#allocation28_spill] sm:$0xff] }
 0x495   : > { %v5857_v40 = vpop.permute.xlu0 %5856  ;;  %v6624_v34 = vmul.f32 %v17089_v27, %v14654_v57  ;;  %v6625_v13 = vmul.f32 %v14917_v29, %v14654_v57  ;;  %v6623_v50 = vmul.f32 %v17090_v30, %v14654_v57  ;;  %v14925_v35 = vmul.f32 %v14227_v15, %v14574_v23 }
 0x496   : > { %v5701_v20 = vadd.f32 %v17091_v31, %v5667_v39  ;;  %v5700_v49 = vadd.f32 %v17092_v25, %v5666_v58  ;;  %v14929_v63 = vadd.f32 %v5859_v11, %v5797_v47  ;;  %v14931_v12 = vadd.f32 %v5857_v40, %v5796_v54  ;;  %6706 = vrot.lane.b32.xlu1 %v6670_v37, %s7340_s24 }
 0x497   : > { %6704 = vrot.lane.b32.xlu0 %v6668_v60, %s7340_s24  ;;  %v6675_v56 = vsel %vm929_vm1, %v6672_v43, %v6674_v18  ;;  %v6673_v5 = vsel %vm929_vm1, %v6671_v7, %v6672_v43  ;;  %v6677_v32 = vrot.slane %v6621_v55, 2  ;;  %v5958_v15 = vrot.slane %v14732_v33, 1 }
 0x498   : > { %v5799_v10 = vadd.f32 %v14726_v14, %v5701_v20  ;;  %v5798_v39 = vadd.f32 %v14728_v45, %v5700_v49  ;;  %v6679_v58 = vrot.slane %v6622_v21, 2  ;;  %v6676_v47 = vrot.slane %v6620_v6, 2  ;;  %v5863_v11 = vpop.permute.xlu1 %5862  ;;  %v17093_v45 = vld [vmem:[#allocation119_spill] sm:$0xff]  ;;  %v17095_v6 = vld [vmem:[#allocation200_spill] sm:$0xff] }
 0x499   : > { %v5861_v54 = vpop.permute.xlu0 %5860  ;;  %v6682_v40 = vrot.slane %v6624_v34, 2  ;;  %v5955_v37 = vrot.slane %v14736_v59, 1  ;;  %v5910_v60 = vmul.f32 %v17046_v4, %v14574_v23  ;;  %v5908_v43 = vmul.f32 %v17055_v1, %v14574_v23  ;;  %v17094_v59 = vld [vmem:[#allocation132_spill] sm:$0xff] }
 0x49a   : > { %v14945_v18 = vadd.f32 %v5863_v11, %v5799_v10  ;;  %v14947_v33 = vadd.f32 %v5861_v54, %v5798_v39  ;;  %v6684_v14 = vrot.slane %v6625_v13, 2  ;;  %v6681_v7 = vrot.slane %v6623_v50, 2  ;;  %6710 = vrot.lane.b32.xlu1 %v6675_v56, %s7340_s24  ;;  %v17098_v54 = vld [vmem:[#allocation196_spill] sm:$0xff] }
 0x49b   : > { %6708 = vrot.lane.b32.xlu0 %v6673_v5, %s7340_s24  ;;  %v6627_v55 = vmul.f32 %v17093_v45, %v14654_v57  ;;  %v6628_v21 = vmul.f32 %v17094_v59, %v14654_v57  ;;  %v6626_v34 = vmul.f32 %v17095_v6, %v14654_v57  ;;  %v6680_v1 = vsel %vm929_vm1, %v6677_v32, %v6679_v58 }
 0x49c   : > { %v6678_v31 = vsel %vm929_vm1, %v6676_v47, %v6677_v32  ;;  %v17096_v13 = vrot.slane %v14596_v0, 1  ;;  %v5959_v20 = vsel %vm498_vm0, %v5956_v61, %v5958_v15  ;;  %v5867_v25 = vpop.permute.xlu1 %5866  ;;  %v5957_v56 = vsel %vm498_vm0, %v5955_v37, %v5956_v61  ;;  %v14987_v47 = vld [vmem:[%s7384_s21 + $0x1d8] sm:$0x3] }
 0x49d   : > { %v5865_v49 = vpop.permute.xlu0 %5864  ;;  %v5961_v5 = vrot.slane %v14925_v35, 1  ;;  %v5963_v32 = vrot.slane %v5910_v60, 1  ;;  %v5960_v10 = vrot.slane %v5908_v43, 1  ;;  %v14972_v0 = vadd.f32 %v5867_v25, %v14770_v38  ;;  %v17097_v35 = vld [vmem:[#allocation255_spill] sm:$0xff] }
 0x49e   : > { %v5952_v50 = vsel %vm498_vm0, %v5950_v28, %v17096_v13  ;;  %v14975_v53 = vadd.f32 %v5865_v49, %v14772_v22  ;;  %v6685_v28 = vsel %vm929_vm1, %v6682_v40, %v6684_v14  ;;  %v6683_v15 = vsel %vm929_vm1, %v6681_v7, %v6682_v40  ;;  %6714 = vrot.lane.b32.xlu1 %v6680_v1, %s7340_s24 }
 0x49f   : > { %6712 = vrot.lane.b32.xlu0 %v6678_v31, %s7340_s24  ;;  %v6687_v41 = vrot.slane %v6627_v55, 2  ;;  %v6689_v61 = vrot.slane %v6628_v21, 2  ;;  %v6686_v39 = vrot.slane %v6626_v34, 2  ;;  %v6630_v58 = vmul.f32 %v17097_v35, %v14654_v57 }
 0x4a0   : > { %v6007_v38 = vadd.f32 %v14705_v19, %v14797_v48  ;;  %v6006_v22 = vadd.f32 %v5952_v50, %v14799_v42  ;;  %v6631_v11 = vmul.f32 %v14987_v47, %v14654_v57  ;;  %v6629_v40 = vmul.f32 %v17098_v54, %v14654_v57  ;;  %v6115_v37 = vpop.permute.xlu1 %6114 }
 0x4a1   : > { %v6113_v60 = vpop.permute.xlu0 %6112  ;;  %v5964_v43 = vsel %vm498_vm0, %v5961_v5, %v5963_v32  ;;  %v5912_v14 = vmul.f32 %v17078_v3, %v14574_v23  ;;  %v5913_v19 = vmul.f32 %v14882_v2, %v14574_v23  ;;  %v5911_v48 = vmul.f32 %v17079_v36, %v14574_v23 }
 0x4a2   : > { %v15000_v42 = vadd.f32 %v6115_v37, %v6007_v38  ;;  %v15002_v7 = vadd.f32 %v6113_v60, %v6006_v22  ;;  %v5962_v45 = vsel %vm498_vm0, %v5960_v10, %v5961_v5  ;;  %v5915_v57 = vmul.f32 %v17086_v17, %v14574_v23  ;;  %6718 = vrot.lane.b32.xlu1 %v6685_v28, %s7340_s24  ;;  %v15042_v37 = vld [vmem:[%s7384_s21 + $0x1b8] sm:$0xff] }
 0x4a3   : > { %6716 = vrot.lane.b32.xlu0 %v6683_v15, %s7340_s24  ;;  %v6690_v3 = vsel %vm929_vm1, %v6687_v41, %v6689_v61  ;;  %v6688_v55 = vsel %vm929_vm1, %v6686_v39, %v6687_v41  ;;  %v6692_v21 = vrot.slane %v6630_v58, 2  ;;  %v5916_v36 = vmul.f32 %v17087_v51, %v14574_v23 }
 0x4a4   : > { %v6009_v6 = vadd.f32 %v5959_v20, %v14825_v24  ;;  %v6008_v34 = vadd.f32 %v5957_v56, %v14827_v8  ;;  %v6694_v1 = vrot.slane %v6631_v11, 2  ;;  %v6691_v31 = vrot.slane %v6629_v40, 2  ;;  %v6119_v13 = vpop.permute.xlu1 %6118 }
 0x4a5   : > { %v6117_v17 = vpop.permute.xlu0 %6116  ;;  %v5966_v50 = vrot.slane %v5912_v14, 1  ;;  %v5968_v25 = vrot.slane %v5913_v19, 1  ;;  %v5965_v49 = vrot.slane %v5911_v48, 1  ;;  %v5914_v5 = vmul.f32 %v17088_v9, %v14574_v23 }
 0x4a6   : > { %v15017_v32 = vadd.f32 %v6119_v13, %v6009_v6  ;;  %v15019_v10 = vadd.f32 %v6117_v17, %v6008_v34  ;;  %6722 = vrot.lane.b32.xlu1 %v6690_v3, %s7340_s24  ;;  %v5971_v24 = vrot.slane %v5915_v57, 1  ;;  %v5973_v8 = vrot.slane %v5916_v36, 1 }
 0x4a7   : > { %6720 = vrot.lane.b32.xlu0 %v6688_v55, %s7340_s24  ;;  %v5918_v20 = vmul.f32 %v17089_v27, %v14574_v23  ;;  %v5919_v56 = vmul.f32 %v14917_v29, %v14574_v23  ;;  %v6011_v28 = vadd.f32 %v5964_v43, %v14850_v26  ;;  %v6010_v9 = vadd.f32 %v5962_v45, %v14852_v46  ;;  %v15053_v55 = vld [vmem:[%s7384_s21 + $0x1b0] sm:$0xff] }
 0x4a8   : > { %v6695_v15 = vsel %vm929_vm1, %v6692_v21, %v6694_v1  ;;  %v6693_v41 = vsel %vm929_vm1, %v6691_v31, %v6692_v21  ;;  %v6123_v61 = vpop.permute.xlu1 %6122  ;;  %v5969_v58 = vsel %vm498_vm0, %v5966_v50, %v5968_v25  ;;  %v5967_v38 = vsel %vm498_vm0, %v5965_v49, %v5966_v50 }
 0x4a9   : > { %v6121_v39 = vpop.permute.xlu0 %6120  ;;  %v5970_v22 = vrot.slane %v5914_v5, 1  ;;  %v5917_v27 = vmul.f32 %v17090_v30, %v14574_v23  ;;  %v15035_v11 = vadd.f32 %v6123_v61, %v6011_v28  ;;  %v5976_v46 = vrot.slane %v5918_v20, 1 }
 0x4aa   : > { %v15037_v26 = vadd.f32 %v6121_v39, %v6010_v9  ;;  %6726 = vrot.lane.b32.xlu1 %v6695_v15, %s7340_s24  ;;  %v5978_v40 = vrot.slane %v5919_v56, 1  ;;  %v5921_v60 = vmul.f32 %v15042_v37, %v14574_v23  ;;  %v6013_v43 = vadd.f32 %v5969_v58, %v14871_v52 }
 0x4ab   : > { %6724 = vrot.lane.b32.xlu0 %v6693_v41, %s7340_s24  ;;  %v6012_v30 = vadd.f32 %v5967_v38, %v14873_v44  ;;  %v5974_v14 = vsel %vm498_vm0, %v5971_v24, %v5973_v8  ;;  %v5972_v45 = vsel %vm498_vm0, %v5970_v22, %v5971_v24  ;;  %v5975_v57 = vrot.slane %v5917_v27, 1  ;;  %s15208_s24 = sld [smem:[#allocation2 + $0x36]] }
 0x4ac   : > { %v6127_v19 = vpop.permute.xlu1 %6126  ;;  %v5922_v3 = vmul.f32 %v17094_v59, %v14574_v23  ;;  %v5920_v21 = vmul.f32 %v15053_v55, %v14574_v23  ;;  %v5979_v44 = vsel %vm498_vm0, %v5976_v46, %v5978_v40  ;;  %v5981_v6 = vrot.slane %v5921_v60, 1 }
 0x4ad   : > { %v6125_v48 = vpop.permute.xlu0 %6124  ;;  %v15057_v36 = vadd.f32 %v6127_v19, %v6013_v43  ;;  %v6015_v34 = vadd.f32 %v5974_v14, %v14899_v16  ;;  %v6014_v1 = vadd.f32 %v5972_v45, %v14901_v62  ;;  %v5924_v31 = vmul.f32 %v17097_v35, %v14574_v23 }
 0x4ae   : > { %v15059_v52 = vadd.f32 %v6125_v48, %v6012_v30  ;;  %v5925_v13 = vmul.f32 %v14987_v47, %v14574_v23  ;;  %v5977_v25 = vsel %vm498_vm0, %v5975_v57, %v5976_v46  ;;  %v5983_v49 = vrot.slane %v5922_v3, 1 }
 0x4af   : > { %v5980_v5 = vrot.slane %v5920_v21, 1  ;;  %v5923_v24 = vmul.f32 %v17098_v54, %v14574_v23  ;;  %v6017_v62 = vadd.f32 %v5979_v44, %v14929_v63  ;;  %v6016_v20 = vadd.f32 %v5977_v25, %v14931_v12 }
 0x4b0   : > { %v6131_v17 = vpop.permute.xlu1 %6130  ;;  %v5986_v56 = vrot.slane %v5924_v31, 1  ;;  %v5984_v15 = vsel %vm498_vm0, %v5981_v6, %v5983_v49  ;;  %v5988_v61 = vrot.slane %v5925_v13, 1 }
 0x4b1   : > { %v6129_v50 = vpop.permute.xlu0 %6128  ;;  %v15071_v8 = vadd.f32 %v6131_v17, %v6015_v34  ;;  %v5982_v41 = vsel %vm498_vm0, %v5980_v5, %v5981_v6  ;;  %v5985_v39 = vrot.slane %v5923_v24, 1  ;;  %v6019_v38 = vadd.f32 %v5984_v15, %v14945_v18 }
 0x4b2   : > { %v15073_v16 = vadd.f32 %v6129_v50, %v6014_v1  ;;  %v6018_v22 = vadd.f32 %v5982_v41, %v14947_v33  ;;  %v5989_v12 = vsel %vm498_vm0, %v5986_v56, %v5988_v61  ;;  %v17108_v41 = vld [vmem:[#allocation32_spill] sm:$0xff] }
 0x4b3   : > { %v5987_v46 = vsel %vm498_vm0, %v5985_v39, %v5986_v56  ;;  %v6021_v43 = vadd.f32 %v5989_v12, %v14972_v0  ;;  %v7300_v39 = vld [vmem:[%s7384_s21 + $0x120] sm:$0xff] }
 0x4b4   : > { %v6135_v28 = vpop.permute.xlu1 %6134  ;;  %v6020_v30 = vadd.f32 %v5987_v46, %v14975_v53  ;;  %v17111_v46 = vld [vmem:[#allocation57_spill] sm:$0xff] }
 0x4b5   : > { %v6133_v9 = vpop.permute.xlu0 %6132  ;;  %v15079_v58 = vadd.f32 %v6135_v28, %v6017_v62 }
 0x4b6   : > { %v15081_v23 = vadd.f32 %v6133_v9, %v6016_v20  ;;  %v15137_v20 = vstv %s7018_s22  ;;  %v7299_v9 = vld [vmem:[%s7384_s21 + $0x128] sm:$0xff] }
 0x4b7   : > { %v6333_v15 = vmul.f32 %v7299_v9, %v15137_v20  ;;  %v6334_v61 = vmul.f32 %v17108_v41, %v15137_v20  ;;  %v6340_v41 = vmul.f32 %v17046_v4, %v15137_v20 }
 0x4b8   : > { %v6139_v63 = vpop.permute.xlu1 %6138 }
 0x4b9   : > { %v6137_v27 = vpop.permute.xlu0 %6136  ;;  %v15087_v40 = vadd.f32 %v6139_v63, %v6019_v38  ;;  %v6332_v38 = vmul.f32 %v7300_v39, %v15137_v20  ;;  %v6381_v39 = vrot.slane %v6333_v15, 2 }
 0x4ba   : > { %v15089_v60 = vadd.f32 %v6137_v27, %v6018_v22  ;;  %v7301_v27 = vld [vmem:[%s7384_s21 + $0x140] sm:$0xff] }
 0x4bb   : > { %17099 = vst [vmem:[#allocation205_spill] sm:$0xff] %v15087_v40  ;;  %v6336_v12 = vmul.f32 %v7301_v27, %v15137_v20  ;;  %v7305_v40 = vld [vmem:[%s7384_s21 + $0x170] sm:$0xff] }
 0x4bc   : > { %17100 = vst [vmem:[#allocation59_spill] sm:$0xff] %v15089_v60  ;;  %v6143_v14 = vpop.permute.xlu1 %6142  ;;  %v6342_v4 = vmul.f32 %v7305_v40, %v15137_v20 }
 0x4bd   : > { %v6141_v19 = vpop.permute.xlu0 %6140  ;;  %v15093_v48 = vadd.f32 %v6143_v14, %v6021_v43  ;;  %v6337_v43 = vmul.f32 %v17111_v46, %v15137_v20  ;;  %v6386_v46 = vrot.slane %v6336_v12, 2  ;;  %v7306_v12 = vld [vmem:[%s7384_s21 + $0x168] sm:$0xff] }
 0x4be   : > { %v15095_v18 = vadd.f32 %v6141_v19, %v6020_v30  ;;  %v7302_v30 = vld [vmem:[%s7384_s21 + $0x138] sm:$0xff] }
 0x4bf   : > { %17101 = vst [vmem:[#allocation201_spill] sm:$0xff] %v15093_v48  ;;  %v6335_v14 = vmul.f32 %v7302_v30, %v15137_v20  ;;  %v7303_v19 = vld [vmem:[%s7384_s21 + $0x158] sm:$0xff]  ;;  %v6388_v48 = vrot.slane %v6337_v43, 2  ;;  %v7304_v30 = vld [vmem:[%s7384_s21 + $0x150] sm:$0xff]  ;;  %v6341_v43 = vmul.f32 %v7306_v12, %v15137_v20 }
 0x4c0   : > { %17102 = vst [vmem:[#allocation133_spill] sm:$0xff] %v15095_v18  ;;  %v15097_v33 = vpop.permute.xlu1 %6268  ;;  %v6339_v9 = vmul.f32 %v7303_v19, %v15137_v20  ;;  %v6380_v18 = vrot.slane %v6332_v38, 2  ;;  %v6338_v60 = vmul.f32 %v7304_v30, %v15137_v20  ;;  %v6393_v19 = vrot.slane %v6340_v41, 2 }
 0x4c1   : > { %v15099_v45 = vpop.permute.xlu0 %6266  ;;  %v6346_v41 = vmul.f32 %v17087_v51, %v15137_v20  ;;  %v6349_v51 = vmul.f32 %v14917_v29, %v15137_v20  ;;  %v6315_v29 = vadd.f32 %v15097_v33, %v15000_v42 }
 0x4c2   : > { %v6382_v38 = vsel %vm929_vm1, %v6380_v18, %v6381_v39  ;;  %v7308_v18 = vld [vmem:[%s7384_s21 + $0x180] sm:$0xff] }
 0x4c4   : > { %v15101_v57 = vpop.permute.xlu1 %6272 }
 0x4c5   : > { %v15103_v3 = vpop.permute.xlu0 %6270 }
 0x4c8   : > { %v15105_v21 = vpop.permute.xlu1 %6276 }
 0x4c9   : > { %v15107_v44 = vpop.permute.xlu0 %6274 }
 0x4cc   : > { %v15109_v0 = vpop.permute.xlu1 %6280 }
 0x4cd   : > { %v15111_v53 = vpop.permute.xlu0 %6278 }
 0x4d0   : > { %v15113_v6 = vpop.permute.xlu1 %6284 }
 0x4d1   : > { %v15115_v34 = vpop.permute.xlu0 %6282 }
 0x4d4   : > { %v15117_v1 = vpop.permute.xlu1 %6288 }
 0x4d5   : > { %v15119_v31 = vpop.permute.xlu0 %6286 }
 0x4d6   : > { %17103 = vst [vmem:[#allocation134_spill] sm:$0xff] %v15119_v31 }
 0x4d8   : > { %v15121_v13 = vpop.permute.xlu1 %6292 }
 0x4d9   : > { %17104 = vst [vmem:[#allocation137_spill] sm:$0xff] %v15121_v13  ;;  %v15123_v17 = vpop.permute.xlu0 %6290  ;;  %v6391_v13 = vrot.slane %v6339_v9, 2 }
 0x4da   : > { %17105 = vst [vmem:[#allocation138_spill] sm:$0xff] %v15123_v17  ;;  %v6385_v17 = vrot.slane %v6335_v14, 2  ;;  %v7307_v14 = vld [vmem:[%s7384_s21 + $0x188] sm:$0xff] }
 0x4db   : > { %v6345_v9 = vmul.f32 %v7307_v14, %v15137_v20  ;;  %v15190_v12 = vsel %vm929_vm1, %v6391_v13, %v6393_v19  ;;  %v7309_v14 = vld [vmem:[%s7384_s21 + $0x1a0] sm:$0xff] }
 0x4dc   : > { %v15125_v50 = vpop.permute.xlu1 %6296 }
 0x4dd   : > { %17106 = vst [vmem:[#allocation139_spill] sm:$0xff] %v15125_v50  ;;  %v15127_v25 = vpop.permute.xlu0 %6294  ;;  %v6401_v19 = vrot.slane %v6345_v9, 2  ;;  %v6408_v9 = vrot.slane %v6349_v51, 2 }
 0x4de   : > { %17107 = vst [vmem:[#allocation140_spill] sm:$0xff] %v15127_v25  ;;  %v6383_v25 = vrot.slane %v6334_v61, 2  ;;  %v6343_v61 = vmul.f32 %v14882_v2, %v15137_v20  ;;  %v6387_v2 = vsel %vm929_vm1, %v6385_v17, %v6386_v46  ;;  %v6352_v17 = vmul.f32 %v17094_v59, %v15137_v20 }
 0x4e0   : > { %v15129_v49 = vpop.permute.xlu1 %6544  ;;  %v6384_v15 = vsel %vm929_vm1, %v6381_v39, %v6383_v25  ;;  %v6389_v25 = vsel %vm929_vm1, %v6386_v46, %v6388_v48  ;;  %v6344_v39 = vmul.f32 %v7308_v18, %v15137_v20  ;;  %v6395_v46 = vrot.slane %v6341_v43, 2 }
 0x4e1   : > { %v15131_v5 = vpop.permute.xlu0 %6542  ;;  %v6403_v18 = vrot.slane %v6346_v41, 2  ;;  %v6354_v41 = vmul.f32 %v17097_v35, %v15137_v20  ;;  %v6413_v31 = vrot.slane %v6352_v17, 2  ;;  %v6317_v35 = vadd.f32 %v15101_v57, %v15017_v32 }
 0x4e3   : > { %v6416_v51 = vrot.slane %v6354_v41, 2 }
 0x4e4   : > { %v15133_v24 = vpop.permute.xlu1 %6548 }
 0x4e5   : > { %v15135_v62 = vpop.permute.xlu0 %6546 }
 0x4e8   : > { %v15139_v56 = vpop.permute.xlu1 %6552 }
 0x4e9   : > { %v15141_v28 = vpop.permute.xlu0 %6550 }
 0x4ec   : > { %v15149_v22 = vpop.permute.xlu1 %6556 }
 0x4ed   : > { %17109 = vst [vmem:[#allocation144_spill] sm:$0xff] %v15149_v22  ;;  %v15151_v63 = vpop.permute.xlu0 %6554 }
 0x4ee   : > { %17110 = vst [vmem:[#allocation145_spill] sm:$0xff] %v15151_v63  ;;  %v6348_v63 = vmul.f32 %v7309_v14, %v15137_v20  ;;  %v6350_v14 = vmul.f32 %v15053_v55, %v15137_v20  ;;  %v6355_v55 = vmul.f32 %v14987_v47, %v15137_v20  ;;  %v6316_v47 = vadd.f32 %v15103_v3, %v15019_v10 }
 0x4ef   : > { %v6319_v10 = vadd.f32 %v15105_v21, %v15035_v11  ;;  %v6320_v11 = vadd.f32 %v15111_v53, %v15059_v52 }
 0x4f0   : > { %v15163_v50 = vpop.permute.xlu1 %6560  ;;  %v6406_v43 = vrot.slane %v6348_v63, 2  ;;  %v6410_v33 = vrot.slane %v6350_v14, 2 }
 0x4f1   : > { %17112 = vst [vmem:[#allocation146_spill] sm:$0xff] %v15163_v50  ;;  %v15165_v27 = vpop.permute.xlu0 %6558  ;;  %v6396_v50 = vrot.slane %v6342_v4, 2 }
 0x4f2   : > { %17113 = vst [vmem:[#allocation148_spill] sm:$0xff] %v15165_v27  ;;  %v6390_v27 = vrot.slane %v6338_v60, 2  ;;  %v6351_v60 = vmul.f32 %v15042_v37, %v15137_v20  ;;  %v6314_v37 = vadd.f32 %v15099_v45, %v15002_v7  ;;  %v6404_v7 = vsel %vm929_vm1, %v6401_v19, %v6403_v18 }
 0x4f3   : > { %v6397_v42 = vsel %vm929_vm1, %v6395_v46, %v6396_v50  ;;  %v6438_v46 = vadd.f32 %v6387_v2, %v6316_v47 }
 0x4f4   : > { %v15181_v30 = vpop.permute.xlu1 %6564  ;;  %v6392_v59 = vsel %vm929_vm1, %v6390_v27, %v6391_v13  ;;  %v6353_v13 = vmul.f32 %v17098_v54, %v15137_v20  ;;  %v6437_v27 = vadd.f32 %v6384_v15, %v6315_v29  ;;  %v15250_v15 = vstv %s15208_s24 }
 0x4f5   : > { %17114 = vst [vmem:[#allocation149_spill] sm:$0xff] %v15181_v30  ;;  %v15183_v40 = vpop.permute.xlu0 %6562  ;;  %v6398_v30 = vrot.slane %v6343_v61, 2  ;;  %v6400_v61 = vrot.slane %v6344_v39, 2  ;;  %v15234_v39 = vsel %vm929_vm1, %v6406_v43, %v6408_v9  ;;  %v6442_v9 = vadd.f32 %v6397_v42, %v6320_v11  ;;  %v17118_v42 = vld [vmem:[#allocation134_spill] sm:$0xff]  ;;  %v17126_v11 = vld [vmem:[#allocation139_spill] sm:$0xff] }
 0x4f6   : > { %17115 = vst [vmem:[#allocation147_spill] sm:$0xff] %v15183_v40  ;;  %v7310_v40 = vld [vmem:[%s7384_s21 + $0x198] sm:$0xff]  ;;  %v6591_v54 = vadd.f32 %v15129_v49, %v6437_v27  ;;  %v6415_v3 = vrot.slane %v6353_v13, 2  ;;  %v6439_v49 = vadd.f32 %v6389_v25, %v6317_v35  ;;  %v6324_v47 = vadd.f32 %v17118_v42, %v15081_v23  ;;  %s7024_s21 = sshll.u32 %s17136_s10, 7 }
 0x4f7   : > { %v6347_v48 = vmul.f32 %v7310_v40, %v15137_v20  ;;  %v6399_v40 = vsel %vm929_vm1, %v6396_v50, %v6398_v30  ;;  %v6436_v30 = vadd.f32 %v6382_v38, %v6314_v37  ;;  %v6402_v50 = vsel %vm929_vm1, %v6400_v61, %v6401_v19  ;;  %v17119_v27 = vld [vmem:[#allocation144_spill] sm:$0xff]  ;;  %s15319_s10 = scalar_lea.vmem %s15360_s2, %s7024_s21 }
 0x4f8   : > { %v15202_v4 = vpop.permute.xlu1 %6568  ;;  %v6593_v18 = vadd.f32 %v15133_v24, %v6439_v49  ;;  %v15271_v52 = vsel %vm929_vm1, %v6415_v3, %v6416_v51  ;;  %v17124_v3 = vld [vmem:[#allocation138_spill] sm:$0xff] }
 0x4f9   : > { %17116 = vst [vmem:[#allocation62_spill] sm:$0xff] %v15202_v4  ;;  %v15206_v22 = vpop.permute.xlu0 %6566  ;;  %v6411_v4 = vrot.slane %v6351_v60, 2  ;;  %v6590_v20 = vadd.f32 %v15131_v5, %v6436_v30 }
 0x4fa   : > { %17117 = vst [vmem:[#allocation63_spill] sm:$0xff] %v15206_v22  ;;  %v6405_v22 = vrot.slane %v6347_v48, 2  ;;  %v6418_v48 = vrot.slane %v6355_v55, 2 }
 0x4fb   : > { %v15242_v32 = vsel %vm929_vm1, %v6411_v4, %v6413_v31  ;;  %v15247_v57 = vsel %vm929_vm1, %v6410_v33, %v6411_v4  ;;  %v6321_v31 = vadd.f32 %v15109_v0, %v15057_v36  ;;  %v6592_v4 = vadd.f32 %v15135_v62, %v6438_v46 }
 0x4fc   : > { %v15222_v45 = vpop.permute.xlu1 %6572  ;;  %v15239_v60 = vsel %vm929_vm1, %v6405_v22, %v6406_v43  ;;  %v6318_v22 = vadd.f32 %v15107_v44, %v15037_v26  ;;  %v15259_v21 = vsel %vm929_vm1, %v6416_v51, %v6418_v48  ;;  %v6323_v26 = vadd.f32 %v15113_v6, %v15071_v8  ;;  %v17120_v48 = vld [vmem:[#allocation145_spill] sm:$0xff] }
 0x4fd   : > { %v15226_v63 = vpop.permute.xlu0 %6570  ;;  %v6322_v36 = vadd.f32 %v15115_v34, %v15073_v16  ;;  %v6441_v44 = vadd.f32 %v15190_v12, %v6319_v10  ;;  %v6443_v43 = vadd.f32 %v6399_v40, %v6321_v31  ;;  %v6325_v12 = vadd.f32 %v15117_v1, %v15079_v58  ;;  %v17123_v10 = vld [vmem:[#allocation59_spill] sm:$0xff]  ;;  %v17125_v31 = vld [vmem:[#allocation201_spill] sm:$0xff] }
 0x4fe   : > { %v6440_v61 = vadd.f32 %v6392_v59, %v6318_v22  ;;  %v6445_v55 = vadd.f32 %v6404_v7, %v6323_v26  ;;  %v17121_v7 = vld [vmem:[#allocation205_spill] sm:$0xff] }
 0x4ff   : > { %v6595_v37 = vadd.f32 %v15139_v56, %v6441_v44  ;;  %v6444_v33 = vadd.f32 %v6402_v50, %v6322_v36  ;;  %v6597_v30 = vadd.f32 %v17119_v27, %v6443_v43  ;;  %v17122_v50 = vld [vmem:[#allocation137_spill] sm:$0xff]  ;;  %v17129_v36 = vld [vmem:[#allocation146_spill] sm:$0xff] }
 0x500   : > { %v6699_v38 = vpop.permute.xlu1 %6698  ;;  %v6594_v41 = vadd.f32 %v15141_v28, %v6440_v61  ;;  %v6599_v44 = vadd.f32 %v17129_v36, %v6445_v55  ;;  %v17131_v55 = vld [vmem:[#allocation149_spill] sm:$0xff] }
 0x501   : > { %v6697_v17 = vpop.permute.xlu0 %6696  ;;  %v6745_v5 = vadd.f32 %v6699_v38, %v6591_v54  ;;  %v6596_v54 = vadd.f32 %v17120_v48, %v6442_v9  ;;  %v6326_v38 = vadd.f32 %v17124_v3, %v17123_v10  ;;  %v17133_v48 = vld [vmem:[#allocation62_spill] sm:$0xff] }
 0x502   : > { %v6744_v19 = vadd.f32 %v6697_v17, %v6590_v20  ;;  %v6327_v20 = vadd.f32 %v17122_v50, %v17121_v7  ;;  %v6447_v17 = vadd.f32 %v15234_v39, %v6325_v12 }
 0x503   : > { %v6763_v25 = vadd.f32 %v15250_v15, %v6745_v5 }
 0x504   : > { %v6762_v2 = vadd.f32 %v15250_v15, %v6744_v19  ;;  %v6703_v0 = vpop.permute.xlu1 %6702 }
 0x505   : > { %v6701_v53 = vpop.permute.xlu0 %6700  ;;  %v6779_v24 = vsub.f32 0.0, %v6763_v25  ;;  %v6747_v62 = vadd.f32 %v6703_v0, %v6593_v18  ;;  %v6329_v18 = vadd.f32 %v17126_v11, %v17125_v31  ;;  %v17128_v25 = vld [vmem:[#allocation140_spill] sm:$0xff] }
 0x506   : > { %v6778_v14 = vsub.f32 0.0, %v6762_v2  ;;  %v6746_v29 = vadd.f32 %v6701_v53, %v6592_v4  ;;  %v17127_v4 = vld [vmem:[#allocation133_spill] sm:$0xff] }
 0x507   : > { %v6796_v8 = vmul.f32 1.442695, %v6779_v24  ;;  %v6765_v16 = vadd.f32 %v15250_v15, %v6747_v62  ;;  %v6328_v2 = vadd.f32 %v17128_v25, %v17127_v4  ;;  %v17130_v24 = vld [vmem:[#allocation148_spill] sm:$0xff]  ;;  %v6446_v62 = vadd.f32 %v15239_v60, %v6324_v47 }
 0x508   : > { %v6794_v6 = vmul.f32 1.442695, %v6778_v14  ;;  %v6764_v34 = vadd.f32 %v15250_v15, %v6746_v29  ;;  %v6707_v13 = vpop.permute.xlu1 %6706  ;;  %v6598_v14 = vadd.f32 %v17130_v24, %v6444_v33  ;;  %v6449_v29 = vadd.f32 %v15242_v32, %v6327_v20 }
 0x509   : > { %v6705_v35 = vpop.permute.xlu0 %6704  ;;  %7047 = vpow2.f32 %v6796_v8  ;;  %v6781_v56 = vsub.f32 0.0, %v6765_v16  ;;  %v6749_v40 = vadd.f32 %v6707_v13, %v6595_v37  ;;  %v6448_v16 = vadd.f32 %v15247_v57, %v6326_v38 }
 0x50a   : > { %v6780_v59 = vsub.f32 0.0, %v6764_v34  ;;  %7049 = vpow2.f32 %v6794_v6  ;;  %v6748_v51 = vadd.f32 %v6705_v35, %v6594_v41  ;;  %v6451_v34 = vadd.f32 %v15259_v21, %v6329_v18 }
 0x50b   : > { %v6800_v58 = vmul.f32 1.442695, %v6781_v56  ;;  %v6767_v28 = vadd.f32 %v15250_v15, %v6749_v40  ;;  %v6601_v33 = vadd.f32 %v17131_v55, %v6447_v17  ;;  %v6450_v60 = vadd.f32 %v15271_v52, %v6328_v2  ;;  %v17132_v56 = vld [vmem:[#allocation147_spill] sm:$0xff] }
 0x50c   : > { %v6798_v1 = vmul.f32 1.442695, %v6780_v59  ;;  %v6766_v23 = vadd.f32 %v15250_v15, %v6748_v51  ;;  %v6711_v49 = vpop.permute.xlu1 %6710  ;;  %v6600_v59 = vadd.f32 %v17132_v56, %v6446_v62 }
 0x50d   : > { %v6709_v46 = vpop.permute.xlu0 %6708  ;;  %7051 = vpow2.f32 %v6800_v58  ;;  %v6783_v5 = vsub.f32 0.0, %v6767_v28  ;;  %v6751_v19 = vadd.f32 %v6711_v49, %v6597_v30  ;;  %v17134_v28 = vld [vmem:[#allocation63_spill] sm:$0xff]  ;;  %v6604_v4 = vadd.f32 %v15226_v63, %v6450_v60 }
 0x50e   : > { %v6750_v22 = vadd.f32 %v6709_v46, %v6596_v54  ;;  %7053 = vpow2.f32 %v6798_v1  ;;  %v6782_v26 = vsub.f32 0.0, %v6766_v23  ;;  %v6603_v54 = vadd.f32 %v17133_v48, %v6449_v29 }
 0x50f   : > { %v6804_v0 = vmul.f32 1.442695, %v6783_v5  ;;  %v6769_v39 = vadd.f32 %v15250_v15, %v6751_v19  ;;  %v6602_v7 = vadd.f32 %v17134_v28, %v6448_v16 }
 0x510   : > { %v6768_v53 = vadd.f32 %v15250_v15, %v6750_v22  ;;  %v6802_v37 = vmul.f32 1.442695, %v6782_v26  ;;  %v6715_v61 = vpop.permute.xlu1 %6714  ;;  %v6605_v22 = vadd.f32 %v15222_v45, %v6451_v34 }
 0x511   : > { %v6713_v43 = vpop.permute.xlu0 %6712  ;;  %7055 = vpow2.f32 %v6804_v0  ;;  %v6785_v9 = vsub.f32 0.0, %v6769_v39  ;;  %v6753_v6 = vadd.f32 %v6715_v61, %v6599_v44 }
 0x512   : > { %v6784_v8 = vsub.f32 0.0, %v6768_v53  ;;  %7057 = vpow2.f32 %v6802_v37  ;;  %v6752_v12 = vadd.f32 %v6713_v43, %v6598_v14 }
 0x513   : > { %v7048_v41 = vpop.eup %7047  ;;  %v6808_v13 = vmul.f32 1.442695, %v6785_v9  ;;  %v6771_v32 = vadd.f32 %v15250_v15, %v6753_v6 }
 0x514   : > { %v7050_v35 = vpop.eup %7049  ;;  %v6827_v40 = vadd.f32 1.0, %v7048_v41  ;;  %v6806_v42 = vmul.f32 1.442695, %v6784_v8  ;;  %v6770_v47 = vadd.f32 %v15250_v15, %v6752_v12  ;;  %v6719_v57 = vpop.permute.xlu1 %6718 }
 0x515   : > { %v6717_v27 = vpop.permute.xlu0 %6716  ;;  %v6826_v21 = vadd.f32 1.0, %v7050_v35  ;;  %7059 = vpow2.f32 %v6808_v13  ;;  %v6787_v30 = vsub.f32 0.0, %v6771_v32  ;;  %v6755_v51 = vadd.f32 %v6719_v57, %v6601_v33 }
 0x516   : > { %7061 = vrcp.f32 %v6827_v40  ;;  %v6786_v52 = vsub.f32 0.0, %v6770_v47  ;;  %v6754_v58 = vadd.f32 %v6717_v27, %v6600_v59 }
 0x517   : > { %v7052_v1 = vpop.eup %7051  ;;  %7063 = vrcp.f32 %v6826_v21  ;;  %v6812_v50 = vmul.f32 1.442695, %v6787_v30  ;;  %v6773_v20 = vadd.f32 %v15250_v15, %v6755_v51 }
 0x518   : > { %v7054_v10 = vpop.eup %7053  ;;  %v6829_v3 = vadd.f32 1.0, %v7052_v1  ;;  %7065 = vpow2.f32 %v6806_v42  ;;  %v6810_v38 = vmul.f32 1.442695, %v6786_v52  ;;  %v6772_v17 = vadd.f32 %v15250_v15, %v6754_v58  ;;  %v6723_v23 = vpop.permute.xlu1 %6722 }
 0x519   : > { %v6721_v49 = vpop.permute.xlu0 %6720  ;;  %v6828_v46 = vadd.f32 1.0, %v7054_v10  ;;  %7067 = vpow2.f32 %v6812_v50  ;;  %v6789_v5 = vsub.f32 0.0, %v6773_v20  ;;  %v6757_v19 = vadd.f32 %v6723_v23, %v6603_v54 }
 0x51a   : > { %7069 = vrcp.f32 %v6829_v3  ;;  %v6788_v31 = vsub.f32 0.0, %v6772_v17  ;;  %v6756_v11 = vadd.f32 %v6721_v49, %v6602_v7 }
 0x51b   : > { %v7056_v18 = vpop.eup %7055  ;;  %7071 = vrcp.f32 %v6828_v46  ;;  %v6816_v25 = vmul.f32 1.442695, %v6789_v5  ;;  %v6775_v2 = vadd.f32 %v15250_v15, %v6757_v19 }
 0x51c   : > { %v7058_v26 = vpop.eup %7057  ;;  %v6831_v36 = vadd.f32 1.0, %v7056_v18  ;;  %7073 = vpow2.f32 %v6810_v38  ;;  %v6814_v44 = vmul.f32 1.442695, %v6788_v31  ;;  %v6774_v0 = vadd.f32 %v15250_v15, %v6756_v11  ;;  %v6727_v39 = vpop.permute.xlu1 %6726 }
 0x51d   : > { %v6725_v53 = vpop.permute.xlu0 %6724  ;;  %v6830_v45 = vadd.f32 1.0, %v7058_v26  ;;  %7075 = vpow2.f32 %v6816_v25  ;;  %v6791_v24 = vsub.f32 0.0, %v6775_v2  ;;  %v6759_v14 = vadd.f32 %v6727_v39, %v6605_v22 }
 0x51e   : > { %7077 = vrcp.f32 %v6831_v36  ;;  %v6790_v63 = vsub.f32 0.0, %v6774_v0  ;;  %v6758_v62 = vadd.f32 %v6725_v53, %v6604_v4 }
 0x51f   : > { %v7060_v29 = vpop.eup %7059  ;;  %7079 = vrcp.f32 %v6830_v45  ;;  %v6820_v37 = vmul.f32 1.442695, %v6791_v24  ;;  %v6777_v61 = vadd.f32 %v15250_v15, %v6759_v14 }
 0x520   : > { %v7062_v43 = vpop.eup %7061  ;;  %v6833_v9 = vadd.f32 1.0, %v7060_v29  ;;  %7081 = vpow2.f32 %v6814_v44  ;;  %v6818_v8 = vmul.f32 1.442695, %v6790_v63  ;;  %v6776_v6 = vadd.f32 %v15250_v15, %v6758_v62 }
 0x521   : > { %v7064_v16 = vpop.eup %7063  ;;  %6876 = vst.msk [vmem:[%s15319_s10 + $0x8] sm:$0xff] %vm6874_vm2, %v7062_v43  ;;  %7083 = vpow2.f32 %v6820_v37  ;;  %v6793_v34 = vsub.f32 0.0, %v6777_v61 }
 0x522   : > { %v7066_v12 = vpop.eup %7065  ;;  %6875 = vst.msk [vmem:[%s15319_s10] sm:$0xff] %vm6874_vm2, %v7064_v16  ;;  %7085 = vrcp.f32 %v6833_v9  ;;  %v6792_v41 = vsub.f32 0.0, %v6776_v6 }
 0x523   : > { %v7068_v55 = vpop.eup %7067  ;;  %v6832_v33 = vadd.f32 1.0, %v7066_v12  ;;  %7087 = vpow2.f32 %v6818_v8  ;;  %v6824_v60 = vmul.f32 1.442695, %v6793_v34 }
 0x524   : > { %v7070_v13 = vpop.eup %7069  ;;  %v6835_v32 = vadd.f32 1.0, %v7068_v55  ;;  %v6822_v15 = vmul.f32 1.442695, %v6792_v41 }
 0x525   : > { %v7072_v35 = vpop.eup %7071  ;;  %6878 = vst.msk [vmem:[%s15319_s10 + $0x18] sm:$0xff] %vm6874_vm2, %v7070_v13  ;;  %7089 = vrcp.f32 %v6832_v33 }
 0x526   : > { %v7074_v56 = vpop.eup %7073  ;;  %6877 = vst.msk [vmem:[%s15319_s10 + $0x10] sm:$0xff] %vm6874_vm2, %v7072_v35  ;;  %7091 = vrcp.f32 %v6835_v32 }
 0x527   : > { %v7076_v59 = vpop.eup %7075  ;;  %v6834_v40 = vadd.f32 1.0, %v7074_v56  ;;  %7093 = vpow2.f32 %v6824_v60 }
 0x528   : > { %v7078_v42 = vpop.eup %7077  ;;  %v6837_v47 = vadd.f32 1.0, %v7076_v59  ;;  %7095 = vpow2.f32 %v6822_v15 }
 0x529   : > { %v7080_v57 = vpop.eup %7079  ;;  %6880 = vst.msk [vmem:[%s15319_s10 + $0x28] sm:$0xff] %vm6874_vm2, %v7078_v42  ;;  %7097 = vrcp.f32 %v6834_v40 }
 0x52a   : > { %v7082_v27 = vpop.eup %7081  ;;  %6879 = vst.msk [vmem:[%s15319_s10 + $0x20] sm:$0xff] %vm6874_vm2, %v7080_v57  ;;  %7099 = vrcp.f32 %v6837_v47 }
 0x52b   : > { %v7084_v21 = vpop.eup %7083  ;;  %v6836_v30 = vadd.f32 1.0, %v7082_v27 }
 0x52c   : > { %v7086_v51 = vpop.eup %7085  ;;  %v6839_v48 = vadd.f32 1.0, %v7084_v21 }
 0x52d   : > { %v7088_v54 = vpop.eup %7087  ;;  %6882 = vst.msk [vmem:[%s15319_s10 + $0x38] sm:$0xff] %vm6874_vm2, %v7086_v51  ;;  %7101 = vrcp.f32 %v6836_v30 }
 0x52e   : > { %7103 = vrcp.f32 %v6839_v48  ;;  %v6838_v52 = vadd.f32 1.0, %v7088_v54 }
 0x52f   : > { %v7090_v58 = vpop.eup %7089 }
 0x530   : > { %v7092_v1 = vpop.eup %7091  ;;  %6881 = vst.msk [vmem:[%s15319_s10 + $0x30] sm:$0xff] %vm6874_vm2, %v7090_v58  ;;  %7105 = vrcp.f32 %v6838_v52 }
 0x531   : > { %v7094_v28 = vpop.eup %7093  ;;  %6884 = vst.msk [vmem:[%s15319_s10 + $0x48] sm:$0xff] %vm6874_vm2, %v7092_v1 }
 0x532   : > { %v7096_v7 = vpop.eup %7095  ;;  %v6841_v50 = vadd.f32 1.0, %v7094_v28 }
 0x533   : > { %v7098_v20 = vpop.eup %7097  ;;  %v6840_v10 = vadd.f32 1.0, %v7096_v7 }
 0x534   : > { %v7100_v3 = vpop.eup %7099  ;;  %6883 = vst.msk [vmem:[%s15319_s10 + $0x40] sm:$0xff] %vm6874_vm2, %v7098_v20  ;;  %7107 = vrcp.f32 %v6841_v50 }
 0x535   : > { %6886 = vst.msk [vmem:[%s15319_s10 + $0x58] sm:$0xff] %vm6874_vm2, %v7100_v3  ;;  %7109 = vrcp.f32 %v6840_v10 }
 0x537   : > { %v7102_v38 = vpop.eup %7101 }
 0x538   : > { %v7104_v17 = vpop.eup %7103  ;;  %6885 = vst.msk [vmem:[%s15319_s10 + $0x50] sm:$0xff] %vm6874_vm2, %v7102_v38 }
 0x539   : > { %6888 = vst.msk [vmem:[%s15319_s10 + $0x68] sm:$0xff] %vm6874_vm2, %v7104_v17 }
 0x53a   : > { %v7106_v23 = vpop.eup %7105 }
 0x53b   : > { %6887 = vst.msk [vmem:[%s15319_s10 + $0x60] sm:$0xff] %vm6874_vm2, %v7106_v23 }
 0x53e   : > { %v7108_v49 = vpop.eup %7107 }
 0x53f   : > { %v7110_v46 = vpop.eup %7109  ;;  %6890 = vst.msk [vmem:[%s15319_s10 + $0x78] sm:$0xff] %vm6874_vm2, %v7108_v49 }
 0x540   : > { %6889 = vst.msk [vmem:[%s15319_s10 + $0x70] sm:$0xff] %vm6874_vm2, %v7110_v46 }
 0x541 PF: > { %s13_s9 = sadd.s32 1, %s7336_s9  }
 0x542   : > { %p10_p1 = scmp.ge.s32.totalorder %s13_s9, 4  }
 0x544   :  { %12 = sbr.rel (!%p10_p1) target bundleno = 1 (0x1), region = 63 }
 0x54b   :  { %6912 = vsyncpa [#allocation3], 1 }
 0x54c   :  { %6914 = vsyncpa [#allocation3 + $0x1], 1 }

</bundles_post_ra>
